<compile_context>
chip_gen: v7x
topology: tpu7x:2x2x1
jax: 0.10.0
libtpu: 0.0.40
codegen_flags: <defaults>
</compile_context>

<pallas_src>
import functools

import jax
import jax.numpy as jnp
from jax.experimental import pallas as pl
from jax.experimental.pallas import tpu as pltpu


# ----------------------------- tile selection --------------------------------

def _pick_tile(dim, prefs):
    """Largest preferred tile that divides `dim`; else the full extent (always a
    legal block shape).  Shapes in this model are small, so the full-extent
    fallback never threatens VMEM."""
    for t in prefs:
        if dim % t == 0:
            return t
    return dim


# --------------------------- matmul (+ fused act) -----------------------------

def _leaky_relu(x):
    return jnp.maximum(x, 0.2 * x)


def _sigmoid(x):
    return 1.0 / (1.0 + jnp.exp(-x))


def _mm_act_kernel(a_ref, b_ref, o_ref, *, act):
    # Accumulate directly into the resident f32 output block (k-invariant out spec).
    @pl.when(pl.program_id(2) == 0)
    def _():
        o_ref[...] = jnp.zeros_like(o_ref)

    o_ref[...] += jnp.dot(a_ref[...], b_ref[...],
                          preferred_element_type=jnp.float32)

    if act is not None:
        @pl.when(pl.program_id(2) == pl.num_programs(2) - 1)
        def _():
            o_ref[...] = act(o_ref[...])


def pallas_matmul_act(a_bf16, b_bf16, act=None):
    """C = A @ B on the MXU with bf16 operands, f32 accumulation, optional fused
    elementwise epilogue.  Tiles are chosen to divide the operand shapes exactly,
    so no padded copies of A are materialized in HBM."""
    M, K = a_bf16.shape
    K2, N = b_bf16.shape
    assert K == K2
    tm = _pick_tile(M, (128, 256))
    tn = _pick_tile(N, (128, 256))
    tk = _pick_tile(K, (2048, 1024, 512, 256, 128))
    kernel = functools.partial(_mm_act_kernel, act=act)
    return pl.pallas_call(
        kernel,
        out_shape=jax.ShapeDtypeStruct((M, N), jnp.float32),
        grid_spec=pltpu.PrefetchScalarGridSpec(
            num_scalar_prefetch=0,
            grid=(M // tm, N // tn, K // tk),
            in_specs=[pl.BlockSpec((tm, tk), lambda i, j, k: (i, k)),
                      pl.BlockSpec((tk, tn), lambda i, j, k: (k, j))],
            out_specs=pl.BlockSpec((tm, tn), lambda i, j, k: (i, j))),
        compiler_params=pltpu.CompilerParams(
            dimension_semantics=("parallel", "parallel", "arbitrary")),
    )(a_bf16, b_bf16)


# ----------------- BatchNorm (batch stats) + LeakyReLU, row-tiled -------------

def _bn_stats_kernel(x_ref, s_ref, q_ref):
    @pl.when(pl.program_id(0) == 0)
    def _():
        s_ref[...] = jnp.zeros_like(s_ref)
        q_ref[...] = jnp.zeros_like(q_ref)
    x = x_ref[...]
    s_ref[...] += jnp.sum(x, axis=0, keepdims=True)
    q_ref[...] += jnp.sum(x * x, axis=0, keepdims=True)


def _scale_shift_lrelu_kernel(x_ref, sc_ref, sh_ref, o_ref):
    y = x_ref[...] * sc_ref[...] + sh_ref[...]
    o_ref[...] = jnp.maximum(y, 0.2 * y)            # LeakyReLU(0.2)


def batchnorm_leaky_relu(x2d, gamma, beta, eps=1e-5):
    """BatchNorm2d in training mode (batch mean, biased variance, eps=1e-5, affine)
    followed by LeakyReLU(0.2), over a (rows=N*H*W, C) f32 slab."""
    M, C = x2d.shape
    bm = _pick_tile(M, (1024, 512, 256, 128))

    # Pass 1: per-channel sum / sum-of-squares reduction (row-tiled accumulator).
    s, q = pl.pallas_call(
        _bn_stats_kernel,
        out_shape=(jax.ShapeDtypeStruct((1, C), jnp.float32),
                   jax.ShapeDtypeStruct((1, C), jnp.float32)),
        grid=(M // bm,),
        in_specs=[pl.BlockSpec((bm, C), lambda i: (i, 0))],
        out_specs=(pl.BlockSpec((1, C), lambda i: (0, 0)),
                   pl.BlockSpec((1, C), lambda i: (0, 0))),
        compiler_params=pltpu.CompilerParams(dimension_semantics=("arbitrary",)),
    )(x2d)

    # Tiny (1, C) math in plain JAX: fold mean/var/gamma/beta into scale & shift.
    mean = s * (1.0 / M)
    var = jnp.maximum(q * (1.0 / M) - mean * mean, 0.0)     # biased variance
    scale = gamma.reshape(1, C) * jax.lax.rsqrt(var + eps)
    shift = beta.reshape(1, C) - mean * scale

    # Pass 2: fused normalize + LeakyReLU, row-tiled.
    return pl.pallas_call(
        _scale_shift_lrelu_kernel,
        out_shape=jax.ShapeDtypeStruct((M, C), jnp.float32),
        grid=(M // bm,),
        in_specs=[pl.BlockSpec((bm, C), lambda i: (i, 0)),
                  pl.BlockSpec((1, C), lambda i: (0, 0)),
                  pl.BlockSpec((1, C), lambda i: (0, 0))],
        out_specs=pl.BlockSpec((bm, C), lambda i: (i, 0)),
        compiler_params=pltpu.CompilerParams(dimension_semantics=("parallel",)),
    )(x2d, scale, shift)


# --------------------------- Conv2d(k4, s2, p1) lowering ----------------------

def im2col_s2_k4_p1(x_nhwc):
    """im2col for Conv2d(kernel=4, stride=2, padding=1).  Plain-JAX glue; the GEMM
    hot path runs in the Pallas matmul kernel.  x: (N,H,W,C) -> (N*H/2*W/2, 16*C)."""
    N, H, W, C = x_nhwc.shape
    Ho, Wo = H // 2, W // 2
    xp = jnp.pad(x_nhwc, ((0, 0), (1, 1), (1, 1), (0, 0)))
    cols = [xp[:, kh:kh + 2 * Ho:2, kw:kw + 2 * Wo:2, :]
            for kh in range(4) for kw in range(4)]
    patches = jnp.stack(cols, axis=3)                       # (N, Ho, Wo, 16, C)
    return patches.reshape(N * Ho * Wo, 16 * C)


# ------------------------------- parameters -----------------------------------

def _conv_w_to_mat(w_pt_oihw):
    """PyTorch (Cout, Cin, kh, kw) -> im2col matrix (kh*kw*Cin, Cout), bf16."""
    cout, cin, kh, kw = w_pt_oihw.shape
    return (jnp.transpose(w_pt_oihw, (2, 3, 1, 0))
            .reshape(kh * kw * cin, cout).astype(jnp.bfloat16))


def init_params(key):
    k1, k2, k3, k4 = jax.random.split(key, 4)
    w1 = 0.02 * jax.random.normal(k1, (128, 3, 4, 4), jnp.float32)
    w2 = 0.02 * jax.random.normal(k2, (256, 128, 4, 4), jnp.float32)
    w3 = 0.02 * jax.random.normal(k3, (512, 256, 4, 4), jnp.float32)
    w4 = 0.02 * jax.random.normal(k4, (1, 512, 4, 4), jnp.float32)
    w4_mat = _conv_w_to_mat(w4)                              # (8192, 1)
    # Pad the 1-wide head to a lane-dense 128-wide matrix (zero columns), baked at init.
    w4_mat = jnp.pad(w4_mat, ((0, 0), (0, 127)))
    return {
        "w1": _conv_w_to_mat(w1),                            # (48, 128)   bf16
        "w2": _conv_w_to_mat(w2),                            # (2048, 256) bf16
        "w3": _conv_w_to_mat(w3),                            # (4096, 512) bf16
        "w4": w4_mat,                                        # (8192, 128) bf16
        "g2": jnp.ones((256,), jnp.float32), "b2": jnp.zeros((256,), jnp.float32),
        "g3": jnp.ones((512,), jnp.float32), "b3": jnp.zeros((512,), jnp.float32),
    }


# ------------------------------- forward --------------------------------------

@jax.jit
def discriminator_forward(x_nchw, params):
    N = x_nchw.shape[0]
    x = jnp.transpose(x_nchw, (0, 2, 3, 1))                  # NHWC (N, 32, 32, 3)

    # Layer 1: Conv(3->128, k4 s2 p1) + LeakyReLU fused into the GEMM epilogue.
    a = im2col_s2_k4_p1(x.astype(jnp.bfloat16))              # (N*256, 48)
    y = pallas_matmul_act(a, params["w1"], act=_leaky_relu)  # (N*256, 128) f32
    y = y.reshape(N, 16, 16, 128)

    # Layer 2: Conv(128->256, k4 s2 p1) + BatchNorm(256) + LeakyReLU.
    a = im2col_s2_k4_p1(y.astype(jnp.bfloat16))              # (N*64, 2048)
    y = pallas_matmul_act(a, params["w2"])                   # (N*64, 256) f32
    y = batchnorm_leaky_relu(y, params["g2"], params["b2"])
    y = y.reshape(N, 8, 8, 256)

    # Layer 3: Conv(256->512, k4 s2 p1) + BatchNorm(512) + LeakyReLU.
    a = im2col_s2_k4_p1(y.astype(jnp.bfloat16))              # (N*16, 4096)
    y = pallas_matmul_act(a, params["w3"])                   # (N*16, 512) f32
    y = batchnorm_leaky_relu(y, params["g3"], params["b3"])
    y = y.reshape(N, 4, 4, 512)

    # Layer 4: Conv(512->1, k4 s1 p0) on a 4x4 map is a pure GEMM; Sigmoid fused.
    a = y.reshape(N, 4 * 4 * 512).astype(jnp.bfloat16)       # (N, 8192)
    y = pallas_matmul_act(a, params["w4"], act=_sigmoid)     # (N, 128); col 0 is real
    y = y[:, 0]                                              # == .view(-1,1).squeeze(1)
    return y


if __name__ == "__main__":
    key = jax.random.PRNGKey(0)
    pkey, xkey = jax.random.split(key)
    params = init_params(pkey)
    x = jax.random.normal(xkey, (2, 3, 32, 32), jnp.float32)

    out = discriminator_forward(x, params)
    out = jax.block_until_ready(out)

    assert out.shape == (2,), out.shape
    assert out.dtype == jnp.float32
    assert bool(jnp.all(jnp.isfinite(out)))
    assert bool(jnp.all((out >= 0.0) & (out <= 1.0)))        # sigmoid range
    print("KERNEL_OK")
</pallas_src>

<mosaic_0001>
module attributes {stable_mosaic.version = 11 : i64} {
  func.func @_mm_act_kernel(%arg0: i32, %arg1: i32, %arg2: i32, %arg3: memref<128x48xbf16, #tpu.memory_space<vmem>>, %arg4: memref<48x128xbf16, #tpu.memory_space<vmem>>, %arg5: memref<128x128xf32, #tpu.memory_space<vmem>>) attributes {dimension_semantics = [#tpu.dimension_semantics<parallel>, #tpu.dimension_semantics<parallel>, #tpu.dimension_semantics<arbitrary>], iteration_bounds = array<i64: 4, 1, 1>, scalar_prefetch = 0 : i64, scratch_operands = 0 : i64, tpu.core_type = #tpu.core_type<tc>, window_params = [{transform_indices = @transform_0, window_bounds = array<i64: 128, 48>}, {transform_indices = @transform_1, window_bounds = array<i64: 48, 128>}, {transform_indices = @transform_2, window_bounds = array<i64: 128, 128>}]} {
    %c0_i32 = arith.constant 0 : i32
    %0 = arith.cmpi eq, %arg2, %c0_i32 : i32
    %1 = arith.extui %0 : i1 to i32
    %c0_i32_0 = arith.constant 0 : i32
    %2 = arith.cmpi ne, %1, %c0_i32_0 : i32
    scf.if %2 {
      %cst_10 = arith.constant 0.000000e+00 : f32
      %12 = vector.broadcast %cst_10 : f32 to vector<128x128xf32>
      %c0_11 = arith.constant 0 : index
      %c0_12 = arith.constant 0 : index
      %13 = vector.load %arg5[%c0_11, %c0_12] : memref<128x128xf32, #tpu.memory_space<vmem>>, vector<128x128xf32>
      tpu.vector_store %arg5[%c0_11, %c0_12], %12 {strides = array<i32>} : memref<128x128xf32, #tpu.memory_space<vmem>>, vector<128x128xf32>,
    } else {
    }
    %c0 = arith.constant 0 : index
    %c0_1 = arith.constant 0 : index
    %3 = vector.load %arg5[%c0, %c0_1] : memref<128x128xf32, #tpu.memory_space<vmem>>, vector<128x128xf32>
    %c0_2 = arith.constant 0 : index
    %c0_3 = arith.constant 0 : index
    %4 = vector.load %arg3[%c0_2, %c0_3] : memref<128x48xbf16, #tpu.memory_space<vmem>>, vector<128x48xbf16>
    %c0_4 = arith.constant 0 : index
    %c0_5 = arith.constant 0 : index
    %5 = vector.load %arg4[%c0_4, %c0_5] : memref<48x128xbf16, #tpu.memory_space<vmem>>, vector<48x128xbf16>
    %cst = arith.constant dense<0.000000e+00> : vector<128x128xf32>
    %6 = tpu.matmul %4, %5, %cst {dimension_numbers = #tpu.dot_dimension_numbers<[1], [0], [0], [1], [0, 0, 1, 1], [], []>} : vector<128x48xbf16>, vector<48x128xbf16>, vector<128x128xf32> -> vector<128x128xf32>
    %7 = arith.addf %3, %6 : vector<128x128xf32>
    %c0_6 = arith.constant 0 : index
    %c0_7 = arith.constant 0 : index
    %8 = vector.load %arg5[%c0_6, %c0_7] : memref<128x128xf32, #tpu.memory_space<vmem>>, vector<128x128xf32>
    tpu.vector_store %arg5[%c0_6, %c0_7], %7 {strides = array<i32>} : memref<128x128xf32, #tpu.memory_space<vmem>>, vector<128x128xf32>,
    %c0_i32_8 = arith.constant 0 : i32
    %9 = arith.cmpi eq, %arg2, %c0_i32_8 : i32
    %10 = arith.extui %9 : i1 to i32
    %c0_i32_9 = arith.constant 0 : i32
    %11 = arith.cmpi ne, %10, %c0_i32_9 : i32
    scf.if %11 {
      %c0_10 = arith.constant 0 : index
      %c0_11 = arith.constant 0 : index
      %12 = vector.load %arg5[%c0_10, %c0_11] : memref<128x128xf32, #tpu.memory_space<vmem>>, vector<128x128xf32>
      %cst_12 = arith.constant 2.000000e-01 : f32
      %13 = vector.broadcast %cst_12 : f32 to vector<128x128xf32>
      %14 = arith.mulf %13, %12 : vector<128x128xf32>
      %15 = arith.maximumf %12, %14 : vector<128x128xf32>
      %c0_13 = arith.constant 0 : index
      %c0_14 = arith.constant 0 : index
      %16 = vector.load %arg5[%c0_13, %c0_14] : memref<128x128xf32, #tpu.memory_space<vmem>>, vector<128x128xf32>
      tpu.vector_store %arg5[%c0_13, %c0_14], %15 {strides = array<i32>} : memref<128x128xf32, #tpu.memory_space<vmem>>, vector<128x128xf32>,
    } else {
    }
    return
  }
  func.func @transform_0(%arg0: i32, %arg1: i32, %arg2: i32) -> (i32, i32) {
    %c0_i32 = arith.constant 0 : i32
    return %arg0, %arg2 : i32, i32
  }
  func.func @transform_1(%arg0: i32, %arg1: i32, %arg2: i32) -> (i32, i32) {
    %c0_i32 = arith.constant 0 : i32
    return %arg2, %arg1 : i32, i32
  }
  func.func @transform_2(%arg0: i32, %arg1: i32, %arg2: i32) -> (i32, i32) {
    %c0_i32 = arith.constant 0 : i32
    return %arg0, %arg1 : i32, i32
  }
}

module attributes {stable_mosaic.version = 11 : i64} {
  func.func @_bn_stats_kernel(%arg0: i32, %arg1: memref<128x256xf32, #tpu.memory_space<vmem>>, %arg2: memref<1x256xf32, #tpu.memory_space<vmem>>, %arg3: memref<1x256xf32, #tpu.memory_space<vmem>>) attributes {dimension_semantics = [#tpu.dimension_semantics<arbitrary>], iteration_bounds = array<i64: 1>, scalar_prefetch = 0 : i64, scratch_operands = 0 : i64, tpu.core_type = #tpu.core_type<tc>, window_params = [{transform_indices = @transform_0, window_bounds = array<i64: 128, 256>}, {pipeline_mode = #tpu.pipeline_mode<synchronous>, transform_indices = @transform_1, window_bounds = array<i64: 1, 256>}, {pipeline_mode = #tpu.pipeline_mode<synchronous>, transform_indices = @transform_2, window_bounds = array<i64: 1, 256>}]} {
    %c0_i32 = arith.constant 0 : i32
    %0 = arith.cmpi eq, %arg0, %c0_i32 : i32
    %1 = arith.extui %0 : i1 to i32
    %c0_i32_0 = arith.constant 0 : i32
    %2 = arith.cmpi ne, %1, %c0_i32_0 : i32
    scf.if %2 {
      %cst_11 = arith.constant 0.000000e+00 : f32
      %15 = vector.broadcast %cst_11 : f32 to vector<1x256xf32>
      %c0_12 = arith.constant 0 : index
      %c0_13 = arith.constant 0 : index
      %16 = vector.load %arg2[%c0_12, %c0_13] : memref<1x256xf32, #tpu.memory_space<vmem>>, vector<1x256xf32>
      tpu.vector_store %arg2[%c0_12, %c0_13], %15 {strides = array<i32>} : memref<1x256xf32, #tpu.memory_space<vmem>>, vector<1x256xf32>,
      %cst_14 = arith.constant 0.000000e+00 : f32
      %17 = vector.broadcast %cst_14 : f32 to vector<1x256xf32>
      %c0_15 = arith.constant 0 : index
      %c0_16 = arith.constant 0 : index
      %18 = vector.load %arg3[%c0_15, %c0_16] : memref<1x256xf32, #tpu.memory_space<vmem>>, vector<1x256xf32>
      tpu.vector_store %arg3[%c0_15, %c0_16], %17 {strides = array<i32>} : memref<1x256xf32, #tpu.memory_space<vmem>>, vector<1x256xf32>,
    } else {
    }
    %c0 = arith.constant 0 : index
    %c0_1 = arith.constant 0 : index
    %3 = vector.load %arg1[%c0, %c0_1] : memref<128x256xf32, #tpu.memory_space<vmem>>, vector<128x256xf32>
    %c0_2 = arith.constant 0 : index
    %c0_3 = arith.constant 0 : index
    %4 = vector.load %arg2[%c0_2, %c0_3] : memref<1x256xf32, #tpu.memory_space<vmem>>, vector<1x256xf32>
    %cst = arith.constant dense<0.000000e+00> : vector<256xf32>
    %5 = vector.multi_reduction <add>, %3, %cst [0] : vector<128x256xf32> to vector<256xf32>
    %6 = vector.shape_cast %5 : vector<256xf32> to vector<1x256xf32>
    %7 = arith.addf %4, %6 : vector<1x256xf32>
    %c0_4 = arith.constant 0 : index
    %c0_5 = arith.constant 0 : index
    %8 = vector.load %arg2[%c0_4, %c0_5] : memref<1x256xf32, #tpu.memory_space<vmem>>, vector<1x256xf32>
    tpu.vector_store %arg2[%c0_4, %c0_5], %7 {strides = array<i32>} : memref<1x256xf32, #tpu.memory_space<vmem>>, vector<1x256xf32>,
    %c0_6 = arith.constant 0 : index
    %c0_7 = arith.constant 0 : index
    %9 = vector.load %arg3[%c0_6, %c0_7] : memref<1x256xf32, #tpu.memory_space<vmem>>, vector<1x256xf32>
    %10 = arith.mulf %3, %3 : vector<128x256xf32>
    %cst_8 = arith.constant dense<0.000000e+00> : vector<256xf32>
    %11 = vector.multi_reduction <add>, %10, %cst_8 [0] : vector<128x256xf32> to vector<256xf32>
    %12 = vector.shape_cast %11 : vector<256xf32> to vector<1x256xf32>
    %13 = arith.addf %9, %12 : vector<1x256xf32>
    %c0_9 = arith.constant 0 : index
    %c0_10 = arith.constant 0 : index
    %14 = vector.load %arg3[%c0_9, %c0_10] : memref<1x256xf32, #tpu.memory_space<vmem>>, vector<1x256xf32>
    tpu.vector_store %arg3[%c0_9, %c0_10], %13 {strides = array<i32>} : memref<1x256xf32, #tpu.memory_space<vmem>>, vector<1x256xf32>,
    return
  }
  func.func @transform_0(%arg0: i32) -> (i32, i32) {
    %c0_i32 = arith.constant 0 : i32
    %c0_i32_0 = arith.constant 0 : i32
    return %arg0, %c0_i32 : i32, i32
  }
  func.func @transform_1(%arg0: i32) -> (i32, i32) {
    %c0_i32 = arith.constant 0 : i32
    %c0_i32_0 = arith.constant 0 : i32
    %c0_i32_1 = arith.constant 0 : i32
    return %c0_i32, %c0_i32_0 : i32, i32
  }
  func.func @transform_2(%arg0: i32) -> (i32, i32) {
    %c0_i32 = arith.constant 0 : i32
    %c0_i32_0 = arith.constant 0 : i32
    %c0_i32_1 = arith.constant 0 : i32
    return %c0_i32, %c0_i32_0 : i32, i32
  }
}

module attributes {stable_mosaic.version = 11 : i64} {
  func.func @_mm_act_kernel(%arg0: i32, %arg1: i32, %arg2: i32, %arg3: memref<128x2048xbf16, #tpu.memory_space<vmem>>, %arg4: memref<2048x128xbf16, #tpu.memory_space<vmem>>, %arg5: memref<128x128xf32, #tpu.memory_space<vmem>>) attributes {dimension_semantics = [#tpu.dimension_semantics<parallel>, #tpu.dimension_semantics<parallel>, #tpu.dimension_semantics<arbitrary>], iteration_bounds = array<i64: 1, 2, 1>, scalar_prefetch = 0 : i64, scratch_operands = 0 : i64, tpu.core_type = #tpu.core_type<tc>, window_params = [{transform_indices = @transform_0, window_bounds = array<i64: 128, 2048>}, {transform_indices = @transform_1, window_bounds = array<i64: 2048, 128>}, {transform_indices = @transform_2, window_bounds = array<i64: 128, 128>}]} {
    %c0_i32 = arith.constant 0 : i32
    %0 = arith.cmpi eq, %arg2, %c0_i32 : i32
    %1 = arith.extui %0 : i1 to i32
    %c0_i32_0 = arith.constant 0 : i32
    %2 = arith.cmpi ne, %1, %c0_i32_0 : i32
    scf.if %2 {
      %cst_8 = arith.constant 0.000000e+00 : f32
      %9 = vector.broadcast %cst_8 : f32 to vector<128x128xf32>
      %c0_9 = arith.constant 0 : index
      %c0_10 = arith.constant 0 : index
      %10 = vector.load %arg5[%c0_9, %c0_10] : memref<128x128xf32, #tpu.memory_space<vmem>>, vector<128x128xf32>
      tpu.vector_store %arg5[%c0_9, %c0_10], %9 {strides = array<i32>} : memref<128x128xf32, #tpu.memory_space<vmem>>, vector<128x128xf32>,
    } else {
    }
    %c0 = arith.constant 0 : index
    %c0_1 = arith.constant 0 : index
    %3 = vector.load %arg5[%c0, %c0_1] : memref<128x128xf32, #tpu.memory_space<vmem>>, vector<128x128xf32>
    %c0_2 = arith.constant 0 : index
    %c0_3 = arith.constant 0 : index
    %4 = vector.load %arg3[%c0_2, %c0_3] : memref<128x2048xbf16, #tpu.memory_space<vmem>>, vector<128x2048xbf16>
    %c0_4 = arith.constant 0 : index
    %c0_5 = arith.constant 0 : index
    %5 = vector.load %arg4[%c0_4, %c0_5] : memref<2048x128xbf16, #tpu.memory_space<vmem>>, vector<2048x128xbf16>
    %cst = arith.constant dense<0.000000e+00> : vector<128x128xf32>
    %6 = tpu.matmul %4, %5, %cst {dimension_numbers = #tpu.dot_dimension_numbers<[1], [0], [0], [1], [0, 0, 1, 1], [], []>} : vector<128x2048xbf16>, vector<2048x128xbf16>, vector<128x128xf32> -> vector<128x128xf32>
    %7 = arith.addf %3, %6 : vector<128x128xf32>
    %c0_6 = arith.constant 0 : index
    %c0_7 = arith.constant 0 : index
    %8 = vector.load %arg5[%c0_6, %c0_7] : memref<128x128xf32, #tpu.memory_space<vmem>>, vector<128x128xf32>
    tpu.vector_store %arg5[%c0_6, %c0_7], %7 {strides = array<i32>} : memref<128x128xf32, #tpu.memory_space<vmem>>, vector<128x128xf32>,
    return
  }
  func.func @transform_0(%arg0: i32, %arg1: i32, %arg2: i32) -> (i32, i32) {
    %c0_i32 = arith.constant 0 : i32
    return %arg0, %arg2 : i32, i32
  }
  func.func @transform_1(%arg0: i32, %arg1: i32, %arg2: i32) -> (i32, i32) {
    %c0_i32 = arith.constant 0 : i32
    return %arg2, %arg1 : i32, i32
  }
  func.func @transform_2(%arg0: i32, %arg1: i32, %arg2: i32) -> (i32, i32) {
    %c0_i32 = arith.constant 0 : i32
    return %arg0, %arg1 : i32, i32
  }
}

module attributes {stable_mosaic.version = 11 : i64} {
  func.func @_scale_shift_lrelu_kernel(%arg0: i32, %arg1: memref<128x256xf32, #tpu.memory_space<vmem>>, %arg2: memref<1x256xf32, #tpu.memory_space<vmem>>, %arg3: memref<1x256xf32, #tpu.memory_space<vmem>>, %arg4: memref<128x256xf32, #tpu.memory_space<vmem>>) attributes {dimension_semantics = [#tpu.dimension_semantics<parallel>], iteration_bounds = array<i64: 1>, scalar_prefetch = 0 : i64, scratch_operands = 0 : i64, tpu.core_type = #tpu.core_type<tc>, window_params = [{transform_indices = @transform_0, window_bounds = array<i64: 128, 256>}, {pipeline_mode = #tpu.pipeline_mode<synchronous>, transform_indices = @transform_1, window_bounds = array<i64: 1, 256>}, {pipeline_mode = #tpu.pipeline_mode<synchronous>, transform_indices = @transform_2, window_bounds = array<i64: 1, 256>}, {transform_indices = @transform_3, window_bounds = array<i64: 128, 256>}]} {
    %c0 = arith.constant 0 : index
    %c0_0 = arith.constant 0 : index
    %0 = vector.load %arg1[%c0, %c0_0] : memref<128x256xf32, #tpu.memory_space<vmem>>, vector<128x256xf32>
    %c0_1 = arith.constant 0 : index
    %c0_2 = arith.constant 0 : index
    %1 = vector.load %arg2[%c0_1, %c0_2] : memref<1x256xf32, #tpu.memory_space<vmem>>, vector<1x256xf32>
    %2 = vector.broadcast %1 : vector<1x256xf32> to vector<128x256xf32>
    %3 = arith.mulf %0, %2 : vector<128x256xf32>
    %c0_3 = arith.constant 0 : index
    %c0_4 = arith.constant 0 : index
    %4 = vector.load %arg3[%c0_3, %c0_4] : memref<1x256xf32, #tpu.memory_space<vmem>>, vector<1x256xf32>
    %5 = vector.broadcast %4 : vector<1x256xf32> to vector<128x256xf32>
    %6 = arith.addf %3, %5 : vector<128x256xf32>
    %cst = arith.constant 2.000000e-01 : f32
    %7 = vector.broadcast %cst : f32 to vector<128x256xf32>
    %8 = arith.mulf %7, %6 : vector<128x256xf32>
    %9 = arith.maximumf %6, %8 : vector<128x256xf32>
    %c0_5 = arith.constant 0 : index
    %c0_6 = arith.constant 0 : index
    %10 = vector.load %arg4[%c0_5, %c0_6] : memref<128x256xf32, #tpu.memory_space<vmem>>, vector<128x256xf32>
    tpu.vector_store %arg4[%c0_5, %c0_6], %9 {strides = array<i32>} : memref<128x256xf32, #tpu.memory_space<vmem>>, vector<128x256xf32>,
    return
  }
  func.func @transform_0(%arg0: i32) -> (i32, i32) {
    %c0_i32 = arith.constant 0 : i32
    %c0_i32_0 = arith.constant 0 : i32
    return %arg0, %c0_i32 : i32, i32
  }
  func.func @transform_1(%arg0: i32) -> (i32, i32) {
    %c0_i32 = arith.constant 0 : i32
    %c0_i32_0 = arith.constant 0 : i32
    %c0_i32_1 = arith.constant 0 : i32
    return %c0_i32, %c0_i32_0 : i32, i32
  }
  func.func @transform_2(%arg0: i32) -> (i32, i32) {
    %c0_i32 = arith.constant 0 : i32
    %c0_i32_0 = arith.constant 0 : i32
    %c0_i32_1 = arith.constant 0 : i32
    return %c0_i32, %c0_i32_0 : i32, i32
  }
  func.func @transform_3(%arg0: i32) -> (i32, i32) {
    %c0_i32 = arith.constant 0 : i32
    %c0_i32_0 = arith.constant 0 : i32
    return %arg0, %c0_i32 : i32, i32
  }
}

module attributes {stable_mosaic.version = 11 : i64} {
  func.func @_mm_act_kernel(%arg0: i32, %arg1: i32, %arg2: i32, %arg3: memref<32x2048xbf16, #tpu.memory_space<vmem>>, %arg4: memref<2048x128xbf16, #tpu.memory_space<vmem>>, %arg5: memref<32x128xf32, #tpu.memory_space<vmem>>) attributes {dimension_semantics = [#tpu.dimension_semantics<parallel>, #tpu.dimension_semantics<parallel>, #tpu.dimension_semantics<arbitrary>], iteration_bounds = array<i64: 1, 4, 2>, scalar_prefetch = 0 : i64, scratch_operands = 0 : i64, tpu.core_type = #tpu.core_type<tc>, window_params = [{transform_indices = @transform_0, window_bounds = array<i64: 32, 2048>}, {transform_indices = @transform_1, window_bounds = array<i64: 2048, 128>}, {transform_indices = @transform_2, window_bounds = array<i64: 32, 128>}]} {
    %c0_i32 = arith.constant 0 : i32
    %0 = arith.cmpi eq, %arg2, %c0_i32 : i32
    %1 = arith.extui %0 : i1 to i32
    %c0_i32_0 = arith.constant 0 : i32
    %2 = arith.cmpi ne, %1, %c0_i32_0 : i32
    scf.if %2 {
      %cst_8 = arith.constant 0.000000e+00 : f32
      %9 = vector.broadcast %cst_8 : f32 to vector<32x128xf32>
      %c0_9 = arith.constant 0 : index
      %c0_10 = arith.constant 0 : index
      %10 = vector.load %arg5[%c0_9, %c0_10] : memref<32x128xf32, #tpu.memory_space<vmem>>, vector<32x128xf32>
      tpu.vector_store %arg5[%c0_9, %c0_10], %9 {strides = array<i32>} : memref<32x128xf32, #tpu.memory_space<vmem>>, vector<32x128xf32>,
    } else {
    }
    %c0 = arith.constant 0 : index
    %c0_1 = arith.constant 0 : index
    %3 = vector.load %arg5[%c0, %c0_1] : memref<32x128xf32, #tpu.memory_space<vmem>>, vector<32x128xf32>
    %c0_2 = arith.constant 0 : index
    %c0_3 = arith.constant 0 : index
    %4 = vector.load %arg3[%c0_2, %c0_3] : memref<32x2048xbf16, #tpu.memory_space<vmem>>, vector<32x2048xbf16>
    %c0_4 = arith.constant 0 : index
    %c0_5 = arith.constant 0 : index
    %5 = vector.load %arg4[%c0_4, %c0_5] : memref<2048x128xbf16, #tpu.memory_space<vmem>>, vector<2048x128xbf16>
    %cst = arith.constant dense<0.000000e+00> : vector<32x128xf32>
    %6 = tpu.matmul %4, %5, %cst {dimension_numbers = #tpu.dot_dimension_numbers<[1], [0], [0], [1], [0, 0, 1, 1], [], []>} : vector<32x2048xbf16>, vector<2048x128xbf16>, vector<32x128xf32> -> vector<32x128xf32>
    %7 = arith.addf %3, %6 : vector<32x128xf32>
    %c0_6 = arith.constant 0 : index
    %c0_7 = arith.constant 0 : index
    %8 = vector.load %arg5[%c0_6, %c0_7] : memref<32x128xf32, #tpu.memory_space<vmem>>, vector<32x128xf32>
    tpu.vector_store %arg5[%c0_6, %c0_7], %7 {strides = array<i32>} : memref<32x128xf32, #tpu.memory_space<vmem>>, vector<32x128xf32>,
    return
  }
  func.func @transform_0(%arg0: i32, %arg1: i32, %arg2: i32) -> (i32, i32) {
    %c0_i32 = arith.constant 0 : i32
    return %arg0, %arg2 : i32, i32
  }
  func.func @transform_1(%arg0: i32, %arg1: i32, %arg2: i32) -> (i32, i32) {
    %c0_i32 = arith.constant 0 : i32
    return %arg2, %arg1 : i32, i32
  }
  func.func @transform_2(%arg0: i32, %arg1: i32, %arg2: i32) -> (i32, i32) {
    %c0_i32 = arith.constant 0 : i32
    return %arg0, %arg1 : i32, i32
  }
}

module attributes {stable_mosaic.version = 11 : i64} {
  func.func @_bn_stats_kernel(%arg0: i32, %arg1: memref<32x512xf32, #tpu.memory_space<vmem>>, %arg2: memref<1x512xf32, #tpu.memory_space<vmem>>, %arg3: memref<1x512xf32, #tpu.memory_space<vmem>>) attributes {dimension_semantics = [#tpu.dimension_semantics<arbitrary>], iteration_bounds = array<i64: 1>, scalar_prefetch = 0 : i64, scratch_operands = 0 : i64, tpu.core_type = #tpu.core_type<tc>, window_params = [{transform_indices = @transform_0, window_bounds = array<i64: 32, 512>}, {pipeline_mode = #tpu.pipeline_mode<synchronous>, transform_indices = @transform_1, window_bounds = array<i64: 1, 512>}, {pipeline_mode = #tpu.pipeline_mode<synchronous>, transform_indices = @transform_2, window_bounds = array<i64: 1, 512>}]} {
    %c0_i32 = arith.constant 0 : i32
    %0 = arith.cmpi eq, %arg0, %c0_i32 : i32
    %1 = arith.extui %0 : i1 to i32
    %c0_i32_0 = arith.constant 0 : i32
    %2 = arith.cmpi ne, %1, %c0_i32_0 : i32
    scf.if %2 {
      %cst_11 = arith.constant 0.000000e+00 : f32
      %15 = vector.broadcast %cst_11 : f32 to vector<1x512xf32>
      %c0_12 = arith.constant 0 : index
      %c0_13 = arith.constant 0 : index
      %16 = vector.load %arg2[%c0_12, %c0_13] : memref<1x512xf32, #tpu.memory_space<vmem>>, vector<1x512xf32>
      tpu.vector_store %arg2[%c0_12, %c0_13], %15 {strides = array<i32>} : memref<1x512xf32, #tpu.memory_space<vmem>>, vector<1x512xf32>,
      %cst_14 = arith.constant 0.000000e+00 : f32
      %17 = vector.broadcast %cst_14 : f32 to vector<1x512xf32>
      %c0_15 = arith.constant 0 : index
      %c0_16 = arith.constant 0 : index
      %18 = vector.load %arg3[%c0_15, %c0_16] : memref<1x512xf32, #tpu.memory_space<vmem>>, vector<1x512xf32>
      tpu.vector_store %arg3[%c0_15, %c0_16], %17 {strides = array<i32>} : memref<1x512xf32, #tpu.memory_space<vmem>>, vector<1x512xf32>,
    } else {
    }
    %c0 = arith.constant 0 : index
    %c0_1 = arith.constant 0 : index
    %3 = vector.load %arg1[%c0, %c0_1] : memref<32x512xf32, #tpu.memory_space<vmem>>, vector<32x512xf32>
    %c0_2 = arith.constant 0 : index
    %c0_3 = arith.constant 0 : index
    %4 = vector.load %arg2[%c0_2, %c0_3] : memref<1x512xf32, #tpu.memory_space<vmem>>, vector<1x512xf32>
    %cst = arith.constant dense<0.000000e+00> : vector<512xf32>
    %5 = vector.multi_reduction <add>, %3, %cst [0] : vector<32x512xf32> to vector<512xf32>
    %6 = vector.shape_cast %5 : vector<512xf32> to vector<1x512xf32>
    %7 = arith.addf %4, %6 : vector<1x512xf32>
    %c0_4 = arith.constant 0 : index
    %c0_5 = arith.constant 0 : index
    %8 = vector.load %arg2[%c0_4, %c0_5] : memref<1x512xf32, #tpu.memory_space<vmem>>, vector<1x512xf32>
    tpu.vector_store %arg2[%c0_4, %c0_5], %7 {strides = array<i32>} : memref<1x512xf32, #tpu.memory_space<vmem>>, vector<1x512xf32>,
    %c0_6 = arith.constant 0 : index
    %c0_7 = arith.constant 0 : index
    %9 = vector.load %arg3[%c0_6, %c0_7] : memref<1x512xf32, #tpu.memory_space<vmem>>, vector<1x512xf32>
    %10 = arith.mulf %3, %3 : vector<32x512xf32>
    %cst_8 = arith.constant dense<0.000000e+00> : vector<512xf32>
    %11 = vector.multi_reduction <add>, %10, %cst_8 [0] : vector<32x512xf32> to vector<512xf32>
    %12 = vector.shape_cast %11 : vector<512xf32> to vector<1x512xf32>
    %13 = arith.addf %9, %12 : vector<1x512xf32>
    %c0_9 = arith.constant 0 : index
    %c0_10 = arith.constant 0 : index
    %14 = vector.load %arg3[%c0_9, %c0_10] : memref<1x512xf32, #tpu.memory_space<vmem>>, vector<1x512xf32>
    tpu.vector_store %arg3[%c0_9, %c0_10], %13 {strides = array<i32>} : memref<1x512xf32, #tpu.memory_space<vmem>>, vector<1x512xf32>,
    return
  }
  func.func @transform_0(%arg0: i32) -> (i32, i32) {
    %c0_i32 = arith.constant 0 : i32
    %c0_i32_0 = arith.constant 0 : i32
    return %arg0, %c0_i32 : i32, i32
  }
  func.func @transform_1(%arg0: i32) -> (i32, i32) {
    %c0_i32 = arith.constant 0 : i32
    %c0_i32_0 = arith.constant 0 : i32
    %c0_i32_1 = arith.constant 0 : i32
    return %c0_i32, %c0_i32_0 : i32, i32
  }
  func.func @transform_2(%arg0: i32) -> (i32, i32) {
    %c0_i32 = arith.constant 0 : i32
    %c0_i32_0 = arith.constant 0 : i32
    %c0_i32_1 = arith.constant 0 : i32
    return %c0_i32, %c0_i32_0 : i32, i32
  }
}

module attributes {stable_mosaic.version = 11 : i64} {
  func.func @_scale_shift_lrelu_kernel(%arg0: i32, %arg1: memref<32x512xf32, #tpu.memory_space<vmem>>, %arg2: memref<1x512xf32, #tpu.memory_space<vmem>>, %arg3: memref<1x512xf32, #tpu.memory_space<vmem>>, %arg4: memref<32x512xf32, #tpu.memory_space<vmem>>) attributes {dimension_semantics = [#tpu.dimension_semantics<parallel>], iteration_bounds = array<i64: 1>, scalar_prefetch = 0 : i64, scratch_operands = 0 : i64, tpu.core_type = #tpu.core_type<tc>, window_params = [{transform_indices = @transform_0, window_bounds = array<i64: 32, 512>}, {pipeline_mode = #tpu.pipeline_mode<synchronous>, transform_indices = @transform_1, window_bounds = array<i64: 1, 512>}, {pipeline_mode = #tpu.pipeline_mode<synchronous>, transform_indices = @transform_2, window_bounds = array<i64: 1, 512>}, {transform_indices = @transform_3, window_bounds = array<i64: 32, 512>}]} {
    %c0 = arith.constant 0 : index
    %c0_0 = arith.constant 0 : index
    %0 = vector.load %arg1[%c0, %c0_0] : memref<32x512xf32, #tpu.memory_space<vmem>>, vector<32x512xf32>
    %c0_1 = arith.constant 0 : index
    %c0_2 = arith.constant 0 : index
    %1 = vector.load %arg2[%c0_1, %c0_2] : memref<1x512xf32, #tpu.memory_space<vmem>>, vector<1x512xf32>
    %2 = vector.broadcast %1 : vector<1x512xf32> to vector<32x512xf32>
    %3 = arith.mulf %0, %2 : vector<32x512xf32>
    %c0_3 = arith.constant 0 : index
    %c0_4 = arith.constant 0 : index
    %4 = vector.load %arg3[%c0_3, %c0_4] : memref<1x512xf32, #tpu.memory_space<vmem>>, vector<1x512xf32>
    %5 = vector.broadcast %4 : vector<1x512xf32> to vector<32x512xf32>
    %6 = arith.addf %3, %5 : vector<32x512xf32>
    %cst = arith.constant 2.000000e-01 : f32
    %7 = vector.broadcast %cst : f32 to vector<32x512xf32>
    %8 = arith.mulf %7, %6 : vector<32x512xf32>
    %9 = arith.maximumf %6, %8 : vector<32x512xf32>
    %c0_5 = arith.constant 0 : index
    %c0_6 = arith.constant 0 : index
    %10 = vector.load %arg4[%c0_5, %c0_6] : memref<32x512xf32, #tpu.memory_space<vmem>>, vector<32x512xf32>
    tpu.vector_store %arg4[%c0_5, %c0_6], %9 {strides = array<i32>} : memref<32x512xf32, #tpu.memory_space<vmem>>, vector<32x512xf32>,
    return
  }
  func.func @transform_0(%arg0: i32) -> (i32, i32) {
    %c0_i32 = arith.constant 0 : i32
    %c0_i32_0 = arith.constant 0 : i32
    return %arg0, %c0_i32 : i32, i32
  }
  func.func @transform_1(%arg0: i32) -> (i32, i32) {
    %c0_i32 = arith.constant 0 : i32
    %c0_i32_0 = arith.constant 0 : i32
    %c0_i32_1 = arith.constant 0 : i32
    return %c0_i32, %c0_i32_0 : i32, i32
  }
  func.func @transform_2(%arg0: i32) -> (i32, i32) {
    %c0_i32 = arith.constant 0 : i32
    %c0_i32_0 = arith.constant 0 : i32
    %c0_i32_1 = arith.constant 0 : i32
    return %c0_i32, %c0_i32_0 : i32, i32
  }
  func.func @transform_3(%arg0: i32) -> (i32, i32) {
    %c0_i32 = arith.constant 0 : i32
    %c0_i32_0 = arith.constant 0 : i32
    return %arg0, %c0_i32 : i32, i32
  }
}

module attributes {stable_mosaic.version = 11 : i64} {
  func.func @_mm_act_kernel(%arg0: i32, %arg1: i32, %arg2: i32, %arg3: memref<2x2048xbf16, #tpu.memory_space<vmem>>, %arg4: memref<2048x128xbf16, #tpu.memory_space<vmem>>, %arg5: memref<2x128xf32, #tpu.memory_space<vmem>>) attributes {dimension_semantics = [#tpu.dimension_semantics<parallel>, #tpu.dimension_semantics<parallel>, #tpu.dimension_semantics<arbitrary>], iteration_bounds = array<i64: 1, 1, 4>, scalar_prefetch = 0 : i64, scratch_operands = 0 : i64, tpu.core_type = #tpu.core_type<tc>, window_params = [{transform_indices = @transform_0, window_bounds = array<i64: 2, 2048>}, {transform_indices = @transform_1, window_bounds = array<i64: 2048, 128>}, {transform_indices = @transform_2, window_bounds = array<i64: 2, 128>}]} {
    %c0_i32 = arith.constant 0 : i32
    %0 = arith.cmpi eq, %arg2, %c0_i32 : i32
    %1 = arith.extui %0 : i1 to i32
    %c0_i32_0 = arith.constant 0 : i32
    %2 = arith.cmpi ne, %1, %c0_i32_0 : i32
    scf.if %2 {
      %cst_9 = arith.constant 0.000000e+00 : f32
      %12 = vector.broadcast %cst_9 : f32 to vector<2x128xf32>
      %c0_10 = arith.constant 0 : index
      %c0_11 = arith.constant 0 : index
      %13 = vector.load %arg5[%c0_10, %c0_11] : memref<2x128xf32, #tpu.memory_space<vmem>>, vector<2x128xf32>
      tpu.vector_store %arg5[%c0_10, %c0_11], %12 {strides = array<i32>} : memref<2x128xf32, #tpu.memory_space<vmem>>, vector<2x128xf32>,
    } else {
    }
    %c0 = arith.constant 0 : index
    %c0_1 = arith.constant 0 : index
    %3 = vector.load %arg5[%c0, %c0_1] : memref<2x128xf32, #tpu.memory_space<vmem>>, vector<2x128xf32>
    %c0_2 = arith.constant 0 : index
    %c0_3 = arith.constant 0 : index
    %4 = vector.load %arg3[%c0_2, %c0_3] : memref<2x2048xbf16, #tpu.memory_space<vmem>>, vector<2x2048xbf16>
    %c0_4 = arith.constant 0 : index
    %c0_5 = arith.constant 0 : index
    %5 = vector.load %arg4[%c0_4, %c0_5] : memref<2048x128xbf16, #tpu.memory_space<vmem>>, vector<2048x128xbf16>
    %cst = arith.constant dense<0.000000e+00> : vector<2x128xf32>
    %6 = tpu.matmul %4, %5, %cst {dimension_numbers = #tpu.dot_dimension_numbers<[1], [0], [0], [1], [0, 0, 1, 1], [], []>} : vector<2x2048xbf16>, vector<2048x128xbf16>, vector<2x128xf32> -> vector<2x128xf32>
    %7 = arith.addf %3, %6 : vector<2x128xf32>
    %c0_6 = arith.constant 0 : index
    %c0_7 = arith.constant 0 : index
    %8 = vector.load %arg5[%c0_6, %c0_7] : memref<2x128xf32, #tpu.memory_space<vmem>>, vector<2x128xf32>
    tpu.vector_store %arg5[%c0_6, %c0_7], %7 {strides = array<i32>} : memref<2x128xf32, #tpu.memory_space<vmem>>, vector<2x128xf32>,
    %c3_i32 = arith.constant 3 : i32
    %9 = arith.cmpi eq, %arg2, %c3_i32 : i32
    %10 = arith.extui %9 : i1 to i32
    %c0_i32_8 = arith.constant 0 : i32
    %11 = arith.cmpi ne, %10, %c0_i32_8 : i32
    scf.if %11 {
      %c0_9 = arith.constant 0 : index
      %c0_10 = arith.constant 0 : index
      %12 = vector.load %arg5[%c0_9, %c0_10] : memref<2x128xf32, #tpu.memory_space<vmem>>, vector<2x128xf32>
      %cst_11 = arith.constant 0.000000e+00 : f32
      %13 = vector.broadcast %cst_11 : f32 to vector<2x128xf32>
      %14 = arith.subf %13, %12 : vector<2x128xf32>
      %15 = math.exp %14 : vector<2x128xf32>
      %cst_12 = arith.constant 1.000000e+00 : f32
      %16 = vector.broadcast %cst_12 : f32 to vector<2x128xf32>
      %17 = arith.addf %16, %15 : vector<2x128xf32>
      %cst_13 = arith.constant 1.000000e+00 : f32
      %18 = vector.broadcast %cst_13 : f32 to vector<2x128xf32>
      %19 = arith.divf %18, %17 : vector<2x128xf32>
      %c0_14 = arith.constant 0 : index
      %c0_15 = arith.constant 0 : index
      %20 = vector.load %arg5[%c0_14, %c0_15] : memref<2x128xf32, #tpu.memory_space<vmem>>, vector<2x128xf32>
      tpu.vector_store %arg5[%c0_14, %c0_15], %19 {strides = array<i32>} : memref<2x128xf32, #tpu.memory_space<vmem>>, vector<2x128xf32>,
    } else {
    }
    return
  }
  func.func @transform_0(%arg0: i32, %arg1: i32, %arg2: i32) -> (i32, i32) {
    %c0_i32 = arith.constant 0 : i32
    return %arg0, %arg2 : i32, i32
  }
  func.func @transform_1(%arg0: i32, %arg1: i32, %arg2: i32) -> (i32, i32) {
    %c0_i32 = arith.constant 0 : i32
    return %arg2, %arg1 : i32, i32
  }
  func.func @transform_2(%arg0: i32, %arg1: i32, %arg2: i32) -> (i32, i32) {
    %c0_i32 = arith.constant 0 : i32
    return %arg0, %arg1 : i32, i32
  }
}

</mosaic_0001>

<bundles_post_ra>
// kernel: discriminator_forward.8
= control target key start
LH: loop header
LB: loop body
LE: loop exit
PB: predicated region body
PF: predicated region fallthrough
CT: control target
= control target key end

     0   :  { %7 = vsyncpa [#allocation3], 0  ;;  %s841_s9 = smov 0   ;;  %s843_s10 = smov 0   ;;  %s946_s0 = inlined_call_operand.vmem [shape: bf16[512,48], index: 0, kind: input, shape index: {}]   ;;  %s947_s1 = inlined_call_operand.hbm [shape: bf16[48,128], index: 1, kind: input, shape index: {}]   ;;  %s948_s2 = inlined_call_operand.vmem [shape: f32[512,128], index: 2, kind: output, shape index: {}]  }
   0x1   :  { %s845_s11 = smov 0  }
   0x2 LB: > { %s647_s12 = sadd.s32 4294967295, %s821_s11   ;;  %s32_s13 = sadd.s32 1, %s817_s10  ;;  %s821_s11 = sphi %s845_s11, %s13_s11   ;;  %s817_s10 = sphi %s843_s10, %s958_s10   ;;  %s813_s9 = sphi %s841_s9, %s957_s9  }
   0x3   : > { %p34_p0 = scmp.ge.s32.totalorder %s32_s13, 4  ;;  %p649_p1 = scmp.ge.s32.totalorder %s821_s11, 1 }
   0x4   : > { %p121_p2 = scmp.lt.s32.totalorder %s821_s11, 5  ;;  %p866_p4 = scmp.eq.s32.totalorder %s647_s12, 0 }
   0x5   : > { %s960_s13 = smov (%p34_p0, %s32_s13), 0  ;;  %s823_s16 = smov [#allocation2]  }
   0x6   : > { %p862_p3 = pnand %p649_p1, %p121_p2  ;;  %s137_s17 = sshll.u32 %s823_s16, 4  ;;  %s138_s17 = int_to_ptr.vmem [resolvable:$true] %s137_s17 }
   0x7   : > { %s953_s15 = scalar_select %p866_p4, 1, 0 }
   0x8   : > { %s952_s14 = scalar_select %p862_p3, 1, 0 }
   0x9   : > { %p722_p5 = pneg %p862_p3  ;;  %s767_s21 = scalar_lea.hbm %s947_s1, 384 }
   0xa   : > { %p768_p7 = scmp.ne.s32.totalorder %s947_s1, %s767_s21  ;;  %p774_p11 = scmp.lt.u32.totalorder %s767_s21, %s947_s1 }
   0xb   : > { %p874_p6 = pnand %p866_p4, %p722_p5 }
   0xd   : > { %p769_p8 = pneg %p874_p6 }
   0xf   : > { %p770_p9 = pnand %p769_p8, %p768_p7 }
  0x11   : > { %p771_p10 = pneg %p770_p9 }
  0x13   : > { %p776_p12 = pnand %p774_p11, %p771_p10 }
  0x15   : > { %779 = shalt.err (!%p776_p12)
}
  0x16   : > { %s780_s26 = scalar_lea.vmem %s138_s17, 384  ;;  %p788_p2 = scmp.lt.s32.totalorder %s138_s17, %s138_s17 }
  0x17   : > { %p781_p13 = scmp.ne.s32.totalorder %s138_s17, %s780_s26  ;;  %p789_p5 = scmp.lt.s32.totalorder %s780_s26, %s780_s26 }
  0x19   : > { %p783_p0 = pnand %p781_p13, %p769_p8  ;;  %p790_p4 = por %p789_p5, %p788_p2 }
  0x1b   : > { %p784_p1 = pneg %p783_p0 }
  0x1d   : > { %p791_p3 = pnand %p790_p4, %p784_p1 }
  0x1f   : > { %794 = shalt.err (!%p791_p3)
}
  0x20   : > { %s824_s27 = smov 64   ;;  %s825_s28 = smov 4  }
  0x21   : > { %725 = dma.hbm_to_vmem [thread:$0]  (!%p874_p6), %s947_s1, 384, %s138_s17, [#allocation3], %s824_s27, %s824_s27, %s825_s28  }
  0x22   : > { %p955_p7 = scmp.ne.s32.totalorder %s952_s14, 0 }
  0x23   : > { %p956_p9 = scmp.ne.s32.totalorder (!%p955_p7), %s953_s15, 0 }
  0x24   : > { %165 = sbr.rel (%p955_p7) target bundleno = 285 (0x11d), region = 28 }
  0x2b   : > { %808 = dma.done.wait (%p956_p9), [#allocation3], 384  }
  0x2c   : > { %810 = vsyncadd (%p956_p9), [#allocation3], 4294966912  ;;  %s654_s3 = sshll.u32 %s813_s9, 4  ;;  %v756_v0 = vld [vmem:[#allocation2] sm:$0xff]   ;;  %v757_v1 = vld [vmem:[#allocation2 + $0x8] sm:$0xff]   ;;  %vm329_vm0 = vcmask 392192  }
  0x2d   : > { %p194_p3 = scmp.lt.s32.totalorder %s654_s3, 63  ;;  %690 = vmatprep.subr.bf16.mxu0 %v756_v0  ;;  %712 = vmatprep.subr.bf16.mxu1 %v756_v0  ;;  %v758_v2 = vld [vmem:[#allocation2 + $0x10] sm:$0xff]  }
  0x2e   : > { %691 = vmatpush3.bf16.msra.mxu0 %v756_v0  ;;  %715 = vmatpush3.bf16.msra.mxu1 %v756_v0 }
  0x2f   : > { %s962_s3 = smov (!%p194_p3, %s654_s3), 63  ;;  %692 = vmatprep.subr.bf16.mxu0 %v757_v1  ;;  %713 = vmatprep.subr.bf16.mxu1 %v757_v1 }
  0x30   : > { %s655_s4 = sshll.u32 %s962_s3, 2  ;;  %s657_s8 = sshll.u32 %s962_s3, 3 }
  0x31   : > { %s200_s7 = scalar_lea.vmem %s946_s0, %s655_s4  ;;  %s919_s14 = scalar_lea.vmem %s948_s2, %s657_s8 }
  0x32   : > { %v759_v3 = vld [vmem:[%s200_s7] sm:$0xff]   ;;  %693 = vmatpush3.bf16.msra.mxu0 %v757_v1  ;;  %716 = vmatpush3.bf16.msra.mxu1 %v757_v1  ;;  %v761_v5 = vld [vmem:[%s200_s7 + $0x8] sm:$0xff]   ;;  %v763_v7 = vld [vmem:[%s200_s7 + $0x10] sm:$0xff]  }
  0x33   : > { %v760_v4 = vld [vmem:[%s200_s7 + $0x20] sm:$0xff]   ;;  %696 = vmatprep.mubr.msk.bf16.mxu0 %vm329_vm0, %v759_v3  ;;  %694 = vmatprep.subr.bf16.mxu0 %v758_v2  ;;  %v762_v6 = vld [vmem:[%s200_s7 + $0x28] sm:$0xff]   ;;  %v764_v8 = vld [vmem:[%s200_s7 + $0x30] sm:$0xff]  }
  0x34   : > { %704 = vmatprep.mubr.msk.bf16.mxu1 %vm329_vm0, %v760_v4  ;;  %714 = vmatprep.subr.bf16.mxu1 %v758_v2  ;;  %v765_v9 = vld [vmem:[%s200_s7 + $0x18] sm:$0xff]  }
  0x35   : > { %v766_v10 = vld [vmem:[%s200_s7 + $0x38] sm:$0xff]  }
  0x36   : > { %695 = vmatpush3.bf16.msra.mxu0 %v758_v2  ;;  %717 = vmatpush3.bf16.msra.mxu1 %v758_v2 }
  0x39   : > { %697 = vmatmul.mubr.msk.bf16.vlgmr.msra.gmra.mrb[0].mxu0 %vm329_vm0, %v761_v5  ;;  %705 = vmatmul.mubr.msk.bf16.vlgmr.msra.gmra.mrb[0].mxu1 %vm329_vm0, %v762_v6 }
  0x3a   : > { %700 = vmatprep.mubr.msk.bf16.mxu0 %vm329_vm0, %v763_v7  ;;  %708 = vmatprep.mubr.msk.bf16.mxu1 %vm329_vm0, %v764_v8 }
  0x41   : > { %701 = vmatmul.mubr.msk.bf16.gmra.mrb[4].mxu0 %vm329_vm0, %v765_v9  ;;  %709 = vmatmul.mubr.msk.bf16.gmra.mrb[4].mxu1 %vm329_vm0, %v766_v10 }
 0x10c   : > { %v698_v11 = vpop.f32.mrb[0].mxu0  ;;  %v706_v12 = vpop.f32.mrb[0].mxu1 }
 0x10d   : > { %v388_v13 = vpop.f32.mrb[1].mxu0  ;;  %v420_v14 = vpop.f32.mrb[1].mxu1  ;;  %v504_v17 = vmul.f32 0.2, %v698_v11  ;;  %v512_v18 = vmul.f32 0.2, %v706_v12 }
 0x10e   : > { %v699_v15 = vpop.f32.mrb[2].mxu0  ;;  %v707_v16 = vpop.f32.mrb[2].mxu1  ;;  %v502_v21 = vmul.f32 0.2, %v388_v13  ;;  %v510_v22 = vmul.f32 0.2, %v420_v14 }
 0x10f   : > { %v391_v19 = vpop.f32.mrb[3].mxu0  ;;  %v423_v20 = vpop.f32.mrb[3].mxu1  ;;  %v520_v23 = vmax.f32 %v698_v11, %v504_v17  ;;  %v528_v24 = vmax.f32 %v706_v12, %v512_v18  ;;  %v505_v25 = vmul.f32 0.2, %v699_v15  ;;  %v513_v26 = vmul.f32 0.2, %v707_v16 }
 0x110   : > { %v518_v27 = vmax.f32 %v388_v13, %v502_v21  ;;  %v526_v28 = vmax.f32 %v420_v14, %v510_v22  ;;  %v503_v29 = vmul.f32 0.2, %v391_v19  ;;  %v511_v30 = vmul.f32 0.2, %v423_v20 }
 0x111   : > { %536 = vst [vmem:[%s919_s14 + $0x10] sm:$0xff] %v520_v23  ;;  %544 = vst [vmem:[%s919_s14 + $0x50] sm:$0xff] %v528_v24  ;;  %v521_v31 = vmax.f32 %v699_v15, %v505_v25  ;;  %v529_v32 = vmax.f32 %v707_v16, %v513_v26 }
 0x112   : > { %534 = vst [vmem:[%s919_s14] sm:$0xff] %v518_v27  ;;  %542 = vst [vmem:[%s919_s14 + $0x40] sm:$0xff] %v526_v28  ;;  %v519_v33 = vmax.f32 %v391_v19, %v503_v29  ;;  %v527_v34 = vmax.f32 %v423_v20, %v511_v30 }
 0x113   : > { %537 = vst [vmem:[%s919_s14 + $0x18] sm:$0xff] %v521_v31  ;;  %545 = vst [vmem:[%s919_s14 + $0x58] sm:$0xff] %v529_v32 }
 0x114   : > { %v702_v35 = vpop.f32.mrb[4].mxu0  ;;  %v710_v36 = vpop.f32.mrb[4].mxu1  ;;  %535 = vst [vmem:[%s919_s14 + $0x8] sm:$0xff] %v519_v33  ;;  %543 = vst [vmem:[%s919_s14 + $0x48] sm:$0xff] %v527_v34 }
 0x115   : > { %v404_v37 = vpop.f32.mrb[5].mxu0  ;;  %v436_v38 = vpop.f32.mrb[5].mxu1  ;;  %v508_v41 = vmul.f32 0.2, %v702_v35  ;;  %v516_v42 = vmul.f32 0.2, %v710_v36 }
 0x116   : > { %v703_v39 = vpop.f32.mrb[6].mxu0  ;;  %v711_v40 = vpop.f32.mrb[6].mxu1  ;;  %v506_v45 = vmul.f32 0.2, %v404_v37  ;;  %v514_v46 = vmul.f32 0.2, %v436_v38 }
 0x117   : > { %v407_v43 = vpop.f32.mrb[7].mxu0  ;;  %v439_v44 = vpop.f32.mrb[7].mxu1  ;;  %v524_v47 = vmax.f32 %v702_v35, %v508_v41  ;;  %v532_v48 = vmax.f32 %v710_v36, %v516_v42  ;;  %v509_v49 = vmul.f32 0.2, %v703_v39  ;;  %v517_v50 = vmul.f32 0.2, %v711_v40 }
 0x118   : > { %v522_v51 = vmax.f32 %v404_v37, %v506_v45  ;;  %v530_v52 = vmax.f32 %v436_v38, %v514_v46  ;;  %v507_v53 = vmul.f32 0.2, %v407_v43  ;;  %v515_v54 = vmul.f32 0.2, %v439_v44 }
 0x119   : > { %540 = vst [vmem:[%s919_s14 + $0x30] sm:$0xff] %v524_v47  ;;  %548 = vst [vmem:[%s919_s14 + $0x70] sm:$0xff] %v532_v48  ;;  %v525_v55 = vmax.f32 %v703_v39, %v509_v49  ;;  %v533_v56 = vmax.f32 %v711_v40, %v517_v50 }
 0x11a   : > { %538 = vst [vmem:[%s919_s14 + $0x20] sm:$0xff] %v522_v51  ;;  %546 = vst [vmem:[%s919_s14 + $0x60] sm:$0xff] %v530_v52  ;;  %v523_v57 = vmax.f32 %v407_v43, %v507_v53  ;;  %v531_v58 = vmax.f32 %v439_v44, %v515_v54 }
 0x11b   : > { %541 = vst [vmem:[%s919_s14 + $0x38] sm:$0xff] %v525_v55  ;;  %549 = vst [vmem:[%s919_s14 + $0x78] sm:$0xff] %v533_v56 }
 0x11c   : > { %539 = vst [vmem:[%s919_s14 + $0x28] sm:$0xff] %v523_v57  ;;  %547 = vst [vmem:[%s919_s14 + $0x68] sm:$0xff] %v531_v58 }
 0x11d PF: > { %s13_s11 = sadd.s32 1, %s821_s11   ;;  %s957_s9 = smov %s817_s10 }
 0x11e   : > { %p10_p4 = scmp.ge.s32.totalorder %s13_s11, 6   ;;  %s958_s10 = smov %s960_s13 }
 0x120   :  { %12 = sbr.rel (!%p10_p4) target bundleno = 2 (0x2), region = 72 }
 0x127   :  { %578 = vsyncpa [#allocation3], 1 }
 0x128   :  { %580 = vsyncpa [#allocation3 + $0x1], 1 }

// kernel: discriminator_forward.10
= control target key start
LH: loop header
LB: loop body
LE: loop exit
PB: predicated region body
PF: predicated region fallthrough
CT: control target
= control target key end

     0   :  { %v14_v0 = vlaneseq  ;;  %v224_v7 = vmov 0.0   ;;  %s369_s0 = inlined_call_operand.vmem [shape: f32[128,256], index: 0, kind: input, shape index: {}]   ;;  %s370_s1 = inlined_call_operand.vmem [shape: f32[1,256], index: 1, kind: output, shape index: {0}]   ;;  %s371_s2 = inlined_call_operand.vmem [shape: f32[1,256], index: 2, kind: output, shape index: {1}]  }
   0x1   :  { %v20_v1 = vld [vmem:[%s369_s0] sm:$0xff]  ;;  %v22_v2 = vld [vmem:[%s369_s0 + $0x10] sm:$0xff]  ;;  %v21_v4 = vld [vmem:[%s369_s0 + $0x8] sm:$0xff] }
   0x2   :  { %vm248_vm0 = vcmp.lt.s32.totalorder %v14_v0, 256  ;;  %v23_v5 = vld [vmem:[%s369_s0 + $0x18] sm:$0xff]  ;;  %v53_v6 = vadd.f32 %v22_v2, %v20_v1  ;;  %v24_v8 = vld [vmem:[%s369_s0 + $0x20] sm:$0xff]  ;;  %v25_v10 = vld [vmem:[%s369_s0 + $0x28] sm:$0xff]  ;;  %v120_v22 = vmul.f32 %v20_v1, %v20_v1  ;;  %v121_v25 = vmul.f32 %v21_v4, %v21_v4 }
   0x3   :  { %18 = vst.msk [vmem:[%s370_s1] sm:$0x3] %vm248_vm0, %v224_v7  ;;  %v74_v9 = vadd.f32 %v23_v5, %v21_v4  ;;  %19 = vst.msk [vmem:[%s371_s2] sm:$0x3] %vm248_vm0, %v224_v7  ;;  %v26_v12 = vld [vmem:[%s369_s0 + $0x30] sm:$0xff]  ;;  %v27_v14 = vld [vmem:[%s369_s0 + $0x38] sm:$0xff]  ;;  %v122_v26 = vmul.f32 %v22_v2, %v22_v2  ;;  %v123_v27 = vmul.f32 %v23_v5, %v23_v5 }
   0x4   :  { %v54_v11 = vadd.f32 %v53_v6, %v24_v8  ;;  %v28_v16 = vld [vmem:[%s369_s0 + $0x40] sm:$0xff]  ;;  %v29_v18 = vld [vmem:[%s369_s0 + $0x48] sm:$0xff]  ;;  %v30_v20 = vld [vmem:[%s369_s0 + $0x50] sm:$0xff]  ;;  %v124_v32 = vmul.f32 %v24_v8, %v24_v8  ;;  %v125_v33 = vmul.f32 %v25_v10, %v25_v10  ;;  %v126_v36 = vmul.f32 %v26_v12, %v26_v12 }
   0x5   :  { %v75_v13 = vadd.f32 %v74_v9, %v25_v10  ;;  %v31_v23 = vld [vmem:[%s369_s0 + $0x58] sm:$0xff]  ;;  %v32_v28 = vld [vmem:[%s369_s0 + $0x60] sm:$0xff]  ;;  %v33_v30 = vld [vmem:[%s369_s0 + $0x68] sm:$0xff]  ;;  %v127_v39 = vmul.f32 %v27_v14, %v27_v14  ;;  %v152_v40 = vadd.f32 %v122_v26, %v120_v22  ;;  %v173_v41 = vadd.f32 %v123_v27, %v121_v25 }
   0x6   :  { %v55_v15 = vadd.f32 %v54_v11, %v26_v12  ;;  %v34_v34 = vld [vmem:[%s369_s0 + $0x70] sm:$0xff]  ;;  %v35_v37 = vld [vmem:[%s369_s0 + $0x78] sm:$0xff]  ;;  %v36_v42 = vld [vmem:[%s369_s0 + $0x80] sm:$0xff]  ;;  %v128_v44 = vmul.f32 %v28_v16, %v28_v16  ;;  %v129_v47 = vmul.f32 %v29_v18, %v29_v18  ;;  %v130_v52 = vmul.f32 %v30_v20, %v30_v20 }
   0x7   :  { %v76_v17 = vadd.f32 %v75_v13, %v27_v14  ;;  %v37_v45 = vld [vmem:[%s369_s0 + $0x88] sm:$0xff]  ;;  %v153_v48 = vadd.f32 %v152_v40, %v124_v32  ;;  %v174_v49 = vadd.f32 %v173_v41, %v125_v33  ;;  %v38_v50 = vld [vmem:[%s369_s0 + $0x90] sm:$0xff]  ;;  %v39_v53 = vld [vmem:[%s369_s0 + $0x98] sm:$0xff]  ;;  %v131_v55 = vmul.f32 %v31_v23, %v31_v23 }
   0x8   :  { %v56_v19 = vadd.f32 %v55_v15, %v28_v16  ;;  %v40_v58 = vld [vmem:[%s369_s0 + $0xa0] sm:$0xff]  ;;  %v132_v60 = vmul.f32 %v32_v28, %v32_v28  ;;  %v41_v61 = vld [vmem:[%s369_s0 + $0xa8] sm:$0xff]  ;;  %v133_v63 = vmul.f32 %v33_v30, %v33_v30  ;;  %v42_v4 = vld [vmem:[%s369_s0 + $0xb0] sm:$0xff]  ;;  %v134_v6 = vmul.f32 %v34_v34, %v34_v34 }
   0x9   :  { %v77_v21 = vadd.f32 %v76_v17, %v29_v18  ;;  %v154_v56 = vadd.f32 %v153_v48, %v126_v36  ;;  %v175_v57 = vadd.f32 %v174_v49, %v127_v39  ;;  %v43_v7 = vld [vmem:[%s369_s0 + $0xb8] sm:$0xff]  ;;  %v135_v9 = vmul.f32 %v35_v37, %v35_v37  ;;  %v44_v12 = vld [vmem:[%s369_s0 + $0xc0] sm:$0xff]  ;;  %v45_v15 = vld [vmem:[%s369_s0 + $0xc8] sm:$0xff] }
   0xa   :  { %v57_v24 = vadd.f32 %v56_v19, %v30_v20  ;;  %v136_v14 = vmul.f32 %v36_v42, %v36_v42  ;;  %v137_v17 = vmul.f32 %v37_v45, %v37_v45  ;;  %v46_v20 = vld [vmem:[%s369_s0 + $0xd0] sm:$0xff]  ;;  %v138_v22 = vmul.f32 %v38_v50, %v38_v50  ;;  %v51_v39 = vld [vmem:[%s369_s0 + $0xf8] sm:$0xff] }
   0xb   :  { %v78_v29 = vadd.f32 %v77_v21, %v31_v23  ;;  %v155_v1 = vadd.f32 %v154_v56, %v128_v44  ;;  %v176_v2 = vadd.f32 %v175_v57, %v129_v47  ;;  %v47_v23 = vld [vmem:[%s369_s0 + $0xd8] sm:$0xff]  ;;  %v139_v25 = vmul.f32 %v39_v53, %v39_v53  ;;  %v50_v36 = vld [vmem:[%s369_s0 + $0xf0] sm:$0xff] }
   0xc   :  { %v58_v31 = vadd.f32 %v57_v24, %v32_v28  ;;  %v48_v28 = vld [vmem:[%s369_s0 + $0xe0] sm:$0xff]  ;;  %v141_v33 = vmul.f32 %v41_v61, %v41_v61  ;;  %v143_v41 = vmul.f32 %v43_v7, %v43_v7  ;;  %v145_v47 = vmul.f32 %v45_v15, %v45_v15 }
   0xd   :  { %v79_v35 = vadd.f32 %v78_v29, %v33_v30  ;;  %v156_v10 = vadd.f32 %v155_v1, %v130_v52  ;;  %v177_v11 = vadd.f32 %v176_v2, %v131_v55  ;;  %v140_v30 = vmul.f32 %v40_v58, %v40_v58 }
   0xe   :  { %v59_v38 = vadd.f32 %v58_v31, %v34_v34  ;;  %v49_v31 = vld [vmem:[%s369_s0 + $0xe8] sm:$0xff]  ;;  %v225_v57 = vmov 1966171168   ;;  %v150_v2 = vmul.f32 %v50_v36, %v50_v36 }
   0xf   :  { %v80_v43 = vadd.f32 %v79_v35, %v35_v37  ;;  %v157_v18 = vadd.f32 %v156_v10, %v132_v60  ;;  %v178_v19 = vadd.f32 %v177_v11, %v133_v63  ;;  %v102_v10 = vshrl.u32 %v14_v0, 7 }
  0x10   :  { %v60_v46 = vadd.f32 %v59_v38, %v36_v42  ;;  %v142_v38 = vmul.f32 %v42_v4, %v42_v4 }
  0x11   :  { %v81_v51 = vadd.f32 %v80_v43, %v37_v45  ;;  %v158_v26 = vadd.f32 %v157_v18, %v134_v6  ;;  %v179_v27 = vadd.f32 %v178_v19, %v135_v9  ;;  %v144_v45 = vmul.f32 %v44_v12, %v44_v12 }
  0x12   :  { %v61_v54 = vadd.f32 %v60_v46, %v38_v50 }
  0x13   :  { %v82_v59 = vadd.f32 %v81_v51, %v39_v53  ;;  %v159_v34 = vadd.f32 %v158_v26, %v136_v14  ;;  %v180_v35 = vadd.f32 %v179_v27, %v137_v17  ;;  %v146_v51 = vmul.f32 %v46_v20, %v46_v20  ;;  %v52_v26 = vld [vmem:[%s370_s1] sm:$0x3] }
  0x14   :  { %v62_v62 = vadd.f32 %v61_v54, %v40_v58  ;;  %v147_v53 = vmul.f32 %v47_v23, %v47_v23  ;;  %v99_v58 = vunpack.c.l.s4 %v225_v57 }
  0x15   :  { %v83_v5 = vadd.f32 %v82_v59, %v41_v61  ;;  %v160_v42 = vadd.f32 %v159_v34, %v138_v22  ;;  %v181_v43 = vadd.f32 %v180_v35, %v139_v25  ;;  %v148_v59 = vmul.f32 %v48_v28, %v48_v28 }
  0x16   :  { %v63_v8 = vadd.f32 %v62_v62, %v42_v4  ;;  %v149_v61 = vmul.f32 %v49_v31, %v49_v31  ;;  %v100_v9 = vunpack.c.0.s8 %v99_v58 }
  0x17   :  { %v84_v13 = vadd.f32 %v83_v5, %v43_v7  ;;  %v161_v48 = vadd.f32 %v160_v42, %v140_v30  ;;  %v182_v49 = vadd.f32 %v181_v43, %v141_v33  ;;  %v151_v5 = vmul.f32 %v51_v39, %v51_v39 }
  0x18   :  { %v64_v16 = vadd.f32 %v63_v8, %v44_v12  ;;  %v103_v19 = vsub.s32 %v100_v9, %v102_v10 }
  0x19   :  { %v85_v21 = vadd.f32 %v84_v13, %v45_v15  ;;  %v162_v54 = vadd.f32 %v161_v48, %v142_v38  ;;  %v183_v55 = vadd.f32 %v182_v49, %v143_v41  ;;  %v119_v38 = vld [vmem:[%s371_s2] sm:$0x3] }
  0x1a   :  { %v65_v24 = vadd.f32 %v64_v16, %v46_v20 }
  0x1b   :  { %v86_v29 = vadd.f32 %v85_v21, %v47_v23  ;;  %v163_v62 = vadd.f32 %v162_v54, %v144_v45  ;;  %v184_v63 = vadd.f32 %v183_v55, %v145_v47 }
  0x1c   :  { %v66_v32 = vadd.f32 %v65_v24, %v48_v28 }
  0x1d   :  { %v87_v37 = vadd.f32 %v86_v29, %v49_v31  ;;  %v164_v6 = vadd.f32 %v163_v62, %v146_v51  ;;  %v185_v7 = vadd.f32 %v184_v63, %v147_v53 }
  0x1e   :  { %v67_v40 = vadd.f32 %v66_v32, %v50_v36 }
  0x1f   :  { %v88_v44 = vadd.f32 %v87_v37, %v51_v39  ;;  %v165_v12 = vadd.f32 %v164_v6, %v148_v59  ;;  %v186_v13 = vadd.f32 %v185_v7, %v149_v61 }
  0x20   :  { %v68_v46 = vrot.slane %v67_v40, 4 }
  0x21   :  { %v89_v50 = vrot.slane %v88_v44, 4  ;;  %v166_v16 = vadd.f32 %v165_v12, %v150_v2  ;;  %v187_v17 = vadd.f32 %v186_v13, %v151_v5 }
  0x22   :  { %v69_v52 = vadd.f32 %v68_v46, %v67_v40 }
  0x23   :  { %v90_v56 = vadd.f32 %v89_v50, %v88_v44  ;;  %v167_v20 = vrot.slane %v166_v16, 4  ;;  %v188_v21 = vrot.slane %v187_v17, 4 }
  0x24   :  { %v70_v60 = vrot.slane %v69_v52, 2 }
  0x25   :  { %v91_v1 = vrot.slane %v90_v56, 2  ;;  %v168_v23 = vadd.f32 %v167_v20, %v166_v16  ;;  %v189_v24 = vadd.f32 %v188_v21, %v187_v17 }
  0x26   :  { %v71_v4 = vadd.f32 %v70_v60, %v69_v52 }
  0x27   :  { %v92_v8 = vadd.f32 %v91_v1, %v90_v56  ;;  %v169_v0 = vrot.slane %v168_v23, 2  ;;  %v190_v27 = vrot.slane %v189_v24, 2 }
  0x28   :  { %v72_v11 = vrot.slane %v71_v4, 1 }
  0x29   :  { %v93_v14 = vrot.slane %v92_v8, 1  ;;  %v170_v29 = vadd.f32 %v169_v0, %v168_v23  ;;  %v191_v30 = vadd.f32 %v190_v27, %v189_v24 }
  0x2a   :  { %v73_v15 = vadd.f32 %v72_v11, %v71_v4 }
  0x2b   :  { %v94_v18 = vadd.f32 %v93_v14, %v92_v8  ;;  %v171_v32 = vrot.slane %v170_v29, 1  ;;  %v192_v33 = vrot.slane %v191_v30, 1 }
  0x2d   :  { %v97_v22 = vcombine.low %v73_v15, %v94_v18  ;;  %v172_v34 = vadd.f32 %v171_v32, %v170_v29  ;;  %v193_v35 = vadd.f32 %v192_v33, %v191_v30 }
  0x2f   :  { %v104_v25 = vrot.slane %v97_v22, %v103_v19  ;;  %v196_v36 = vcombine.low %v172_v34, %v193_v35 }
  0x31   :  { %v111_v28 = vrot.slane %v104_v25, %v103_v19  ;;  %v203_v37 = vrot.slane %v196_v36, %v103_v19 }
  0x33   :  { %v113_v31 = vadd.f32 %v111_v28, %v52_v26  ;;  %v210_v39 = vrot.slane %v203_v37, %v103_v19 }
  0x35   :  { %118 = vst.msk [vmem:[%s370_s1] sm:$0x3] %vm248_vm0, %v113_v31  ;;  %v212_v40 = vadd.f32 %v210_v39, %v119_v38 }
  0x37   :  { %213 = vst.msk [vmem:[%s371_s2] sm:$0x3] %vm248_vm0, %v212_v40 }

// kernel: discriminator_forward.11
= control target key start
LH: loop header
LB: loop body
LE: loop exit
PB: predicated region body
PF: predicated region fallthrough
CT: control target
= control target key end

     0   :  { %v48_v0 = vlaneseq  ;;  %s524_s1 = inlined_call_operand.vmem [shape: f32[1,256], index: 1, kind: input, shape index: {}]   ;;  %s525_s2 = inlined_call_operand.vmem [shape: f32[1,256], index: 2, kind: input, shape index: {}]   ;;  %s526_s0 = inlined_call_operand.vmem [shape: f32[128,256], index: 0, kind: input, shape index: {}]   ;;  %s527_s3 = inlined_call_operand.vmem [shape: f32[128,256], index: 3, kind: output, shape index: {}]  }
   0x1   :  { %v46_v2 = vld [vmem:[%s524_s1] sm:$0x3]  ;;  %v15_v6 = vld [vmem:[%s526_s0 + $0x8] sm:$0xff]  ;;  %v16_v8 = vld [vmem:[%s526_s0 + $0x10] sm:$0xff] }
   0x2   :  { %v49_v1 = vshrl.u32 %v48_v0, 7  ;;  %v90_v3 = vld [vmem:[%s525_s2] sm:$0x3]  ;;  %v17_v9 = vld [vmem:[%s526_s0 + $0x18] sm:$0xff]  ;;  %v19_v15 = vld [vmem:[%s526_s0 + $0x28] sm:$0xff] }
   0x3   :  { %v14_v4 = vld [vmem:[%s526_s0] sm:$0xff]  ;;  %v20_v16 = vld [vmem:[%s526_s0 + $0x30] sm:$0xff]  ;;  %v21_v17 = vld [vmem:[%s526_s0 + $0x38] sm:$0xff] }
   0x4   :  { %v50_v5 = vsub.s32 0, %v49_v1  ;;  %v54_v7 = vsub.s32 1, %v49_v1  ;;  %v18_v10 = vld [vmem:[%s526_s0 + $0x20] sm:$0xff]  ;;  %v23_v31 = vld [vmem:[%s526_s0 + $0x48] sm:$0xff]  ;;  %v24_v36 = vld [vmem:[%s526_s0 + $0x50] sm:$0xff] }
   0x5   :  { %v22_v26 = vld [vmem:[%s526_s0 + $0x40] sm:$0xff]  ;;  %v25_v49 = vld [vmem:[%s526_s0 + $0x58] sm:$0xff]  ;;  %v27_v51 = vld [vmem:[%s526_s0 + $0x68] sm:$0xff] }
   0x6   :  { %v275_v11 = vrot.slane %v46_v2, %v50_v5  ;;  %v277_v12 = vrot.slane %v90_v3, %v50_v5  ;;  %v279_v13 = vrot.slane %v46_v2, %v54_v7  ;;  %v281_v14 = vrot.slane %v90_v3, %v54_v7  ;;  %v26_v50 = vld [vmem:[%s526_s0 + $0x60] sm:$0xff]  ;;  %v28_v56 = vld [vmem:[%s526_s0 + $0x70] sm:$0xff]  ;;  %v29_v61 = vld [vmem:[%s526_s0 + $0x78] sm:$0xff] }
   0x8   :  { %v58_v18 = vmul.f32 %v275_v11, %v14_v4  ;;  %v59_v19 = vmul.f32 %v279_v13, %v15_v6  ;;  %v60_v20 = vmul.f32 %v275_v11, %v16_v8  ;;  %v61_v21 = vmul.f32 %v279_v13, %v17_v9 }
   0x9   :  { %v62_v22 = vmul.f32 %v275_v11, %v18_v10  ;;  %v63_v23 = vmul.f32 %v279_v13, %v19_v15  ;;  %v64_v24 = vmul.f32 %v275_v11, %v20_v16  ;;  %v65_v25 = vmul.f32 %v279_v13, %v21_v17  ;;  %v30_v10 = vld [vmem:[%s526_s0 + $0x80] sm:$0xff]  ;;  %v31_v15 = vld [vmem:[%s526_s0 + $0x88] sm:$0xff] }
   0xa   :  { %v102_v27 = vadd.f32 %v277_v12, %v58_v18  ;;  %v103_v28 = vadd.f32 %v281_v14, %v59_v19  ;;  %v104_v29 = vadd.f32 %v277_v12, %v60_v20  ;;  %v105_v30 = vadd.f32 %v281_v14, %v61_v21  ;;  %v32_v20 = vld [vmem:[%s526_s0 + $0x90] sm:$0xff] }
   0xb   :  { %v106_v32 = vadd.f32 %v277_v12, %v62_v22  ;;  %v107_v33 = vadd.f32 %v281_v14, %v63_v23  ;;  %v108_v34 = vadd.f32 %v277_v12, %v64_v24  ;;  %v109_v35 = vadd.f32 %v281_v14, %v65_v25 }
   0xc   :  { %v134_v37 = vmul.f32 0.2, %v102_v27  ;;  %v135_v38 = vmul.f32 0.2, %v103_v28  ;;  %v136_v39 = vmul.f32 0.2, %v104_v29  ;;  %v66_v40 = vmul.f32 %v275_v11, %v22_v26 }
   0xd   :  { %v137_v41 = vmul.f32 0.2, %v105_v30  ;;  %v138_v42 = vmul.f32 0.2, %v106_v32  ;;  %v139_v43 = vmul.f32 0.2, %v107_v33  ;;  %v67_v44 = vmul.f32 %v279_v13, %v23_v31 }
   0xe   :  { %v166_v45 = vmax.f32 %v102_v27, %v134_v37  ;;  %v167_v46 = vmax.f32 %v103_v28, %v135_v38  ;;  %v168_v47 = vmax.f32 %v104_v29, %v136_v39  ;;  %v140_v48 = vmul.f32 0.2, %v108_v34  ;;  %v33_v29 = vld [vmem:[%s526_s0 + $0x98] sm:$0xff]  ;;  %v35_v31 = vld [vmem:[%s526_s0 + $0xa8] sm:$0xff] }
   0xf   :  { %v169_v52 = vmax.f32 %v105_v30, %v137_v41  ;;  %v170_v53 = vmax.f32 %v106_v32, %v138_v42  ;;  %v171_v54 = vmax.f32 %v107_v33, %v139_v43  ;;  %v141_v55 = vmul.f32 0.2, %v109_v35  ;;  %v34_v30 = vld [vmem:[%s526_s0 + $0xa0] sm:$0xff]  ;;  %v37_v41 = vld [vmem:[%s526_s0 + $0xb8] sm:$0xff] }
  0x10   :  { %198 = vst [vmem:[%s527_s3] sm:$0xff] %v166_v45  ;;  %199 = vst [vmem:[%s527_s3 + $0x8] sm:$0xff] %v167_v46  ;;  %v172_v57 = vmax.f32 %v108_v34, %v140_v48  ;;  %v110_v58 = vadd.f32 %v277_v12, %v66_v40  ;;  %v111_v59 = vadd.f32 %v281_v14, %v67_v44 }
  0x11   :  { %200 = vst [vmem:[%s527_s3 + $0x10] sm:$0xff] %v168_v47  ;;  %v68_v60 = vmul.f32 %v275_v11, %v24_v36  ;;  %201 = vst [vmem:[%s527_s3 + $0x18] sm:$0xff] %v169_v52  ;;  %v173_v62 = vmax.f32 %v109_v35, %v141_v55  ;;  %v69_v63 = vmul.f32 %v279_v13, %v25_v49  ;;  %v36_v36 = vld [vmem:[%s526_s0 + $0xb0] sm:$0xff]  ;;  %v39_v55 = vld [vmem:[%s526_s0 + $0xc8] sm:$0xff] }
  0x12   :  { %202 = vst [vmem:[%s527_s3 + $0x20] sm:$0xff] %v170_v53  ;;  %203 = vst [vmem:[%s527_s3 + $0x28] sm:$0xff] %v171_v54  ;;  %v70_v0 = vmul.f32 %v275_v11, %v26_v50  ;;  %v71_v1 = vmul.f32 %v279_v13, %v27_v51  ;;  %v142_v2 = vmul.f32 0.2, %v110_v58  ;;  %v143_v3 = vmul.f32 0.2, %v111_v59 }
  0x13   :  { %204 = vst [vmem:[%s527_s3 + $0x30] sm:$0xff] %v172_v57  ;;  %v112_v4 = vadd.f32 %v277_v12, %v68_v60  ;;  %v72_v5 = vmul.f32 %v275_v11, %v28_v56  ;;  %205 = vst [vmem:[%s527_s3 + $0x38] sm:$0xff] %v173_v62  ;;  %v113_v6 = vadd.f32 %v281_v14, %v69_v63  ;;  %v38_v54 = vld [vmem:[%s526_s0 + $0xc0] sm:$0xff]  ;;  %v40_v60 = vld [vmem:[%s526_s0 + $0xd0] sm:$0xff] }
  0x14   :  { %v114_v7 = vadd.f32 %v277_v12, %v70_v0  ;;  %v115_v8 = vadd.f32 %v281_v14, %v71_v1  ;;  %v73_v9 = vmul.f32 %v279_v13, %v29_v61  ;;  %v174_v16 = vmax.f32 %v110_v58, %v142_v2 }
  0x15   :  { %v175_v17 = vmax.f32 %v111_v59, %v143_v3  ;;  %v144_v18 = vmul.f32 0.2, %v112_v4  ;;  %v116_v19 = vadd.f32 %v277_v12, %v72_v5  ;;  %v145_v21 = vmul.f32 0.2, %v113_v6  ;;  %v41_v5 = vld [vmem:[%s526_s0 + $0xd8] sm:$0xff] }
  0x16   :  { %v146_v22 = vmul.f32 0.2, %v114_v7  ;;  %v147_v23 = vmul.f32 0.2, %v115_v8  ;;  %v117_v24 = vadd.f32 %v281_v14, %v73_v9  ;;  %206 = vst [vmem:[%s527_s3 + $0x40] sm:$0xff] %v174_v16  ;;  %v74_v27 = vmul.f32 %v275_v11, %v30_v10  ;;  %v44_v16 = vld [vmem:[%s526_s0 + $0xf0] sm:$0xff] }
  0x17   :  { %207 = vst [vmem:[%s527_s3 + $0x48] sm:$0xff] %v175_v17  ;;  %v176_v25 = vmax.f32 %v112_v4, %v144_v18  ;;  %v148_v26 = vmul.f32 0.2, %v116_v19  ;;  %v75_v28 = vmul.f32 %v279_v13, %v31_v15  ;;  %v177_v32 = vmax.f32 %v113_v6, %v145_v21  ;;  %v42_v6 = vld [vmem:[%s526_s0 + $0xe0] sm:$0xff]  ;;  %v45_v21 = vld [vmem:[%s526_s0 + $0xf8] sm:$0xff] }
  0x18   :  { %v178_v33 = vmax.f32 %v114_v7, %v146_v22  ;;  %v179_v34 = vmax.f32 %v115_v8, %v147_v23  ;;  %v149_v35 = vmul.f32 0.2, %v117_v24  ;;  %v118_v38 = vadd.f32 %v277_v12, %v74_v27  ;;  %v43_v7 = vld [vmem:[%s526_s0 + $0xe8] sm:$0xff] }
  0x19   :  { %208 = vst [vmem:[%s527_s3 + $0x50] sm:$0xff] %v176_v25  ;;  %v180_v37 = vmax.f32 %v116_v19, %v148_v26  ;;  %v119_v39 = vadd.f32 %v281_v14, %v75_v28  ;;  %v76_v40 = vmul.f32 %v275_v11, %v32_v20  ;;  %209 = vst [vmem:[%s527_s3 + $0x58] sm:$0xff] %v177_v32 }
  0x1a   :  { %210 = vst [vmem:[%s527_s3 + $0x60] sm:$0xff] %v178_v33  ;;  %211 = vst [vmem:[%s527_s3 + $0x68] sm:$0xff] %v179_v34  ;;  %v181_v42 = vmax.f32 %v117_v24, %v149_v35  ;;  %v77_v43 = vmul.f32 %v279_v13, %v33_v29  ;;  %v78_v44 = vmul.f32 %v275_v11, %v34_v30  ;;  %v150_v46 = vmul.f32 0.2, %v118_v38 }
  0x1b   :  { %v79_v45 = vmul.f32 %v279_v13, %v35_v31  ;;  %212 = vst [vmem:[%s527_s3 + $0x70] sm:$0xff] %v180_v37  ;;  %v151_v47 = vmul.f32 0.2, %v119_v39  ;;  %v120_v48 = vadd.f32 %v277_v12, %v76_v40  ;;  %v80_v49 = vmul.f32 %v275_v11, %v36_v36 }
  0x1c   :  { %213 = vst [vmem:[%s527_s3 + $0x78] sm:$0xff] %v181_v42  ;;  %v121_v50 = vadd.f32 %v281_v14, %v77_v43  ;;  %v122_v51 = vadd.f32 %v277_v12, %v78_v44  ;;  %v81_v53 = vmul.f32 %v279_v13, %v37_v41  ;;  %v182_v56 = vmax.f32 %v118_v38, %v150_v46 }
  0x1d   :  { %v123_v52 = vadd.f32 %v281_v14, %v79_v45  ;;  %v183_v57 = vmax.f32 %v119_v39, %v151_v47  ;;  %v152_v58 = vmul.f32 0.2, %v120_v48  ;;  %v124_v59 = vadd.f32 %v277_v12, %v80_v49 }
  0x1e   :  { %v153_v61 = vmul.f32 0.2, %v121_v50  ;;  %v154_v62 = vmul.f32 0.2, %v122_v51  ;;  %v125_v0 = vadd.f32 %v281_v14, %v81_v53  ;;  %214 = vst [vmem:[%s527_s3 + $0x80] sm:$0xff] %v182_v56  ;;  %v82_v3 = vmul.f32 %v275_v11, %v38_v54 }
  0x1f   :  { %v155_v63 = vmul.f32 0.2, %v123_v52  ;;  %215 = vst [vmem:[%s527_s3 + $0x88] sm:$0xff] %v183_v57  ;;  %v184_v1 = vmax.f32 %v120_v48, %v152_v58  ;;  %v156_v2 = vmul.f32 0.2, %v124_v59  ;;  %v83_v4 = vmul.f32 %v279_v13, %v39_v55 }
  0x20   :  { %v185_v8 = vmax.f32 %v121_v50, %v153_v61  ;;  %v186_v9 = vmax.f32 %v122_v51, %v154_v62  ;;  %v157_v15 = vmul.f32 0.2, %v125_v0  ;;  %v126_v18 = vadd.f32 %v277_v12, %v82_v3 }
  0x21   :  { %v187_v10 = vmax.f32 %v123_v52, %v155_v63  ;;  %216 = vst [vmem:[%s527_s3 + $0x90] sm:$0xff] %v184_v1  ;;  %v188_v17 = vmax.f32 %v124_v59, %v156_v2  ;;  %v127_v19 = vadd.f32 %v281_v14, %v83_v4  ;;  %v84_v20 = vmul.f32 %v275_v11, %v40_v60 }
  0x22   :  { %217 = vst [vmem:[%s527_s3 + $0x98] sm:$0xff] %v185_v8  ;;  %218 = vst [vmem:[%s527_s3 + $0xa0] sm:$0xff] %v186_v9  ;;  %v189_v22 = vmax.f32 %v125_v0, %v157_v15  ;;  %v85_v23 = vmul.f32 %v279_v13, %v41_v5  ;;  %v86_v24 = vmul.f32 %v275_v11, %v42_v6  ;;  %v158_v26 = vmul.f32 0.2, %v126_v18 }
  0x23   :  { %219 = vst [vmem:[%s527_s3 + $0xa8] sm:$0xff] %v187_v10  ;;  %v87_v25 = vmul.f32 %v279_v13, %v43_v7  ;;  %220 = vst [vmem:[%s527_s3 + $0xb0] sm:$0xff] %v188_v17  ;;  %v159_v27 = vmul.f32 0.2, %v127_v19  ;;  %v128_v28 = vadd.f32 %v277_v12, %v84_v20  ;;  %v88_v29 = vmul.f32 %v275_v11, %v44_v16 }
  0x24   :  { %221 = vst [vmem:[%s527_s3 + $0xb8] sm:$0xff] %v189_v22  ;;  %v129_v30 = vadd.f32 %v281_v14, %v85_v23  ;;  %v130_v31 = vadd.f32 %v277_v12, %v86_v24  ;;  %v89_v33 = vmul.f32 %v279_v13, %v45_v21  ;;  %v190_v34 = vmax.f32 %v126_v18, %v158_v26 }
  0x25   :  { %v131_v32 = vadd.f32 %v281_v14, %v87_v25  ;;  %v191_v35 = vmax.f32 %v127_v19, %v159_v27  ;;  %v160_v36 = vmul.f32 0.2, %v128_v28  ;;  %v132_v37 = vadd.f32 %v277_v12, %v88_v29 }
  0x26   :  { %v161_v38 = vmul.f32 0.2, %v129_v30  ;;  %v162_v39 = vmul.f32 0.2, %v130_v31  ;;  %v133_v40 = vadd.f32 %v281_v14, %v89_v33  ;;  %222 = vst [vmem:[%s527_s3 + $0xc0] sm:$0xff] %v190_v34 }
  0x27   :  { %v163_v11 = vmul.f32 0.2, %v131_v32  ;;  %223 = vst [vmem:[%s527_s3 + $0xc8] sm:$0xff] %v191_v35  ;;  %v192_v41 = vmax.f32 %v128_v28, %v160_v36  ;;  %v164_v13 = vmul.f32 0.2, %v132_v37 }
  0x28   :  { %v193_v42 = vmax.f32 %v129_v30, %v161_v38  ;;  %v194_v43 = vmax.f32 %v130_v31, %v162_v39  ;;  %v165_v45 = vmul.f32 0.2, %v133_v40 }
  0x29   :  { %v195_v44 = vmax.f32 %v131_v32, %v163_v11  ;;  %224 = vst [vmem:[%s527_s3 + $0xd0] sm:$0xff] %v192_v41  ;;  %v196_v12 = vmax.f32 %v132_v37, %v164_v13 }
  0x2a   :  { %225 = vst [vmem:[%s527_s3 + $0xd8] sm:$0xff] %v193_v42  ;;  %226 = vst [vmem:[%s527_s3 + $0xe0] sm:$0xff] %v194_v43  ;;  %v197_v14 = vmax.f32 %v133_v40, %v165_v45 }
  0x2b   :  { %227 = vst [vmem:[%s527_s3 + $0xe8] sm:$0xff] %v195_v44  ;;  %228 = vst [vmem:[%s527_s3 + $0xf0] sm:$0xff] %v196_v12 }
  0x2c   :  { %229 = vst [vmem:[%s527_s3 + $0xf8] sm:$0xff] %v197_v14 }

// kernel: discriminator_forward.9
= control target key start
LH: loop header
LB: loop body
LE: loop exit
PB: predicated region body
PF: predicated region fallthrough
CT: control target
= control target key end

     0   :  { %s5108_s9 = smov 0   ;;  %s5110_s10 = smov 0   ;;  %s6408_s0 = inlined_call_operand.vmem [shape: bf16[128,2048], index: 0, kind: input, shape index: {}]   ;;  %s6409_s1 = inlined_call_operand.vmem [shape: bf16[2048,256], index: 1, kind: input, shape index: {}]   ;;  %s6410_s2 = inlined_call_operand.vmem [shape: f32[128,256], index: 2, kind: output, shape index: {}]  }
   0x1   :  { %s5112_s11 = smov 0   ;;  %s5114_s12 = smov 0  }
   0x2   :  { %s5116_s13 = smov 0  }
   0x3 LB: > { %s27_s14 = sadd.s32 1, %s5087_s12  ;;  %s4102_s15 = sadd.s32 4294967295, %s5091_s13   ;;  %s5091_s13 = sphi %s5116_s13, %s12_s13   ;;  %s5087_s12 = sphi %s5114_s12, %s6415_s12   ;;  %s5083_s11 = sphi %s5112_s11, %s6414_s11   ;;  %s5079_s10 = sphi %s5110_s10, %s6413_s10   ;;  %s5075_s9 = sphi %s5108_s9, %s6412_s9  }
   0x4   : > { %p29_p0 = scmp.ge.s32.totalorder %s27_s14, 2  ;;  %p75_p1 = scmp.ne.s32.totalorder %s5079_s10, %s5075_s9 }
   0x5   : > { %p76_p2 = scmp.eq.s32.totalorder %s5091_s13, 0  ;;  %p107_p4 = scmp.eq.s32.totalorder %s4102_s15, 1 }
   0x6   : > { %s6417_s14 = smov (%p29_p0, %s27_s14), 0  ;;  %s68_s17 = sadd.s32 1, %s5079_s10 }
   0x7   : > { %p77_p3 = por %p76_p2, %p75_p1  ;;  %s64_s16 = ssub.s32 %s5087_s12, %s6417_s14 }
   0x8   : > { %p66_p5 = scmp.eq.s32.totalorder %s64_s16, 0  ;;  %p5143_p6 = por %p107_p4, %p75_p1 }
   0x9   : > { %p4106_p7 = scmp.ge.s32.totalorder %s5091_s13, 2 }
   0xa   : > { %s5148_s19 = scalar_select %p66_p5, %s5079_s10, %s68_s17  }
   0xb   : > { %144 = sbr.rel (%p4106_p7) target bundleno = 192 (0xc0), region = 20 }
  0x12   : > { %147 = sbr.rel (!%p77_p3) target bundleno = 192 (0xc0), region = 24  ;;  %s149_s20 = sand.u32 (%p77_p3), 1, %s5079_s10  }
  0x13   : > { %s4108_s21 = sshll.u32 (%p77_p3), %s5087_s12, 2  ;;  %s4107_s22 = sshll.u32 (%p77_p3), %s149_s20, 10 }
  0x14   : > { %s5156_s25 = scalar_lea.vmem (%p77_p3), %s6409_s1, %s4108_s21  ;;  %s5160_s26 = scalar_lea.vmem (%p77_p3), [#allocation2], %s4107_s22 }
  0x15   : > { %v172_v0 = vld [vmem:[%s5156_s25] sm:$0xf] (%p77_p3)  ;;  %v174_v1 = vld [vmem:[%s5156_s25 + $0x8] sm:$0xf] (%p77_p3)  ;;  %v176_v2 = vld [vmem:[%s5156_s25 + $0x10] sm:$0xf] (%p77_p3) }
  0x16   : > { %173 = vst [vmem:[%s5160_s26] sm:$0xf] (%p77_p3), %v172_v0  ;;  %175 = vst [vmem:[%s5160_s26 + $0x4] sm:$0xf] (%p77_p3), %v174_v1  ;;  %v178_v3 = vld [vmem:[%s5156_s25 + $0x18] sm:$0xf] (%p77_p3) }
  0x17   : > { %v180_v4 = vld [vmem:[%s5156_s25 + $0x20] sm:$0xf] (%p77_p3)  ;;  %177 = vst [vmem:[%s5160_s26 + $0x8] sm:$0xf] (%p77_p3), %v176_v2  ;;  %179 = vst [vmem:[%s5160_s26 + $0xc] sm:$0xf] (%p77_p3), %v178_v3 }
  0x18   : > { %181 = vst [vmem:[%s5160_s26 + $0x10] sm:$0xf] (%p77_p3), %v180_v4  ;;  %v182_v5 = vld [vmem:[%s5156_s25 + $0x28] sm:$0xf] (%p77_p3)  ;;  %v184_v6 = vld [vmem:[%s5156_s25 + $0x30] sm:$0xf] (%p77_p3) }
  0x19   : > { %v186_v7 = vld [vmem:[%s5156_s25 + $0x38] sm:$0xf]  ;;  %183 = vst [vmem:[%s5160_s26 + $0x14] sm:$0xf] %v182_v5  ;;  %185 = vst [vmem:[%s5160_s26 + $0x18] sm:$0xf] %v184_v6 }
  0x1a   : > { %187 = vst [vmem:[%s5160_s26 + $0x1c] sm:$0xf] %v186_v7  ;;  %v188_v8 = vld [vmem:[%s5156_s25 + $0x40] sm:$0xf]  ;;  %v190_v9 = vld [vmem:[%s5156_s25 + $0x48] sm:$0xf] }
  0x1b   : > { %v192_v10 = vld [vmem:[%s5156_s25 + $0x50] sm:$0xf]  ;;  %189 = vst [vmem:[%s5160_s26 + $0x20] sm:$0xf] %v188_v8  ;;  %191 = vst [vmem:[%s5160_s26 + $0x24] sm:$0xf] %v190_v9 }
  0x1c   : > { %193 = vst [vmem:[%s5160_s26 + $0x28] sm:$0xf] %v192_v10  ;;  %v194_v11 = vld [vmem:[%s5156_s25 + $0x58] sm:$0xf]  ;;  %v196_v12 = vld [vmem:[%s5156_s25 + $0x60] sm:$0xf] }
  0x1d   : > { %v198_v13 = vld [vmem:[%s5156_s25 + $0x68] sm:$0xf]  ;;  %195 = vst [vmem:[%s5160_s26 + $0x2c] sm:$0xf] %v194_v11  ;;  %197 = vst [vmem:[%s5160_s26 + $0x30] sm:$0xf] %v196_v12 }
  0x1e   : > { %199 = vst [vmem:[%s5160_s26 + $0x34] sm:$0xf] %v198_v13  ;;  %v200_v14 = vld [vmem:[%s5156_s25 + $0x70] sm:$0xf]  ;;  %v202_v15 = vld [vmem:[%s5156_s25 + $0x78] sm:$0xf] }
  0x1f   : > { %v204_v16 = vld [vmem:[%s5156_s25 + $0x80] sm:$0xf]  ;;  %201 = vst [vmem:[%s5160_s26 + $0x38] sm:$0xf] %v200_v14  ;;  %203 = vst [vmem:[%s5160_s26 + $0x3c] sm:$0xf] %v202_v15 }
  0x20   : > { %205 = vst [vmem:[%s5160_s26 + $0x40] sm:$0xf] %v204_v16  ;;  %v206_v17 = vld [vmem:[%s5156_s25 + $0x88] sm:$0xf]  ;;  %v208_v18 = vld [vmem:[%s5156_s25 + $0x90] sm:$0xf] }
  0x21   : > { %v210_v19 = vld [vmem:[%s5156_s25 + $0x98] sm:$0xf]  ;;  %207 = vst [vmem:[%s5160_s26 + $0x44] sm:$0xf] %v206_v17  ;;  %209 = vst [vmem:[%s5160_s26 + $0x48] sm:$0xf] %v208_v18 }
  0x22   : > { %211 = vst [vmem:[%s5160_s26 + $0x4c] sm:$0xf] %v210_v19  ;;  %v212_v20 = vld [vmem:[%s5156_s25 + $0xa0] sm:$0xf]  ;;  %v214_v21 = vld [vmem:[%s5156_s25 + $0xa8] sm:$0xf] }
  0x23   : > { %v216_v22 = vld [vmem:[%s5156_s25 + $0xb0] sm:$0xf]  ;;  %213 = vst [vmem:[%s5160_s26 + $0x50] sm:$0xf] %v212_v20  ;;  %215 = vst [vmem:[%s5160_s26 + $0x54] sm:$0xf] %v214_v21 }
  0x24   : > { %217 = vst [vmem:[%s5160_s26 + $0x58] sm:$0xf] %v216_v22  ;;  %v218_v23 = vld [vmem:[%s5156_s25 + $0xb8] sm:$0xf]  ;;  %v220_v24 = vld [vmem:[%s5156_s25 + $0xc0] sm:$0xf] }
  0x25   : > { %v222_v25 = vld [vmem:[%s5156_s25 + $0xc8] sm:$0xf]  ;;  %219 = vst [vmem:[%s5160_s26 + $0x5c] sm:$0xf] %v218_v23  ;;  %221 = vst [vmem:[%s5160_s26 + $0x60] sm:$0xf] %v220_v24 }
  0x26   : > { %223 = vst [vmem:[%s5160_s26 + $0x64] sm:$0xf] %v222_v25  ;;  %v224_v26 = vld [vmem:[%s5156_s25 + $0xd0] sm:$0xf]  ;;  %v226_v27 = vld [vmem:[%s5156_s25 + $0xd8] sm:$0xf] }
  0x27   : > { %v228_v28 = vld [vmem:[%s5156_s25 + $0xe0] sm:$0xf]  ;;  %225 = vst [vmem:[%s5160_s26 + $0x68] sm:$0xf] %v224_v26  ;;  %227 = vst [vmem:[%s5160_s26 + $0x6c] sm:$0xf] %v226_v27 }
  0x28   : > { %229 = vst [vmem:[%s5160_s26 + $0x70] sm:$0xf] %v228_v28  ;;  %v230_v29 = vld [vmem:[%s5156_s25 + $0xe8] sm:$0xf]  ;;  %v232_v30 = vld [vmem:[%s5156_s25 + $0xf0] sm:$0xf] }
  0x29   : > { %v234_v31 = vld [vmem:[%s5156_s25 + $0xf8] sm:$0xf]  ;;  %231 = vst [vmem:[%s5160_s26 + $0x74] sm:$0xf] %v230_v29  ;;  %233 = vst [vmem:[%s5160_s26 + $0x78] sm:$0xf] %v232_v30 }
  0x2a   : > { %235 = vst [vmem:[%s5160_s26 + $0x7c] sm:$0xf] %v234_v31  ;;  %v236_v32 = vld [vmem:[%s5156_s25 + $0x100] sm:$0xf]  ;;  %v238_v33 = vld [vmem:[%s5156_s25 + $0x108] sm:$0xf] }
  0x2b   : > { %v240_v34 = vld [vmem:[%s5156_s25 + $0x110] sm:$0xf]  ;;  %237 = vst [vmem:[%s5160_s26 + $0x80] sm:$0xf] %v236_v32  ;;  %239 = vst [vmem:[%s5160_s26 + $0x84] sm:$0xf] %v238_v33 }
  0x2c   : > { %241 = vst [vmem:[%s5160_s26 + $0x88] sm:$0xf] %v240_v34  ;;  %v242_v35 = vld [vmem:[%s5156_s25 + $0x118] sm:$0xf]  ;;  %v244_v36 = vld [vmem:[%s5156_s25 + $0x120] sm:$0xf] }
  0x2d   : > { %v246_v37 = vld [vmem:[%s5156_s25 + $0x128] sm:$0xf]  ;;  %243 = vst [vmem:[%s5160_s26 + $0x8c] sm:$0xf] %v242_v35  ;;  %245 = vst [vmem:[%s5160_s26 + $0x90] sm:$0xf] %v244_v36 }
  0x2e   : > { %247 = vst [vmem:[%s5160_s26 + $0x94] sm:$0xf] %v246_v37  ;;  %v248_v38 = vld [vmem:[%s5156_s25 + $0x130] sm:$0xf]  ;;  %v250_v39 = vld [vmem:[%s5156_s25 + $0x138] sm:$0xf] }
  0x2f   : > { %v252_v40 = vld [vmem:[%s5156_s25 + $0x140] sm:$0xf]  ;;  %249 = vst [vmem:[%s5160_s26 + $0x98] sm:$0xf] %v248_v38  ;;  %251 = vst [vmem:[%s5160_s26 + $0x9c] sm:$0xf] %v250_v39 }
  0x30   : > { %253 = vst [vmem:[%s5160_s26 + $0xa0] sm:$0xf] %v252_v40  ;;  %v254_v41 = vld [vmem:[%s5156_s25 + $0x148] sm:$0xf]  ;;  %v256_v42 = vld [vmem:[%s5156_s25 + $0x150] sm:$0xf] }
  0x31   : > { %v258_v43 = vld [vmem:[%s5156_s25 + $0x158] sm:$0xf]  ;;  %255 = vst [vmem:[%s5160_s26 + $0xa4] sm:$0xf] %v254_v41  ;;  %257 = vst [vmem:[%s5160_s26 + $0xa8] sm:$0xf] %v256_v42 }
  0x32   : > { %259 = vst [vmem:[%s5160_s26 + $0xac] sm:$0xf] %v258_v43  ;;  %v260_v44 = vld [vmem:[%s5156_s25 + $0x160] sm:$0xf]  ;;  %v262_v45 = vld [vmem:[%s5156_s25 + $0x168] sm:$0xf] }
  0x33   : > { %v264_v46 = vld [vmem:[%s5156_s25 + $0x170] sm:$0xf]  ;;  %261 = vst [vmem:[%s5160_s26 + $0xb0] sm:$0xf] %v260_v44  ;;  %263 = vst [vmem:[%s5160_s26 + $0xb4] sm:$0xf] %v262_v45 }
  0x34   : > { %265 = vst [vmem:[%s5160_s26 + $0xb8] sm:$0xf] %v264_v46  ;;  %v266_v47 = vld [vmem:[%s5156_s25 + $0x178] sm:$0xf]  ;;  %v268_v48 = vld [vmem:[%s5156_s25 + $0x180] sm:$0xf] }
  0x35   : > { %v270_v49 = vld [vmem:[%s5156_s25 + $0x188] sm:$0xf]  ;;  %267 = vst [vmem:[%s5160_s26 + $0xbc] sm:$0xf] %v266_v47  ;;  %269 = vst [vmem:[%s5160_s26 + $0xc0] sm:$0xf] %v268_v48 }
  0x36   : > { %271 = vst [vmem:[%s5160_s26 + $0xc4] sm:$0xf] %v270_v49  ;;  %v272_v50 = vld [vmem:[%s5156_s25 + $0x190] sm:$0xf]  ;;  %v274_v51 = vld [vmem:[%s5156_s25 + $0x198] sm:$0xf] }
  0x37   : > { %v276_v52 = vld [vmem:[%s5156_s25 + $0x1a0] sm:$0xf]  ;;  %273 = vst [vmem:[%s5160_s26 + $0xc8] sm:$0xf] %v272_v50  ;;  %275 = vst [vmem:[%s5160_s26 + $0xcc] sm:$0xf] %v274_v51 }
  0x38   : > { %277 = vst [vmem:[%s5160_s26 + $0xd0] sm:$0xf] %v276_v52  ;;  %v278_v53 = vld [vmem:[%s5156_s25 + $0x1a8] sm:$0xf]  ;;  %v280_v54 = vld [vmem:[%s5156_s25 + $0x1b0] sm:$0xf] }
  0x39   : > { %v282_v55 = vld [vmem:[%s5156_s25 + $0x1b8] sm:$0xf]  ;;  %279 = vst [vmem:[%s5160_s26 + $0xd4] sm:$0xf] %v278_v53  ;;  %281 = vst [vmem:[%s5160_s26 + $0xd8] sm:$0xf] %v280_v54 }
  0x3a   : > { %283 = vst [vmem:[%s5160_s26 + $0xdc] sm:$0xf] %v282_v55  ;;  %v284_v56 = vld [vmem:[%s5156_s25 + $0x1c0] sm:$0xf]  ;;  %v286_v57 = vld [vmem:[%s5156_s25 + $0x1c8] sm:$0xf] }
  0x3b   : > { %v288_v58 = vld [vmem:[%s5156_s25 + $0x1d0] sm:$0xf]  ;;  %285 = vst [vmem:[%s5160_s26 + $0xe0] sm:$0xf] %v284_v56  ;;  %287 = vst [vmem:[%s5160_s26 + $0xe4] sm:$0xf] %v286_v57 }
  0x3c   : > { %289 = vst [vmem:[%s5160_s26 + $0xe8] sm:$0xf] %v288_v58  ;;  %v290_v59 = vld [vmem:[%s5156_s25 + $0x1d8] sm:$0xf]  ;;  %v292_v60 = vld [vmem:[%s5156_s25 + $0x1e0] sm:$0xf] }
  0x3d   : > { %v294_v61 = vld [vmem:[%s5156_s25 + $0x1e8] sm:$0xf]  ;;  %291 = vst [vmem:[%s5160_s26 + $0xec] sm:$0xf] %v290_v59  ;;  %293 = vst [vmem:[%s5160_s26 + $0xf0] sm:$0xf] %v292_v60 }
  0x3e   : > { %295 = vst [vmem:[%s5160_s26 + $0xf4] sm:$0xf] %v294_v61  ;;  %v296_v62 = vld [vmem:[%s5156_s25 + $0x1f0] sm:$0xf]  ;;  %v298_v63 = vld [vmem:[%s5156_s25 + $0x1f8] sm:$0xf] }
  0x3f   : > { %v300_v0 = vld [vmem:[%s5156_s25 + $0x200] sm:$0xf]  ;;  %297 = vst [vmem:[%s5160_s26 + $0xf8] sm:$0xf] %v296_v62  ;;  %299 = vst [vmem:[%s5160_s26 + $0xfc] sm:$0xf] %v298_v63 }
  0x40   : > { %301 = vst [vmem:[%s5160_s26 + $0x100] sm:$0xf] %v300_v0  ;;  %v302_v1 = vld [vmem:[%s5156_s25 + $0x208] sm:$0xf]  ;;  %v304_v2 = vld [vmem:[%s5156_s25 + $0x210] sm:$0xf] }
  0x41   : > { %v306_v3 = vld [vmem:[%s5156_s25 + $0x218] sm:$0xf]  ;;  %303 = vst [vmem:[%s5160_s26 + $0x104] sm:$0xf] %v302_v1  ;;  %305 = vst [vmem:[%s5160_s26 + $0x108] sm:$0xf] %v304_v2 }
  0x42   : > { %307 = vst [vmem:[%s5160_s26 + $0x10c] sm:$0xf] %v306_v3  ;;  %v308_v4 = vld [vmem:[%s5156_s25 + $0x220] sm:$0xf]  ;;  %v310_v5 = vld [vmem:[%s5156_s25 + $0x228] sm:$0xf] }
  0x43   : > { %v312_v6 = vld [vmem:[%s5156_s25 + $0x230] sm:$0xf]  ;;  %309 = vst [vmem:[%s5160_s26 + $0x110] sm:$0xf] %v308_v4  ;;  %311 = vst [vmem:[%s5160_s26 + $0x114] sm:$0xf] %v310_v5 }
  0x44   : > { %313 = vst [vmem:[%s5160_s26 + $0x118] sm:$0xf] %v312_v6  ;;  %v314_v7 = vld [vmem:[%s5156_s25 + $0x238] sm:$0xf]  ;;  %v316_v8 = vld [vmem:[%s5156_s25 + $0x240] sm:$0xf] }
  0x45   : > { %v318_v9 = vld [vmem:[%s5156_s25 + $0x248] sm:$0xf]  ;;  %315 = vst [vmem:[%s5160_s26 + $0x11c] sm:$0xf] %v314_v7  ;;  %317 = vst [vmem:[%s5160_s26 + $0x120] sm:$0xf] %v316_v8 }
  0x46   : > { %319 = vst [vmem:[%s5160_s26 + $0x124] sm:$0xf] %v318_v9  ;;  %v320_v10 = vld [vmem:[%s5156_s25 + $0x250] sm:$0xf]  ;;  %v322_v11 = vld [vmem:[%s5156_s25 + $0x258] sm:$0xf] }
  0x47   : > { %v324_v12 = vld [vmem:[%s5156_s25 + $0x260] sm:$0xf]  ;;  %321 = vst [vmem:[%s5160_s26 + $0x128] sm:$0xf] %v320_v10  ;;  %323 = vst [vmem:[%s5160_s26 + $0x12c] sm:$0xf] %v322_v11 }
  0x48   : > { %325 = vst [vmem:[%s5160_s26 + $0x130] sm:$0xf] %v324_v12  ;;  %v326_v13 = vld [vmem:[%s5156_s25 + $0x268] sm:$0xf]  ;;  %v328_v14 = vld [vmem:[%s5156_s25 + $0x270] sm:$0xf] }
  0x49   : > { %v330_v15 = vld [vmem:[%s5156_s25 + $0x278] sm:$0xf]  ;;  %327 = vst [vmem:[%s5160_s26 + $0x134] sm:$0xf] %v326_v13  ;;  %329 = vst [vmem:[%s5160_s26 + $0x138] sm:$0xf] %v328_v14 }
  0x4a   : > { %331 = vst [vmem:[%s5160_s26 + $0x13c] sm:$0xf] %v330_v15  ;;  %v332_v16 = vld [vmem:[%s5156_s25 + $0x280] sm:$0xf]  ;;  %v334_v17 = vld [vmem:[%s5156_s25 + $0x288] sm:$0xf] }
  0x4b   : > { %v336_v18 = vld [vmem:[%s5156_s25 + $0x290] sm:$0xf]  ;;  %333 = vst [vmem:[%s5160_s26 + $0x140] sm:$0xf] %v332_v16  ;;  %335 = vst [vmem:[%s5160_s26 + $0x144] sm:$0xf] %v334_v17 }
  0x4c   : > { %337 = vst [vmem:[%s5160_s26 + $0x148] sm:$0xf] %v336_v18  ;;  %v338_v19 = vld [vmem:[%s5156_s25 + $0x298] sm:$0xf]  ;;  %v340_v20 = vld [vmem:[%s5156_s25 + $0x2a0] sm:$0xf] }
  0x4d   : > { %v342_v21 = vld [vmem:[%s5156_s25 + $0x2a8] sm:$0xf]  ;;  %339 = vst [vmem:[%s5160_s26 + $0x14c] sm:$0xf] %v338_v19  ;;  %341 = vst [vmem:[%s5160_s26 + $0x150] sm:$0xf] %v340_v20 }
  0x4e   : > { %343 = vst [vmem:[%s5160_s26 + $0x154] sm:$0xf] %v342_v21  ;;  %v344_v22 = vld [vmem:[%s5156_s25 + $0x2b0] sm:$0xf]  ;;  %v346_v23 = vld [vmem:[%s5156_s25 + $0x2b8] sm:$0xf] }
  0x4f   : > { %v348_v24 = vld [vmem:[%s5156_s25 + $0x2c0] sm:$0xf]  ;;  %345 = vst [vmem:[%s5160_s26 + $0x158] sm:$0xf] %v344_v22  ;;  %347 = vst [vmem:[%s5160_s26 + $0x15c] sm:$0xf] %v346_v23 }
  0x50   : > { %349 = vst [vmem:[%s5160_s26 + $0x160] sm:$0xf] %v348_v24  ;;  %v350_v25 = vld [vmem:[%s5156_s25 + $0x2c8] sm:$0xf]  ;;  %v352_v26 = vld [vmem:[%s5156_s25 + $0x2d0] sm:$0xf] }
  0x51   : > { %v354_v27 = vld [vmem:[%s5156_s25 + $0x2d8] sm:$0xf]  ;;  %351 = vst [vmem:[%s5160_s26 + $0x164] sm:$0xf] %v350_v25  ;;  %353 = vst [vmem:[%s5160_s26 + $0x168] sm:$0xf] %v352_v26 }
  0x52   : > { %355 = vst [vmem:[%s5160_s26 + $0x16c] sm:$0xf] %v354_v27  ;;  %v356_v28 = vld [vmem:[%s5156_s25 + $0x2e0] sm:$0xf]  ;;  %v358_v29 = vld [vmem:[%s5156_s25 + $0x2e8] sm:$0xf] }
  0x53   : > { %v360_v30 = vld [vmem:[%s5156_s25 + $0x2f0] sm:$0xf]  ;;  %357 = vst [vmem:[%s5160_s26 + $0x170] sm:$0xf] %v356_v28  ;;  %359 = vst [vmem:[%s5160_s26 + $0x174] sm:$0xf] %v358_v29 }
  0x54   : > { %361 = vst [vmem:[%s5160_s26 + $0x178] sm:$0xf] %v360_v30  ;;  %v362_v31 = vld [vmem:[%s5156_s25 + $0x2f8] sm:$0xf]  ;;  %v364_v32 = vld [vmem:[%s5156_s25 + $0x300] sm:$0xf] }
  0x55   : > { %v366_v33 = vld [vmem:[%s5156_s25 + $0x308] sm:$0xf]  ;;  %363 = vst [vmem:[%s5160_s26 + $0x17c] sm:$0xf] %v362_v31  ;;  %365 = vst [vmem:[%s5160_s26 + $0x180] sm:$0xf] %v364_v32 }
  0x56   : > { %367 = vst [vmem:[%s5160_s26 + $0x184] sm:$0xf] %v366_v33  ;;  %v368_v34 = vld [vmem:[%s5156_s25 + $0x310] sm:$0xf]  ;;  %v370_v35 = vld [vmem:[%s5156_s25 + $0x318] sm:$0xf] }
  0x57   : > { %v372_v36 = vld [vmem:[%s5156_s25 + $0x320] sm:$0xf]  ;;  %369 = vst [vmem:[%s5160_s26 + $0x188] sm:$0xf] %v368_v34  ;;  %371 = vst [vmem:[%s5160_s26 + $0x18c] sm:$0xf] %v370_v35 }
  0x58   : > { %373 = vst [vmem:[%s5160_s26 + $0x190] sm:$0xf] %v372_v36  ;;  %v374_v37 = vld [vmem:[%s5156_s25 + $0x328] sm:$0xf]  ;;  %v376_v38 = vld [vmem:[%s5156_s25 + $0x330] sm:$0xf] }
  0x59   : > { %v378_v39 = vld [vmem:[%s5156_s25 + $0x338] sm:$0xf]  ;;  %375 = vst [vmem:[%s5160_s26 + $0x194] sm:$0xf] %v374_v37  ;;  %377 = vst [vmem:[%s5160_s26 + $0x198] sm:$0xf] %v376_v38 }
  0x5a   : > { %379 = vst [vmem:[%s5160_s26 + $0x19c] sm:$0xf] %v378_v39  ;;  %v380_v40 = vld [vmem:[%s5156_s25 + $0x340] sm:$0xf]  ;;  %v382_v41 = vld [vmem:[%s5156_s25 + $0x348] sm:$0xf] }
  0x5b   : > { %v384_v42 = vld [vmem:[%s5156_s25 + $0x350] sm:$0xf]  ;;  %381 = vst [vmem:[%s5160_s26 + $0x1a0] sm:$0xf] %v380_v40  ;;  %383 = vst [vmem:[%s5160_s26 + $0x1a4] sm:$0xf] %v382_v41 }
  0x5c   : > { %385 = vst [vmem:[%s5160_s26 + $0x1a8] sm:$0xf] %v384_v42  ;;  %v386_v43 = vld [vmem:[%s5156_s25 + $0x358] sm:$0xf]  ;;  %v388_v44 = vld [vmem:[%s5156_s25 + $0x360] sm:$0xf] }
  0x5d   : > { %v390_v45 = vld [vmem:[%s5156_s25 + $0x368] sm:$0xf]  ;;  %387 = vst [vmem:[%s5160_s26 + $0x1ac] sm:$0xf] %v386_v43  ;;  %389 = vst [vmem:[%s5160_s26 + $0x1b0] sm:$0xf] %v388_v44 }
  0x5e   : > { %391 = vst [vmem:[%s5160_s26 + $0x1b4] sm:$0xf] %v390_v45  ;;  %v392_v46 = vld [vmem:[%s5156_s25 + $0x370] sm:$0xf]  ;;  %v394_v47 = vld [vmem:[%s5156_s25 + $0x378] sm:$0xf] }
  0x5f   : > { %v396_v48 = vld [vmem:[%s5156_s25 + $0x380] sm:$0xf]  ;;  %393 = vst [vmem:[%s5160_s26 + $0x1b8] sm:$0xf] %v392_v46  ;;  %395 = vst [vmem:[%s5160_s26 + $0x1bc] sm:$0xf] %v394_v47 }
  0x60   : > { %397 = vst [vmem:[%s5160_s26 + $0x1c0] sm:$0xf] %v396_v48  ;;  %v398_v49 = vld [vmem:[%s5156_s25 + $0x388] sm:$0xf]  ;;  %v400_v50 = vld [vmem:[%s5156_s25 + $0x390] sm:$0xf] }
  0x61   : > { %v402_v51 = vld [vmem:[%s5156_s25 + $0x398] sm:$0xf]  ;;  %399 = vst [vmem:[%s5160_s26 + $0x1c4] sm:$0xf] %v398_v49  ;;  %401 = vst [vmem:[%s5160_s26 + $0x1c8] sm:$0xf] %v400_v50 }
  0x62   : > { %403 = vst [vmem:[%s5160_s26 + $0x1cc] sm:$0xf] %v402_v51  ;;  %v404_v52 = vld [vmem:[%s5156_s25 + $0x3a0] sm:$0xf]  ;;  %v406_v53 = vld [vmem:[%s5156_s25 + $0x3a8] sm:$0xf] }
  0x63   : > { %v408_v54 = vld [vmem:[%s5156_s25 + $0x3b0] sm:$0xf]  ;;  %405 = vst [vmem:[%s5160_s26 + $0x1d0] sm:$0xf] %v404_v52  ;;  %407 = vst [vmem:[%s5160_s26 + $0x1d4] sm:$0xf] %v406_v53 }
  0x64   : > { %409 = vst [vmem:[%s5160_s26 + $0x1d8] sm:$0xf] %v408_v54  ;;  %v410_v55 = vld [vmem:[%s5156_s25 + $0x3b8] sm:$0xf]  ;;  %v412_v56 = vld [vmem:[%s5156_s25 + $0x3c0] sm:$0xf] }
  0x65   : > { %v414_v57 = vld [vmem:[%s5156_s25 + $0x3c8] sm:$0xf]  ;;  %411 = vst [vmem:[%s5160_s26 + $0x1dc] sm:$0xf] %v410_v55  ;;  %413 = vst [vmem:[%s5160_s26 + $0x1e0] sm:$0xf] %v412_v56 }
  0x66   : > { %415 = vst [vmem:[%s5160_s26 + $0x1e4] sm:$0xf] %v414_v57  ;;  %v416_v58 = vld [vmem:[%s5156_s25 + $0x3d0] sm:$0xf]  ;;  %v418_v59 = vld [vmem:[%s5156_s25 + $0x3d8] sm:$0xf] }
  0x67   : > { %v420_v60 = vld [vmem:[%s5156_s25 + $0x3e0] sm:$0xf]  ;;  %417 = vst [vmem:[%s5160_s26 + $0x1e8] sm:$0xf] %v416_v58  ;;  %419 = vst [vmem:[%s5160_s26 + $0x1ec] sm:$0xf] %v418_v59 }
  0x68   : > { %421 = vst [vmem:[%s5160_s26 + $0x1f0] sm:$0xf] %v420_v60  ;;  %v422_v61 = vld [vmem:[%s5156_s25 + $0x3e8] sm:$0xf]  ;;  %v424_v62 = vld [vmem:[%s5156_s25 + $0x3f0] sm:$0xf] }
  0x69   : > { %v426_v63 = vld [vmem:[%s5156_s25 + $0x3f8] sm:$0xf]  ;;  %423 = vst [vmem:[%s5160_s26 + $0x1f4] sm:$0xf] %v422_v61  ;;  %425 = vst [vmem:[%s5160_s26 + $0x1f8] sm:$0xf] %v424_v62 }
  0x6a   : > { %427 = vst [vmem:[%s5160_s26 + $0x1fc] sm:$0xf] %v426_v63  ;;  %v428_v0 = vld [vmem:[%s5156_s25 + $0x400] sm:$0xf]  ;;  %v430_v1 = vld [vmem:[%s5156_s25 + $0x408] sm:$0xf] }
  0x6b   : > { %v432_v2 = vld [vmem:[%s5156_s25 + $0x410] sm:$0xf]  ;;  %429 = vst [vmem:[%s5160_s26 + $0x200] sm:$0xf] %v428_v0  ;;  %431 = vst [vmem:[%s5160_s26 + $0x204] sm:$0xf] %v430_v1 }
  0x6c   : > { %433 = vst [vmem:[%s5160_s26 + $0x208] sm:$0xf] %v432_v2  ;;  %v434_v3 = vld [vmem:[%s5156_s25 + $0x418] sm:$0xf]  ;;  %v436_v4 = vld [vmem:[%s5156_s25 + $0x420] sm:$0xf] }
  0x6d   : > { %v438_v5 = vld [vmem:[%s5156_s25 + $0x428] sm:$0xf]  ;;  %435 = vst [vmem:[%s5160_s26 + $0x20c] sm:$0xf] %v434_v3  ;;  %437 = vst [vmem:[%s5160_s26 + $0x210] sm:$0xf] %v436_v4 }
  0x6e   : > { %439 = vst [vmem:[%s5160_s26 + $0x214] sm:$0xf] %v438_v5  ;;  %v440_v6 = vld [vmem:[%s5156_s25 + $0x430] sm:$0xf]  ;;  %v442_v7 = vld [vmem:[%s5156_s25 + $0x438] sm:$0xf] }
  0x6f   : > { %v444_v8 = vld [vmem:[%s5156_s25 + $0x440] sm:$0xf]  ;;  %441 = vst [vmem:[%s5160_s26 + $0x218] sm:$0xf] %v440_v6  ;;  %443 = vst [vmem:[%s5160_s26 + $0x21c] sm:$0xf] %v442_v7 }
  0x70   : > { %445 = vst [vmem:[%s5160_s26 + $0x220] sm:$0xf] %v444_v8  ;;  %v446_v9 = vld [vmem:[%s5156_s25 + $0x448] sm:$0xf]  ;;  %v448_v10 = vld [vmem:[%s5156_s25 + $0x450] sm:$0xf] }
  0x71   : > { %v450_v11 = vld [vmem:[%s5156_s25 + $0x458] sm:$0xf]  ;;  %447 = vst [vmem:[%s5160_s26 + $0x224] sm:$0xf] %v446_v9  ;;  %449 = vst [vmem:[%s5160_s26 + $0x228] sm:$0xf] %v448_v10 }
  0x72   : > { %451 = vst [vmem:[%s5160_s26 + $0x22c] sm:$0xf] %v450_v11  ;;  %v452_v12 = vld [vmem:[%s5156_s25 + $0x460] sm:$0xf]  ;;  %v454_v13 = vld [vmem:[%s5156_s25 + $0x468] sm:$0xf] }
  0x73   : > { %v456_v14 = vld [vmem:[%s5156_s25 + $0x470] sm:$0xf]  ;;  %453 = vst [vmem:[%s5160_s26 + $0x230] sm:$0xf] %v452_v12  ;;  %455 = vst [vmem:[%s5160_s26 + $0x234] sm:$0xf] %v454_v13 }
  0x74   : > { %457 = vst [vmem:[%s5160_s26 + $0x238] sm:$0xf] %v456_v14  ;;  %v458_v15 = vld [vmem:[%s5156_s25 + $0x478] sm:$0xf]  ;;  %v460_v16 = vld [vmem:[%s5156_s25 + $0x480] sm:$0xf] }
  0x75   : > { %v462_v17 = vld [vmem:[%s5156_s25 + $0x488] sm:$0xf]  ;;  %459 = vst [vmem:[%s5160_s26 + $0x23c] sm:$0xf] %v458_v15  ;;  %461 = vst [vmem:[%s5160_s26 + $0x240] sm:$0xf] %v460_v16 }
  0x76   : > { %463 = vst [vmem:[%s5160_s26 + $0x244] sm:$0xf] %v462_v17  ;;  %v464_v18 = vld [vmem:[%s5156_s25 + $0x490] sm:$0xf]  ;;  %v466_v19 = vld [vmem:[%s5156_s25 + $0x498] sm:$0xf] }
  0x77   : > { %v468_v20 = vld [vmem:[%s5156_s25 + $0x4a0] sm:$0xf]  ;;  %465 = vst [vmem:[%s5160_s26 + $0x248] sm:$0xf] %v464_v18  ;;  %467 = vst [vmem:[%s5160_s26 + $0x24c] sm:$0xf] %v466_v19 }
  0x78   : > { %469 = vst [vmem:[%s5160_s26 + $0x250] sm:$0xf] %v468_v20  ;;  %v470_v21 = vld [vmem:[%s5156_s25 + $0x4a8] sm:$0xf]  ;;  %v472_v22 = vld [vmem:[%s5156_s25 + $0x4b0] sm:$0xf] }
  0x79   : > { %v474_v23 = vld [vmem:[%s5156_s25 + $0x4b8] sm:$0xf]  ;;  %471 = vst [vmem:[%s5160_s26 + $0x254] sm:$0xf] %v470_v21  ;;  %473 = vst [vmem:[%s5160_s26 + $0x258] sm:$0xf] %v472_v22 }
  0x7a   : > { %475 = vst [vmem:[%s5160_s26 + $0x25c] sm:$0xf] %v474_v23  ;;  %v476_v24 = vld [vmem:[%s5156_s25 + $0x4c0] sm:$0xf]  ;;  %v478_v25 = vld [vmem:[%s5156_s25 + $0x4c8] sm:$0xf] }
  0x7b   : > { %v480_v26 = vld [vmem:[%s5156_s25 + $0x4d0] sm:$0xf]  ;;  %477 = vst [vmem:[%s5160_s26 + $0x260] sm:$0xf] %v476_v24  ;;  %479 = vst [vmem:[%s5160_s26 + $0x264] sm:$0xf] %v478_v25 }
  0x7c   : > { %481 = vst [vmem:[%s5160_s26 + $0x268] sm:$0xf] %v480_v26  ;;  %v482_v27 = vld [vmem:[%s5156_s25 + $0x4d8] sm:$0xf]  ;;  %v484_v28 = vld [vmem:[%s5156_s25 + $0x4e0] sm:$0xf] }
  0x7d   : > { %v486_v29 = vld [vmem:[%s5156_s25 + $0x4e8] sm:$0xf]  ;;  %483 = vst [vmem:[%s5160_s26 + $0x26c] sm:$0xf] %v482_v27  ;;  %485 = vst [vmem:[%s5160_s26 + $0x270] sm:$0xf] %v484_v28 }
  0x7e   : > { %487 = vst [vmem:[%s5160_s26 + $0x274] sm:$0xf] %v486_v29  ;;  %v488_v30 = vld [vmem:[%s5156_s25 + $0x4f0] sm:$0xf]  ;;  %v490_v31 = vld [vmem:[%s5156_s25 + $0x4f8] sm:$0xf] }
  0x7f   : > { %v492_v32 = vld [vmem:[%s5156_s25 + $0x500] sm:$0xf]  ;;  %489 = vst [vmem:[%s5160_s26 + $0x278] sm:$0xf] %v488_v30  ;;  %491 = vst [vmem:[%s5160_s26 + $0x27c] sm:$0xf] %v490_v31 }
  0x80   : > { %493 = vst [vmem:[%s5160_s26 + $0x280] sm:$0xf] %v492_v32  ;;  %v494_v33 = vld [vmem:[%s5156_s25 + $0x508] sm:$0xf]  ;;  %v496_v34 = vld [vmem:[%s5156_s25 + $0x510] sm:$0xf] }
  0x81   : > { %v498_v35 = vld [vmem:[%s5156_s25 + $0x518] sm:$0xf]  ;;  %495 = vst [vmem:[%s5160_s26 + $0x284] sm:$0xf] %v494_v33  ;;  %497 = vst [vmem:[%s5160_s26 + $0x288] sm:$0xf] %v496_v34 }
  0x82   : > { %499 = vst [vmem:[%s5160_s26 + $0x28c] sm:$0xf] %v498_v35  ;;  %v500_v36 = vld [vmem:[%s5156_s25 + $0x520] sm:$0xf]  ;;  %v502_v37 = vld [vmem:[%s5156_s25 + $0x528] sm:$0xf] }
  0x83   : > { %v504_v38 = vld [vmem:[%s5156_s25 + $0x530] sm:$0xf]  ;;  %501 = vst [vmem:[%s5160_s26 + $0x290] sm:$0xf] %v500_v36  ;;  %503 = vst [vmem:[%s5160_s26 + $0x294] sm:$0xf] %v502_v37 }
  0x84   : > { %505 = vst [vmem:[%s5160_s26 + $0x298] sm:$0xf] %v504_v38  ;;  %v506_v39 = vld [vmem:[%s5156_s25 + $0x538] sm:$0xf]  ;;  %v508_v40 = vld [vmem:[%s5156_s25 + $0x540] sm:$0xf] }
  0x85   : > { %v510_v41 = vld [vmem:[%s5156_s25 + $0x548] sm:$0xf]  ;;  %507 = vst [vmem:[%s5160_s26 + $0x29c] sm:$0xf] %v506_v39  ;;  %509 = vst [vmem:[%s5160_s26 + $0x2a0] sm:$0xf] %v508_v40 }
  0x86   : > { %511 = vst [vmem:[%s5160_s26 + $0x2a4] sm:$0xf] %v510_v41  ;;  %v512_v42 = vld [vmem:[%s5156_s25 + $0x550] sm:$0xf]  ;;  %v514_v43 = vld [vmem:[%s5156_s25 + $0x558] sm:$0xf] }
  0x87   : > { %v516_v44 = vld [vmem:[%s5156_s25 + $0x560] sm:$0xf]  ;;  %513 = vst [vmem:[%s5160_s26 + $0x2a8] sm:$0xf] %v512_v42  ;;  %515 = vst [vmem:[%s5160_s26 + $0x2ac] sm:$0xf] %v514_v43 }
  0x88   : > { %517 = vst [vmem:[%s5160_s26 + $0x2b0] sm:$0xf] %v516_v44  ;;  %v518_v45 = vld [vmem:[%s5156_s25 + $0x568] sm:$0xf]  ;;  %v520_v46 = vld [vmem:[%s5156_s25 + $0x570] sm:$0xf] }
  0x89   : > { %v522_v47 = vld [vmem:[%s5156_s25 + $0x578] sm:$0xf]  ;;  %519 = vst [vmem:[%s5160_s26 + $0x2b4] sm:$0xf] %v518_v45  ;;  %521 = vst [vmem:[%s5160_s26 + $0x2b8] sm:$0xf] %v520_v46 }
  0x8a   : > { %523 = vst [vmem:[%s5160_s26 + $0x2bc] sm:$0xf] %v522_v47  ;;  %v524_v48 = vld [vmem:[%s5156_s25 + $0x580] sm:$0xf]  ;;  %v526_v49 = vld [vmem:[%s5156_s25 + $0x588] sm:$0xf] }
  0x8b   : > { %v528_v50 = vld [vmem:[%s5156_s25 + $0x590] sm:$0xf]  ;;  %525 = vst [vmem:[%s5160_s26 + $0x2c0] sm:$0xf] %v524_v48  ;;  %527 = vst [vmem:[%s5160_s26 + $0x2c4] sm:$0xf] %v526_v49 }
  0x8c   : > { %529 = vst [vmem:[%s5160_s26 + $0x2c8] sm:$0xf] %v528_v50  ;;  %v530_v51 = vld [vmem:[%s5156_s25 + $0x598] sm:$0xf]  ;;  %v532_v52 = vld [vmem:[%s5156_s25 + $0x5a0] sm:$0xf] }
  0x8d   : > { %v534_v53 = vld [vmem:[%s5156_s25 + $0x5a8] sm:$0xf]  ;;  %531 = vst [vmem:[%s5160_s26 + $0x2cc] sm:$0xf] %v530_v51  ;;  %533 = vst [vmem:[%s5160_s26 + $0x2d0] sm:$0xf] %v532_v52 }
  0x8e   : > { %535 = vst [vmem:[%s5160_s26 + $0x2d4] sm:$0xf] %v534_v53  ;;  %v536_v54 = vld [vmem:[%s5156_s25 + $0x5b0] sm:$0xf]  ;;  %v538_v55 = vld [vmem:[%s5156_s25 + $0x5b8] sm:$0xf] }
  0x8f   : > { %v540_v56 = vld [vmem:[%s5156_s25 + $0x5c0] sm:$0xf]  ;;  %537 = vst [vmem:[%s5160_s26 + $0x2d8] sm:$0xf] %v536_v54  ;;  %539 = vst [vmem:[%s5160_s26 + $0x2dc] sm:$0xf] %v538_v55 }
  0x90   : > { %541 = vst [vmem:[%s5160_s26 + $0x2e0] sm:$0xf] %v540_v56  ;;  %v542_v57 = vld [vmem:[%s5156_s25 + $0x5c8] sm:$0xf]  ;;  %v544_v58 = vld [vmem:[%s5156_s25 + $0x5d0] sm:$0xf] }
  0x91   : > { %v546_v59 = vld [vmem:[%s5156_s25 + $0x5d8] sm:$0xf]  ;;  %543 = vst [vmem:[%s5160_s26 + $0x2e4] sm:$0xf] %v542_v57  ;;  %545 = vst [vmem:[%s5160_s26 + $0x2e8] sm:$0xf] %v544_v58 }
  0x92   : > { %547 = vst [vmem:[%s5160_s26 + $0x2ec] sm:$0xf] %v546_v59  ;;  %v548_v60 = vld [vmem:[%s5156_s25 + $0x5e0] sm:$0xf]  ;;  %v550_v61 = vld [vmem:[%s5156_s25 + $0x5e8] sm:$0xf] }
  0x93   : > { %v552_v62 = vld [vmem:[%s5156_s25 + $0x5f0] sm:$0xf]  ;;  %549 = vst [vmem:[%s5160_s26 + $0x2f0] sm:$0xf] %v548_v60  ;;  %551 = vst [vmem:[%s5160_s26 + $0x2f4] sm:$0xf] %v550_v61 }
  0x94   : > { %553 = vst [vmem:[%s5160_s26 + $0x2f8] sm:$0xf] %v552_v62  ;;  %v554_v63 = vld [vmem:[%s5156_s25 + $0x5f8] sm:$0xf]  ;;  %v556_v0 = vld [vmem:[%s5156_s25 + $0x600] sm:$0xf] }
  0x95   : > { %v558_v1 = vld [vmem:[%s5156_s25 + $0x608] sm:$0xf]  ;;  %555 = vst [vmem:[%s5160_s26 + $0x2fc] sm:$0xf] %v554_v63  ;;  %557 = vst [vmem:[%s5160_s26 + $0x300] sm:$0xf] %v556_v0 }
  0x96   : > { %559 = vst [vmem:[%s5160_s26 + $0x304] sm:$0xf] %v558_v1  ;;  %v560_v2 = vld [vmem:[%s5156_s25 + $0x610] sm:$0xf]  ;;  %v562_v3 = vld [vmem:[%s5156_s25 + $0x618] sm:$0xf] }
  0x97   : > { %v564_v4 = vld [vmem:[%s5156_s25 + $0x620] sm:$0xf]  ;;  %561 = vst [vmem:[%s5160_s26 + $0x308] sm:$0xf] %v560_v2  ;;  %563 = vst [vmem:[%s5160_s26 + $0x30c] sm:$0xf] %v562_v3 }
  0x98   : > { %565 = vst [vmem:[%s5160_s26 + $0x310] sm:$0xf] %v564_v4  ;;  %v566_v5 = vld [vmem:[%s5156_s25 + $0x628] sm:$0xf]  ;;  %v568_v6 = vld [vmem:[%s5156_s25 + $0x630] sm:$0xf] }
  0x99   : > { %v570_v7 = vld [vmem:[%s5156_s25 + $0x638] sm:$0xf]  ;;  %567 = vst [vmem:[%s5160_s26 + $0x314] sm:$0xf] %v566_v5  ;;  %569 = vst [vmem:[%s5160_s26 + $0x318] sm:$0xf] %v568_v6 }
  0x9a   : > { %571 = vst [vmem:[%s5160_s26 + $0x31c] sm:$0xf] %v570_v7  ;;  %v572_v8 = vld [vmem:[%s5156_s25 + $0x640] sm:$0xf]  ;;  %v574_v9 = vld [vmem:[%s5156_s25 + $0x648] sm:$0xf] }
  0x9b   : > { %v576_v10 = vld [vmem:[%s5156_s25 + $0x650] sm:$0xf]  ;;  %573 = vst [vmem:[%s5160_s26 + $0x320] sm:$0xf] %v572_v8  ;;  %575 = vst [vmem:[%s5160_s26 + $0x324] sm:$0xf] %v574_v9 }
  0x9c   : > { %577 = vst [vmem:[%s5160_s26 + $0x328] sm:$0xf] %v576_v10  ;;  %v578_v11 = vld [vmem:[%s5156_s25 + $0x658] sm:$0xf]  ;;  %v580_v12 = vld [vmem:[%s5156_s25 + $0x660] sm:$0xf] }
  0x9d   : > { %v582_v13 = vld [vmem:[%s5156_s25 + $0x668] sm:$0xf]  ;;  %579 = vst [vmem:[%s5160_s26 + $0x32c] sm:$0xf] %v578_v11  ;;  %581 = vst [vmem:[%s5160_s26 + $0x330] sm:$0xf] %v580_v12 }
  0x9e   : > { %583 = vst [vmem:[%s5160_s26 + $0x334] sm:$0xf] %v582_v13  ;;  %v584_v14 = vld [vmem:[%s5156_s25 + $0x670] sm:$0xf]  ;;  %v586_v15 = vld [vmem:[%s5156_s25 + $0x678] sm:$0xf] }
  0x9f   : > { %v588_v16 = vld [vmem:[%s5156_s25 + $0x680] sm:$0xf]  ;;  %585 = vst [vmem:[%s5160_s26 + $0x338] sm:$0xf] %v584_v14  ;;  %587 = vst [vmem:[%s5160_s26 + $0x33c] sm:$0xf] %v586_v15 }
  0xa0   : > { %589 = vst [vmem:[%s5160_s26 + $0x340] sm:$0xf] %v588_v16  ;;  %v590_v17 = vld [vmem:[%s5156_s25 + $0x688] sm:$0xf]  ;;  %v592_v18 = vld [vmem:[%s5156_s25 + $0x690] sm:$0xf] }
  0xa1   : > { %v594_v19 = vld [vmem:[%s5156_s25 + $0x698] sm:$0xf]  ;;  %591 = vst [vmem:[%s5160_s26 + $0x344] sm:$0xf] %v590_v17  ;;  %593 = vst [vmem:[%s5160_s26 + $0x348] sm:$0xf] %v592_v18 }
  0xa2   : > { %595 = vst [vmem:[%s5160_s26 + $0x34c] sm:$0xf] %v594_v19  ;;  %v596_v20 = vld [vmem:[%s5156_s25 + $0x6a0] sm:$0xf]  ;;  %v598_v21 = vld [vmem:[%s5156_s25 + $0x6a8] sm:$0xf] }
  0xa3   : > { %v600_v22 = vld [vmem:[%s5156_s25 + $0x6b0] sm:$0xf]  ;;  %597 = vst [vmem:[%s5160_s26 + $0x350] sm:$0xf] %v596_v20  ;;  %599 = vst [vmem:[%s5160_s26 + $0x354] sm:$0xf] %v598_v21 }
  0xa4   : > { %601 = vst [vmem:[%s5160_s26 + $0x358] sm:$0xf] %v600_v22  ;;  %v602_v23 = vld [vmem:[%s5156_s25 + $0x6b8] sm:$0xf]  ;;  %v604_v24 = vld [vmem:[%s5156_s25 + $0x6c0] sm:$0xf] }
  0xa5   : > { %v606_v25 = vld [vmem:[%s5156_s25 + $0x6c8] sm:$0xf]  ;;  %603 = vst [vmem:[%s5160_s26 + $0x35c] sm:$0xf] %v602_v23  ;;  %605 = vst [vmem:[%s5160_s26 + $0x360] sm:$0xf] %v604_v24 }
  0xa6   : > { %607 = vst [vmem:[%s5160_s26 + $0x364] sm:$0xf] %v606_v25  ;;  %v608_v26 = vld [vmem:[%s5156_s25 + $0x6d0] sm:$0xf]  ;;  %v610_v27 = vld [vmem:[%s5156_s25 + $0x6d8] sm:$0xf] }
  0xa7   : > { %v612_v28 = vld [vmem:[%s5156_s25 + $0x6e0] sm:$0xf]  ;;  %609 = vst [vmem:[%s5160_s26 + $0x368] sm:$0xf] %v608_v26  ;;  %611 = vst [vmem:[%s5160_s26 + $0x36c] sm:$0xf] %v610_v27 }
  0xa8   : > { %613 = vst [vmem:[%s5160_s26 + $0x370] sm:$0xf] %v612_v28  ;;  %v614_v29 = vld [vmem:[%s5156_s25 + $0x6e8] sm:$0xf]  ;;  %v616_v30 = vld [vmem:[%s5156_s25 + $0x6f0] sm:$0xf] }
  0xa9   : > { %v618_v31 = vld [vmem:[%s5156_s25 + $0x6f8] sm:$0xf]  ;;  %615 = vst [vmem:[%s5160_s26 + $0x374] sm:$0xf] %v614_v29  ;;  %617 = vst [vmem:[%s5160_s26 + $0x378] sm:$0xf] %v616_v30 }
  0xaa   : > { %619 = vst [vmem:[%s5160_s26 + $0x37c] sm:$0xf] %v618_v31  ;;  %v620_v32 = vld [vmem:[%s5156_s25 + $0x700] sm:$0xf]  ;;  %v622_v33 = vld [vmem:[%s5156_s25 + $0x708] sm:$0xf] }
  0xab   : > { %v624_v34 = vld [vmem:[%s5156_s25 + $0x710] sm:$0xf]  ;;  %621 = vst [vmem:[%s5160_s26 + $0x380] sm:$0xf] %v620_v32  ;;  %623 = vst [vmem:[%s5160_s26 + $0x384] sm:$0xf] %v622_v33 }
  0xac   : > { %625 = vst [vmem:[%s5160_s26 + $0x388] sm:$0xf] %v624_v34  ;;  %v626_v35 = vld [vmem:[%s5156_s25 + $0x718] sm:$0xf]  ;;  %v628_v36 = vld [vmem:[%s5156_s25 + $0x720] sm:$0xf] }
  0xad   : > { %v630_v37 = vld [vmem:[%s5156_s25 + $0x728] sm:$0xf]  ;;  %627 = vst [vmem:[%s5160_s26 + $0x38c] sm:$0xf] %v626_v35  ;;  %629 = vst [vmem:[%s5160_s26 + $0x390] sm:$0xf] %v628_v36 }
  0xae   : > { %631 = vst [vmem:[%s5160_s26 + $0x394] sm:$0xf] %v630_v37  ;;  %v632_v38 = vld [vmem:[%s5156_s25 + $0x730] sm:$0xf]  ;;  %v634_v39 = vld [vmem:[%s5156_s25 + $0x738] sm:$0xf] }
  0xaf   : > { %v636_v40 = vld [vmem:[%s5156_s25 + $0x740] sm:$0xf]  ;;  %633 = vst [vmem:[%s5160_s26 + $0x398] sm:$0xf] %v632_v38  ;;  %635 = vst [vmem:[%s5160_s26 + $0x39c] sm:$0xf] %v634_v39 }
  0xb0   : > { %637 = vst [vmem:[%s5160_s26 + $0x3a0] sm:$0xf] %v636_v40  ;;  %v638_v41 = vld [vmem:[%s5156_s25 + $0x748] sm:$0xf]  ;;  %v640_v42 = vld [vmem:[%s5156_s25 + $0x750] sm:$0xf] }
  0xb1   : > { %v642_v43 = vld [vmem:[%s5156_s25 + $0x758] sm:$0xf]  ;;  %639 = vst [vmem:[%s5160_s26 + $0x3a4] sm:$0xf] %v638_v41  ;;  %641 = vst [vmem:[%s5160_s26 + $0x3a8] sm:$0xf] %v640_v42 }
  0xb2   : > { %643 = vst [vmem:[%s5160_s26 + $0x3ac] sm:$0xf] %v642_v43  ;;  %v644_v44 = vld [vmem:[%s5156_s25 + $0x760] sm:$0xf]  ;;  %v646_v45 = vld [vmem:[%s5156_s25 + $0x768] sm:$0xf] }
  0xb3   : > { %v648_v46 = vld [vmem:[%s5156_s25 + $0x770] sm:$0xf]  ;;  %645 = vst [vmem:[%s5160_s26 + $0x3b0] sm:$0xf] %v644_v44  ;;  %647 = vst [vmem:[%s5160_s26 + $0x3b4] sm:$0xf] %v646_v45 }
  0xb4   : > { %649 = vst [vmem:[%s5160_s26 + $0x3b8] sm:$0xf] %v648_v46  ;;  %v650_v47 = vld [vmem:[%s5156_s25 + $0x778] sm:$0xf]  ;;  %v652_v48 = vld [vmem:[%s5156_s25 + $0x780] sm:$0xf] }
  0xb5   : > { %v654_v49 = vld [vmem:[%s5156_s25 + $0x788] sm:$0xf]  ;;  %651 = vst [vmem:[%s5160_s26 + $0x3bc] sm:$0xf] %v650_v47  ;;  %653 = vst [vmem:[%s5160_s26 + $0x3c0] sm:$0xf] %v652_v48 }
  0xb6   : > { %655 = vst [vmem:[%s5160_s26 + $0x3c4] sm:$0xf] %v654_v49  ;;  %v656_v50 = vld [vmem:[%s5156_s25 + $0x790] sm:$0xf]  ;;  %v658_v51 = vld [vmem:[%s5156_s25 + $0x798] sm:$0xf] }
  0xb7   : > { %v660_v52 = vld [vmem:[%s5156_s25 + $0x7a0] sm:$0xf]  ;;  %657 = vst [vmem:[%s5160_s26 + $0x3c8] sm:$0xf] %v656_v50  ;;  %659 = vst [vmem:[%s5160_s26 + $0x3cc] sm:$0xf] %v658_v51 }
  0xb8   : > { %661 = vst [vmem:[%s5160_s26 + $0x3d0] sm:$0xf] %v660_v52  ;;  %v662_v53 = vld [vmem:[%s5156_s25 + $0x7a8] sm:$0xf]  ;;  %v664_v54 = vld [vmem:[%s5156_s25 + $0x7b0] sm:$0xf] }
  0xb9   : > { %v666_v55 = vld [vmem:[%s5156_s25 + $0x7b8] sm:$0xf]  ;;  %663 = vst [vmem:[%s5160_s26 + $0x3d4] sm:$0xf] %v662_v53  ;;  %665 = vst [vmem:[%s5160_s26 + $0x3d8] sm:$0xf] %v664_v54 }
  0xba   : > { %667 = vst [vmem:[%s5160_s26 + $0x3dc] sm:$0xf] %v666_v55  ;;  %v668_v56 = vld [vmem:[%s5156_s25 + $0x7c0] sm:$0xf]  ;;  %v670_v57 = vld [vmem:[%s5156_s25 + $0x7c8] sm:$0xf] }
  0xbb   : > { %v672_v58 = vld [vmem:[%s5156_s25 + $0x7d0] sm:$0xf]  ;;  %669 = vst [vmem:[%s5160_s26 + $0x3e0] sm:$0xf] %v668_v56  ;;  %671 = vst [vmem:[%s5160_s26 + $0x3e4] sm:$0xf] %v670_v57 }
  0xbc   : > { %673 = vst [vmem:[%s5160_s26 + $0x3e8] sm:$0xf] %v672_v58  ;;  %v674_v59 = vld [vmem:[%s5156_s25 + $0x7d8] sm:$0xf]  ;;  %v676_v60 = vld [vmem:[%s5156_s25 + $0x7e0] sm:$0xf] }
  0xbd   : > { %v678_v61 = vld [vmem:[%s5156_s25 + $0x7e8] sm:$0xf]  ;;  %675 = vst [vmem:[%s5160_s26 + $0x3ec] sm:$0xf] %v674_v59  ;;  %677 = vst [vmem:[%s5160_s26 + $0x3f0] sm:$0xf] %v676_v60 }
  0xbe   : > { %679 = vst [vmem:[%s5160_s26 + $0x3f4] sm:$0xf] %v678_v61  ;;  %v680_v62 = vld [vmem:[%s5156_s25 + $0x7f0] sm:$0xf]  ;;  %v682_v63 = vld [vmem:[%s5156_s25 + $0x7f8] sm:$0xf] }
  0xbf   : > { %681 = vst [vmem:[%s5160_s26 + $0x3f8] sm:$0xf] %v680_v62  ;;  %683 = vst [vmem:[%s5160_s26 + $0x3fc] sm:$0xf] %v682_v63 }
  0xc0 PF: > { %p4109_p8 = scmp.ge.s32.totalorder %s5091_s13, 1  ;;  %p1217_p9 = scmp.lt.s32.totalorder %s5091_s13, 3 }
  0xc2   : > { %p1218_p10 = pnand %p4109_p8, %p1217_p9 }
  0xc3   : > { %s1224_s27 = sand.u32 (!%p1218_p10), 1, %s5075_s9   ;;  %v5678_v0 = vld [vmem:[%s6408_s0] sm:$0xff] (!%p1218_p10)  ;;  %v5688_v2 = vld [vmem:[%s6408_s0 + $0x8] sm:$0xff] (!%p1218_p10) }
  0xc4   : > { %1221 = sbr.rel (%p1218_p10) target bundleno = 710 (0x2c6), region = 65  ;;  %v5683_v1 = vld [vmem:[%s6408_s0 + $0x40] sm:$0xff] (!%p1218_p10)  ;;  %s4110_s6 = sshll.u32 (!%p1218_p10), %s1224_s27, 10  ;;  %v5697_v4 = vld [vmem:[%s6408_s0 + $0x48] sm:$0xff] (!%p1218_p10) }
  0xc5   : > { %v4113_v3 = vcombine.high (!%p1218_p10), %v5678_v0, %v5683_v1  ;;  %v4115_v5 = vcombine.high (!%p1218_p10), %v5688_v2, %v5697_v4  ;;  %s5701_s15 = scalar_lea.vmem (!%p1218_p10), [#allocation2], %s4110_s6  ;;  %v1321_v35 = vld [vmem:[%s6408_s0 + $0x80] sm:$0xff] (!%p1218_p10)  ;;  %v1322_v38 = vld [vmem:[%s6408_s0 + $0x88] sm:$0xff] (!%p1218_p10)  ;;  %v4112_v42 = vcombine.low (!%p1218_p10), %v5678_v0, %v5683_v1  ;;  %v4114_v43 = vcombine.low (!%p1218_p10), %v5688_v2, %v5697_v4 }
  0xc6   : > { %v4925_v6 = vld [vmem:[%s5701_s15 + $0x40] sm:$0xff] (!%p1218_p10)   ;;  %v4929_v10 = vld [vmem:[%s5701_s15 + $0x48] sm:$0xff] (!%p1218_p10)   ;;  %v4933_v14 = vld [vmem:[%s5701_s15 + $0x50] sm:$0xff] (!%p1218_p10)  }
  0xc7   : > { %3129 = vmatprep.mubr.bf16.mxu0 (!%p1218_p10), %v4113_v3  ;;  %v4926_v7 = vld [vmem:[%s5701_s15 + $0xc0] sm:$0xff] (!%p1218_p10)   ;;  %3226 = vmatprep.mubr.bf16.mxu1 (!%p1218_p10), %v4115_v5  ;;  %v4930_v11 = vld [vmem:[%s5701_s15 + $0xc8] sm:$0xff] (!%p1218_p10)   ;;  %v4934_v15 = vld [vmem:[%s5701_s15 + $0xd0] sm:$0xff] (!%p1218_p10)  }
  0xc8   : > { %4372 = vmatprep.subr.bf16.mxu0 (!%p1218_p10), %v4925_v6  ;;  %v4927_v8 = vld [vmem:[%s5701_s15] sm:$0xff] (!%p1218_p10)   ;;  %4436 = vmatprep.subr.bf16.mxu1 (!%p1218_p10), %v4926_v7  ;;  %v4931_v12 = vld [vmem:[%s5701_s15 + $0x8] sm:$0xff] (!%p1218_p10)   ;;  %v4935_v16 = vld [vmem:[%s5701_s15 + $0x10] sm:$0xff] (!%p1218_p10)  }
  0xc9   : > { %v4928_v9 = vld [vmem:[%s5701_s15 + $0x80] sm:$0xff] (!%p1218_p10)   ;;  %4373 = vmatpush3.bf16.msra.mxu0 (!%p1218_p10), %v4927_v8  ;;  %v4932_v13 = vld [vmem:[%s5701_s15 + $0x88] sm:$0xff] (!%p1218_p10)   ;;  %v4936_v17 = vld [vmem:[%s5701_s15 + $0x90] sm:$0xff] (!%p1218_p10)  }
  0xca   : > { %4437 = vmatpush3.bf16.msra.mxu1 (!%p1218_p10), %v4928_v9  ;;  %4374 = vmatprep.subr.bf16.mxu0 (!%p1218_p10), %v4929_v10  ;;  %v4937_v18 = vld [vmem:[%s5701_s15 + $0x58] sm:$0xff] (!%p1218_p10)   ;;  %v4941_v22 = vld [vmem:[%s5701_s15 + $0x60] sm:$0xff] (!%p1218_p10)   ;;  %v4945_v26 = vld [vmem:[%s5701_s15 + $0x68] sm:$0xff] (!%p1218_p10)  }
  0xcb   : > { %4438 = vmatprep.subr.bf16.mxu1 %v4930_v11  ;;  %v4938_v19 = vld [vmem:[%s5701_s15 + $0xd8] sm:$0xff]   ;;  %v4942_v23 = vld [vmem:[%s5701_s15 + $0xe0] sm:$0xff]   ;;  %v4946_v27 = vld [vmem:[%s5701_s15 + $0xe8] sm:$0xff]   ;;  %s4369_s9 = sshll.u32 (%p5143_p6), %s5083_s11, 3 }
  0xcc   : > { %v4939_v20 = vld [vmem:[%s5701_s15 + $0x18] sm:$0xff]   ;;  %v4943_v24 = vld [vmem:[%s5701_s15 + $0x20] sm:$0xff]   ;;  %v4947_v28 = vld [vmem:[%s5701_s15 + $0x28] sm:$0xff]   ;;  %s3916_s3 = scalar_lea.vmem (%p5143_p6), %s6410_s2, %s4369_s9 }
  0xcd   : > { %4375 = vmatpush3.bf16.msra.mxu0 %v4931_v12  ;;  %v4940_v21 = vld [vmem:[%s5701_s15 + $0x98] sm:$0xff]   ;;  %v4944_v25 = vld [vmem:[%s5701_s15 + $0xa0] sm:$0xff]   ;;  %v4948_v29 = vld [vmem:[%s5701_s15 + $0xa8] sm:$0xff]  }
  0xce   : > { %4439 = vmatpush3.bf16.msra.mxu1 %v4932_v13  ;;  %4376 = vmatprep.subr.bf16.mxu0 %v4933_v14  ;;  %v4949_v30 = vld [vmem:[%s5701_s15 + $0x70] sm:$0xff]   ;;  %v4953_v34 = vld [vmem:[%s5701_s15 + $0x78] sm:$0xff]   ;;  %v1329_v36 = vld [vmem:[%s6408_s0 + $0xc0] sm:$0xff] }
  0xcf   : > { %4440 = vmatprep.subr.bf16.mxu1 %v4934_v15  ;;  %v4950_v31 = vld [vmem:[%s5701_s15 + $0xf0] sm:$0xff]   ;;  %v4954_v37 = vld [vmem:[%s5701_s15 + $0xf8] sm:$0xff]   ;;  %v1330_v39 = vld [vmem:[%s6408_s0 + $0xc8] sm:$0xff]  ;;  %v4129_v46 = vcombine.high %v1321_v35, %v1329_v36  ;;  %v4128_v54 = vcombine.low %v1321_v35, %v1329_v36 }
  0xd0   : > { %v4951_v32 = vld [vmem:[%s5701_s15 + $0x30] sm:$0xff]   ;;  %v4955_v40 = vld [vmem:[%s5701_s15 + $0x38] sm:$0xff]   ;;  %v4957_v44 = vld [vmem:[%s5701_s15 + $0x140] sm:$0xff]   ;;  %v4131_v48 = vcombine.high %v1322_v38, %v1330_v39  ;;  %v4130_v56 = vcombine.low %v1322_v38, %v1330_v39 }
  0xd1   : > { %4377 = vmatpush3.bf16.msra.mxu0 %v4935_v16  ;;  %v4952_v33 = vld [vmem:[%s5701_s15 + $0xb0] sm:$0xff]   ;;  %v4956_v41 = vld [vmem:[%s5701_s15 + $0xb8] sm:$0xff]   ;;  %v4958_v45 = vld [vmem:[%s5701_s15 + $0x100] sm:$0xff]  }
  0xd2   : > { %4441 = vmatpush3.bf16.msra.mxu1 %v4936_v17  ;;  %4378 = vmatprep.subr.bf16.mxu0 %v4937_v18  ;;  %v4959_v47 = vld [vmem:[%s5701_s15 + $0x1c0] sm:$0xff]   ;;  %v4961_v50 = vld [vmem:[%s5701_s15 + $0x148] sm:$0xff]   ;;  %v4965_v62 = vld [vmem:[%s5701_s15 + $0x150] sm:$0xff]  }
  0xd3   : > { %4442 = vmatprep.subr.bf16.mxu1 %v4938_v19  ;;  %v4960_v49 = vld [vmem:[%s5701_s15 + $0x180] sm:$0xff]   ;;  %v4962_v52 = vld [vmem:[%s5701_s15 + $0x108] sm:$0xff]   ;;  %v4966_v63 = vld [vmem:[%s5701_s15 + $0x110] sm:$0xff]  }
  0xd4   : > { %v1337_v51 = vld [vmem:[%s6408_s0 + $0x100] sm:$0xff]  ;;  %v4963_v53 = vld [vmem:[%s5701_s15 + $0x1c8] sm:$0xff]   ;;  %v4967_v0 = vld [vmem:[%s5701_s15 + $0x1d0] sm:$0xff]  }
  0xd5   : > { %4379 = vmatpush3.bf16.msra.mxu0 %v4939_v20  ;;  %v4964_v55 = vld [vmem:[%s5701_s15 + $0x188] sm:$0xff]   ;;  %v1345_v57 = vld [vmem:[%s6408_s0 + $0x140] sm:$0xff]  ;;  %v4968_v1 = vld [vmem:[%s5701_s15 + $0x190] sm:$0xff]  }
  0xd6   : > { %4443 = vmatpush3.bf16.msra.mxu1 %v4940_v21  ;;  %4380 = vmatprep.subr.bf16.mxu0 %v4941_v22  ;;  %v1338_v58 = vld [vmem:[%s6408_s0 + $0x108] sm:$0xff]  ;;  %v4145_v60 = vcombine.high %v1337_v51, %v1345_v57  ;;  %v1353_v2 = vld [vmem:[%s6408_s0 + $0x180] sm:$0xff]  ;;  %v4144_v6 = vcombine.low %v1337_v51, %v1345_v57  ;;  %v4969_v7 = vld [vmem:[%s5701_s15 + $0x158] sm:$0xff]  }
  0xd7   : > { %4444 = vmatprep.subr.bf16.mxu1 %v4942_v23  ;;  %v1346_v59 = vld [vmem:[%s6408_s0 + $0x148] sm:$0xff]  ;;  %v1361_v3 = vld [vmem:[%s6408_s0 + $0x1c0] sm:$0xff]  ;;  %v4970_v10 = vld [vmem:[%s5701_s15 + $0x118] sm:$0xff]  }
  0xd8   : > { %v4147_v61 = vcombine.high %v1338_v58, %v1346_v59  ;;  %v1354_v4 = vld [vmem:[%s6408_s0 + $0x188] sm:$0xff]  ;;  %v4146_v8 = vcombine.low %v1338_v58, %v1346_v59  ;;  %v4161_v9 = vcombine.high %v1353_v2, %v1361_v3  ;;  %v4971_v12 = vld [vmem:[%s5701_s15 + $0x1d8] sm:$0xff]   ;;  %v1369_v14 = vld [vmem:[%s6408_s0 + $0x200] sm:$0xff]  ;;  %v4160_v21 = vcombine.low %v1353_v2, %v1361_v3 }
  0xd9   : > { %4381 = vmatpush3.bf16.msra.mxu0 %v4943_v24  ;;  %v1362_v5 = vld [vmem:[%s6408_s0 + $0x1c8] sm:$0xff]  ;;  %v4972_v13 = vld [vmem:[%s5701_s15 + $0x198] sm:$0xff]   ;;  %v1377_v15 = vld [vmem:[%s6408_s0 + $0x240] sm:$0xff] }
  0xda   : > { %4445 = vmatpush3.bf16.msra.mxu1 %v4944_v25  ;;  %4382 = vmatprep.subr.bf16.mxu0 %v4945_v26  ;;  %v4163_v11 = vcombine.high %v1354_v4, %v1362_v5  ;;  %v1370_v16 = vld [vmem:[%s6408_s0 + $0x208] sm:$0xff]  ;;  %v4973_v18 = vld [vmem:[%s5701_s15 + $0x160] sm:$0xff]   ;;  %v4162_v23 = vcombine.low %v1354_v4, %v1362_v5  ;;  %v4177_v24 = vcombine.high %v1369_v14, %v1377_v15  ;;  %v4981_v35 = vld [vmem:[%s5701_s15 + $0x170] sm:$0xff]  }
  0xdb   : > { %4446 = vmatprep.subr.bf16.mxu1 %v4946_v27  ;;  %v1378_v17 = vld [vmem:[%s6408_s0 + $0x248] sm:$0xff]  ;;  %v4974_v19 = vld [vmem:[%s5701_s15 + $0x120] sm:$0xff]   ;;  %v4982_v38 = vld [vmem:[%s5701_s15 + $0x130] sm:$0xff]  }
  0xdc   : > { %v4975_v20 = vld [vmem:[%s5701_s15 + $0x1e0] sm:$0xff]   ;;  %v4179_v25 = vcombine.high %v1370_v16, %v1378_v17  ;;  %v4977_v26 = vld [vmem:[%s5701_s15 + $0x168] sm:$0xff]   ;;  %v4178_v36 = vcombine.low %v1370_v16, %v1378_v17  ;;  %v1308_v2 = vld [vmem:[%s6408_s0 + $0x18] sm:$0xff] }
  0xdd   : > { %4383 = vmatpush3.bf16.msra.mxu0 %v4947_v28  ;;  %v4976_v22 = vld [vmem:[%s5701_s15 + $0x1a0] sm:$0xff]   ;;  %v4978_v27 = vld [vmem:[%s5701_s15 + $0x128] sm:$0xff]   ;;  %v1316_v3 = vld [vmem:[%s6408_s0 + $0x58] sm:$0xff] }
  0xde   : > { %4447 = vmatpush3.bf16.msra.mxu1 %v4948_v29  ;;  %4384 = vmatprep.subr.bf16.mxu0 %v4949_v30  ;;  %v4979_v28 = vld [vmem:[%s5701_s15 + $0x1e8] sm:$0xff]   ;;  %v1385_v30 = vld [vmem:[%s6408_s0 + $0x280] sm:$0xff] }
  0xdf   : > { %4448 = vmatprep.subr.bf16.mxu1 %v4950_v31  ;;  %v4980_v29 = vld [vmem:[%s5701_s15 + $0x1a8] sm:$0xff]   ;;  %v1393_v31 = vld [vmem:[%s6408_s0 + $0x2c0] sm:$0xff] }
  0xe0   : > { %v1425_v57 = vld [vmem:[%s6408_s0 + $0x3c0] sm:$0xff]  ;;  %v1418_v58 = vld [vmem:[%s6408_s0 + $0x388] sm:$0xff] }
  0xe1   : > { %4385 = vmatpush3.bf16.msra.mxu0 %v4951_v32  ;;  %v1386_v32 = vld [vmem:[%s6408_s0 + $0x288] sm:$0xff] }
  0xe2   : > { %4449 = vmatpush3.bf16.msra.mxu1 %v4952_v33  ;;  %4386 = vmatprep.subr.bf16.mxu0 %v4953_v34  ;;  %v1394_v33 = vld [vmem:[%s6408_s0 + $0x2c8] sm:$0xff]  ;;  %v4176_v34 = vcombine.low %v1369_v14, %v1377_v15  ;;  %v4990_v14 = vld [vmem:[%s5701_s15 + $0x200] sm:$0xff]  }
  0xe3   : > { %4450 = vmatprep.subr.bf16.mxu1 %v4954_v37  ;;  %v4193_v37 = vcombine.high %v1385_v30, %v1393_v31  ;;  %v4195_v39 = vcombine.high %v1386_v32, %v1394_v33  ;;  %v4194_v51 = vcombine.low %v1386_v32, %v1394_v33  ;;  %v1426_v59 = vld [vmem:[%s6408_s0 + $0x3c8] sm:$0xff]  ;;  %v4992_v15 = vld [vmem:[%s5701_s15 + $0x280] sm:$0xff]   ;;  %v5000_v33 = vld [vmem:[%s5701_s15 + $0x290] sm:$0xff]  }
  0xe4   : > { %v4226_v5 = vcombine.low %v1418_v58, %v1426_v59 }
  0xe5   : > { %4387 = vmatpush3.bf16.msra.mxu0 %v4955_v40  ;;  %v4983_v40 = vld [vmem:[%s5701_s15 + $0x1f0] sm:$0xff]  }
  0xe6   : > { %4451 = vmatpush3.bf16.msra.mxu1 %v4956_v41  ;;  %4500 = vmatprep.subr.bf16.mxu0 %v4957_v44  ;;  %v4984_v41 = vld [vmem:[%s5701_s15 + $0x1b0] sm:$0xff]   ;;  %v1402_v44 = vld [vmem:[%s6408_s0 + $0x308] sm:$0xff] }
  0xe7   : > { %4564 = vmatprep.subr.bf16.mxu1 %v4959_v47  ;;  %v4986_v47 = vld [vmem:[%s5701_s15 + $0x138] sm:$0xff]  }
  0xe8   : > { %3130 = vmatmul.mubr.bf16.vlgmr.msra.gmra.mrb[0].mxu0 %v4112_v42  ;;  %v1401_v42 = vld [vmem:[%s6408_s0 + $0x300] sm:$0xff] }
  0xe9   : > { %3227 = vmatmul.mubr.bf16.vlgmr.msra.gmra.mrb[0].mxu1 %v4114_v43  ;;  %4501 = vmatpush3.bf16.msra.mxu0 %v4958_v45  ;;  %v1409_v43 = vld [vmem:[%s6408_s0 + $0x340] sm:$0xff]  ;;  %v1410_v45 = vld [vmem:[%s6408_s0 + $0x348] sm:$0xff] }
  0xea   : > { %3137 = vmatprep.mubr.bf16.mxu0 %v4129_v46  ;;  %4565 = vmatpush3.bf16.msra.mxu1 %v4960_v49  ;;  %v4985_v46 = vld [vmem:[%s5701_s15 + $0x178] sm:$0xff]   ;;  %v4192_v49 = vcombine.low %v1385_v30, %v1393_v31  ;;  %v4998_v31 = vld [vmem:[%s5701_s15 + $0x210] sm:$0xff]  }
  0xeb   : > { %3234 = vmatprep.mubr.bf16.mxu1 %v4131_v48  ;;  %4502 = vmatprep.subr.bf16.mxu0 %v4961_v50  ;;  %v4987_v48 = vld [vmem:[%s5701_s15 + $0x1f8] sm:$0xff]  }
  0xec   : > { %4566 = vmatprep.subr.bf16.mxu1 %v4963_v53  ;;  %v4988_v50 = vld [vmem:[%s5701_s15 + $0x1b8] sm:$0xff]   ;;  %v4211_v53 = vcombine.high %v1402_v44, %v1410_v45 }
  0xed   : > { %4503 = vmatpush3.bf16.msra.mxu0 %v4962_v52  ;;  %v4209_v52 = vcombine.high %v1401_v42, %v1409_v43 }
  0xee   : > { %4567 = vmatpush3.bf16.msra.mxu1 %v4964_v55  ;;  %4504 = vmatprep.subr.bf16.mxu0 %v4965_v62  ;;  %v4991_v55 = vld [vmem:[%s5701_s15 + $0x2c0] sm:$0xff]  }
  0xef   : > { %4568 = vmatprep.subr.bf16.mxu1 %v4967_v0  ;;  %v1307_v0 = vld [vmem:[%s6408_s0 + $0x10] sm:$0xff] }
  0xf0   : > { %3138 = vmatmul.mubr.bf16.gmra.mrb[4].mxu0 %v4128_v54  ;;  %v4989_v54 = vld [vmem:[%s5701_s15 + $0x240] sm:$0xff]  }
  0xf1   : > { %3235 = vmatmul.mubr.bf16.gmra.mrb[4].mxu1 %v4130_v56  ;;  %3145 = vmatprep.mubr.bf16.mxu0 %v4145_v60  ;;  %v1417_v56 = vld [vmem:[%s6408_s0 + $0x380] sm:$0xff]  ;;  %v4208_v60 = vcombine.low %v1401_v42, %v1409_v43 }
  0xf2   : > { %3242 = vmatprep.mubr.bf16.mxu1 %v4147_v61  ;;  %4505 = vmatpush3.bf16.msra.mxu0 %v4966_v63  ;;  %v4210_v61 = vcombine.low %v1402_v44, %v1410_v45  ;;  %v4225_v62 = vcombine.high %v1417_v56, %v1425_v57  ;;  %v4227_v63 = vcombine.high %v1418_v58, %v1426_v59  ;;  %v5005_v42 = vld [vmem:[%s5701_s15 + $0x260] sm:$0xff]   ;;  %v5013_v58 = vld [vmem:[%s5701_s15 + $0x270] sm:$0xff]  }
  0xf3   : > { %4569 = vmatpush3.bf16.msra.mxu1 %v4968_v1  ;;  %4506 = vmatprep.subr.bf16.mxu0 %v4969_v7  ;;  %v1315_v1 = vld [vmem:[%s6408_s0 + $0x50] sm:$0xff]  ;;  %v4224_v4 = vcombine.low %v1417_v56, %v1425_v57  ;;  %v4119_v7 = vcombine.high %v1308_v2, %v1316_v3  ;;  %v5007_v44 = vld [vmem:[%s5701_s15 + $0x2e0] sm:$0xff]   ;;  %v5010_v56 = vld [vmem:[%s5701_s15 + $0x228] sm:$0xff]  }
  0xf4   : > { %4570 = vmatprep.subr.bf16.mxu1 %v4971_v12  ;;  %v1332_v12 = vld [vmem:[%s6408_s0 + $0xd8] sm:$0xff]  ;;  %v5012_v57 = vld [vmem:[%s5701_s15 + $0x2a8] sm:$0xff]  }
  0xf6   : > { %4507 = vmatpush3.bf16.msra.mxu0 %v4970_v10  ;;  %v1324_v10 = vld [vmem:[%s6408_s0 + $0x98] sm:$0xff] }
  0xf7   : > { %4571 = vmatpush3.bf16.msra.mxu1 %v4972_v13  ;;  %4508 = vmatprep.subr.bf16.mxu0 %v4973_v18  ;;  %v4118_v13 = vcombine.low %v1308_v2, %v1316_v3  ;;  %v4135_v17 = vcombine.high %v1324_v10, %v1332_v12  ;;  %v4993_v18 = vld [vmem:[%s5701_s15 + $0x248] sm:$0xff]   ;;  %v5017_v2 = vld [vmem:[%s5701_s15 + $0x278] sm:$0xff]   ;;  %v1387_v3 = vld [vmem:[%s6408_s0 + $0x290] sm:$0xff] }
  0xf8   : > { %3146 = vmatmul.mubr.bf16.gmra.mrb[8].mxu0 %v4144_v6  ;;  %4572 = vmatprep.subr.bf16.mxu1 %v4975_v20  ;;  %v4117_v6 = vcombine.high %v1307_v0, %v1315_v1  ;;  %v4995_v20 = vld [vmem:[%s5701_s15 + $0x2c8] sm:$0xff]  }
  0xf9   : > { %3243 = vmatmul.mubr.bf16.gmra.mrb[8].mxu1 %v4146_v8  ;;  %3153 = vmatprep.mubr.bf16.mxu0 %v4161_v9  ;;  %v1323_v8 = vld [vmem:[%s6408_s0 + $0x90] sm:$0xff] }
  0xfa   : > { %3250 = vmatprep.mubr.bf16.mxu1 %v4163_v11  ;;  %4509 = vmatpush3.bf16.msra.mxu0 %v4974_v19  ;;  %v1331_v9 = vld [vmem:[%s6408_s0 + $0xd0] sm:$0xff]  ;;  %v4116_v11 = vcombine.low %v1307_v0, %v1315_v1  ;;  %v4994_v19 = vld [vmem:[%s5701_s15 + $0x208] sm:$0xff]  }
  0xfb   : > { %4573 = vmatpush3.bf16.msra.mxu1 %v4976_v22  ;;  %4510 = vmatprep.subr.bf16.mxu0 %v4977_v26  ;;  %v4133_v16 = vcombine.high %v1323_v8, %v1331_v9  ;;  %v1339_v22 = vld [vmem:[%s6408_s0 + $0x110] sm:$0xff] }
  0xfc   : > { %4574 = vmatprep.subr.bf16.mxu1 %v4979_v28  ;;  %v4997_v26 = vld [vmem:[%s5701_s15 + $0x250] sm:$0xff]   ;;  %v4132_v28 = vcombine.low %v1323_v8, %v1331_v9  ;;  %v5018_v8 = vld [vmem:[%s5701_s15 + $0x238] sm:$0xff]  }
  0xfd   : > { %v5016_v1 = vld [vmem:[%s5701_s15 + $0x2b0] sm:$0xff]   ;;  %v5020_v9 = vld [vmem:[%s5701_s15 + $0x2b8] sm:$0xff]  }
  0xfe   : > { %4511 = vmatpush3.bf16.msra.mxu0 %v4978_v27  ;;  %v4999_v27 = vld [vmem:[%s5701_s15 + $0x2d0] sm:$0xff]  }
  0xff   : > { %4575 = vmatpush3.bf16.msra.mxu1 %v4980_v29  ;;  %4512 = vmatprep.subr.bf16.mxu0 %v4981_v35  ;;  %v4134_v29 = vcombine.low %v1324_v10, %v1332_v12  ;;  %v1355_v35 = vld [vmem:[%s6408_s0 + $0x190] sm:$0xff]  ;;  %v5021_v10 = vld [vmem:[%s5701_s15 + $0x340] sm:$0xff]  }
 0x100   : > { %3154 = vmatmul.mubr.bf16.gmra.mrb[12].mxu0 %v4160_v21  ;;  %4576 = vmatprep.subr.bf16.mxu1 %v4983_v40  ;;  %v4996_v21 = vld [vmem:[%s5701_s15 + $0x288] sm:$0xff]   ;;  %v5002_v40 = vld [vmem:[%s5701_s15 + $0x218] sm:$0xff]   ;;  %v5023_v12 = vld [vmem:[%s5701_s15 + $0x3c0] sm:$0xff]  }
 0x101   : > { %3251 = vmatmul.mubr.bf16.gmra.mrb[12].mxu1 %v4162_v23  ;;  %3161 = vmatprep.mubr.bf16.mxu0 %v4177_v24  ;;  %v1347_v23 = vld [vmem:[%s6408_s0 + $0x150] sm:$0xff]  ;;  %v1340_v24 = vld [vmem:[%s6408_s0 + $0x118] sm:$0xff] }
 0x102   : > { %3258 = vmatprep.mubr.bf16.mxu1 %v4179_v25  ;;  %4513 = vmatpush3.bf16.msra.mxu0 %v4982_v38  ;;  %v1348_v25 = vld [vmem:[%s6408_s0 + $0x158] sm:$0xff]  ;;  %v4149_v30 = vcombine.high %v1339_v22, %v1347_v23  ;;  %v4148_v43 = vcombine.low %v1339_v22, %v1347_v23 }
 0x103   : > { %4577 = vmatpush3.bf16.msra.mxu1 %v4984_v41  ;;  %4514 = vmatprep.subr.bf16.mxu0 %v4985_v46  ;;  %v4151_v32 = vcombine.high %v1340_v24, %v1348_v25  ;;  %v1356_v38 = vld [vmem:[%s6408_s0 + $0x198] sm:$0xff]  ;;  %v4150_v45 = vcombine.low %v1340_v24, %v1348_v25  ;;  %v1419_v24 = vld [vmem:[%s6408_s0 + $0x390] sm:$0xff] }
 0x104   : > { %4578 = vmatprep.subr.bf16.mxu1 %v4987_v48  ;;  %v5004_v41 = vld [vmem:[%s5701_s15 + $0x298] sm:$0xff]   ;;  %v5006_v48 = vld [vmem:[%s5701_s15 + $0x220] sm:$0xff]   ;;  %v1427_v25 = vld [vmem:[%s6408_s0 + $0x3d0] sm:$0xff] }
 0x106   : > { %4515 = vmatpush3.bf16.msra.mxu0 %v4986_v47 }
 0x107   : > { %4579 = vmatpush3.bf16.msra.mxu1 %v4988_v50  ;;  %4628 = vmatprep.subr.bf16.mxu0 %v4989_v54  ;;  %v5009_v50 = vld [vmem:[%s5701_s15 + $0x268] sm:$0xff]   ;;  %v1372_v54 = vld [vmem:[%s6408_s0 + $0x218] sm:$0xff] }
 0x108   : > { %3162 = vmatmul.mubr.bf16.gmra.mrb[16].mxu0 %v4176_v34  ;;  %4692 = vmatprep.subr.bf16.mxu1 %v4991_v55  ;;  %v5001_v34 = vld [vmem:[%s5701_s15 + $0x258] sm:$0xff]  }
 0x109   : > { %3259 = vmatmul.mubr.bf16.gmra.mrb[16].mxu1 %v4178_v36  ;;  %3169 = vmatprep.mubr.bf16.mxu0 %v4193_v37  ;;  %v1363_v36 = vld [vmem:[%s6408_s0 + $0x1d0] sm:$0xff]  ;;  %v5003_v37 = vld [vmem:[%s5701_s15 + $0x2d8] sm:$0xff]  }
 0x10a   : > { %3266 = vmatprep.mubr.bf16.mxu1 %v4195_v39  ;;  %v1364_v39 = vld [vmem:[%s6408_s0 + $0x1d8] sm:$0xff]  ;;  %v4165_v46 = vcombine.high %v1355_v35, %v1363_v36  ;;  %v4164_v59 = vcombine.low %v1355_v35, %v1363_v36  ;;  %v1318_v35 = vld [vmem:[%s6408_s0 + $0x68] sm:$0xff]  ;;  %v4228_v36 = vcombine.low %v1419_v24, %v1427_v25 }
 0x10b   : > { %v4167_v47 = vcombine.high %v1356_v38, %v1364_v39  ;;  %v1380_v55 = vld [vmem:[%s6408_s0 + $0x258] sm:$0xff] }
 0x10c   : > { %v4183_v0 = vcombine.high %v1372_v54, %v1380_v55 }
 0x110   : > { %3170 = vmatmul.mubr.bf16.gmra.mrb[20].mxu0 %v4192_v49  ;;  %v5008_v49 = vld [vmem:[%s5701_s15 + $0x2a0] sm:$0xff]  }
 0x111   : > { %3267 = vmatmul.mubr.bf16.gmra.mrb[20].mxu1 %v4194_v51  ;;  %3177 = vmatprep.mubr.bf16.mxu0 %v4209_v52  ;;  %v1371_v51 = vld [vmem:[%s6408_s0 + $0x210] sm:$0xff] }
 0x112   : > { %3274 = vmatprep.mubr.bf16.mxu1 %v4211_v53  ;;  %v1379_v52 = vld [vmem:[%s6408_s0 + $0x250] sm:$0xff]  ;;  %v5011_v53 = vld [vmem:[%s5701_s15 + $0x2e8] sm:$0xff]  }
 0x118   : > { %3178 = vmatmul.mubr.bf16.gmra.mrb[24].mxu0 %v4208_v60  ;;  %v5015_v60 = vld [vmem:[%s5701_s15 + $0x2f0] sm:$0xff]  }
 0x119   : > { %3275 = vmatmul.mubr.bf16.gmra.mrb[24].mxu1 %v4210_v61  ;;  %3185 = vmatprep.mubr.bf16.mxu0 %v4225_v62  ;;  %v4166_v61 = vcombine.low %v1356_v38, %v1364_v39  ;;  %v4181_v62 = vcombine.high %v1371_v51, %v1379_v52 }
 0x11a   : > { %3282 = vmatprep.mubr.bf16.mxu1 %v4227_v63  ;;  %v5014_v63 = vld [vmem:[%s5701_s15 + $0x230] sm:$0xff]  }
 0x120   : > { %3186 = vmatmul.mubr.bf16.gmra.mrb[28].mxu0 %v4224_v4  ;;  %v1395_v4 = vld [vmem:[%s6408_s0 + $0x2d0] sm:$0xff] }
 0x121   : > { %3283 = vmatmul.mubr.bf16.gmra.mrb[28].mxu1 %v4226_v5  ;;  %3323 = vmatprep.mubr.bf16.mxu0 %v4117_v6  ;;  %v5019_v5 = vld [vmem:[%s5701_s15 + $0x2f8] sm:$0xff]  }
 0x122   : > { %3420 = vmatprep.mubr.bf16.mxu1 %v4119_v7  ;;  %v1388_v6 = vld [vmem:[%s6408_s0 + $0x298] sm:$0xff] }
 0x123   : > { %v1396_v7 = vld [vmem:[%s6408_s0 + $0x2d8] sm:$0xff] }
 0x128   : > { %3324 = vmatmul.mubr.bf16.vlgmr.msra.gmra.mrb[32].mxu0 %v4116_v11  ;;  %v4180_v11 = vcombine.low %v1371_v51, %v1379_v52  ;;  %v5027_v51 = vld [vmem:[%s5701_s15 + $0x3c8] sm:$0xff]  }
 0x129   : > { %3421 = vmatmul.mubr.bf16.vlgmr.msra.gmra.mrb[32].mxu1 %v4118_v13  ;;  %4629 = vmatpush3.bf16.msra.mxu0 %v4990_v14  ;;  %v4182_v13 = vcombine.low %v1372_v54, %v1380_v55  ;;  %v4197_v14 = vcombine.high %v1387_v3, %v1395_v4  ;;  %v5026_v52 = vld [vmem:[%s5701_s15 + $0x308] sm:$0xff]   ;;  %v1341_v54 = vld [vmem:[%s6408_s0 + $0x120] sm:$0xff] }
 0x12a   : > { %4693 = vmatpush3.bf16.msra.mxu1 %v4992_v15  ;;  %3331 = vmatprep.mubr.bf16.mxu0 %v4133_v16  ;;  %v4199_v15 = vcombine.high %v1388_v6, %v1396_v7  ;;  %v1403_v16 = vld [vmem:[%s6408_s0 + $0x310] sm:$0xff]  ;;  %v1349_v55 = vld [vmem:[%s6408_s0 + $0x160] sm:$0xff] }
 0x12b   : > { %3428 = vmatprep.mubr.bf16.mxu1 %v4135_v17  ;;  %4630 = vmatprep.subr.bf16.mxu0 %v4993_v18  ;;  %v1411_v17 = vld [vmem:[%s6408_s0 + $0x350] sm:$0xff]  ;;  %v1404_v18 = vld [vmem:[%s6408_s0 + $0x318] sm:$0xff] }
 0x12c   : > { %4694 = vmatprep.subr.bf16.mxu1 %v4995_v20  ;;  %v4196_v20 = vcombine.low %v1387_v3, %v1395_v4  ;;  %v4213_v22 = vcombine.high %v1403_v16, %v1411_v17  ;;  %v5035_v3 = vld [vmem:[%s5701_s15 + $0x3d8] sm:$0xff]   ;;  %v1357_v4 = vld [vmem:[%s6408_s0 + $0x1a0] sm:$0xff] }
 0x12d   : > { %4631 = vmatpush3.bf16.msra.mxu0 %v4994_v19  ;;  %v1412_v19 = vld [vmem:[%s6408_s0 + $0x358] sm:$0xff] }
 0x12e   : > { %4695 = vmatpush3.bf16.msra.mxu1 %v4996_v21  ;;  %4632 = vmatprep.subr.bf16.mxu0 %v4997_v26  ;;  %v4198_v21 = vcombine.low %v1388_v6, %v1396_v7  ;;  %v4215_v23 = vcombine.high %v1404_v18, %v1412_v19  ;;  %v1420_v26 = vld [vmem:[%s6408_s0 + $0x398] sm:$0xff]  ;;  %v1358_v6 = vld [vmem:[%s6408_s0 + $0x1a8] sm:$0xff] }
 0x12f   : > { %4696 = vmatprep.subr.bf16.mxu1 %v4999_v27  ;;  %v1428_v27 = vld [vmem:[%s6408_s0 + $0x3d8] sm:$0xff] }
 0x130   : > { %3332 = vmatmul.mubr.bf16.gmra.mrb[36].mxu0 %v4132_v28  ;;  %v4212_v28 = vcombine.low %v1403_v16, %v1411_v17  ;;  %v5034_v7 = vld [vmem:[%s5701_s15 + $0x318] sm:$0xff]   ;;  %v5038_v16 = vld [vmem:[%s5701_s15 + $0x320] sm:$0xff]  }
 0x131   : > { %3429 = vmatmul.mubr.bf16.gmra.mrb[36].mxu1 %v4134_v29  ;;  %3339 = vmatprep.mubr.bf16.mxu0 %v4149_v30  ;;  %v4214_v29 = vcombine.low %v1404_v18, %v1412_v19  ;;  %v4229_v30 = vcombine.high %v1419_v24, %v1427_v25  ;;  %v5040_v17 = vld [vmem:[%s5701_s15 + $0x3a0] sm:$0xff]   ;;  %v5041_v18 = vld [vmem:[%s5701_s15 + $0x368] sm:$0xff]  }
 0x132   : > { %3436 = vmatprep.mubr.bf16.mxu1 %v4151_v32  ;;  %4633 = vmatpush3.bf16.msra.mxu0 %v4998_v31  ;;  %v4231_v31 = vcombine.high %v1420_v26, %v1428_v27  ;;  %v1309_v32 = vld [vmem:[%s6408_s0 + $0x20] sm:$0xff]  ;;  %v5043_v19 = vld [vmem:[%s5701_s15 + $0x3e8] sm:$0xff]  }
 0x133   : > { %4697 = vmatpush3.bf16.msra.mxu1 %v5000_v33  ;;  %4634 = vmatprep.subr.bf16.mxu0 %v5001_v34  ;;  %v1317_v33 = vld [vmem:[%s6408_s0 + $0x60] sm:$0xff]  ;;  %v1310_v34 = vld [vmem:[%s6408_s0 + $0x28] sm:$0xff] }
 0x134   : > { %4698 = vmatprep.subr.bf16.mxu1 %v5003_v37  ;;  %v4230_v37 = vcombine.low %v1420_v26, %v1428_v27  ;;  %v4121_v38 = vcombine.high %v1309_v32, %v1317_v33  ;;  %v4123_v39 = vcombine.high %v1310_v34, %v1318_v35  ;;  %v1382_v24 = vld [vmem:[%s6408_s0 + $0x268] sm:$0xff]  ;;  %v5045_v26 = vld [vmem:[%s5701_s15 + $0x370] sm:$0xff]  }
 0x135   : > { %v5044_v25 = vld [vmem:[%s5701_s15 + $0x3a8] sm:$0xff]  }
 0x136   : > { %4635 = vmatpush3.bf16.msra.mxu0 %v5002_v40  ;;  %v1325_v40 = vld [vmem:[%s6408_s0 + $0xa0] sm:$0xff] }
 0x137   : > { %4699 = vmatpush3.bf16.msra.mxu1 %v5004_v41  ;;  %4636 = vmatprep.subr.bf16.mxu0 %v5005_v42  ;;  %v1333_v41 = vld [vmem:[%s6408_s0 + $0xe0] sm:$0xff]  ;;  %v4120_v42 = vcombine.low %v1309_v32, %v1317_v33  ;;  %v5046_v32 = vld [vmem:[%s5701_s15 + $0x330] sm:$0xff]  }
 0x138   : > { %3340 = vmatmul.mubr.bf16.gmra.mrb[40].mxu0 %v4148_v43  ;;  %4700 = vmatprep.subr.bf16.mxu1 %v5007_v44  ;;  %v1326_v43 = vld [vmem:[%s6408_s0 + $0xa8] sm:$0xff]  ;;  %v5048_v33 = vld [vmem:[%s5701_s15 + $0x3b0] sm:$0xff]  }
 0x139   : > { %3437 = vmatmul.mubr.bf16.gmra.mrb[40].mxu1 %v4150_v45  ;;  %3347 = vmatprep.mubr.bf16.mxu0 %v4165_v46  ;;  %v1334_v44 = vld [vmem:[%s6408_s0 + $0xe8] sm:$0xff]  ;;  %v4122_v45 = vcombine.low %v1310_v34, %v1318_v35  ;;  %v5022_v46 = vld [vmem:[%s5701_s15 + $0x300] sm:$0xff]   ;;  %v5049_v34 = vld [vmem:[%s5701_s15 + $0x378] sm:$0xff]  }
 0x13a   : > { %3444 = vmatprep.mubr.bf16.mxu1 %v4167_v47  ;;  %4637 = vmatpush3.bf16.msra.mxu0 %v5006_v48  ;;  %v5024_v47 = vld [vmem:[%s5701_s15 + $0x380] sm:$0xff]   ;;  %v4137_v48 = vcombine.high %v1325_v40, %v1333_v41  ;;  %v5051_v35 = vld [vmem:[%s5701_s15 + $0x3f8] sm:$0xff]  }
 0x13b   : > { %4701 = vmatpush3.bf16.msra.mxu1 %v5008_v49  ;;  %4638 = vmatprep.subr.bf16.mxu0 %v5009_v50  ;;  %v4139_v49 = vcombine.high %v1326_v43, %v1334_v44  ;;  %v5025_v50 = vld [vmem:[%s5701_s15 + $0x348] sm:$0xff]  }
 0x13c   : > { %4702 = vmatprep.subr.bf16.mxu1 %v5011_v53  ;;  %v5028_v53 = vld [vmem:[%s5701_s15 + $0x388] sm:$0xff]  }
 0x13e   : > { %4639 = vmatpush3.bf16.msra.mxu0 %v5010_v56  ;;  %v5029_v56 = vld [vmem:[%s5701_s15 + $0x350] sm:$0xff]  }
 0x13f   : > { %4703 = vmatpush3.bf16.msra.mxu1 %v5012_v57  ;;  %4640 = vmatprep.subr.bf16.mxu0 %v5013_v58  ;;  %v1342_v57 = vld [vmem:[%s6408_s0 + $0x128] sm:$0xff] }
 0x140   : > { %3348 = vmatmul.mubr.bf16.gmra.mrb[44].mxu0 %v4164_v59  ;;  %4704 = vmatprep.subr.bf16.mxu1 %v5015_v60  ;;  %v1350_v58 = vld [vmem:[%s6408_s0 + $0x168] sm:$0xff]  ;;  %v5031_v59 = vld [vmem:[%s5701_s15 + $0x3d0] sm:$0xff]   ;;  %v4136_v60 = vcombine.low %v1325_v40, %v1333_v41  ;;  %v5052_v41 = vld [vmem:[%s5701_s15 + $0x3b8] sm:$0xff]  }
 0x141   : > { %3445 = vmatmul.mubr.bf16.gmra.mrb[44].mxu1 %v4166_v61  ;;  %3355 = vmatprep.mubr.bf16.mxu0 %v4181_v62  ;;  %v4138_v61 = vcombine.low %v1326_v43, %v1334_v44  ;;  %v4153_v62 = vcombine.high %v1341_v54, %v1349_v55  ;;  %v1398_v40 = vld [vmem:[%s6408_s0 + $0x2e8] sm:$0xff] }
 0x142   : > { %3452 = vmatprep.mubr.bf16.mxu1 %v4183_v0  ;;  %4641 = vmatpush3.bf16.msra.mxu0 %v5014_v63  ;;  %v4155_v63 = vcombine.high %v1342_v57, %v1350_v58  ;;  %v5030_v0 = vld [vmem:[%s5701_s15 + $0x310] sm:$0xff]  }
 0x143   : > { %4705 = vmatpush3.bf16.msra.mxu1 %v5016_v1  ;;  %4642 = vmatprep.subr.bf16.mxu0 %v5017_v2  ;;  %v5032_v1 = vld [vmem:[%s5701_s15 + $0x390] sm:$0xff]   ;;  %v5033_v2 = vld [vmem:[%s5701_s15 + $0x358] sm:$0xff]  }
 0x144   : > { %4706 = vmatprep.subr.bf16.mxu1 %v5019_v5  ;;  %v1365_v5 = vld [vmem:[%s6408_s0 + $0x1e0] sm:$0xff] }
 0x145   : > { %v4168_v27 = vcombine.low %v1357_v4, %v1365_v5 }
 0x146   : > { %4643 = vmatpush3.bf16.msra.mxu0 %v5018_v8  ;;  %v1366_v8 = vld [vmem:[%s6408_s0 + $0x1e8] sm:$0xff] }
 0x147   : > { %4707 = vmatpush3.bf16.msra.mxu1 %v5020_v9  ;;  %4756 = vmatprep.subr.bf16.mxu0 %v5021_v10  ;;  %v5036_v9 = vld [vmem:[%s5701_s15 + $0x398] sm:$0xff]   ;;  %v5037_v10 = vld [vmem:[%s5701_s15 + $0x360] sm:$0xff]  }
 0x148   : > { %3356 = vmatmul.mubr.bf16.gmra.mrb[48].mxu0 %v4180_v11  ;;  %4820 = vmatprep.subr.bf16.mxu1 %v5023_v12  ;;  %v4152_v11 = vcombine.low %v1341_v54, %v1349_v55  ;;  %v5039_v12 = vld [vmem:[%s5701_s15 + $0x3e0] sm:$0xff]  }
 0x149   : > { %3453 = vmatmul.mubr.bf16.gmra.mrb[48].mxu1 %v4182_v13  ;;  %3363 = vmatprep.mubr.bf16.mxu0 %v4197_v14  ;;  %v4154_v13 = vcombine.low %v1342_v57, %v1350_v58  ;;  %v4169_v14 = vcombine.high %v1357_v4, %v1365_v5  ;;  %v1421_v54 = vld [vmem:[%s6408_s0 + $0x3a0] sm:$0xff]  ;;  %v1430_v57 = vld [vmem:[%s6408_s0 + $0x3e8] sm:$0xff] }
 0x14a   : > { %3460 = vmatprep.mubr.bf16.mxu1 %v4199_v15  ;;  %v4171_v15 = vcombine.high %v1358_v6, %v1366_v8  ;;  %v1429_v55 = vld [vmem:[%s6408_s0 + $0x3e0] sm:$0xff] }
 0x150   : > { %3364 = vmatmul.mubr.bf16.gmra.mrb[52].mxu0 %v4196_v20  ;;  %v1373_v20 = vld [vmem:[%s6408_s0 + $0x220] sm:$0xff] }
 0x151   : > { %3461 = vmatmul.mubr.bf16.gmra.mrb[52].mxu1 %v4198_v21  ;;  %3371 = vmatprep.mubr.bf16.mxu0 %v4213_v22  ;;  %v1381_v21 = vld [vmem:[%s6408_s0 + $0x260] sm:$0xff]  ;;  %v1374_v22 = vld [vmem:[%s6408_s0 + $0x228] sm:$0xff] }
 0x152   : > { %3468 = vmatprep.mubr.bf16.mxu1 %v4215_v23  ;;  %v5042_v23 = vld [vmem:[%s5701_s15 + $0x328] sm:$0xff]   ;;  %v4186_v43 = vcombine.low %v1374_v22, %v1382_v24 }
 0x158   : > { %3372 = vmatmul.mubr.bf16.gmra.mrb[56].mxu0 %v4212_v28  ;;  %v5047_v28 = vld [vmem:[%s5701_s15 + $0x3f0] sm:$0xff]  }
 0x159   : > { %3469 = vmatmul.mubr.bf16.gmra.mrb[56].mxu1 %v4214_v29  ;;  %3379 = vmatprep.mubr.bf16.mxu0 %v4229_v30  ;;  %v4170_v29 = vcombine.low %v1358_v6, %v1366_v8  ;;  %v4185_v30 = vcombine.high %v1373_v20, %v1381_v21  ;;  %v1327_v6 = vld [vmem:[%s6408_s0 + $0xb0] sm:$0xff]  ;;  %v1328_v8 = vld [vmem:[%s6408_s0 + $0xb8] sm:$0xff] }
 0x15a   : > { %3476 = vmatprep.mubr.bf16.mxu1 %v4231_v31  ;;  %v4187_v31 = vcombine.high %v1374_v22, %v1382_v24  ;;  %v1359_v22 = vld [vmem:[%s6408_s0 + $0x1b0] sm:$0xff]  ;;  %v1360_v24 = vld [vmem:[%s6408_s0 + $0x1b8] sm:$0xff] }
 0x160   : > { %3380 = vmatmul.mubr.bf16.gmra.mrb[60].mxu0 %v4228_v36  ;;  %v1389_v36 = vld [vmem:[%s6408_s0 + $0x2a0] sm:$0xff] }
 0x161   : > { %3477 = vmatmul.mubr.bf16.gmra.mrb[60].mxu1 %v4230_v37  ;;  %3517 = vmatprep.mubr.bf16.mxu0 %v4121_v38  ;;  %v1397_v37 = vld [vmem:[%s6408_s0 + $0x2e0] sm:$0xff]  ;;  %v5050_v38 = vld [vmem:[%s5701_s15 + $0x338] sm:$0xff]   ;;  %s4111_s15 = sshll.u32 %s1224_s27, 7 }
 0x162   : > { %3614 = vmatprep.mubr.bf16.mxu1 %v4123_v39  ;;  %v1390_v39 = vld [vmem:[%s6408_s0 + $0x2a8] sm:$0xff]  ;;  %v4201_v44 = vcombine.high %v1389_v36, %v1397_v37  ;;  %s6339_s29 = scalar_lea.vmem [#allocation3], %s4111_s15 }
 0x168   : > { %3518 = vmatmul.mubr.bf16.vlgmr.msra.gmra.mrb[64].mxu0 %v4120_v42  ;;  %v4184_v42 = vcombine.low %v1373_v20, %v1381_v21 }
 0x169   : > { %3615 = vmatmul.mubr.bf16.vlgmr.msra.gmra.mrb[64].mxu1 %v4122_v45  ;;  %4757 = vmatpush3.bf16.msra.mxu0 %v5022_v46  ;;  %v4203_v45 = vcombine.high %v1390_v39, %v1398_v40  ;;  %v1405_v46 = vld [vmem:[%s6408_s0 + $0x320] sm:$0xff] }
 0x16a   : > { %4821 = vmatpush3.bf16.msra.mxu1 %v5024_v47  ;;  %3525 = vmatprep.mubr.bf16.mxu0 %v4137_v48  ;;  %v1413_v47 = vld [vmem:[%s6408_s0 + $0x360] sm:$0xff]  ;;  %v1406_v48 = vld [vmem:[%s6408_s0 + $0x328] sm:$0xff] }
 0x16b   : > { %3622 = vmatprep.mubr.bf16.mxu1 %v4139_v49  ;;  %4758 = vmatprep.subr.bf16.mxu0 %v5025_v50  ;;  %v1414_v49 = vld [vmem:[%s6408_s0 + $0x368] sm:$0xff]  ;;  %v4200_v50 = vcombine.low %v1389_v36, %v1397_v37  ;;  %v4216_v58 = vcombine.low %v1405_v46, %v1413_v47 }
 0x16c   : > { %4822 = vmatprep.subr.bf16.mxu1 %v5027_v51  ;;  %v4202_v51 = vcombine.low %v1390_v39, %v1398_v40 }
 0x16d   : > { %4759 = vmatpush3.bf16.msra.mxu0 %v5026_v52  ;;  %v4217_v52 = vcombine.high %v1405_v46, %v1413_v47 }
 0x16e   : > { %4823 = vmatpush3.bf16.msra.mxu1 %v5028_v53  ;;  %4760 = vmatprep.subr.bf16.mxu0 %v5029_v56  ;;  %v4219_v53 = vcombine.high %v1406_v48, %v1414_v49  ;;  %v1422_v56 = vld [vmem:[%s6408_s0 + $0x3a8] sm:$0xff] }
 0x16f   : > { %4824 = vmatprep.subr.bf16.mxu1 %v5031_v59  ;;  %v4218_v59 = vcombine.low %v1406_v48, %v1414_v49 }
 0x170   : > { %3526 = vmatmul.mubr.bf16.gmra.mrb[68].mxu0 %v4136_v60  ;;  %v4233_v60 = vcombine.high %v1421_v54, %v1429_v55 }
 0x171   : > { %3623 = vmatmul.mubr.bf16.gmra.mrb[68].mxu1 %v4138_v61  ;;  %3533 = vmatprep.mubr.bf16.mxu0 %v4153_v62  ;;  %v4235_v61 = vcombine.high %v1422_v56, %v1430_v57  ;;  %v1311_v62 = vld [vmem:[%s6408_s0 + $0x30] sm:$0xff] }
 0x172   : > { %3630 = vmatprep.mubr.bf16.mxu1 %v4155_v63  ;;  %4761 = vmatpush3.bf16.msra.mxu0 %v5030_v0  ;;  %v1319_v63 = vld [vmem:[%s6408_s0 + $0x70] sm:$0xff]  ;;  %v1312_v0 = vld [vmem:[%s6408_s0 + $0x38] sm:$0xff] }
 0x173   : > { %4825 = vmatpush3.bf16.msra.mxu1 %v5032_v1  ;;  %4762 = vmatprep.subr.bf16.mxu0 %v5033_v2  ;;  %v1320_v1 = vld [vmem:[%s6408_s0 + $0x78] sm:$0xff]  ;;  %v4232_v2 = vcombine.low %v1421_v54, %v1429_v55  ;;  %v4125_v4 = vcombine.high %v1311_v62, %v1319_v63 }
 0x174   : > { %4826 = vmatprep.subr.bf16.mxu1 %v5035_v3  ;;  %v4234_v3 = vcombine.low %v1422_v56, %v1430_v57  ;;  %v4127_v5 = vcombine.high %v1312_v0, %v1320_v1  ;;  %v1392_v55 = vld [vmem:[%s6408_s0 + $0x2b8] sm:$0xff] }
 0x175   : > { %v1400_v56 = vld [vmem:[%s6408_s0 + $0x2f8] sm:$0xff] }
 0x176   : > { %4763 = vmatpush3.bf16.msra.mxu0 %v5034_v7  ;;  %v1335_v7 = vld [vmem:[%s6408_s0 + $0xf0] sm:$0xff] }
 0x177   : > { %4827 = vmatpush3.bf16.msra.mxu1 %v5036_v9  ;;  %4764 = vmatprep.subr.bf16.mxu0 %v5037_v10  ;;  %v1336_v9 = vld [vmem:[%s6408_s0 + $0xf8] sm:$0xff]  ;;  %v4124_v10 = vcombine.low %v1311_v62, %v1319_v63 }
 0x178   : > { %3534 = vmatmul.mubr.bf16.gmra.mrb[72].mxu0 %v4152_v11  ;;  %4828 = vmatprep.subr.bf16.mxu1 %v5039_v12  ;;  %v4126_v11 = vcombine.low %v1312_v0, %v1320_v1  ;;  %v4141_v12 = vcombine.high %v1327_v6, %v1335_v7 }
 0x179   : > { %3631 = vmatmul.mubr.bf16.gmra.mrb[72].mxu1 %v4154_v13  ;;  %3541 = vmatprep.mubr.bf16.mxu0 %v4169_v14  ;;  %v4143_v13 = vcombine.high %v1328_v8, %v1336_v9  ;;  %v1343_v14 = vld [vmem:[%s6408_s0 + $0x130] sm:$0xff] }
 0x17a   : > { %3638 = vmatprep.mubr.bf16.mxu1 %v4171_v15  ;;  %4765 = vmatpush3.bf16.msra.mxu0 %v5038_v16  ;;  %v1351_v15 = vld [vmem:[%s6408_s0 + $0x170] sm:$0xff]  ;;  %v1344_v16 = vld [vmem:[%s6408_s0 + $0x138] sm:$0xff] }
 0x17b   : > { %4829 = vmatpush3.bf16.msra.mxu1 %v5040_v17  ;;  %4766 = vmatprep.subr.bf16.mxu0 %v5041_v18  ;;  %v1352_v17 = vld [vmem:[%s6408_s0 + $0x178] sm:$0xff]  ;;  %v4140_v18 = vcombine.low %v1327_v6, %v1335_v7  ;;  %v4157_v20 = vcombine.high %v1343_v14, %v1351_v15 }
 0x17c   : > { %4830 = vmatprep.subr.bf16.mxu1 %v5043_v19  ;;  %v4142_v19 = vcombine.low %v1328_v8, %v1336_v9  ;;  %v4159_v21 = vcombine.high %v1344_v16, %v1352_v17 }
 0x17e   : > { %4767 = vmatpush3.bf16.msra.mxu0 %v5042_v23  ;;  %v1367_v23 = vld [vmem:[%s6408_s0 + $0x1f0] sm:$0xff] }
 0x17f   : > { %4831 = vmatpush3.bf16.msra.mxu1 %v5044_v25  ;;  %4768 = vmatprep.subr.bf16.mxu0 %v5045_v26  ;;  %v1368_v25 = vld [vmem:[%s6408_s0 + $0x1f8] sm:$0xff]  ;;  %v4156_v26 = vcombine.low %v1343_v14, %v1351_v15  ;;  %v4172_v37 = vcombine.low %v1359_v22, %v1367_v23 }
 0x180   : > { %3542 = vmatmul.mubr.bf16.gmra.mrb[76].mxu0 %v4168_v27  ;;  %4832 = vmatprep.subr.bf16.mxu1 %v5047_v28  ;;  %v4158_v27 = vcombine.low %v1344_v16, %v1352_v17  ;;  %v4173_v28 = vcombine.high %v1359_v22, %v1367_v23  ;;  %v1416_v14 = vld [vmem:[%s6408_s0 + $0x378] sm:$0xff] }
 0x181   : > { %3639 = vmatmul.mubr.bf16.gmra.mrb[76].mxu1 %v4170_v29  ;;  %3549 = vmatprep.mubr.bf16.mxu0 %v4185_v30  ;;  %v4175_v29 = vcombine.high %v1360_v24, %v1368_v25  ;;  %v1375_v30 = vld [vmem:[%s6408_s0 + $0x230] sm:$0xff] }
 0x182   : > { %3646 = vmatprep.mubr.bf16.mxu1 %v4187_v31  ;;  %4769 = vmatpush3.bf16.msra.mxu0 %v5046_v32  ;;  %v1383_v31 = vld [vmem:[%s6408_s0 + $0x270] sm:$0xff] }
 0x183   : > { %4833 = vmatpush3.bf16.msra.mxu1 %v5048_v33  ;;  %4770 = vmatprep.subr.bf16.mxu0 %v5049_v34  ;;  %v1376_v33 = vld [vmem:[%s6408_s0 + $0x238] sm:$0xff] }
 0x184   : > { %4834 = vmatprep.subr.bf16.mxu1 %v5051_v35  ;;  %v1384_v34 = vld [vmem:[%s6408_s0 + $0x278] sm:$0xff] }
 0x185   : > { %v4191_v46 = vcombine.high %v1376_v33, %v1384_v34  ;;  %v4190_v63 = vcombine.low %v1376_v33, %v1384_v34  ;;  %v1431_v33 = vld [vmem:[%s6408_s0 + $0x3f0] sm:$0xff] }
 0x186   : > { %4771 = vmatpush3.bf16.msra.mxu0 %v5050_v38 }
 0x187   : > { %4835 = vmatpush3.bf16.msra.mxu1 %v5052_v41  ;;  %v4174_v41 = vcombine.low %v1360_v24, %v1368_v25 }
 0x188   : > { %3550 = vmatmul.mubr.bf16.gmra.mrb[80].mxu0 %v4184_v42  ;;  %v4189_v42 = vcombine.high %v1375_v30, %v1383_v31 }
 0x189   : > { %3647 = vmatmul.mubr.bf16.gmra.mrb[80].mxu1 %v4186_v43  ;;  %3557 = vmatprep.mubr.bf16.mxu0 %v4201_v44 }
 0x18a   : > { %3654 = vmatprep.mubr.bf16.mxu1 %v4203_v45 }
 0x190   : > { %3558 = vmatmul.mubr.bf16.gmra.mrb[84].mxu0 %v4200_v50 }
 0x191   : > { %3655 = vmatmul.mubr.bf16.gmra.mrb[84].mxu1 %v4202_v51  ;;  %3565 = vmatprep.mubr.bf16.mxu0 %v4217_v52  ;;  %v1391_v52 = vld [vmem:[%s6408_s0 + $0x2b0] sm:$0xff] }
 0x192   : > { %3662 = vmatprep.mubr.bf16.mxu1 %v4219_v53  ;;  %v1399_v53 = vld [vmem:[%s6408_s0 + $0x2f0] sm:$0xff] }
 0x193   : > { %v4205_v0 = vcombine.high %v1391_v52, %v1399_v53  ;;  %v4204_v17 = vcombine.low %v1391_v52, %v1399_v53 }
 0x198   : > { %3566 = vmatmul.mubr.bf16.gmra.mrb[88].mxu0 %v4216_v58 }
 0x199   : > { %3663 = vmatmul.mubr.bf16.gmra.mrb[88].mxu1 %v4218_v59  ;;  %3573 = vmatprep.mubr.bf16.mxu0 %v4233_v60  ;;  %v4188_v59 = vcombine.low %v1375_v30, %v1383_v31 }
 0x19a   : > { %3670 = vmatprep.mubr.bf16.mxu1 %v4235_v61 }
 0x1a0   : > { %3574 = vmatmul.mubr.bf16.gmra.mrb[92].mxu0 %v4232_v2 }
 0x1a1   : > { %3671 = vmatmul.mubr.bf16.gmra.mrb[92].mxu1 %v4234_v3  ;;  %3711 = vmatprep.mubr.bf16.mxu0 %v4125_v4  ;;  %v4207_v4 = vcombine.high %v1392_v55, %v1400_v56 }
 0x1a2   : > { %3808 = vmatprep.mubr.bf16.mxu1 %v4127_v5 }
 0x1a8   : > { %3712 = vmatmul.mubr.bf16.vlgmr.msra.gmra.mrb[96].mxu0 %v4124_v10  ;;  %v1407_v10 = vld [vmem:[%s6408_s0 + $0x330] sm:$0xff] }
 0x1a9   : > { %3809 = vmatmul.mubr.bf16.vlgmr.msra.gmra.mrb[96].mxu1 %v4126_v11  ;;  %3719 = vmatprep.mubr.bf16.mxu0 %v4141_v12  ;;  %v1415_v11 = vld [vmem:[%s6408_s0 + $0x370] sm:$0xff] }
 0x1aa   : > { %3816 = vmatprep.mubr.bf16.mxu1 %v4143_v13  ;;  %v1408_v13 = vld [vmem:[%s6408_s0 + $0x338] sm:$0xff]  ;;  %v4221_v22 = vcombine.high %v1407_v10, %v1415_v11 }
 0x1b0   : > { %3720 = vmatmul.mubr.bf16.gmra.mrb[100].mxu0 %v4140_v18 }
 0x1b1   : > { %3817 = vmatmul.mubr.bf16.gmra.mrb[100].mxu1 %v4142_v19  ;;  %3727 = vmatprep.mubr.bf16.mxu0 %v4157_v20 }
 0x1b2   : > { %3824 = vmatprep.mubr.bf16.mxu1 %v4159_v21  ;;  %v4206_v21 = vcombine.low %v1392_v55, %v1400_v56 }
 0x1b8   : > { %3728 = vmatmul.mubr.bf16.gmra.mrb[104].mxu0 %v4156_v26  ;;  %v4223_v26 = vcombine.high %v1408_v13, %v1416_v14 }
 0x1b9   : > { %3825 = vmatmul.mubr.bf16.gmra.mrb[104].mxu1 %v4158_v27  ;;  %3735 = vmatprep.mubr.bf16.mxu0 %v4173_v28 }
 0x1ba   : > { %3832 = vmatprep.mubr.bf16.mxu1 %v4175_v29 }
 0x1bb   : > { %v4388_v32 = vpop.f32.mrb[0].mxu0 }
 0x1bc   : > { %v4452_v35 = vpop.f32.mrb[0].mxu1  ;;  %v4389_v36 = vpop.f32.mrb[1].mxu0 }
 0x1bd   : > { %v4390_v38 = vadd.f32 %v4389_v36, %v4388_v32  ;;  %v4453_v39 = vpop.f32.mrb[1].mxu1  ;;  %v4391_v40 = vpop.f32.mrb[2].mxu0  ;;  %v1423_v32 = vld [vmem:[%s6408_s0 + $0x3b0] sm:$0xff]  ;;  %v1432_v36 = vld [vmem:[%s6408_s0 + $0x3f8] sm:$0xff] }
 0x1be   : > { %v4454_v43 = vadd.f32 %v4453_v39, %v4452_v35  ;;  %v4455_v44 = vpop.f32.mrb[2].mxu1  ;;  %v4392_v45 = vpop.f32.mrb[3].mxu0  ;;  %v1424_v35 = vld [vmem:[%s6408_s0 + $0x3b8] sm:$0xff]  ;;  %v4220_v39 = vcombine.low %v1407_v10, %v1415_v11 }
 0x1bf   : > { %v4393_v47 = vadd.f32 %v4392_v45, %v4391_v40  ;;  %v4456_v48 = vpop.f32.mrb[3].mxu1 }
 0x1c0   : > { %v6171_v49 = vadd.f32 %v4454_v43, %v4390_v38  ;;  %v4457_v50 = vadd.f32 %v4456_v48, %v4455_v44  ;;  %3736 = vmatmul.mubr.bf16.gmra.mrb[108].mxu0 %v4172_v37  ;;  %v4222_v43 = vcombine.low %v1408_v13, %v1416_v14  ;;  %v4237_v44 = vcombine.high %v1423_v32, %v1431_v33 }
 0x1c1   : > { %3833 = vmatmul.mubr.bf16.gmra.mrb[108].mxu1 %v4174_v41  ;;  %3743 = vmatprep.mubr.bf16.mxu0 %v4189_v42  ;;  %v4239_v48 = vcombine.high %v1424_v35, %v1432_v36 }
 0x1c2   : > { %v6173_v51 = vadd.f32 %v4457_v50, %v4393_v47  ;;  %3840 = vmatprep.mubr.bf16.mxu1 %v4191_v46 }
 0x1c3   : > { %v4394_v54 = vpop.f32.mrb[4].mxu0 }
 0x1c4   : > { %v4458_v57 = vpop.f32.mrb[4].mxu1  ;;  %v4395_v58 = vpop.f32.mrb[5].mxu0 }
 0x1c5   : > { %v4396_v60 = vadd.f32 %v4395_v58, %v4394_v54  ;;  %v4459_v61 = vpop.f32.mrb[5].mxu1  ;;  %v4397_v62 = vpop.f32.mrb[6].mxu0 }
 0x1c6   : > { %v4460_v1 = vadd.f32 %v4459_v61, %v4458_v57  ;;  %v4461_v2 = vpop.f32.mrb[6].mxu1  ;;  %v4398_v3 = vpop.f32.mrb[7].mxu0 }
 0x1c7   : > { %v4399_v5 = vadd.f32 %v4398_v3, %v4397_v62  ;;  %v4462_v6 = vpop.f32.mrb[7].mxu1 }
 0x1c8   : > { %v6187_v7 = vadd.f32 %v4460_v1, %v4396_v60  ;;  %v4463_v8 = vadd.f32 %v4462_v6, %v4461_v2  ;;  %3744 = vmatmul.mubr.bf16.gmra.mrb[112].mxu0 %v4188_v59  ;;  %v4236_v59 = vcombine.low %v1423_v32, %v1431_v33 }
 0x1c9   : > { %3841 = vmatmul.mubr.bf16.gmra.mrb[112].mxu1 %v4190_v63  ;;  %3751 = vmatprep.mubr.bf16.mxu0 %v4205_v0  ;;  %v4238_v63 = vcombine.low %v1424_v35, %v1432_v36 }
 0x1ca   : > { %v6189_v9 = vadd.f32 %v4463_v8, %v4399_v5  ;;  %3848 = vmatprep.mubr.bf16.mxu1 %v4207_v4 }
 0x1cb   : > { %v4400_v12 = vpop.f32.mrb[8].mxu0 }
 0x1cc   : > { %v4464_v15 = vpop.f32.mrb[8].mxu1  ;;  %v4401_v16 = vpop.f32.mrb[9].mxu0 }
 0x1cd   : > { %v4402_v18 = vadd.f32 %v4401_v16, %v4400_v12  ;;  %v4465_v19 = vpop.f32.mrb[9].mxu1  ;;  %v4403_v20 = vpop.f32.mrb[10].mxu0 }
 0x1ce   : > { %v4466_v23 = vadd.f32 %v4465_v19, %v4464_v15  ;;  %v4467_v24 = vpop.f32.mrb[10].mxu1  ;;  %v4404_v25 = vpop.f32.mrb[11].mxu0 }
 0x1cf   : > { %v4405_v27 = vadd.f32 %v4404_v25, %v4403_v20  ;;  %v4468_v28 = vpop.f32.mrb[11].mxu1 }
 0x1d0   : > { %v6203_v29 = vadd.f32 %v4466_v23, %v4402_v18  ;;  %v4469_v30 = vadd.f32 %v4468_v28, %v4467_v24  ;;  %3752 = vmatmul.mubr.bf16.gmra.mrb[116].mxu0 %v4204_v17 }
 0x1d1   : > { %3849 = vmatmul.mubr.bf16.gmra.mrb[116].mxu1 %v4206_v21  ;;  %3759 = vmatprep.mubr.bf16.mxu0 %v4221_v22 }
 0x1d2   : > { %v6205_v31 = vadd.f32 %v4469_v30, %v4405_v27  ;;  %3856 = vmatprep.mubr.bf16.mxu1 %v4223_v26 }
 0x1d3   : > { %v4406_v34 = vpop.f32.mrb[12].mxu0 }
 0x1d4   : > { %v4470_v37 = vpop.f32.mrb[12].mxu1  ;;  %v4407_v38 = vpop.f32.mrb[13].mxu0 }
 0x1d5   : > { %v4408_v40 = vadd.f32 %v4407_v38, %v4406_v34  ;;  %v4471_v41 = vpop.f32.mrb[13].mxu1  ;;  %v4409_v42 = vpop.f32.mrb[14].mxu0 }
 0x1d6   : > { %v4472_v45 = vadd.f32 %v4471_v41, %v4470_v37  ;;  %v4473_v46 = vpop.f32.mrb[14].mxu1  ;;  %v4410_v47 = vpop.f32.mrb[15].mxu0 }
 0x1d7   : > { %v4411_v50 = vadd.f32 %v4410_v47, %v4409_v42  ;;  %v4474_v52 = vpop.f32.mrb[15].mxu1 }
 0x1d8   : > { %v6219_v53 = vadd.f32 %v4472_v45, %v4408_v40  ;;  %v4475_v54 = vadd.f32 %v4474_v52, %v4473_v46  ;;  %3760 = vmatmul.mubr.bf16.gmra.mrb[120].mxu0 %v4220_v39 }
 0x1d9   : > { %3857 = vmatmul.mubr.bf16.gmra.mrb[120].mxu1 %v4222_v43  ;;  %3767 = vmatprep.mubr.bf16.mxu0 %v4237_v44 }
 0x1da   : > { %v6221_v55 = vadd.f32 %v4475_v54, %v4411_v50  ;;  %3864 = vmatprep.mubr.bf16.mxu1 %v4239_v48 }
 0x1db   : > { %v4412_v56 = vpop.f32.mrb[16].mxu0 }
 0x1dc   : > { %v4476_v57 = vpop.f32.mrb[16].mxu1  ;;  %v4413_v58 = vpop.f32.mrb[17].mxu0 }
 0x1dd   : > { %v4414_v60 = vadd.f32 %v4413_v58, %v4412_v56  ;;  %v4477_v61 = vpop.f32.mrb[17].mxu1  ;;  %v4415_v62 = vpop.f32.mrb[18].mxu0 }
 0x1de   : > { %v4478_v0 = vadd.f32 %v4477_v61, %v4476_v57  ;;  %v4479_v1 = vpop.f32.mrb[18].mxu1  ;;  %v4416_v2 = vpop.f32.mrb[19].mxu0 }
 0x1df   : > { %v4417_v3 = vadd.f32 %v4416_v2, %v4415_v62  ;;  %v4480_v4 = vpop.f32.mrb[19].mxu1 }
 0x1e0   : > { %v6223_v5 = vadd.f32 %v4478_v0, %v4414_v60  ;;  %v4481_v6 = vadd.f32 %v4480_v4, %v4479_v1  ;;  %3768 = vmatmul.mubr.bf16.gmra.mrb[124].mxu0 %v4236_v59 }
 0x1e1   : > { %3865 = vmatmul.mubr.bf16.gmra.mrb[124].mxu1 %v4238_v63 }
 0x1e2   : > { %v6225_v8 = vadd.f32 %v4481_v6, %v4417_v3 }
 0x1e3   : > { %v4418_v10 = vpop.f32.mrb[20].mxu0 }
 0x1e4   : > { %v4482_v11 = vpop.f32.mrb[20].mxu1  ;;  %v4419_v12 = vpop.f32.mrb[21].mxu0 }
 0x1e5   : > { %v4420_v13 = vadd.f32 %v4419_v12, %v4418_v10  ;;  %v4483_v14 = vpop.f32.mrb[21].mxu1  ;;  %v4421_v15 = vpop.f32.mrb[22].mxu0 }
 0x1e6   : > { %v4484_v16 = vadd.f32 %v4483_v14, %v4482_v11  ;;  %v4485_v17 = vpop.f32.mrb[22].mxu1  ;;  %v4422_v18 = vpop.f32.mrb[23].mxu0 }
 0x1e7   : > { %v4423_v19 = vadd.f32 %v4422_v18, %v4421_v15  ;;  %v4486_v20 = vpop.f32.mrb[23].mxu1 }
 0x1e8   : > { %v6227_v21 = vadd.f32 %v4484_v16, %v4420_v13  ;;  %v4487_v22 = vadd.f32 %v4486_v20, %v4485_v17 }
 0x1ea   : > { %v6229_v23 = vadd.f32 %v4487_v22, %v4423_v19 }
 0x1eb   : > { %v4424_v24 = vpop.f32.mrb[24].mxu0 }
 0x1ec   : > { %v4488_v25 = vpop.f32.mrb[24].mxu1  ;;  %v4425_v26 = vpop.f32.mrb[25].mxu0 }
 0x1ed   : > { %v4426_v27 = vadd.f32 %v4425_v26, %v4424_v24  ;;  %v4489_v28 = vpop.f32.mrb[25].mxu1  ;;  %v4427_v30 = vpop.f32.mrb[26].mxu0 }
 0x1ee   : > { %v4490_v32 = vadd.f32 %v4489_v28, %v4488_v25  ;;  %v4491_v33 = vpop.f32.mrb[26].mxu1  ;;  %v4428_v34 = vpop.f32.mrb[27].mxu0 }
 0x1ef   : > { %v4429_v35 = vadd.f32 %v4428_v34, %v4427_v30  ;;  %v4492_v36 = vpop.f32.mrb[27].mxu1 }
 0x1f0   : > { %v6231_v37 = vadd.f32 %v4490_v32, %v4426_v27  ;;  %v4493_v38 = vadd.f32 %v4492_v36, %v4491_v33 }
 0x1f2   : > { %v6233_v39 = vadd.f32 %v4493_v38, %v4429_v35 }
 0x1f3   : > { %v4430_v40 = vpop.f32.mrb[28].mxu0 }
 0x1f4   : > { %v4494_v41 = vpop.f32.mrb[28].mxu1  ;;  %v4431_v42 = vpop.f32.mrb[29].mxu0 }
 0x1f5   : > { %v4432_v43 = vadd.f32 %v4431_v42, %v4430_v40  ;;  %v4495_v44 = vpop.f32.mrb[29].mxu1  ;;  %v4433_v45 = vpop.f32.mrb[30].mxu0 }
 0x1f6   : > { %v4496_v46 = vadd.f32 %v4495_v44, %v4494_v41  ;;  %v4497_v47 = vpop.f32.mrb[30].mxu1  ;;  %v4434_v48 = vpop.f32.mrb[31].mxu0 }
 0x1f7   : > { %v4435_v50 = vadd.f32 %v4434_v48, %v4433_v45  ;;  %v4498_v52 = vpop.f32.mrb[31].mxu1 }
 0x1f8   : > { %v6235_v54 = vadd.f32 %v4496_v46, %v4432_v43  ;;  %v4499_v56 = vadd.f32 %v4498_v52, %v4497_v47 }
 0x1fa   : > { %v6237_v57 = vadd.f32 %v4499_v56, %v4435_v50 }
 0x1fb   : > { %v4516_v58 = vpop.f32.mrb[32].mxu0 }
 0x1fc   : > { %v4580_v59 = vpop.f32.mrb[32].mxu1  ;;  %v4517_v60 = vpop.f32.mrb[33].mxu0 }
 0x1fd   : > { %v4518_v61 = vadd.f32 %v4517_v60, %v4516_v58  ;;  %v4581_v62 = vpop.f32.mrb[33].mxu1  ;;  %v4519_v63 = vpop.f32.mrb[34].mxu0 }
 0x1fe   : > { %v4582_v0 = vadd.f32 %v4581_v62, %v4580_v59  ;;  %v4583_v1 = vpop.f32.mrb[34].mxu1  ;;  %v4520_v2 = vpop.f32.mrb[35].mxu0 }
 0x1ff   : > { %v3326_v3 = vadd.f32 %v4518_v61, %v6171_v49  ;;  %v4521_v4 = vadd.f32 %v4520_v2, %v4519_v63  ;;  %v4584_v6 = vpop.f32.mrb[35].mxu1 }
 0x200   : > { %v4585_v10 = vadd.f32 %v4584_v6, %v4583_v1 }
 0x201   : > { %v6240_v11 = vadd.f32 %v4582_v0, %v3326_v3  ;;  %v3329_v12 = vadd.f32 %v4521_v4, %v6173_v51 }
 0x203   : > { %v6243_v13 = vadd.f32 %v4585_v10, %v3329_v12  ;;  %v4522_v14 = vpop.f32.mrb[36].mxu0 }
 0x204   : > { %v4586_v15 = vpop.f32.mrb[36].mxu1  ;;  %v4523_v16 = vpop.f32.mrb[37].mxu0 }
 0x205   : > { %v4524_v17 = vadd.f32 %v4523_v16, %v4522_v14  ;;  %v4587_v18 = vpop.f32.mrb[37].mxu1  ;;  %v4525_v19 = vpop.f32.mrb[38].mxu0 }
 0x206   : > { %v4588_v20 = vadd.f32 %v4587_v18, %v4586_v15  ;;  %v4589_v22 = vpop.f32.mrb[38].mxu1  ;;  %v4526_v24 = vpop.f32.mrb[39].mxu0 }
 0x207   : > { %v3334_v49 = vadd.f32 %v4524_v17, %v6187_v7  ;;  %v4527_v25 = vadd.f32 %v4526_v24, %v4525_v19  ;;  %v4590_v26 = vpop.f32.mrb[39].mxu1 }
 0x208   : > { %v4591_v27 = vadd.f32 %v4590_v26, %v4589_v22 }
 0x209   : > { %v6246_v28 = vadd.f32 %v4588_v20, %v3334_v49  ;;  %v3337_v51 = vadd.f32 %v4527_v25, %v6189_v9 }
 0x20b   : > { %v6249_v30 = vadd.f32 %v4591_v27, %v3337_v51  ;;  %v4528_v32 = vpop.f32.mrb[40].mxu0 }
 0x20c   : > { %v4592_v33 = vpop.f32.mrb[40].mxu1  ;;  %v4529_v34 = vpop.f32.mrb[41].mxu0 }
 0x20d   : > { %v4530_v35 = vadd.f32 %v4529_v34, %v4528_v32  ;;  %v4593_v36 = vpop.f32.mrb[41].mxu1  ;;  %v4531_v38 = vpop.f32.mrb[42].mxu0 }
 0x20e   : > { %v4594_v40 = vadd.f32 %v4593_v36, %v4592_v33  ;;  %v4595_v41 = vpop.f32.mrb[42].mxu1  ;;  %v4532_v42 = vpop.f32.mrb[43].mxu0 }
 0x20f   : > { %v3342_v7 = vadd.f32 %v4530_v35, %v6203_v29  ;;  %v4533_v43 = vadd.f32 %v4532_v42, %v4531_v38  ;;  %v4596_v44 = vpop.f32.mrb[43].mxu1 }
 0x210   : > { %v4597_v45 = vadd.f32 %v4596_v44, %v4595_v41 }
 0x211   : > { %v6252_v46 = vadd.f32 %v4594_v40, %v3342_v7  ;;  %v3345_v9 = vadd.f32 %v4533_v43, %v6205_v31 }
 0x213   : > { %v6255_v47 = vadd.f32 %v4597_v45, %v3345_v9  ;;  %v4534_v48 = vpop.f32.mrb[44].mxu0 }
 0x214   : > { %v4598_v50 = vpop.f32.mrb[44].mxu1  ;;  %v4535_v52 = vpop.f32.mrb[45].mxu0 }
 0x215   : > { %v4536_v56 = vadd.f32 %v4535_v52, %v4534_v48  ;;  %v4599_v58 = vpop.f32.mrb[45].mxu1  ;;  %v4537_v59 = vpop.f32.mrb[46].mxu0 }
 0x216   : > { %v4600_v60 = vadd.f32 %v4599_v58, %v4598_v50  ;;  %v4601_v61 = vpop.f32.mrb[46].mxu1  ;;  %v4538_v62 = vpop.f32.mrb[47].mxu0 }
 0x217   : > { %v3350_v29 = vadd.f32 %v4536_v56, %v6219_v53  ;;  %v4539_v63 = vadd.f32 %v4538_v62, %v4537_v59  ;;  %v4602_v0 = vpop.f32.mrb[47].mxu1 }
 0x218   : > { %v4603_v1 = vadd.f32 %v4602_v0, %v4601_v61 }
 0x219   : > { %v6258_v2 = vadd.f32 %v4600_v60, %v3350_v29  ;;  %v3353_v31 = vadd.f32 %v4539_v63, %v6221_v55 }
 0x21b   : > { %v6261_v3 = vadd.f32 %v4603_v1, %v3353_v31  ;;  %v4540_v4 = vpop.f32.mrb[48].mxu0 }
 0x21c   : > { %v4604_v6 = vpop.f32.mrb[48].mxu1  ;;  %v4541_v10 = vpop.f32.mrb[49].mxu0 }
 0x21d   : > { %v4542_v12 = vadd.f32 %v4541_v10, %v4540_v4  ;;  %v4605_v14 = vpop.f32.mrb[49].mxu1  ;;  %v4543_v15 = vpop.f32.mrb[50].mxu0 }
 0x21e   : > { %v4606_v16 = vadd.f32 %v4605_v14, %v4604_v6  ;;  %v4607_v17 = vpop.f32.mrb[50].mxu1  ;;  %v4544_v18 = vpop.f32.mrb[51].mxu0 }
 0x21f   : > { %v3358_v53 = vadd.f32 %v4542_v12, %v6223_v5  ;;  %v4545_v19 = vadd.f32 %v4544_v18, %v4543_v15  ;;  %v4608_v20 = vpop.f32.mrb[51].mxu1 }
 0x220   : > { %v4609_v22 = vadd.f32 %v4608_v20, %v4607_v17 }
 0x221   : > { %v6264_v24 = vadd.f32 %v4606_v16, %v3358_v53  ;;  %v3361_v55 = vadd.f32 %v4545_v19, %v6225_v8 }
 0x223   : > { %v6267_v49 = vadd.f32 %v4609_v22, %v3361_v55  ;;  %v4546_v25 = vpop.f32.mrb[52].mxu0 }
 0x224   : > { %v4610_v26 = vpop.f32.mrb[52].mxu1  ;;  %v4547_v27 = vpop.f32.mrb[53].mxu0 }
 0x225   : > { %v4548_v51 = vadd.f32 %v4547_v27, %v4546_v25  ;;  %v4611_v32 = vpop.f32.mrb[53].mxu1  ;;  %v4549_v33 = vpop.f32.mrb[54].mxu0 }
 0x226   : > { %v4612_v34 = vadd.f32 %v4611_v32, %v4610_v26  ;;  %v4613_v35 = vpop.f32.mrb[54].mxu1  ;;  %v4550_v36 = vpop.f32.mrb[55].mxu0 }
 0x227   : > { %v3366_v5 = vadd.f32 %v4548_v51, %v6227_v21  ;;  %v4551_v38 = vadd.f32 %v4550_v36, %v4549_v33  ;;  %v4614_v40 = vpop.f32.mrb[55].mxu1 }
 0x228   : > { %v4615_v41 = vadd.f32 %v4614_v40, %v4613_v35 }
 0x229   : > { %v6270_v42 = vadd.f32 %v4612_v34, %v3366_v5  ;;  %v3369_v8 = vadd.f32 %v4551_v38, %v6229_v23 }
 0x22b   : > { %v6273_v7 = vadd.f32 %v4615_v41, %v3369_v8  ;;  %v4552_v43 = vpop.f32.mrb[56].mxu0 }
 0x22c   : > { %v4616_v44 = vpop.f32.mrb[56].mxu1  ;;  %v4553_v45 = vpop.f32.mrb[57].mxu0 }
 0x22d   : > { %v4554_v9 = vadd.f32 %v4553_v45, %v4552_v43  ;;  %v4617_v48 = vpop.f32.mrb[57].mxu1  ;;  %v4555_v50 = vpop.f32.mrb[58].mxu0 }
 0x22e   : > { %v4618_v52 = vadd.f32 %v4617_v48, %v4616_v44  ;;  %v4619_v56 = vpop.f32.mrb[58].mxu1  ;;  %v4556_v58 = vpop.f32.mrb[59].mxu0 }
 0x22f   : > { %v3374_v21 = vadd.f32 %v4554_v9, %v6231_v37  ;;  %v4557_v59 = vadd.f32 %v4556_v58, %v4555_v50  ;;  %v4620_v60 = vpop.f32.mrb[59].mxu1 }
 0x230   : > { %v4621_v61 = vadd.f32 %v4620_v60, %v4619_v56 }
 0x231   : > { %v6276_v62 = vadd.f32 %v4618_v52, %v3374_v21  ;;  %v3377_v23 = vadd.f32 %v4557_v59, %v6233_v39 }
 0x233   : > { %v6279_v29 = vadd.f32 %v4621_v61, %v3377_v23  ;;  %v4558_v63 = vpop.f32.mrb[60].mxu0 }
 0x234   : > { %v4622_v0 = vpop.f32.mrb[60].mxu1  ;;  %v4559_v1 = vpop.f32.mrb[61].mxu0 }
 0x235   : > { %v4560_v31 = vadd.f32 %v4559_v1, %v4558_v63  ;;  %v4623_v4 = vpop.f32.mrb[61].mxu1  ;;  %v4561_v6 = vpop.f32.mrb[62].mxu0 }
 0x236   : > { %v4624_v10 = vadd.f32 %v4623_v4, %v4622_v0  ;;  %v4625_v12 = vpop.f32.mrb[62].mxu1  ;;  %v4562_v14 = vpop.f32.mrb[63].mxu0 }
 0x237   : > { %v3382_v37 = vadd.f32 %v4560_v31, %v6235_v54  ;;  %v4563_v15 = vadd.f32 %v4562_v14, %v4561_v6  ;;  %v4626_v16 = vpop.f32.mrb[63].mxu1 }
 0x238   : > { %v4627_v17 = vadd.f32 %v4626_v16, %v4625_v12 }
 0x239   : > { %v6282_v18 = vadd.f32 %v4624_v10, %v3382_v37  ;;  %v3385_v39 = vadd.f32 %v4563_v15, %v6237_v57 }
 0x23b   : > { %v6285_v53 = vadd.f32 %v4627_v17, %v3385_v39  ;;  %v4644_v19 = vpop.f32.mrb[64].mxu0 }
 0x23c   : > { %v4708_v20 = vpop.f32.mrb[64].mxu1  ;;  %v4645_v22 = vpop.f32.mrb[65].mxu0 }
 0x23d   : > { %v4646_v55 = vadd.f32 %v4645_v22, %v4644_v19  ;;  %v4709_v25 = vpop.f32.mrb[65].mxu1  ;;  %v4647_v26 = vpop.f32.mrb[66].mxu0 }
 0x23e   : > { %v4710_v27 = vadd.f32 %v4709_v25, %v4708_v20  ;;  %v4711_v51 = vpop.f32.mrb[66].mxu1  ;;  %v4648_v32 = vpop.f32.mrb[67].mxu0 }
 0x23f   : > { %v3520_v54 = vadd.f32 %v4646_v55, %v6240_v11  ;;  %v4649_v33 = vadd.f32 %v4648_v32, %v4647_v26  ;;  %v4712_v34 = vpop.f32.mrb[67].mxu1 }
 0x240   : > { %v4713_v35 = vadd.f32 %v4712_v34, %v4711_v51 }
 0x241   : > { %v6288_v36 = vadd.f32 %v4710_v27, %v3520_v54  ;;  %v3523_v57 = vadd.f32 %v4649_v33, %v6243_v13 }
 0x243   : > { %v6291_v5 = vadd.f32 %v4713_v35, %v3523_v57  ;;  %v4650_v38 = vpop.f32.mrb[68].mxu0 }
 0x244   : > { %v4714_v40 = vpop.f32.mrb[68].mxu1  ;;  %v4651_v41 = vpop.f32.mrb[69].mxu0 }
 0x245   : > { %v4652_v8 = vadd.f32 %v4651_v41, %v4650_v38  ;;  %v4715_v43 = vpop.f32.mrb[69].mxu1  ;;  %v4653_v44 = vpop.f32.mrb[70].mxu0 }
 0x246   : > { %v4716_v45 = vadd.f32 %v4715_v43, %v4714_v40  ;;  %v4717_v9 = vpop.f32.mrb[70].mxu1  ;;  %v4654_v48 = vpop.f32.mrb[71].mxu0 }
 0x247   : > { %v3528_v11 = vadd.f32 %v4652_v8, %v6246_v28  ;;  %v4655_v50 = vadd.f32 %v4654_v48, %v4653_v44  ;;  %v4718_v52 = vpop.f32.mrb[71].mxu1 }
 0x248   : > { %v4719_v56 = vadd.f32 %v4718_v52, %v4717_v9 }
 0x249   : > { %v6294_v58 = vadd.f32 %v4716_v45, %v3528_v11  ;;  %v3531_v13 = vadd.f32 %v4655_v50, %v6249_v30 }
 0x24b   : > { %v6297_v21 = vadd.f32 %v4719_v56, %v3531_v13  ;;  %v4656_v59 = vpop.f32.mrb[72].mxu0 }
 0x24c   : > { %v4720_v60 = vpop.f32.mrb[72].mxu1  ;;  %v4657_v61 = vpop.f32.mrb[73].mxu0 }
 0x24d   : > { %v4658_v23 = vadd.f32 %v4657_v61, %v4656_v59  ;;  %v4721_v63 = vpop.f32.mrb[73].mxu1  ;;  %v4659_v0 = vpop.f32.mrb[74].mxu0 }
 0x24e   : > { %v4722_v1 = vadd.f32 %v4721_v63, %v4720_v60  ;;  %v4723_v31 = vpop.f32.mrb[74].mxu1  ;;  %v4660_v4 = vpop.f32.mrb[75].mxu0 }
 0x24f   : > { %v3536_v28 = vadd.f32 %v4658_v23, %v6252_v46  ;;  %v4661_v6 = vadd.f32 %v4660_v4, %v4659_v0  ;;  %v4724_v10 = vpop.f32.mrb[75].mxu1 }
 0x250   : > { %v4725_v12 = vadd.f32 %v4724_v10, %v4723_v31 }
 0x251   : > { %v6300_v14 = vadd.f32 %v4722_v1, %v3536_v28  ;;  %v3539_v30 = vadd.f32 %v4661_v6, %v6255_v47 }
 0x253   : > { %v6303_v37 = vadd.f32 %v4725_v12, %v3539_v30  ;;  %v4662_v15 = vpop.f32.mrb[76].mxu0 }
 0x254   : > { %v4726_v16 = vpop.f32.mrb[76].mxu1  ;;  %v4663_v17 = vpop.f32.mrb[77].mxu0 }
 0x255   : > { %v4664_v39 = vadd.f32 %v4663_v17, %v4662_v15  ;;  %v4727_v19 = vpop.f32.mrb[77].mxu1  ;;  %v4665_v20 = vpop.f32.mrb[78].mxu0 }
 0x256   : > { %v4728_v22 = vadd.f32 %v4727_v19, %v4726_v16  ;;  %v4729_v55 = vpop.f32.mrb[78].mxu1  ;;  %v4666_v25 = vpop.f32.mrb[79].mxu0 }
 0x257   : > { %v3544_v46 = vadd.f32 %v4664_v39, %v6258_v2  ;;  %v4667_v26 = vadd.f32 %v4666_v25, %v4665_v20  ;;  %v4730_v27 = vpop.f32.mrb[79].mxu1 }
 0x258   : > { %v4731_v51 = vadd.f32 %v4730_v27, %v4729_v55 }
 0x259   : > { %v6306_v32 = vadd.f32 %v4728_v22, %v3544_v46  ;;  %v3547_v47 = vadd.f32 %v4667_v26, %v6261_v3 }
 0x25b   : > { %v6309_v54 = vadd.f32 %v4731_v51, %v3547_v47  ;;  %v4668_v33 = vpop.f32.mrb[80].mxu0 }
 0x25c   : > { %v4732_v34 = vpop.f32.mrb[80].mxu1  ;;  %v4669_v35 = vpop.f32.mrb[81].mxu0 }
 0x25d   : > { %v4670_v57 = vadd.f32 %v4669_v35, %v4668_v33  ;;  %v4733_v38 = vpop.f32.mrb[81].mxu1  ;;  %v4671_v40 = vpop.f32.mrb[82].mxu0 }
 0x25e   : > { %v4734_v41 = vadd.f32 %v4733_v38, %v4732_v34  ;;  %v4735_v8 = vpop.f32.mrb[82].mxu1  ;;  %v4672_v43 = vpop.f32.mrb[83].mxu0 }
 0x25f   : > { %v3552_v2 = vadd.f32 %v4670_v57, %v6264_v24  ;;  %v4673_v44 = vadd.f32 %v4672_v43, %v4671_v40  ;;  %v4736_v45 = vpop.f32.mrb[83].mxu1 }
 0x260   : > { %v4737_v9 = vadd.f32 %v4736_v45, %v4735_v8 }
 0x261   : > { %v6312_v48 = vadd.f32 %v4734_v41, %v3552_v2  ;;  %v3555_v3 = vadd.f32 %v4673_v44, %v6267_v49 }
 0x263   : > { %v6315_v11 = vadd.f32 %v4737_v9, %v3555_v3  ;;  %v4674_v50 = vpop.f32.mrb[84].mxu0 }
 0x264   : > { %v4738_v52 = vpop.f32.mrb[84].mxu1  ;;  %v4675_v56 = vpop.f32.mrb[85].mxu0 }
 0x265   : > { %v4676_v13 = vadd.f32 %v4675_v56, %v4674_v50  ;;  %v4739_v59 = vpop.f32.mrb[85].mxu1  ;;  %v4677_v60 = vpop.f32.mrb[86].mxu0 }
 0x266   : > { %v4740_v61 = vadd.f32 %v4739_v59, %v4738_v52  ;;  %v4741_v23 = vpop.f32.mrb[86].mxu1  ;;  %v4678_v63 = vpop.f32.mrb[87].mxu0 }
 0x267   : > { %v3560_v24 = vadd.f32 %v4676_v13, %v6270_v42  ;;  %v4679_v0 = vadd.f32 %v4678_v63, %v4677_v60  ;;  %v4742_v1 = vpop.f32.mrb[87].mxu1 }
 0x268   : > { %v4743_v31 = vadd.f32 %v4742_v1, %v4741_v23 }
 0x269   : > { %v6318_v4 = vadd.f32 %v4740_v61, %v3560_v24  ;;  %v3563_v49 = vadd.f32 %v4679_v0, %v6273_v7 }
 0x26b   : > { %v6321_v28 = vadd.f32 %v4743_v31, %v3563_v49  ;;  %v4680_v6 = vpop.f32.mrb[88].mxu0 }
 0x26c   : > { %v4744_v10 = vpop.f32.mrb[88].mxu1  ;;  %v4681_v12 = vpop.f32.mrb[89].mxu0 }
 0x26d   : > { %v4682_v30 = vadd.f32 %v4681_v12, %v4680_v6  ;;  %v4745_v15 = vpop.f32.mrb[89].mxu1  ;;  %v4683_v16 = vpop.f32.mrb[90].mxu0 }
 0x26e   : > { %v4746_v17 = vadd.f32 %v4745_v15, %v4744_v10  ;;  %v4747_v39 = vpop.f32.mrb[90].mxu1  ;;  %v4684_v19 = vpop.f32.mrb[91].mxu0 }
 0x26f   : > { %v3568_v42 = vadd.f32 %v4682_v30, %v6276_v62  ;;  %v4685_v20 = vadd.f32 %v4684_v19, %v4683_v16  ;;  %v4748_v22 = vpop.f32.mrb[91].mxu1 }
 0x270   : > { %v4749_v55 = vadd.f32 %v4748_v22, %v4747_v39 }
 0x271   : > { %v6324_v25 = vadd.f32 %v4746_v17, %v3568_v42  ;;  %v3571_v7 = vadd.f32 %v4685_v20, %v6279_v29 }
 0x273   : > { %v6327_v46 = vadd.f32 %v4749_v55, %v3571_v7  ;;  %v4686_v26 = vpop.f32.mrb[92].mxu0 }
 0x274   : > { %v4750_v27 = vpop.f32.mrb[92].mxu1  ;;  %v4687_v51 = vpop.f32.mrb[93].mxu0 }
 0x275   : > { %v4688_v47 = vadd.f32 %v4687_v51, %v4686_v26  ;;  %v4751_v33 = vpop.f32.mrb[93].mxu1  ;;  %v4689_v34 = vpop.f32.mrb[94].mxu0 }
 0x276   : > { %v4752_v35 = vadd.f32 %v4751_v33, %v4750_v27  ;;  %v4753_v57 = vpop.f32.mrb[94].mxu1  ;;  %v4690_v38 = vpop.f32.mrb[95].mxu0 }
 0x277   : > { %v3576_v62 = vadd.f32 %v4688_v47, %v6282_v18  ;;  %v4691_v40 = vadd.f32 %v4690_v38, %v4689_v34  ;;  %v4754_v41 = vpop.f32.mrb[95].mxu1 }
 0x278   : > { %v4755_v8 = vadd.f32 %v4754_v41, %v4753_v57 }
 0x279   : > { %v6330_v43 = vadd.f32 %v4752_v35, %v3576_v62  ;;  %v3579_v29 = vadd.f32 %v4691_v40, %v6285_v53 }
 0x27b   : > { %v6333_v2 = vadd.f32 %v4755_v8, %v3579_v29  ;;  %v4772_v44 = vpop.f32.mrb[96].mxu0 }
 0x27c   : > { %v4836_v45 = vpop.f32.mrb[96].mxu1  ;;  %v4773_v9 = vpop.f32.mrb[97].mxu0 }
 0x27d   : > { %v4774_v3 = vadd.f32 %v4773_v9, %v4772_v44  ;;  %v4837_v50 = vpop.f32.mrb[97].mxu1  ;;  %v4775_v52 = vpop.f32.mrb[98].mxu0 }
 0x27e   : > { %v4838_v56 = vadd.f32 %v4837_v50, %v4836_v45  ;;  %v4839_v13 = vpop.f32.mrb[98].mxu1  ;;  %v4776_v59 = vpop.f32.mrb[99].mxu0 }
 0x27f   : > { %v3714_v18 = vadd.f32 %v4774_v3, %v6288_v36  ;;  %v4777_v60 = vadd.f32 %v4776_v59, %v4775_v52  ;;  %v4840_v61 = vpop.f32.mrb[99].mxu1 }
 0x280   : > { %v4841_v23 = vadd.f32 %v4840_v61, %v4839_v13 }
 0x281   : > { %v3811_v63 = vadd.f32 %v4838_v56, %v3714_v18  ;;  %v3717_v53 = vadd.f32 %v4777_v60, %v6291_v5 }
 0x283   : > { %v3814_v24 = vadd.f32 %v4841_v23, %v3717_v53  ;;  %v4778_v0 = vpop.f32.mrb[100].mxu0  ;;  %3889 = vst [vmem:[%s6339_s29] sm:$0xff] %v3811_v63 }
 0x284   : > { %v4842_v1 = vpop.f32.mrb[100].mxu1  ;;  %v4779_v31 = vpop.f32.mrb[101].mxu0 }
 0x285   : > { %v4780_v49 = vadd.f32 %v4779_v31, %v4778_v0  ;;  %v4843_v6 = vpop.f32.mrb[101].mxu1  ;;  %v4781_v36 = vpop.f32.mrb[102].mxu0  ;;  %3890 = vst [vmem:[%s6339_s29 + $0x8] sm:$0xff] %v3814_v24 }
 0x286   : > { %v4844_v10 = vadd.f32 %v4843_v6, %v4842_v1  ;;  %v4845_v12 = vpop.f32.mrb[102].mxu1  ;;  %v4782_v30 = vpop.f32.mrb[103].mxu0 }
 0x287   : > { %v3722_v15 = vadd.f32 %v4780_v49, %v6294_v58  ;;  %v4783_v5 = vadd.f32 %v4782_v30, %v4781_v36  ;;  %v4846_v16 = vpop.f32.mrb[103].mxu1 }
 0x288   : > { %v4847_v17 = vadd.f32 %v4846_v16, %v4845_v12 }
 0x289   : > { %v3819_v39 = vadd.f32 %v4844_v10, %v3722_v15  ;;  %v3725_v19 = vadd.f32 %v4783_v5, %v6297_v21 }
 0x28b   : > { %v3822_v42 = vadd.f32 %v4847_v17, %v3725_v19  ;;  %v4784_v20 = vpop.f32.mrb[104].mxu0  ;;  %3891 = vst [vmem:[%s6339_s29 + $0x10] sm:$0xff] %v3819_v39 }
 0x28c   : > { %v4848_v22 = vpop.f32.mrb[104].mxu1  ;;  %v4785_v55 = vpop.f32.mrb[105].mxu0 }
 0x28d   : > { %v4786_v7 = vadd.f32 %v4785_v55, %v4784_v20  ;;  %v4849_v26 = vpop.f32.mrb[105].mxu1  ;;  %v4787_v27 = vpop.f32.mrb[106].mxu0  ;;  %3892 = vst [vmem:[%s6339_s29 + $0x18] sm:$0xff] %v3822_v42 }
 0x28e   : > { %v4850_v51 = vadd.f32 %v4849_v26, %v4848_v22  ;;  %v4851_v47 = vpop.f32.mrb[106].mxu1  ;;  %v4788_v33 = vpop.f32.mrb[107].mxu0 }
 0x28f   : > { %v3730_v58 = vadd.f32 %v4786_v7, %v6300_v14  ;;  %v4789_v34 = vadd.f32 %v4788_v33, %v4787_v27  ;;  %v4852_v35 = vpop.f32.mrb[107].mxu1 }
 0x290   : > { %v4853_v57 = vadd.f32 %v4852_v35, %v4851_v47 }
 0x291   : > { %v3827_v21 = vadd.f32 %v4850_v51, %v3730_v58  ;;  %v3733_v38 = vadd.f32 %v4789_v34, %v6303_v37 }
 0x293   : > { %v3830_v62 = vadd.f32 %v4853_v57, %v3733_v38  ;;  %v4790_v40 = vpop.f32.mrb[108].mxu0  ;;  %3893 = vst [vmem:[%s6339_s29 + $0x20] sm:$0xff] %v3827_v21 }
 0x294   : > { %v4854_v41 = vpop.f32.mrb[108].mxu1  ;;  %v4791_v8 = vpop.f32.mrb[109].mxu0 }
 0x295   : > { %v4792_v29 = vadd.f32 %v4791_v8, %v4790_v40  ;;  %v4855_v44 = vpop.f32.mrb[109].mxu1  ;;  %v4793_v45 = vpop.f32.mrb[110].mxu0  ;;  %3894 = vst [vmem:[%s6339_s29 + $0x28] sm:$0xff] %v3830_v62 }
 0x296   : > { %v4856_v9 = vadd.f32 %v4855_v44, %v4854_v41  ;;  %v4857_v3 = vpop.f32.mrb[110].mxu1  ;;  %v4794_v50 = vpop.f32.mrb[111].mxu0 }
 0x297   : > { %v3738_v14 = vadd.f32 %v4792_v29, %v6306_v32  ;;  %v4795_v52 = vadd.f32 %v4794_v50, %v4793_v45  ;;  %v4858_v56 = vpop.f32.mrb[111].mxu1 }
 0x298   : > { %v4859_v13 = vadd.f32 %v4858_v56, %v4857_v3 }
 0x299   : > { %v3835_v37 = vadd.f32 %v4856_v9, %v3738_v14  ;;  %v3741_v59 = vadd.f32 %v4795_v52, %v6309_v54 }
 0x29b   : > { %v3838_v18 = vadd.f32 %v4859_v13, %v3741_v59  ;;  %v4796_v60 = vpop.f32.mrb[112].mxu0  ;;  %3895 = vst [vmem:[%s6339_s29 + $0x30] sm:$0xff] %v3835_v37 }
 0x29c   : > { %v4860_v61 = vpop.f32.mrb[112].mxu1  ;;  %v4797_v23 = vpop.f32.mrb[113].mxu0 }
 0x29d   : > { %v4798_v63 = vadd.f32 %v4797_v23, %v4796_v60  ;;  %v4861_v53 = vpop.f32.mrb[113].mxu1  ;;  %v4799_v24 = vpop.f32.mrb[114].mxu0  ;;  %3896 = vst [vmem:[%s6339_s29 + $0x38] sm:$0xff] %v3838_v18  ;;  %v3976_v23 = vld [vmem:[%s6339_s29 + $0x8] sm:$0xff] (%p5143_p6) }
 0x29e   : > { %v4862_v0 = vadd.f32 %v4861_v53, %v4860_v61  ;;  %v4863_v1 = vpop.f32.mrb[114].mxu1  ;;  %v4800_v31 = vpop.f32.mrb[115].mxu0  ;;  %v3982_v53 = vld [vmem:[%s6339_s29 + $0x20] sm:$0xff] (%p5143_p6)  ;;  %3977 = vst [vmem:[%s3916_s3 + $0x10] sm:$0xff] (%p5143_p6), %v3976_v23 }
 0x29f   : > { %v3746_v32 = vadd.f32 %v4798_v63, %v6312_v48  ;;  %v4801_v49 = vadd.f32 %v4800_v31, %v4799_v24  ;;  %v4864_v6 = vpop.f32.mrb[115].mxu1  ;;  %v3980_v63 = vld [vmem:[%s6339_s29 + $0x18] sm:$0xff] (%p5143_p6)  ;;  %v3984_v24 = vld [vmem:[%s6339_s29 + $0x28] sm:$0xff] (%p5143_p6)  ;;  %3983 = vst [vmem:[%s3916_s3 + $0x40] sm:$0xff] (%p5143_p6), %v3982_v53 }
 0x2a0   : > { %v4865_v36 = vadd.f32 %v4864_v6, %v4863_v1  ;;  %3981 = vst [vmem:[%s3916_s3 + $0x30] sm:$0xff] (%p5143_p6), %v3980_v63  ;;  %3985 = vst [vmem:[%s3916_s3 + $0x50] sm:$0xff] (%p5143_p6), %v3984_v24 }
 0x2a1   : > { %v3843_v54 = vadd.f32 %v4862_v0, %v3746_v32  ;;  %v3749_v10 = vadd.f32 %v4801_v49, %v6315_v11 }
 0x2a2   : > { %v3986_v0 = vld [vmem:[%s6339_s29 + $0x30] sm:$0xff] (%p5143_p6) }
 0x2a3   : > { %v3846_v12 = vadd.f32 %v4865_v36, %v3749_v10  ;;  %v4802_v30 = vpop.f32.mrb[116].mxu0  ;;  %3897 = vst [vmem:[%s6339_s29 + $0x40] sm:$0xff] %v3843_v54  ;;  %3987 = vst [vmem:[%s3916_s3 + $0x60] sm:$0xff] (%p5143_p6), %v3986_v0 }
 0x2a4   : > { %v4866_v15 = vpop.f32.mrb[116].mxu1  ;;  %v4803_v5 = vpop.f32.mrb[117].mxu0  ;;  %v3988_v1 = vld [vmem:[%s6339_s29 + $0x38] sm:$0xff] (%p5143_p6) }
 0x2a5   : > { %v4804_v16 = vadd.f32 %v4803_v5, %v4802_v30  ;;  %v4867_v17 = vpop.f32.mrb[117].mxu1  ;;  %v4805_v39 = vpop.f32.mrb[118].mxu0  ;;  %3898 = vst [vmem:[%s6339_s29 + $0x48] sm:$0xff] %v3846_v12  ;;  %3989 = vst [vmem:[%s3916_s3 + $0x70] sm:$0xff] (%p5143_p6), %v3988_v1 }
 0x2a6   : > { %v4868_v19 = vadd.f32 %v4867_v17, %v4866_v15  ;;  %v4869_v42 = vpop.f32.mrb[118].mxu1  ;;  %v4806_v20 = vpop.f32.mrb[119].mxu0 }
 0x2a7   : > { %v3754_v48 = vadd.f32 %v4804_v16, %v6318_v4  ;;  %v4807_v22 = vadd.f32 %v4806_v20, %v4805_v39  ;;  %v4870_v55 = vpop.f32.mrb[119].mxu1 }
 0x2a8   : > { %v4871_v7 = vadd.f32 %v4870_v55, %v4869_v42 }
 0x2a9   : > { %v3851_v11 = vadd.f32 %v4868_v19, %v3754_v48  ;;  %v3757_v26 = vadd.f32 %v4807_v22, %v6321_v28 }
 0x2aa   : > { %v3990_v31 = vld [vmem:[%s6339_s29 + $0x40] sm:$0xff] (%p5143_p6) }
 0x2ab   : > { %v3854_v27 = vadd.f32 %v4871_v7, %v3757_v26  ;;  %v4808_v51 = vpop.f32.mrb[120].mxu0  ;;  %3899 = vst [vmem:[%s6339_s29 + $0x50] sm:$0xff] %v3851_v11  ;;  %3991 = vst [vmem:[%s3916_s3 + $0x80] sm:$0xff] (%p5143_p6), %v3990_v31 }
 0x2ac   : > { %v4872_v47 = vpop.f32.mrb[120].mxu1  ;;  %v4809_v33 = vpop.f32.mrb[121].mxu0  ;;  %v3992_v32 = vld [vmem:[%s6339_s29 + $0x48] sm:$0xff] (%p5143_p6) }
 0x2ad   : > { %v4810_v58 = vadd.f32 %v4809_v33, %v4808_v51  ;;  %v4873_v34 = vpop.f32.mrb[121].mxu1  ;;  %v4811_v35 = vpop.f32.mrb[122].mxu0  ;;  %3900 = vst [vmem:[%s6339_s29 + $0x58] sm:$0xff] %v3854_v27  ;;  %3993 = vst [vmem:[%s3916_s3 + $0x90] sm:$0xff] (%p5143_p6), %v3992_v32 }
 0x2ae   : > { %v4874_v57 = vadd.f32 %v4873_v34, %v4872_v47  ;;  %v4875_v21 = vpop.f32.mrb[122].mxu1  ;;  %v4812_v38 = vpop.f32.mrb[123].mxu0 }
 0x2af   : > { %v3762_v4 = vadd.f32 %v4810_v58, %v6324_v25  ;;  %v4813_v62 = vadd.f32 %v4812_v38, %v4811_v35  ;;  %v4876_v40 = vpop.f32.mrb[123].mxu1 }
 0x2b0   : > { %v4877_v41 = vadd.f32 %v4876_v40, %v4875_v21 }
 0x2b1   : > { %v3859_v28 = vadd.f32 %v4874_v57, %v3762_v4  ;;  %v3765_v8 = vadd.f32 %v4813_v62, %v6327_v46 }
 0x2b2   : > { %v3994_v49 = vld [vmem:[%s6339_s29 + $0x50] sm:$0xff] (%p5143_p6) }
 0x2b3   : > { %v3862_v29 = vadd.f32 %v4877_v41, %v3765_v8  ;;  %v4814_v44 = vpop.f32.mrb[124].mxu0  ;;  %3901 = vst [vmem:[%s6339_s29 + $0x60] sm:$0xff] %v3859_v28  ;;  %3995 = vst [vmem:[%s3916_s3 + $0xa0] sm:$0xff] (%p5143_p6), %v3994_v49 }
 0x2b4   : > { %v4878_v45 = vpop.f32.mrb[124].mxu1  ;;  %v4815_v9 = vpop.f32.mrb[125].mxu0  ;;  %v3996_v6 = vld [vmem:[%s6339_s29 + $0x58] sm:$0xff] (%p5143_p6) }
 0x2b5   : > { %v4816_v3 = vadd.f32 %v4815_v9, %v4814_v44  ;;  %v4879_v50 = vpop.f32.mrb[125].mxu1  ;;  %v4817_v14 = vpop.f32.mrb[126].mxu0  ;;  %3902 = vst [vmem:[%s6339_s29 + $0x68] sm:$0xff] %v3862_v29  ;;  %3997 = vst [vmem:[%s3916_s3 + $0xb0] sm:$0xff] (%p5143_p6), %v3996_v6 }
 0x2b6   : > { %v4880_v52 = vadd.f32 %v4879_v50, %v4878_v45  ;;  %v4881_v56 = vpop.f32.mrb[126].mxu1  ;;  %v4818_v25 = vpop.f32.mrb[127].mxu0 }
 0x2b7   : > { %v3770_v13 = vadd.f32 %v4816_v3, %v6330_v43  ;;  %v4819_v37 = vadd.f32 %v4818_v25, %v4817_v14  ;;  %v4882_v59 = vpop.f32.mrb[127].mxu1  ;;  %3911 = sbr.rel (!%p5143_p6) target bundleno = 710 (0x2c6), region = 77  ;;  %v3974_v43 = vld [vmem:[%s6339_s29] sm:$0xff] (%p5143_p6) }
 0x2b8   : > { %v4883_v18 = vadd.f32 %v4882_v59, %v4881_v56  ;;  %3975 = vst [vmem:[%s3916_s3] sm:$0xff] (%p5143_p6), %v3974_v43 }
 0x2b9   : > { %v3867_v46 = vadd.f32 %v4880_v52, %v3770_v13  ;;  %v3773_v60 = vadd.f32 %v4819_v37, %v6333_v2  ;;  %v3978_v2 = vld [vmem:[%s6339_s29 + $0x10] sm:$0xff] (%p5143_p6) }
 0x2ba   : > { %3979 = vst [vmem:[%s3916_s3 + $0x20] sm:$0xff] (%p5143_p6), %v3978_v2  ;;  %v3998_v36 = vld [vmem:[%s6339_s29 + $0x60] sm:$0xff] (%p5143_p6) }
 0x2bb   : > { %v3870_v61 = vadd.f32 %v4883_v18, %v3773_v60  ;;  %3903 = vst [vmem:[%s6339_s29 + $0x70] sm:$0xff] %v3867_v46  ;;  %3999 = vst [vmem:[%s3916_s3 + $0xc0] sm:$0xff] (%p5143_p6), %v3998_v36 }
 0x2bc   : > { %v4000_v54 = vld [vmem:[%s6339_s29 + $0x68] sm:$0xff] (%p5143_p6) }
 0x2bd   : > { %3904 = vst [vmem:[%s6339_s29 + $0x78] sm:$0xff] %v3870_v61  ;;  %4001 = vst [vmem:[%s3916_s3 + $0xd0] sm:$0xff] (%p5143_p6), %v4000_v54 }
 0x2c2   : > { %v4002_v10 = vld [vmem:[%s6339_s29 + $0x70] sm:$0xff] }
 0x2c3   : > { %4003 = vst [vmem:[%s3916_s3 + $0xe0] sm:$0xff] %v4002_v10 }
 0x2c4   : > { %v4004_v12 = vld [vmem:[%s6339_s29 + $0x78] sm:$0xff] }
 0x2c5   : > { %4005 = vst [vmem:[%s3916_s3 + $0xf0] sm:$0xff] %v4004_v12 }
 0x2c6 PF: > { %s12_s13 = sadd.s32 1, %s5091_s13   ;;  %s6412_s9 = smov %s5079_s10 }
 0x2c7   : > { %p9_p11 = scmp.ge.s32.totalorder %s12_s13, 4   ;;  %s6413_s10 = smov %s5148_s19 }
 0x2c8   : > { %s6414_s11 = smov %s5087_s12  ;;  %s6415_s12 = smov %s6417_s14 }
 0x2c9   :  { %11 = sbr.rel (!%p9_p11) target bundleno = 3 (0x3), region = 149 }

// kernel: discriminator_forward.12
= control target key start
LH: loop header
LB: loop body
LE: loop exit
PB: predicated region body
PF: predicated region fallthrough
CT: control target
= control target key end

     0   :  { %s3844_s9 = smov 0   ;;  %s3846_s10 = smov 0   ;;  %s4769_s0 = inlined_call_operand.vmem [shape: bf16[32,4096], index: 0, kind: input, shape index: {}]   ;;  %s4770_s1 = inlined_call_operand.vmem [shape: bf16[4096,512], index: 1, kind: input, shape index: {}]   ;;  %s4771_s2 = inlined_call_operand.vmem [shape: f32[32,512], index: 2, kind: output, shape index: {}]  }
   0x1   :  { %s3848_s11 = smov 0   ;;  %s3850_s12 = smov 0  }
   0x2   :  { %s3852_s13 = smov 0   ;;  %s3854_s14 = smov 0  }
   0x3   :  { %s3856_s15 = smov 0   ;;  %s3858_s16 = smov 0  }
   0x4   :  { %s3860_s17 = smov 0   ;;  %s3862_s18 = smov 0  }
   0x5   :  { %s3864_s19 = smov 0  }
   0x6 LB: > { %s3117_s20 = sadd.s32 4294967295, %s3826_s19   ;;  %s24_s21 = sadd.s32 1, %s3818_s17  ;;  %s3826_s19 = sphi %s3864_s19, %s12_s19   ;;  %s3822_s18 = sphi %s3862_s18, %s4784_s18   ;;  %s3818_s17 = sphi %s3860_s17, %s4783_s17   ;;  %s3814_s16 = sphi %s3858_s16, %s4782_s16   ;;  %s3810_s15 = sphi %s3856_s15, %s4781_s15   ;;  %s3806_s14 = sphi %s3854_s14, %s4780_s14   ;;  %s3802_s13 = sphi %s3852_s13, %s4779_s13   ;;  %s3798_s12 = sphi %s3850_s12, %s4778_s12   ;;  %s3794_s11 = sphi %s3848_s11, %s4777_s11   ;;  %s3790_s10 = sphi %s3846_s10, %s4776_s10   ;;  %s3786_s9 = sphi %s3844_s9, %s4775_s9  }
   0x7   : > { %p25_p0 = scmp.ge.s32.totalorder %s24_s21, 2  ;;  %s27_s22 = sadd.s32 1, %s3822_s18 }
   0x8   : > { %s40_s23 = sadd.s32 1, %s3806_s14  ;;  %p47_p1 = scmp.ne.s32.totalorder %s3806_s14, %s3802_s13 }
   0x9   : > { %s4786_s21 = smov (%p25_p0, %s24_s21), 0  ;;  %s4788_s22 = smov (!%p25_p0, %s27_s22), %s3822_s18 }
   0xa   : > { %s36_s24 = ssub.s32 %s3818_s17, %s4786_s21  ;;  %p48_p2 = scmp.eq.s32.totalorder %s3826_s19, 0 }
   0xb   : > { %p29_p3 = scmp.ge.s32.totalorder %s4788_s22, 4  ;;  %p38_p4 = scmp.eq.s32.totalorder %s36_s24, 0 }
   0xc   : > { %p3911_p5 = por %p48_p2, %p47_p1  ;;  %s68_s26 = sadd.s32 1, %s3798_s12 }
   0xd   : > { %s4790_s22 = smov (%p29_p3, %s4788_s22), 0  ;;  %p75_p6 = scmp.ne.s32.totalorder %s3798_s12, %s3794_s11 }
   0xe   : > { %s3919_s27 = scalar_select %p38_p4, %s3806_s14, %s40_s23  }
   0xf   : > { %s64_s28 = ssub.s32 %s3822_s18, %s4790_s22  ;;  %p3925_p9 = por %p75_p6, %p48_p2 }
  0x10   : > { %s65_s29 = sor.u32 %s64_s28, %s36_s24  ;;  %p94_p7 = scmp.eq.s32.totalorder %s64_s28, 0 }
  0x11   : > { %p66_p8 = scmp.eq.s32.totalorder %s65_s29, 0  ;;  %s96_s3 = sadd.s32 1, %s3790_s10 }
  0x12   : > { %p106_p10 = scmp.ne.s32.totalorder %s3790_s10, %s3786_s9  ;;  %p107_p11 = scmp.eq.s32.totalorder %s3117_s20, 7 }
  0x13   : > { %s3933_s4 = scalar_select %p66_p8, %s3798_s12, %s68_s26  }
  0x14   : > { %s3936_s5 = scalar_select %p94_p7, %s3790_s10, %s96_s3  }
  0x15   : > { %p3938_p12 = por %p107_p11, %p106_p10  ;;  %p3120_p13 = scmp.ge.s32.totalorder %s3826_s19, 8 }
  0x17   : > { %129 = sbr.rel (%p3120_p13) target bundleno = 227 (0xe3), region = 16 }
  0x1e   : > { %132 = sbr.rel (!%p3911_p5) target bundleno = 50 (0x32), region = 20  ;;  %s134_s7 = sand.u32 (%p3911_p5), 1, %s3806_s14  }
  0x1f   : > { %s3297_s8 = sshll.u32 (%p3911_p5), %s3818_s17, 6  ;;  %s3121_s23 = sshll.u32 (%p3911_p5), %s134_s7, 8 }
  0x20   : > { %s3950_s28 = scalar_lea.vmem (%p3911_p5), %s4769_s0, %s3297_s8  ;;  %s3955_s20 = scalar_lea.vmem (%p3911_p5), [#allocation2], %s3121_s23 }
  0x21   : > { %v155_v0 = vld [vmem:[%s3950_s28] sm:$0xff] (%p3911_p5)  ;;  %v157_v1 = vld [vmem:[%s3950_s28 + $0x8] sm:$0xff] (%p3911_p5)  ;;  %v159_v2 = vld [vmem:[%s3950_s28 + $0x10] sm:$0xff] (%p3911_p5) }
  0x22   : > { %156 = vst [vmem:[%s3955_s20] sm:$0xff] (%p3911_p5), %v155_v0  ;;  %158 = vst [vmem:[%s3955_s20 + $0x8] sm:$0xff] (%p3911_p5), %v157_v1  ;;  %v161_v3 = vld [vmem:[%s3950_s28 + $0x18] sm:$0xff] (%p3911_p5)  ;;  %v163_v4 = vld [vmem:[%s3950_s28 + $0x20] sm:$0xff] (%p3911_p5) }
  0x23   : > { %160 = vst [vmem:[%s3955_s20 + $0x10] sm:$0xff] (%p3911_p5), %v159_v2  ;;  %v165_v5 = vld [vmem:[%s3950_s28 + $0x28] sm:$0xff] (%p3911_p5)  ;;  %162 = vst [vmem:[%s3955_s20 + $0x18] sm:$0xff] (%p3911_p5), %v161_v3  ;;  %v167_v6 = vld [vmem:[%s3950_s28 + $0x30] sm:$0xff] (%p3911_p5) }
  0x24   : > { %164 = vst [vmem:[%s3955_s20 + $0x20] sm:$0xff] (%p3911_p5), %v163_v4  ;;  %166 = vst [vmem:[%s3955_s20 + $0x28] sm:$0xff] (%p3911_p5), %v165_v5  ;;  %v169_v7 = vld [vmem:[%s3950_s28 + $0x38] sm:$0xff] (%p3911_p5)  ;;  %v171_v8 = vld [vmem:[%s3950_s28 + $0x80] sm:$0xff] (%p3911_p5) }
  0x25   : > { %168 = vst [vmem:[%s3955_s20 + $0x30] sm:$0xff] %v167_v6  ;;  %170 = vst [vmem:[%s3955_s20 + $0x38] sm:$0xff] %v169_v7  ;;  %v173_v9 = vld [vmem:[%s3950_s28 + $0x88] sm:$0xff]  ;;  %v175_v10 = vld [vmem:[%s3950_s28 + $0x90] sm:$0xff] }
  0x26   : > { %172 = vst [vmem:[%s3955_s20 + $0x40] sm:$0xff] %v171_v8  ;;  %v177_v11 = vld [vmem:[%s3950_s28 + $0x98] sm:$0xff]  ;;  %174 = vst [vmem:[%s3955_s20 + $0x48] sm:$0xff] %v173_v9  ;;  %v179_v12 = vld [vmem:[%s3950_s28 + $0xa0] sm:$0xff] }
  0x27   : > { %176 = vst [vmem:[%s3955_s20 + $0x50] sm:$0xff] %v175_v10  ;;  %178 = vst [vmem:[%s3955_s20 + $0x58] sm:$0xff] %v177_v11  ;;  %v181_v13 = vld [vmem:[%s3950_s28 + $0xa8] sm:$0xff]  ;;  %v183_v14 = vld [vmem:[%s3950_s28 + $0xb0] sm:$0xff] }
  0x28   : > { %180 = vst [vmem:[%s3955_s20 + $0x60] sm:$0xff] %v179_v12  ;;  %182 = vst [vmem:[%s3955_s20 + $0x68] sm:$0xff] %v181_v13  ;;  %v185_v15 = vld [vmem:[%s3950_s28 + $0xb8] sm:$0xff]  ;;  %v187_v16 = vld [vmem:[%s3950_s28 + $0x100] sm:$0xff] }
  0x29   : > { %184 = vst [vmem:[%s3955_s20 + $0x70] sm:$0xff] %v183_v14  ;;  %v189_v17 = vld [vmem:[%s3950_s28 + $0x108] sm:$0xff]  ;;  %186 = vst [vmem:[%s3955_s20 + $0x78] sm:$0xff] %v185_v15  ;;  %v191_v18 = vld [vmem:[%s3950_s28 + $0x110] sm:$0xff] }
  0x2a   : > { %188 = vst [vmem:[%s3955_s20 + $0x80] sm:$0xff] %v187_v16  ;;  %190 = vst [vmem:[%s3955_s20 + $0x88] sm:$0xff] %v189_v17  ;;  %v193_v19 = vld [vmem:[%s3950_s28 + $0x118] sm:$0xff]  ;;  %v195_v20 = vld [vmem:[%s3950_s28 + $0x120] sm:$0xff] }
  0x2b   : > { %192 = vst [vmem:[%s3955_s20 + $0x90] sm:$0xff] %v191_v18  ;;  %194 = vst [vmem:[%s3955_s20 + $0x98] sm:$0xff] %v193_v19  ;;  %v197_v21 = vld [vmem:[%s3950_s28 + $0x128] sm:$0xff]  ;;  %v199_v22 = vld [vmem:[%s3950_s28 + $0x130] sm:$0xff] }
  0x2c   : > { %196 = vst [vmem:[%s3955_s20 + $0xa0] sm:$0xff] %v195_v20  ;;  %v201_v23 = vld [vmem:[%s3950_s28 + $0x138] sm:$0xff]  ;;  %198 = vst [vmem:[%s3955_s20 + $0xa8] sm:$0xff] %v197_v21  ;;  %v203_v24 = vld [vmem:[%s3950_s28 + $0x180] sm:$0xff] }
  0x2d   : > { %200 = vst [vmem:[%s3955_s20 + $0xb0] sm:$0xff] %v199_v22  ;;  %202 = vst [vmem:[%s3955_s20 + $0xb8] sm:$0xff] %v201_v23  ;;  %v205_v25 = vld [vmem:[%s3950_s28 + $0x188] sm:$0xff]  ;;  %v207_v26 = vld [vmem:[%s3950_s28 + $0x190] sm:$0xff] }
  0x2e   : > { %204 = vst [vmem:[%s3955_s20 + $0xc0] sm:$0xff] %v203_v24  ;;  %206 = vst [vmem:[%s3955_s20 + $0xc8] sm:$0xff] %v205_v25  ;;  %v209_v27 = vld [vmem:[%s3950_s28 + $0x198] sm:$0xff]  ;;  %v211_v28 = vld [vmem:[%s3950_s28 + $0x1a0] sm:$0xff] }
  0x2f   : > { %208 = vst [vmem:[%s3955_s20 + $0xd0] sm:$0xff] %v207_v26  ;;  %v213_v29 = vld [vmem:[%s3950_s28 + $0x1a8] sm:$0xff]  ;;  %210 = vst [vmem:[%s3955_s20 + $0xd8] sm:$0xff] %v209_v27  ;;  %v215_v30 = vld [vmem:[%s3950_s28 + $0x1b0] sm:$0xff] }
  0x30   : > { %212 = vst [vmem:[%s3955_s20 + $0xe0] sm:$0xff] %v211_v28  ;;  %214 = vst [vmem:[%s3955_s20 + $0xe8] sm:$0xff] %v213_v29  ;;  %v217_v31 = vld [vmem:[%s3950_s28 + $0x1b8] sm:$0xff] }
  0x31   : > { %216 = vst [vmem:[%s3955_s20 + $0xf0] sm:$0xff] %v215_v30  ;;  %218 = vst [vmem:[%s3955_s20 + $0xf8] sm:$0xff] %v217_v31 }
  0x32 PF: > { %224 = sbr.rel (!%p3925_p9) target bundleno = 227 (0xe3), region = 43  ;;  %s226_s25 = sand.u32 (%p3925_p9), 1, %s3798_s12  }
  0x33   : > { %s3298_s29 = sshll.u32 (%p3925_p9), %s3818_s17, 10  ;;  %s3124_s3 = sshll.u32 (%p3925_p9), %s226_s25, 10 }
  0x34   : > { %s231_s7 = sadd.s32 (%p3925_p9), %s3822_s18, %s3298_s29  ;;  %s4031_s30 = scalar_lea.vmem (%p3925_p9), [#allocation3], %s3124_s3 }
  0x35   : > { %s3127_s8 = sshll.u32 (%p3925_p9), %s231_s7, 2 }
  0x36   : > { %s4026_s26 = scalar_lea.vmem (%p3925_p9), %s4770_s1, %s3127_s8 }
  0x37   : > { %v249_v32 = vld [vmem:[%s4026_s26] sm:$0xf] (%p3925_p9)  ;;  %v251_v33 = vld [vmem:[%s4026_s26 + $0x10] sm:$0xf] (%p3925_p9) }
  0x38   : > { %v253_v34 = vld [vmem:[%s4026_s26 + $0x20] sm:$0xf] (%p3925_p9)  ;;  %250 = vst [vmem:[%s4031_s30] sm:$0xf] (%p3925_p9), %v249_v32  ;;  %252 = vst [vmem:[%s4031_s30 + $0x4] sm:$0xf] (%p3925_p9), %v251_v33 }
  0x39   : > { %254 = vst [vmem:[%s4031_s30 + $0x8] sm:$0xf] %v253_v34  ;;  %v255_v35 = vld [vmem:[%s4026_s26 + $0x30] sm:$0xf]  ;;  %v257_v36 = vld [vmem:[%s4026_s26 + $0x40] sm:$0xf] }
  0x3a   : > { %v259_v37 = vld [vmem:[%s4026_s26 + $0x50] sm:$0xf]  ;;  %256 = vst [vmem:[%s4031_s30 + $0xc] sm:$0xf] %v255_v35  ;;  %258 = vst [vmem:[%s4031_s30 + $0x10] sm:$0xf] %v257_v36 }
  0x3b   : > { %260 = vst [vmem:[%s4031_s30 + $0x14] sm:$0xf] %v259_v37  ;;  %v261_v38 = vld [vmem:[%s4026_s26 + $0x60] sm:$0xf]  ;;  %v263_v39 = vld [vmem:[%s4026_s26 + $0x70] sm:$0xf] }
  0x3c   : > { %v265_v40 = vld [vmem:[%s4026_s26 + $0x80] sm:$0xf]  ;;  %262 = vst [vmem:[%s4031_s30 + $0x18] sm:$0xf] %v261_v38  ;;  %264 = vst [vmem:[%s4031_s30 + $0x1c] sm:$0xf] %v263_v39 }
  0x3d   : > { %266 = vst [vmem:[%s4031_s30 + $0x20] sm:$0xf] %v265_v40  ;;  %v267_v41 = vld [vmem:[%s4026_s26 + $0x90] sm:$0xf]  ;;  %v269_v42 = vld [vmem:[%s4026_s26 + $0xa0] sm:$0xf] }
  0x3e   : > { %v271_v43 = vld [vmem:[%s4026_s26 + $0xb0] sm:$0xf]  ;;  %268 = vst [vmem:[%s4031_s30 + $0x24] sm:$0xf] %v267_v41  ;;  %270 = vst [vmem:[%s4031_s30 + $0x28] sm:$0xf] %v269_v42 }
  0x3f   : > { %272 = vst [vmem:[%s4031_s30 + $0x2c] sm:$0xf] %v271_v43  ;;  %v273_v44 = vld [vmem:[%s4026_s26 + $0xc0] sm:$0xf]  ;;  %v275_v45 = vld [vmem:[%s4026_s26 + $0xd0] sm:$0xf] }
  0x40   : > { %v277_v46 = vld [vmem:[%s4026_s26 + $0xe0] sm:$0xf]  ;;  %274 = vst [vmem:[%s4031_s30 + $0x30] sm:$0xf] %v273_v44  ;;  %276 = vst [vmem:[%s4031_s30 + $0x34] sm:$0xf] %v275_v45 }
  0x41   : > { %278 = vst [vmem:[%s4031_s30 + $0x38] sm:$0xf] %v277_v46  ;;  %v279_v47 = vld [vmem:[%s4026_s26 + $0xf0] sm:$0xf]  ;;  %v281_v48 = vld [vmem:[%s4026_s26 + $0x100] sm:$0xf] }
  0x42   : > { %v283_v49 = vld [vmem:[%s4026_s26 + $0x110] sm:$0xf]  ;;  %280 = vst [vmem:[%s4031_s30 + $0x3c] sm:$0xf] %v279_v47  ;;  %282 = vst [vmem:[%s4031_s30 + $0x40] sm:$0xf] %v281_v48 }
  0x43   : > { %284 = vst [vmem:[%s4031_s30 + $0x44] sm:$0xf] %v283_v49  ;;  %v285_v50 = vld [vmem:[%s4026_s26 + $0x120] sm:$0xf]  ;;  %v287_v51 = vld [vmem:[%s4026_s26 + $0x130] sm:$0xf] }
  0x44   : > { %v289_v52 = vld [vmem:[%s4026_s26 + $0x140] sm:$0xf]  ;;  %286 = vst [vmem:[%s4031_s30 + $0x48] sm:$0xf] %v285_v50  ;;  %288 = vst [vmem:[%s4031_s30 + $0x4c] sm:$0xf] %v287_v51 }
  0x45   : > { %290 = vst [vmem:[%s4031_s30 + $0x50] sm:$0xf] %v289_v52  ;;  %v291_v53 = vld [vmem:[%s4026_s26 + $0x150] sm:$0xf]  ;;  %v293_v54 = vld [vmem:[%s4026_s26 + $0x160] sm:$0xf] }
  0x46   : > { %v295_v55 = vld [vmem:[%s4026_s26 + $0x170] sm:$0xf]  ;;  %292 = vst [vmem:[%s4031_s30 + $0x54] sm:$0xf] %v291_v53  ;;  %294 = vst [vmem:[%s4031_s30 + $0x58] sm:$0xf] %v293_v54 }
  0x47   : > { %296 = vst [vmem:[%s4031_s30 + $0x5c] sm:$0xf] %v295_v55  ;;  %v297_v56 = vld [vmem:[%s4026_s26 + $0x180] sm:$0xf]  ;;  %v299_v57 = vld [vmem:[%s4026_s26 + $0x190] sm:$0xf] }
  0x48   : > { %v301_v58 = vld [vmem:[%s4026_s26 + $0x1a0] sm:$0xf]  ;;  %298 = vst [vmem:[%s4031_s30 + $0x60] sm:$0xf] %v297_v56  ;;  %300 = vst [vmem:[%s4031_s30 + $0x64] sm:$0xf] %v299_v57 }
  0x49   : > { %302 = vst [vmem:[%s4031_s30 + $0x68] sm:$0xf] %v301_v58  ;;  %v303_v59 = vld [vmem:[%s4026_s26 + $0x1b0] sm:$0xf]  ;;  %v305_v60 = vld [vmem:[%s4026_s26 + $0x1c0] sm:$0xf] }
  0x4a   : > { %v307_v61 = vld [vmem:[%s4026_s26 + $0x1d0] sm:$0xf]  ;;  %304 = vst [vmem:[%s4031_s30 + $0x6c] sm:$0xf] %v303_v59  ;;  %306 = vst [vmem:[%s4031_s30 + $0x70] sm:$0xf] %v305_v60 }
  0x4b   : > { %308 = vst [vmem:[%s4031_s30 + $0x74] sm:$0xf] %v307_v61  ;;  %v309_v62 = vld [vmem:[%s4026_s26 + $0x1e0] sm:$0xf]  ;;  %v311_v63 = vld [vmem:[%s4026_s26 + $0x1f0] sm:$0xf] }
  0x4c   : > { %v313_v0 = vld [vmem:[%s4026_s26 + $0x200] sm:$0xf]  ;;  %310 = vst [vmem:[%s4031_s30 + $0x78] sm:$0xf] %v309_v62  ;;  %312 = vst [vmem:[%s4031_s30 + $0x7c] sm:$0xf] %v311_v63 }
  0x4d   : > { %314 = vst [vmem:[%s4031_s30 + $0x80] sm:$0xf] %v313_v0  ;;  %v315_v1 = vld [vmem:[%s4026_s26 + $0x210] sm:$0xf]  ;;  %v317_v2 = vld [vmem:[%s4026_s26 + $0x220] sm:$0xf] }
  0x4e   : > { %v319_v3 = vld [vmem:[%s4026_s26 + $0x230] sm:$0xf]  ;;  %316 = vst [vmem:[%s4031_s30 + $0x84] sm:$0xf] %v315_v1  ;;  %318 = vst [vmem:[%s4031_s30 + $0x88] sm:$0xf] %v317_v2 }
  0x4f   : > { %320 = vst [vmem:[%s4031_s30 + $0x8c] sm:$0xf] %v319_v3  ;;  %v321_v4 = vld [vmem:[%s4026_s26 + $0x240] sm:$0xf]  ;;  %v323_v5 = vld [vmem:[%s4026_s26 + $0x250] sm:$0xf] }
  0x50   : > { %v325_v6 = vld [vmem:[%s4026_s26 + $0x260] sm:$0xf]  ;;  %322 = vst [vmem:[%s4031_s30 + $0x90] sm:$0xf] %v321_v4  ;;  %324 = vst [vmem:[%s4031_s30 + $0x94] sm:$0xf] %v323_v5 }
  0x51   : > { %326 = vst [vmem:[%s4031_s30 + $0x98] sm:$0xf] %v325_v6  ;;  %v327_v7 = vld [vmem:[%s4026_s26 + $0x270] sm:$0xf]  ;;  %v329_v8 = vld [vmem:[%s4026_s26 + $0x280] sm:$0xf] }
  0x52   : > { %v331_v9 = vld [vmem:[%s4026_s26 + $0x290] sm:$0xf]  ;;  %328 = vst [vmem:[%s4031_s30 + $0x9c] sm:$0xf] %v327_v7  ;;  %330 = vst [vmem:[%s4031_s30 + $0xa0] sm:$0xf] %v329_v8 }
  0x53   : > { %332 = vst [vmem:[%s4031_s30 + $0xa4] sm:$0xf] %v331_v9  ;;  %v333_v10 = vld [vmem:[%s4026_s26 + $0x2a0] sm:$0xf]  ;;  %v335_v11 = vld [vmem:[%s4026_s26 + $0x2b0] sm:$0xf] }
  0x54   : > { %v337_v12 = vld [vmem:[%s4026_s26 + $0x2c0] sm:$0xf]  ;;  %334 = vst [vmem:[%s4031_s30 + $0xa8] sm:$0xf] %v333_v10  ;;  %336 = vst [vmem:[%s4031_s30 + $0xac] sm:$0xf] %v335_v11 }
  0x55   : > { %338 = vst [vmem:[%s4031_s30 + $0xb0] sm:$0xf] %v337_v12  ;;  %v339_v13 = vld [vmem:[%s4026_s26 + $0x2d0] sm:$0xf]  ;;  %v341_v14 = vld [vmem:[%s4026_s26 + $0x2e0] sm:$0xf] }
  0x56   : > { %v343_v15 = vld [vmem:[%s4026_s26 + $0x2f0] sm:$0xf]  ;;  %340 = vst [vmem:[%s4031_s30 + $0xb4] sm:$0xf] %v339_v13  ;;  %342 = vst [vmem:[%s4031_s30 + $0xb8] sm:$0xf] %v341_v14 }
  0x57   : > { %344 = vst [vmem:[%s4031_s30 + $0xbc] sm:$0xf] %v343_v15  ;;  %v345_v16 = vld [vmem:[%s4026_s26 + $0x300] sm:$0xf]  ;;  %v347_v17 = vld [vmem:[%s4026_s26 + $0x310] sm:$0xf] }
  0x58   : > { %v349_v18 = vld [vmem:[%s4026_s26 + $0x320] sm:$0xf]  ;;  %346 = vst [vmem:[%s4031_s30 + $0xc0] sm:$0xf] %v345_v16  ;;  %348 = vst [vmem:[%s4031_s30 + $0xc4] sm:$0xf] %v347_v17 }
  0x59   : > { %350 = vst [vmem:[%s4031_s30 + $0xc8] sm:$0xf] %v349_v18  ;;  %v351_v19 = vld [vmem:[%s4026_s26 + $0x330] sm:$0xf]  ;;  %v353_v20 = vld [vmem:[%s4026_s26 + $0x340] sm:$0xf] }
  0x5a   : > { %v355_v21 = vld [vmem:[%s4026_s26 + $0x350] sm:$0xf]  ;;  %352 = vst [vmem:[%s4031_s30 + $0xcc] sm:$0xf] %v351_v19  ;;  %354 = vst [vmem:[%s4031_s30 + $0xd0] sm:$0xf] %v353_v20 }
  0x5b   : > { %356 = vst [vmem:[%s4031_s30 + $0xd4] sm:$0xf] %v355_v21  ;;  %v357_v22 = vld [vmem:[%s4026_s26 + $0x360] sm:$0xf]  ;;  %v359_v23 = vld [vmem:[%s4026_s26 + $0x370] sm:$0xf] }
  0x5c   : > { %v361_v24 = vld [vmem:[%s4026_s26 + $0x380] sm:$0xf]  ;;  %358 = vst [vmem:[%s4031_s30 + $0xd8] sm:$0xf] %v357_v22  ;;  %360 = vst [vmem:[%s4031_s30 + $0xdc] sm:$0xf] %v359_v23 }
  0x5d   : > { %362 = vst [vmem:[%s4031_s30 + $0xe0] sm:$0xf] %v361_v24  ;;  %v363_v25 = vld [vmem:[%s4026_s26 + $0x390] sm:$0xf]  ;;  %v365_v26 = vld [vmem:[%s4026_s26 + $0x3a0] sm:$0xf] }
  0x5e   : > { %v367_v27 = vld [vmem:[%s4026_s26 + $0x3b0] sm:$0xf]  ;;  %364 = vst [vmem:[%s4031_s30 + $0xe4] sm:$0xf] %v363_v25  ;;  %366 = vst [vmem:[%s4031_s30 + $0xe8] sm:$0xf] %v365_v26 }
  0x5f   : > { %368 = vst [vmem:[%s4031_s30 + $0xec] sm:$0xf] %v367_v27  ;;  %v369_v28 = vld [vmem:[%s4026_s26 + $0x3c0] sm:$0xf]  ;;  %v371_v29 = vld [vmem:[%s4026_s26 + $0x3d0] sm:$0xf] }
  0x60   : > { %v373_v30 = vld [vmem:[%s4026_s26 + $0x3e0] sm:$0xf]  ;;  %370 = vst [vmem:[%s4031_s30 + $0xf0] sm:$0xf] %v369_v28  ;;  %372 = vst [vmem:[%s4031_s30 + $0xf4] sm:$0xf] %v371_v29 }
  0x61   : > { %374 = vst [vmem:[%s4031_s30 + $0xf8] sm:$0xf] %v373_v30  ;;  %v375_v31 = vld [vmem:[%s4026_s26 + $0x3f0] sm:$0xf]  ;;  %v377_v32 = vld [vmem:[%s4026_s26 + $0x400] sm:$0xf] }
  0x62   : > { %v379_v33 = vld [vmem:[%s4026_s26 + $0x410] sm:$0xf]  ;;  %376 = vst [vmem:[%s4031_s30 + $0xfc] sm:$0xf] %v375_v31  ;;  %378 = vst [vmem:[%s4031_s30 + $0x100] sm:$0xf] %v377_v32 }
  0x63   : > { %380 = vst [vmem:[%s4031_s30 + $0x104] sm:$0xf] %v379_v33  ;;  %v381_v34 = vld [vmem:[%s4026_s26 + $0x420] sm:$0xf]  ;;  %v383_v35 = vld [vmem:[%s4026_s26 + $0x430] sm:$0xf] }
  0x64   : > { %v385_v36 = vld [vmem:[%s4026_s26 + $0x440] sm:$0xf]  ;;  %382 = vst [vmem:[%s4031_s30 + $0x108] sm:$0xf] %v381_v34  ;;  %384 = vst [vmem:[%s4031_s30 + $0x10c] sm:$0xf] %v383_v35 }
  0x65   : > { %386 = vst [vmem:[%s4031_s30 + $0x110] sm:$0xf] %v385_v36  ;;  %v387_v37 = vld [vmem:[%s4026_s26 + $0x450] sm:$0xf]  ;;  %v389_v38 = vld [vmem:[%s4026_s26 + $0x460] sm:$0xf] }
  0x66   : > { %v391_v39 = vld [vmem:[%s4026_s26 + $0x470] sm:$0xf]  ;;  %388 = vst [vmem:[%s4031_s30 + $0x114] sm:$0xf] %v387_v37  ;;  %390 = vst [vmem:[%s4031_s30 + $0x118] sm:$0xf] %v389_v38 }
  0x67   : > { %392 = vst [vmem:[%s4031_s30 + $0x11c] sm:$0xf] %v391_v39  ;;  %v393_v40 = vld [vmem:[%s4026_s26 + $0x480] sm:$0xf]  ;;  %v395_v41 = vld [vmem:[%s4026_s26 + $0x490] sm:$0xf] }
  0x68   : > { %v397_v42 = vld [vmem:[%s4026_s26 + $0x4a0] sm:$0xf]  ;;  %394 = vst [vmem:[%s4031_s30 + $0x120] sm:$0xf] %v393_v40  ;;  %396 = vst [vmem:[%s4031_s30 + $0x124] sm:$0xf] %v395_v41 }
  0x69   : > { %398 = vst [vmem:[%s4031_s30 + $0x128] sm:$0xf] %v397_v42  ;;  %v399_v43 = vld [vmem:[%s4026_s26 + $0x4b0] sm:$0xf]  ;;  %v401_v44 = vld [vmem:[%s4026_s26 + $0x4c0] sm:$0xf] }
  0x6a   : > { %v403_v45 = vld [vmem:[%s4026_s26 + $0x4d0] sm:$0xf]  ;;  %400 = vst [vmem:[%s4031_s30 + $0x12c] sm:$0xf] %v399_v43  ;;  %402 = vst [vmem:[%s4031_s30 + $0x130] sm:$0xf] %v401_v44 }
  0x6b   : > { %404 = vst [vmem:[%s4031_s30 + $0x134] sm:$0xf] %v403_v45  ;;  %v405_v46 = vld [vmem:[%s4026_s26 + $0x4e0] sm:$0xf]  ;;  %v407_v47 = vld [vmem:[%s4026_s26 + $0x4f0] sm:$0xf] }
  0x6c   : > { %v409_v48 = vld [vmem:[%s4026_s26 + $0x500] sm:$0xf]  ;;  %406 = vst [vmem:[%s4031_s30 + $0x138] sm:$0xf] %v405_v46  ;;  %408 = vst [vmem:[%s4031_s30 + $0x13c] sm:$0xf] %v407_v47 }
  0x6d   : > { %410 = vst [vmem:[%s4031_s30 + $0x140] sm:$0xf] %v409_v48  ;;  %v411_v49 = vld [vmem:[%s4026_s26 + $0x510] sm:$0xf]  ;;  %v413_v50 = vld [vmem:[%s4026_s26 + $0x520] sm:$0xf] }
  0x6e   : > { %v415_v51 = vld [vmem:[%s4026_s26 + $0x530] sm:$0xf]  ;;  %412 = vst [vmem:[%s4031_s30 + $0x144] sm:$0xf] %v411_v49  ;;  %414 = vst [vmem:[%s4031_s30 + $0x148] sm:$0xf] %v413_v50 }
  0x6f   : > { %416 = vst [vmem:[%s4031_s30 + $0x14c] sm:$0xf] %v415_v51  ;;  %v417_v52 = vld [vmem:[%s4026_s26 + $0x540] sm:$0xf]  ;;  %v419_v53 = vld [vmem:[%s4026_s26 + $0x550] sm:$0xf] }
  0x70   : > { %v421_v54 = vld [vmem:[%s4026_s26 + $0x560] sm:$0xf]  ;;  %418 = vst [vmem:[%s4031_s30 + $0x150] sm:$0xf] %v417_v52  ;;  %420 = vst [vmem:[%s4031_s30 + $0x154] sm:$0xf] %v419_v53 }
  0x71   : > { %422 = vst [vmem:[%s4031_s30 + $0x158] sm:$0xf] %v421_v54  ;;  %v423_v55 = vld [vmem:[%s4026_s26 + $0x570] sm:$0xf]  ;;  %v425_v56 = vld [vmem:[%s4026_s26 + $0x580] sm:$0xf] }
  0x72   : > { %v427_v57 = vld [vmem:[%s4026_s26 + $0x590] sm:$0xf]  ;;  %424 = vst [vmem:[%s4031_s30 + $0x15c] sm:$0xf] %v423_v55  ;;  %426 = vst [vmem:[%s4031_s30 + $0x160] sm:$0xf] %v425_v56 }
  0x73   : > { %428 = vst [vmem:[%s4031_s30 + $0x164] sm:$0xf] %v427_v57  ;;  %v429_v58 = vld [vmem:[%s4026_s26 + $0x5a0] sm:$0xf]  ;;  %v431_v59 = vld [vmem:[%s4026_s26 + $0x5b0] sm:$0xf] }
  0x74   : > { %v433_v60 = vld [vmem:[%s4026_s26 + $0x5c0] sm:$0xf]  ;;  %430 = vst [vmem:[%s4031_s30 + $0x168] sm:$0xf] %v429_v58  ;;  %432 = vst [vmem:[%s4031_s30 + $0x16c] sm:$0xf] %v431_v59 }
  0x75   : > { %434 = vst [vmem:[%s4031_s30 + $0x170] sm:$0xf] %v433_v60  ;;  %v435_v61 = vld [vmem:[%s4026_s26 + $0x5d0] sm:$0xf]  ;;  %v437_v62 = vld [vmem:[%s4026_s26 + $0x5e0] sm:$0xf] }
  0x76   : > { %v439_v63 = vld [vmem:[%s4026_s26 + $0x5f0] sm:$0xf]  ;;  %436 = vst [vmem:[%s4031_s30 + $0x174] sm:$0xf] %v435_v61  ;;  %438 = vst [vmem:[%s4031_s30 + $0x178] sm:$0xf] %v437_v62 }
  0x77   : > { %440 = vst [vmem:[%s4031_s30 + $0x17c] sm:$0xf] %v439_v63  ;;  %v441_v0 = vld [vmem:[%s4026_s26 + $0x600] sm:$0xf]  ;;  %v443_v1 = vld [vmem:[%s4026_s26 + $0x610] sm:$0xf] }
  0x78   : > { %v445_v2 = vld [vmem:[%s4026_s26 + $0x620] sm:$0xf]  ;;  %442 = vst [vmem:[%s4031_s30 + $0x180] sm:$0xf] %v441_v0  ;;  %444 = vst [vmem:[%s4031_s30 + $0x184] sm:$0xf] %v443_v1 }
  0x79   : > { %446 = vst [vmem:[%s4031_s30 + $0x188] sm:$0xf] %v445_v2  ;;  %v447_v3 = vld [vmem:[%s4026_s26 + $0x630] sm:$0xf]  ;;  %v449_v4 = vld [vmem:[%s4026_s26 + $0x640] sm:$0xf] }
  0x7a   : > { %v451_v5 = vld [vmem:[%s4026_s26 + $0x650] sm:$0xf]  ;;  %448 = vst [vmem:[%s4031_s30 + $0x18c] sm:$0xf] %v447_v3  ;;  %450 = vst [vmem:[%s4031_s30 + $0x190] sm:$0xf] %v449_v4 }
  0x7b   : > { %452 = vst [vmem:[%s4031_s30 + $0x194] sm:$0xf] %v451_v5  ;;  %v453_v6 = vld [vmem:[%s4026_s26 + $0x660] sm:$0xf]  ;;  %v455_v7 = vld [vmem:[%s4026_s26 + $0x670] sm:$0xf] }
  0x7c   : > { %v457_v8 = vld [vmem:[%s4026_s26 + $0x680] sm:$0xf]  ;;  %454 = vst [vmem:[%s4031_s30 + $0x198] sm:$0xf] %v453_v6  ;;  %456 = vst [vmem:[%s4031_s30 + $0x19c] sm:$0xf] %v455_v7 }
  0x7d   : > { %458 = vst [vmem:[%s4031_s30 + $0x1a0] sm:$0xf] %v457_v8  ;;  %v459_v9 = vld [vmem:[%s4026_s26 + $0x690] sm:$0xf]  ;;  %v461_v10 = vld [vmem:[%s4026_s26 + $0x6a0] sm:$0xf] }
  0x7e   : > { %v463_v11 = vld [vmem:[%s4026_s26 + $0x6b0] sm:$0xf]  ;;  %460 = vst [vmem:[%s4031_s30 + $0x1a4] sm:$0xf] %v459_v9  ;;  %462 = vst [vmem:[%s4031_s30 + $0x1a8] sm:$0xf] %v461_v10 }
  0x7f   : > { %464 = vst [vmem:[%s4031_s30 + $0x1ac] sm:$0xf] %v463_v11  ;;  %v465_v12 = vld [vmem:[%s4026_s26 + $0x6c0] sm:$0xf]  ;;  %v467_v13 = vld [vmem:[%s4026_s26 + $0x6d0] sm:$0xf] }
  0x80   : > { %v469_v14 = vld [vmem:[%s4026_s26 + $0x6e0] sm:$0xf]  ;;  %466 = vst [vmem:[%s4031_s30 + $0x1b0] sm:$0xf] %v465_v12  ;;  %468 = vst [vmem:[%s4031_s30 + $0x1b4] sm:$0xf] %v467_v13 }
  0x81   : > { %470 = vst [vmem:[%s4031_s30 + $0x1b8] sm:$0xf] %v469_v14  ;;  %v471_v15 = vld [vmem:[%s4026_s26 + $0x6f0] sm:$0xf]  ;;  %v473_v16 = vld [vmem:[%s4026_s26 + $0x700] sm:$0xf] }
  0x82   : > { %v475_v17 = vld [vmem:[%s4026_s26 + $0x710] sm:$0xf]  ;;  %472 = vst [vmem:[%s4031_s30 + $0x1bc] sm:$0xf] %v471_v15  ;;  %474 = vst [vmem:[%s4031_s30 + $0x1c0] sm:$0xf] %v473_v16 }
  0x83   : > { %476 = vst [vmem:[%s4031_s30 + $0x1c4] sm:$0xf] %v475_v17  ;;  %v477_v18 = vld [vmem:[%s4026_s26 + $0x720] sm:$0xf]  ;;  %v479_v19 = vld [vmem:[%s4026_s26 + $0x730] sm:$0xf] }
  0x84   : > { %v481_v20 = vld [vmem:[%s4026_s26 + $0x740] sm:$0xf]  ;;  %478 = vst [vmem:[%s4031_s30 + $0x1c8] sm:$0xf] %v477_v18  ;;  %480 = vst [vmem:[%s4031_s30 + $0x1cc] sm:$0xf] %v479_v19 }
  0x85   : > { %482 = vst [vmem:[%s4031_s30 + $0x1d0] sm:$0xf] %v481_v20  ;;  %v483_v21 = vld [vmem:[%s4026_s26 + $0x750] sm:$0xf]  ;;  %v485_v22 = vld [vmem:[%s4026_s26 + $0x760] sm:$0xf] }
  0x86   : > { %v487_v23 = vld [vmem:[%s4026_s26 + $0x770] sm:$0xf]  ;;  %484 = vst [vmem:[%s4031_s30 + $0x1d4] sm:$0xf] %v483_v21  ;;  %486 = vst [vmem:[%s4031_s30 + $0x1d8] sm:$0xf] %v485_v22 }
  0x87   : > { %488 = vst [vmem:[%s4031_s30 + $0x1dc] sm:$0xf] %v487_v23  ;;  %v489_v24 = vld [vmem:[%s4026_s26 + $0x780] sm:$0xf]  ;;  %v491_v25 = vld [vmem:[%s4026_s26 + $0x790] sm:$0xf] }
  0x88   : > { %v493_v26 = vld [vmem:[%s4026_s26 + $0x7a0] sm:$0xf]  ;;  %490 = vst [vmem:[%s4031_s30 + $0x1e0] sm:$0xf] %v489_v24  ;;  %492 = vst [vmem:[%s4031_s30 + $0x1e4] sm:$0xf] %v491_v25 }
  0x89   : > { %494 = vst [vmem:[%s4031_s30 + $0x1e8] sm:$0xf] %v493_v26  ;;  %v495_v27 = vld [vmem:[%s4026_s26 + $0x7b0] sm:$0xf]  ;;  %v497_v28 = vld [vmem:[%s4026_s26 + $0x7c0] sm:$0xf] }
  0x8a   : > { %v499_v29 = vld [vmem:[%s4026_s26 + $0x7d0] sm:$0xf]  ;;  %496 = vst [vmem:[%s4031_s30 + $0x1ec] sm:$0xf] %v495_v27  ;;  %498 = vst [vmem:[%s4031_s30 + $0x1f0] sm:$0xf] %v497_v28 }
  0x8b   : > { %500 = vst [vmem:[%s4031_s30 + $0x1f4] sm:$0xf] %v499_v29  ;;  %v501_v30 = vld [vmem:[%s4026_s26 + $0x7e0] sm:$0xf]  ;;  %v503_v31 = vld [vmem:[%s4026_s26 + $0x7f0] sm:$0xf] }
  0x8c   : > { %v505_v32 = vld [vmem:[%s4026_s26 + $0x800] sm:$0xf]  ;;  %502 = vst [vmem:[%s4031_s30 + $0x1f8] sm:$0xf] %v501_v30  ;;  %504 = vst [vmem:[%s4031_s30 + $0x1fc] sm:$0xf] %v503_v31 }
  0x8d   : > { %506 = vst [vmem:[%s4031_s30 + $0x200] sm:$0xf] %v505_v32  ;;  %v507_v33 = vld [vmem:[%s4026_s26 + $0x810] sm:$0xf]  ;;  %v509_v34 = vld [vmem:[%s4026_s26 + $0x820] sm:$0xf] }
  0x8e   : > { %v511_v35 = vld [vmem:[%s4026_s26 + $0x830] sm:$0xf]  ;;  %508 = vst [vmem:[%s4031_s30 + $0x204] sm:$0xf] %v507_v33  ;;  %510 = vst [vmem:[%s4031_s30 + $0x208] sm:$0xf] %v509_v34 }
  0x8f   : > { %512 = vst [vmem:[%s4031_s30 + $0x20c] sm:$0xf] %v511_v35  ;;  %v513_v36 = vld [vmem:[%s4026_s26 + $0x840] sm:$0xf]  ;;  %v515_v37 = vld [vmem:[%s4026_s26 + $0x850] sm:$0xf] }
  0x90   : > { %v517_v38 = vld [vmem:[%s4026_s26 + $0x860] sm:$0xf]  ;;  %514 = vst [vmem:[%s4031_s30 + $0x210] sm:$0xf] %v513_v36  ;;  %516 = vst [vmem:[%s4031_s30 + $0x214] sm:$0xf] %v515_v37 }
  0x91   : > { %518 = vst [vmem:[%s4031_s30 + $0x218] sm:$0xf] %v517_v38  ;;  %v519_v39 = vld [vmem:[%s4026_s26 + $0x870] sm:$0xf]  ;;  %v521_v40 = vld [vmem:[%s4026_s26 + $0x880] sm:$0xf] }
  0x92   : > { %v523_v41 = vld [vmem:[%s4026_s26 + $0x890] sm:$0xf]  ;;  %520 = vst [vmem:[%s4031_s30 + $0x21c] sm:$0xf] %v519_v39  ;;  %522 = vst [vmem:[%s4031_s30 + $0x220] sm:$0xf] %v521_v40 }
  0x93   : > { %524 = vst [vmem:[%s4031_s30 + $0x224] sm:$0xf] %v523_v41  ;;  %v525_v42 = vld [vmem:[%s4026_s26 + $0x8a0] sm:$0xf]  ;;  %v527_v43 = vld [vmem:[%s4026_s26 + $0x8b0] sm:$0xf] }
  0x94   : > { %v529_v44 = vld [vmem:[%s4026_s26 + $0x8c0] sm:$0xf]  ;;  %526 = vst [vmem:[%s4031_s30 + $0x228] sm:$0xf] %v525_v42  ;;  %528 = vst [vmem:[%s4031_s30 + $0x22c] sm:$0xf] %v527_v43 }
  0x95   : > { %530 = vst [vmem:[%s4031_s30 + $0x230] sm:$0xf] %v529_v44  ;;  %v531_v45 = vld [vmem:[%s4026_s26 + $0x8d0] sm:$0xf]  ;;  %v533_v46 = vld [vmem:[%s4026_s26 + $0x8e0] sm:$0xf] }
  0x96   : > { %v535_v47 = vld [vmem:[%s4026_s26 + $0x8f0] sm:$0xf]  ;;  %532 = vst [vmem:[%s4031_s30 + $0x234] sm:$0xf] %v531_v45  ;;  %534 = vst [vmem:[%s4031_s30 + $0x238] sm:$0xf] %v533_v46 }
  0x97   : > { %536 = vst [vmem:[%s4031_s30 + $0x23c] sm:$0xf] %v535_v47  ;;  %v537_v48 = vld [vmem:[%s4026_s26 + $0x900] sm:$0xf]  ;;  %v539_v49 = vld [vmem:[%s4026_s26 + $0x910] sm:$0xf] }
  0x98   : > { %v541_v50 = vld [vmem:[%s4026_s26 + $0x920] sm:$0xf]  ;;  %538 = vst [vmem:[%s4031_s30 + $0x240] sm:$0xf] %v537_v48  ;;  %540 = vst [vmem:[%s4031_s30 + $0x244] sm:$0xf] %v539_v49 }
  0x99   : > { %542 = vst [vmem:[%s4031_s30 + $0x248] sm:$0xf] %v541_v50  ;;  %v543_v51 = vld [vmem:[%s4026_s26 + $0x930] sm:$0xf]  ;;  %v545_v52 = vld [vmem:[%s4026_s26 + $0x940] sm:$0xf] }
  0x9a   : > { %v547_v53 = vld [vmem:[%s4026_s26 + $0x950] sm:$0xf]  ;;  %544 = vst [vmem:[%s4031_s30 + $0x24c] sm:$0xf] %v543_v51  ;;  %546 = vst [vmem:[%s4031_s30 + $0x250] sm:$0xf] %v545_v52 }
  0x9b   : > { %548 = vst [vmem:[%s4031_s30 + $0x254] sm:$0xf] %v547_v53  ;;  %v549_v54 = vld [vmem:[%s4026_s26 + $0x960] sm:$0xf]  ;;  %v551_v55 = vld [vmem:[%s4026_s26 + $0x970] sm:$0xf] }
  0x9c   : > { %v553_v56 = vld [vmem:[%s4026_s26 + $0x980] sm:$0xf]  ;;  %550 = vst [vmem:[%s4031_s30 + $0x258] sm:$0xf] %v549_v54  ;;  %552 = vst [vmem:[%s4031_s30 + $0x25c] sm:$0xf] %v551_v55 }
  0x9d   : > { %554 = vst [vmem:[%s4031_s30 + $0x260] sm:$0xf] %v553_v56  ;;  %v555_v57 = vld [vmem:[%s4026_s26 + $0x990] sm:$0xf]  ;;  %v557_v58 = vld [vmem:[%s4026_s26 + $0x9a0] sm:$0xf] }
  0x9e   : > { %v559_v59 = vld [vmem:[%s4026_s26 + $0x9b0] sm:$0xf]  ;;  %556 = vst [vmem:[%s4031_s30 + $0x264] sm:$0xf] %v555_v57  ;;  %558 = vst [vmem:[%s4031_s30 + $0x268] sm:$0xf] %v557_v58 }
  0x9f   : > { %560 = vst [vmem:[%s4031_s30 + $0x26c] sm:$0xf] %v559_v59  ;;  %v561_v60 = vld [vmem:[%s4026_s26 + $0x9c0] sm:$0xf]  ;;  %v563_v61 = vld [vmem:[%s4026_s26 + $0x9d0] sm:$0xf] }
  0xa0   : > { %v565_v62 = vld [vmem:[%s4026_s26 + $0x9e0] sm:$0xf]  ;;  %562 = vst [vmem:[%s4031_s30 + $0x270] sm:$0xf] %v561_v60  ;;  %564 = vst [vmem:[%s4031_s30 + $0x274] sm:$0xf] %v563_v61 }
  0xa1   : > { %566 = vst [vmem:[%s4031_s30 + $0x278] sm:$0xf] %v565_v62  ;;  %v567_v63 = vld [vmem:[%s4026_s26 + $0x9f0] sm:$0xf]  ;;  %v569_v0 = vld [vmem:[%s4026_s26 + $0xa00] sm:$0xf] }
  0xa2   : > { %v571_v1 = vld [vmem:[%s4026_s26 + $0xa10] sm:$0xf]  ;;  %568 = vst [vmem:[%s4031_s30 + $0x27c] sm:$0xf] %v567_v63  ;;  %570 = vst [vmem:[%s4031_s30 + $0x280] sm:$0xf] %v569_v0 }
  0xa3   : > { %572 = vst [vmem:[%s4031_s30 + $0x284] sm:$0xf] %v571_v1  ;;  %v573_v2 = vld [vmem:[%s4026_s26 + $0xa20] sm:$0xf]  ;;  %v575_v3 = vld [vmem:[%s4026_s26 + $0xa30] sm:$0xf] }
  0xa4   : > { %v577_v4 = vld [vmem:[%s4026_s26 + $0xa40] sm:$0xf]  ;;  %574 = vst [vmem:[%s4031_s30 + $0x288] sm:$0xf] %v573_v2  ;;  %576 = vst [vmem:[%s4031_s30 + $0x28c] sm:$0xf] %v575_v3 }
  0xa5   : > { %578 = vst [vmem:[%s4031_s30 + $0x290] sm:$0xf] %v577_v4  ;;  %v579_v5 = vld [vmem:[%s4026_s26 + $0xa50] sm:$0xf]  ;;  %v581_v6 = vld [vmem:[%s4026_s26 + $0xa60] sm:$0xf] }
  0xa6   : > { %v583_v7 = vld [vmem:[%s4026_s26 + $0xa70] sm:$0xf]  ;;  %580 = vst [vmem:[%s4031_s30 + $0x294] sm:$0xf] %v579_v5  ;;  %582 = vst [vmem:[%s4031_s30 + $0x298] sm:$0xf] %v581_v6 }
  0xa7   : > { %584 = vst [vmem:[%s4031_s30 + $0x29c] sm:$0xf] %v583_v7  ;;  %v585_v8 = vld [vmem:[%s4026_s26 + $0xa80] sm:$0xf]  ;;  %v587_v9 = vld [vmem:[%s4026_s26 + $0xa90] sm:$0xf] }
  0xa8   : > { %v589_v10 = vld [vmem:[%s4026_s26 + $0xaa0] sm:$0xf]  ;;  %586 = vst [vmem:[%s4031_s30 + $0x2a0] sm:$0xf] %v585_v8  ;;  %588 = vst [vmem:[%s4031_s30 + $0x2a4] sm:$0xf] %v587_v9 }
  0xa9   : > { %590 = vst [vmem:[%s4031_s30 + $0x2a8] sm:$0xf] %v589_v10  ;;  %v591_v11 = vld [vmem:[%s4026_s26 + $0xab0] sm:$0xf]  ;;  %v593_v12 = vld [vmem:[%s4026_s26 + $0xac0] sm:$0xf] }
  0xaa   : > { %v595_v13 = vld [vmem:[%s4026_s26 + $0xad0] sm:$0xf]  ;;  %592 = vst [vmem:[%s4031_s30 + $0x2ac] sm:$0xf] %v591_v11  ;;  %594 = vst [vmem:[%s4031_s30 + $0x2b0] sm:$0xf] %v593_v12 }
  0xab   : > { %596 = vst [vmem:[%s4031_s30 + $0x2b4] sm:$0xf] %v595_v13  ;;  %v597_v14 = vld [vmem:[%s4026_s26 + $0xae0] sm:$0xf]  ;;  %v599_v15 = vld [vmem:[%s4026_s26 + $0xaf0] sm:$0xf] }
  0xac   : > { %v601_v16 = vld [vmem:[%s4026_s26 + $0xb00] sm:$0xf]  ;;  %598 = vst [vmem:[%s4031_s30 + $0x2b8] sm:$0xf] %v597_v14  ;;  %600 = vst [vmem:[%s4031_s30 + $0x2bc] sm:$0xf] %v599_v15 }
  0xad   : > { %602 = vst [vmem:[%s4031_s30 + $0x2c0] sm:$0xf] %v601_v16  ;;  %v603_v17 = vld [vmem:[%s4026_s26 + $0xb10] sm:$0xf]  ;;  %v605_v18 = vld [vmem:[%s4026_s26 + $0xb20] sm:$0xf] }
  0xae   : > { %v607_v19 = vld [vmem:[%s4026_s26 + $0xb30] sm:$0xf]  ;;  %604 = vst [vmem:[%s4031_s30 + $0x2c4] sm:$0xf] %v603_v17  ;;  %606 = vst [vmem:[%s4031_s30 + $0x2c8] sm:$0xf] %v605_v18 }
  0xaf   : > { %608 = vst [vmem:[%s4031_s30 + $0x2cc] sm:$0xf] %v607_v19  ;;  %v609_v20 = vld [vmem:[%s4026_s26 + $0xb40] sm:$0xf]  ;;  %v611_v21 = vld [vmem:[%s4026_s26 + $0xb50] sm:$0xf] }
  0xb0   : > { %v613_v22 = vld [vmem:[%s4026_s26 + $0xb60] sm:$0xf]  ;;  %610 = vst [vmem:[%s4031_s30 + $0x2d0] sm:$0xf] %v609_v20  ;;  %612 = vst [vmem:[%s4031_s30 + $0x2d4] sm:$0xf] %v611_v21 }
  0xb1   : > { %614 = vst [vmem:[%s4031_s30 + $0x2d8] sm:$0xf] %v613_v22  ;;  %v615_v23 = vld [vmem:[%s4026_s26 + $0xb70] sm:$0xf]  ;;  %v617_v24 = vld [vmem:[%s4026_s26 + $0xb80] sm:$0xf] }
  0xb2   : > { %v619_v25 = vld [vmem:[%s4026_s26 + $0xb90] sm:$0xf]  ;;  %616 = vst [vmem:[%s4031_s30 + $0x2dc] sm:$0xf] %v615_v23  ;;  %618 = vst [vmem:[%s4031_s30 + $0x2e0] sm:$0xf] %v617_v24 }
  0xb3   : > { %620 = vst [vmem:[%s4031_s30 + $0x2e4] sm:$0xf] %v619_v25  ;;  %v621_v26 = vld [vmem:[%s4026_s26 + $0xba0] sm:$0xf]  ;;  %v623_v27 = vld [vmem:[%s4026_s26 + $0xbb0] sm:$0xf] }
  0xb4   : > { %v625_v28 = vld [vmem:[%s4026_s26 + $0xbc0] sm:$0xf]  ;;  %622 = vst [vmem:[%s4031_s30 + $0x2e8] sm:$0xf] %v621_v26  ;;  %624 = vst [vmem:[%s4031_s30 + $0x2ec] sm:$0xf] %v623_v27 }
  0xb5   : > { %626 = vst [vmem:[%s4031_s30 + $0x2f0] sm:$0xf] %v625_v28  ;;  %v627_v29 = vld [vmem:[%s4026_s26 + $0xbd0] sm:$0xf]  ;;  %v629_v30 = vld [vmem:[%s4026_s26 + $0xbe0] sm:$0xf] }
  0xb6   : > { %v631_v31 = vld [vmem:[%s4026_s26 + $0xbf0] sm:$0xf]  ;;  %628 = vst [vmem:[%s4031_s30 + $0x2f4] sm:$0xf] %v627_v29  ;;  %630 = vst [vmem:[%s4031_s30 + $0x2f8] sm:$0xf] %v629_v30 }
  0xb7   : > { %632 = vst [vmem:[%s4031_s30 + $0x2fc] sm:$0xf] %v631_v31  ;;  %v633_v32 = vld [vmem:[%s4026_s26 + $0xc00] sm:$0xf]  ;;  %v635_v33 = vld [vmem:[%s4026_s26 + $0xc10] sm:$0xf] }
  0xb8   : > { %v637_v34 = vld [vmem:[%s4026_s26 + $0xc20] sm:$0xf]  ;;  %634 = vst [vmem:[%s4031_s30 + $0x300] sm:$0xf] %v633_v32  ;;  %636 = vst [vmem:[%s4031_s30 + $0x304] sm:$0xf] %v635_v33 }
  0xb9   : > { %638 = vst [vmem:[%s4031_s30 + $0x308] sm:$0xf] %v637_v34  ;;  %v639_v35 = vld [vmem:[%s4026_s26 + $0xc30] sm:$0xf]  ;;  %v641_v36 = vld [vmem:[%s4026_s26 + $0xc40] sm:$0xf] }
  0xba   : > { %v643_v37 = vld [vmem:[%s4026_s26 + $0xc50] sm:$0xf]  ;;  %640 = vst [vmem:[%s4031_s30 + $0x30c] sm:$0xf] %v639_v35  ;;  %642 = vst [vmem:[%s4031_s30 + $0x310] sm:$0xf] %v641_v36 }
  0xbb   : > { %644 = vst [vmem:[%s4031_s30 + $0x314] sm:$0xf] %v643_v37  ;;  %v645_v38 = vld [vmem:[%s4026_s26 + $0xc60] sm:$0xf]  ;;  %v647_v39 = vld [vmem:[%s4026_s26 + $0xc70] sm:$0xf] }
  0xbc   : > { %v649_v40 = vld [vmem:[%s4026_s26 + $0xc80] sm:$0xf]  ;;  %646 = vst [vmem:[%s4031_s30 + $0x318] sm:$0xf] %v645_v38  ;;  %648 = vst [vmem:[%s4031_s30 + $0x31c] sm:$0xf] %v647_v39 }
  0xbd   : > { %650 = vst [vmem:[%s4031_s30 + $0x320] sm:$0xf] %v649_v40  ;;  %v651_v41 = vld [vmem:[%s4026_s26 + $0xc90] sm:$0xf]  ;;  %v653_v42 = vld [vmem:[%s4026_s26 + $0xca0] sm:$0xf] }
  0xbe   : > { %v655_v43 = vld [vmem:[%s4026_s26 + $0xcb0] sm:$0xf]  ;;  %652 = vst [vmem:[%s4031_s30 + $0x324] sm:$0xf] %v651_v41  ;;  %654 = vst [vmem:[%s4031_s30 + $0x328] sm:$0xf] %v653_v42 }
  0xbf   : > { %656 = vst [vmem:[%s4031_s30 + $0x32c] sm:$0xf] %v655_v43  ;;  %v657_v44 = vld [vmem:[%s4026_s26 + $0xcc0] sm:$0xf]  ;;  %v659_v45 = vld [vmem:[%s4026_s26 + $0xcd0] sm:$0xf] }
  0xc0   : > { %v661_v46 = vld [vmem:[%s4026_s26 + $0xce0] sm:$0xf]  ;;  %658 = vst [vmem:[%s4031_s30 + $0x330] sm:$0xf] %v657_v44  ;;  %660 = vst [vmem:[%s4031_s30 + $0x334] sm:$0xf] %v659_v45 }
  0xc1   : > { %662 = vst [vmem:[%s4031_s30 + $0x338] sm:$0xf] %v661_v46  ;;  %v663_v47 = vld [vmem:[%s4026_s26 + $0xcf0] sm:$0xf]  ;;  %v665_v48 = vld [vmem:[%s4026_s26 + $0xd00] sm:$0xf] }
  0xc2   : > { %v667_v49 = vld [vmem:[%s4026_s26 + $0xd10] sm:$0xf]  ;;  %664 = vst [vmem:[%s4031_s30 + $0x33c] sm:$0xf] %v663_v47  ;;  %666 = vst [vmem:[%s4031_s30 + $0x340] sm:$0xf] %v665_v48 }
  0xc3   : > { %668 = vst [vmem:[%s4031_s30 + $0x344] sm:$0xf] %v667_v49  ;;  %v669_v50 = vld [vmem:[%s4026_s26 + $0xd20] sm:$0xf]  ;;  %v671_v51 = vld [vmem:[%s4026_s26 + $0xd30] sm:$0xf] }
  0xc4   : > { %v673_v52 = vld [vmem:[%s4026_s26 + $0xd40] sm:$0xf]  ;;  %670 = vst [vmem:[%s4031_s30 + $0x348] sm:$0xf] %v669_v50  ;;  %672 = vst [vmem:[%s4031_s30 + $0x34c] sm:$0xf] %v671_v51 }
  0xc5   : > { %674 = vst [vmem:[%s4031_s30 + $0x350] sm:$0xf] %v673_v52  ;;  %v675_v53 = vld [vmem:[%s4026_s26 + $0xd50] sm:$0xf]  ;;  %v677_v54 = vld [vmem:[%s4026_s26 + $0xd60] sm:$0xf] }
  0xc6   : > { %v679_v55 = vld [vmem:[%s4026_s26 + $0xd70] sm:$0xf]  ;;  %676 = vst [vmem:[%s4031_s30 + $0x354] sm:$0xf] %v675_v53  ;;  %678 = vst [vmem:[%s4031_s30 + $0x358] sm:$0xf] %v677_v54 }
  0xc7   : > { %680 = vst [vmem:[%s4031_s30 + $0x35c] sm:$0xf] %v679_v55  ;;  %v681_v56 = vld [vmem:[%s4026_s26 + $0xd80] sm:$0xf]  ;;  %v683_v57 = vld [vmem:[%s4026_s26 + $0xd90] sm:$0xf] }
  0xc8   : > { %v685_v58 = vld [vmem:[%s4026_s26 + $0xda0] sm:$0xf]  ;;  %682 = vst [vmem:[%s4031_s30 + $0x360] sm:$0xf] %v681_v56  ;;  %684 = vst [vmem:[%s4031_s30 + $0x364] sm:$0xf] %v683_v57 }
  0xc9   : > { %686 = vst [vmem:[%s4031_s30 + $0x368] sm:$0xf] %v685_v58  ;;  %v687_v59 = vld [vmem:[%s4026_s26 + $0xdb0] sm:$0xf]  ;;  %v689_v60 = vld [vmem:[%s4026_s26 + $0xdc0] sm:$0xf] }
  0xca   : > { %v691_v61 = vld [vmem:[%s4026_s26 + $0xdd0] sm:$0xf]  ;;  %688 = vst [vmem:[%s4031_s30 + $0x36c] sm:$0xf] %v687_v59  ;;  %690 = vst [vmem:[%s4031_s30 + $0x370] sm:$0xf] %v689_v60 }
  0xcb   : > { %692 = vst [vmem:[%s4031_s30 + $0x374] sm:$0xf] %v691_v61  ;;  %v693_v62 = vld [vmem:[%s4026_s26 + $0xde0] sm:$0xf]  ;;  %v695_v63 = vld [vmem:[%s4026_s26 + $0xdf0] sm:$0xf] }
  0xcc   : > { %v697_v0 = vld [vmem:[%s4026_s26 + $0xe00] sm:$0xf]  ;;  %694 = vst [vmem:[%s4031_s30 + $0x378] sm:$0xf] %v693_v62  ;;  %696 = vst [vmem:[%s4031_s30 + $0x37c] sm:$0xf] %v695_v63 }
  0xcd   : > { %698 = vst [vmem:[%s4031_s30 + $0x380] sm:$0xf] %v697_v0  ;;  %v699_v1 = vld [vmem:[%s4026_s26 + $0xe10] sm:$0xf]  ;;  %v701_v2 = vld [vmem:[%s4026_s26 + $0xe20] sm:$0xf] }
  0xce   : > { %v703_v3 = vld [vmem:[%s4026_s26 + $0xe30] sm:$0xf]  ;;  %700 = vst [vmem:[%s4031_s30 + $0x384] sm:$0xf] %v699_v1  ;;  %702 = vst [vmem:[%s4031_s30 + $0x388] sm:$0xf] %v701_v2 }
  0xcf   : > { %704 = vst [vmem:[%s4031_s30 + $0x38c] sm:$0xf] %v703_v3  ;;  %v705_v4 = vld [vmem:[%s4026_s26 + $0xe40] sm:$0xf]  ;;  %v707_v5 = vld [vmem:[%s4026_s26 + $0xe50] sm:$0xf] }
  0xd0   : > { %v709_v6 = vld [vmem:[%s4026_s26 + $0xe60] sm:$0xf]  ;;  %706 = vst [vmem:[%s4031_s30 + $0x390] sm:$0xf] %v705_v4  ;;  %708 = vst [vmem:[%s4031_s30 + $0x394] sm:$0xf] %v707_v5 }
  0xd1   : > { %710 = vst [vmem:[%s4031_s30 + $0x398] sm:$0xf] %v709_v6  ;;  %v711_v7 = vld [vmem:[%s4026_s26 + $0xe70] sm:$0xf]  ;;  %v713_v8 = vld [vmem:[%s4026_s26 + $0xe80] sm:$0xf] }
  0xd2   : > { %v715_v9 = vld [vmem:[%s4026_s26 + $0xe90] sm:$0xf]  ;;  %712 = vst [vmem:[%s4031_s30 + $0x39c] sm:$0xf] %v711_v7  ;;  %714 = vst [vmem:[%s4031_s30 + $0x3a0] sm:$0xf] %v713_v8 }
  0xd3   : > { %716 = vst [vmem:[%s4031_s30 + $0x3a4] sm:$0xf] %v715_v9  ;;  %v717_v10 = vld [vmem:[%s4026_s26 + $0xea0] sm:$0xf]  ;;  %v719_v11 = vld [vmem:[%s4026_s26 + $0xeb0] sm:$0xf] }
  0xd4   : > { %v721_v12 = vld [vmem:[%s4026_s26 + $0xec0] sm:$0xf]  ;;  %718 = vst [vmem:[%s4031_s30 + $0x3a8] sm:$0xf] %v717_v10  ;;  %720 = vst [vmem:[%s4031_s30 + $0x3ac] sm:$0xf] %v719_v11 }
  0xd5   : > { %722 = vst [vmem:[%s4031_s30 + $0x3b0] sm:$0xf] %v721_v12  ;;  %v723_v13 = vld [vmem:[%s4026_s26 + $0xed0] sm:$0xf]  ;;  %v725_v14 = vld [vmem:[%s4026_s26 + $0xee0] sm:$0xf] }
  0xd6   : > { %v727_v15 = vld [vmem:[%s4026_s26 + $0xef0] sm:$0xf]  ;;  %724 = vst [vmem:[%s4031_s30 + $0x3b4] sm:$0xf] %v723_v13  ;;  %726 = vst [vmem:[%s4031_s30 + $0x3b8] sm:$0xf] %v725_v14 }
  0xd7   : > { %728 = vst [vmem:[%s4031_s30 + $0x3bc] sm:$0xf] %v727_v15  ;;  %v729_v16 = vld [vmem:[%s4026_s26 + $0xf00] sm:$0xf]  ;;  %v731_v17 = vld [vmem:[%s4026_s26 + $0xf10] sm:$0xf] }
  0xd8   : > { %v733_v18 = vld [vmem:[%s4026_s26 + $0xf20] sm:$0xf]  ;;  %730 = vst [vmem:[%s4031_s30 + $0x3c0] sm:$0xf] %v729_v16  ;;  %732 = vst [vmem:[%s4031_s30 + $0x3c4] sm:$0xf] %v731_v17 }
  0xd9   : > { %734 = vst [vmem:[%s4031_s30 + $0x3c8] sm:$0xf] %v733_v18  ;;  %v735_v19 = vld [vmem:[%s4026_s26 + $0xf30] sm:$0xf]  ;;  %v737_v20 = vld [vmem:[%s4026_s26 + $0xf40] sm:$0xf] }
  0xda   : > { %v739_v21 = vld [vmem:[%s4026_s26 + $0xf50] sm:$0xf]  ;;  %736 = vst [vmem:[%s4031_s30 + $0x3cc] sm:$0xf] %v735_v19  ;;  %738 = vst [vmem:[%s4031_s30 + $0x3d0] sm:$0xf] %v737_v20 }
  0xdb   : > { %740 = vst [vmem:[%s4031_s30 + $0x3d4] sm:$0xf] %v739_v21  ;;  %v741_v22 = vld [vmem:[%s4026_s26 + $0xf60] sm:$0xf]  ;;  %v743_v23 = vld [vmem:[%s4026_s26 + $0xf70] sm:$0xf] }
  0xdc   : > { %v745_v24 = vld [vmem:[%s4026_s26 + $0xf80] sm:$0xf]  ;;  %742 = vst [vmem:[%s4031_s30 + $0x3d8] sm:$0xf] %v741_v22  ;;  %744 = vst [vmem:[%s4031_s30 + $0x3dc] sm:$0xf] %v743_v23 }
  0xdd   : > { %746 = vst [vmem:[%s4031_s30 + $0x3e0] sm:$0xf] %v745_v24  ;;  %v747_v25 = vld [vmem:[%s4026_s26 + $0xf90] sm:$0xf]  ;;  %v749_v26 = vld [vmem:[%s4026_s26 + $0xfa0] sm:$0xf] }
  0xde   : > { %v751_v27 = vld [vmem:[%s4026_s26 + $0xfb0] sm:$0xf]  ;;  %748 = vst [vmem:[%s4031_s30 + $0x3e4] sm:$0xf] %v747_v25  ;;  %750 = vst [vmem:[%s4031_s30 + $0x3e8] sm:$0xf] %v749_v26 }
  0xdf   : > { %752 = vst [vmem:[%s4031_s30 + $0x3ec] sm:$0xf] %v751_v27  ;;  %v753_v28 = vld [vmem:[%s4026_s26 + $0xfc0] sm:$0xf]  ;;  %v755_v29 = vld [vmem:[%s4026_s26 + $0xfd0] sm:$0xf] }
  0xe0   : > { %v757_v30 = vld [vmem:[%s4026_s26 + $0xfe0] sm:$0xf]  ;;  %754 = vst [vmem:[%s4031_s30 + $0x3f0] sm:$0xf] %v753_v28  ;;  %756 = vst [vmem:[%s4031_s30 + $0x3f4] sm:$0xf] %v755_v29 }
  0xe1   : > { %758 = vst [vmem:[%s4031_s30 + $0x3f8] sm:$0xf] %v757_v30  ;;  %v759_v31 = vld [vmem:[%s4026_s26 + $0xff0] sm:$0xf] }
  0xe2   : > { %760 = vst [vmem:[%s4031_s30 + $0x3fc] sm:$0xf] %v759_v31 }
  0xe3 PF: > { %p3128_p0 = scmp.ge.s32.totalorder %s3826_s19, 1  ;;  %p1294_p1 = scmp.lt.s32.totalorder %s3826_s19, 9 }
  0xe5   : > { %p1295_p2 = pnand %p3128_p0, %p1294_p1 }
  0xe6   : > { %s1301_s28 = sand.u32 (!%p1295_p2), 1, %s3802_s13   ;;  %s1308_s20 = sand.u32 (!%p1295_p2), 1, %s3794_s11  }
  0xe7   : > { %1298 = sbr.rel (%p1295_p2) target bundleno = 615 (0x267), region = 84  ;;  %s3129_s25 = sshll.u32 (!%p1295_p2), %s1301_s28, 8 }
  0xe8   : > { %s3130_s29 = sshll.u32 (!%p1295_p2), %s1308_s20, 10  ;;  %s1329_s3 = sand.u32 (!%p1295_p2), 1, %s3786_s9  }
  0xe9   : > { %s3131_s7 = sshll.u32 (!%p1295_p2), %s1329_s3, 5  ;;  %s4547_s8 = scalar_lea.vmem (!%p1295_p2), [#allocation2], %s3129_s25 }
  0xea   : > { %s4549_s23 = scalar_lea.vmem (!%p1295_p2), [#allocation3], %s3130_s29  ;;  %s4551_s24 = scalar_lea.vmem (!%p1295_p2), [#allocation4], %s3131_s7 }
  0xeb   : > { %p3132_p3 = scmp.ne.s32.totalorder (!%p1295_p2), %s3810_s15, 0 }
  0xee   : > { %1340 = sbr.rel (%p3132_p3) target bundleno = 245 (0xf5), region = 96  ;;  %v3828_v32 = vmov (!%p3132_p3), 0.0  }
  0xef   : > { %1341 = vst [vmem:[%s4551_s24] sm:$0xff] (!%p3132_p3), %v3828_v32  ;;  %1342 = vst [vmem:[%s4551_s24 + $0x8] sm:$0xff] (!%p3132_p3), %v3828_v32 }
  0xf0   : > { %1343 = vst [vmem:[%s4551_s24 + $0x10] sm:$0xff] (!%p3132_p3), %v3828_v32  ;;  %1344 = vst [vmem:[%s4551_s24 + $0x18] sm:$0xff] (!%p3132_p3), %v3828_v32 }
  0xf5 PF: > { %v3612_v33 = vld [vmem:[%s4549_s23 + $0x40] sm:$0xff]   ;;  %v3616_v37 = vld [vmem:[%s4549_s23 + $0x48] sm:$0xff]   ;;  %v3620_v41 = vld [vmem:[%s4549_s23 + $0x50] sm:$0xff]   ;;  %s3294_s9 = sshll.u32 (%p3938_p12), %s3814_s16, 3 }
  0xf6   : > { %v3613_v34 = vld [vmem:[%s4549_s23 + $0xc0] sm:$0xff]   ;;  %3299 = vmatprep.subr.bf16.mxu0 %v3612_v33  ;;  %v3617_v38 = vld [vmem:[%s4549_s23 + $0xc8] sm:$0xff]   ;;  %v3621_v42 = vld [vmem:[%s4549_s23 + $0xd0] sm:$0xff]   ;;  %s2976_s15 = scalar_lea.vmem (%p3938_p12), %s4771_s2, %s3294_s9 }
  0xf7   : > { %v3614_v35 = vld [vmem:[%s4549_s23] sm:$0xff]   ;;  %3327 = vmatprep.subr.bf16.mxu1 %v3613_v34  ;;  %v3618_v39 = vld [vmem:[%s4549_s23 + $0x8] sm:$0xff]   ;;  %v3622_v43 = vld [vmem:[%s4549_s23 + $0x10] sm:$0xff]  }
  0xf8   : > { %v3615_v36 = vld [vmem:[%s4549_s23 + $0x80] sm:$0xff]   ;;  %3300 = vmatpush3.bf16.msra.mxu0 %v3614_v35  ;;  %v3619_v40 = vld [vmem:[%s4549_s23 + $0x88] sm:$0xff]   ;;  %v3623_v44 = vld [vmem:[%s4549_s23 + $0x90] sm:$0xff]  }
  0xf9   : > { %3328 = vmatpush3.bf16.msra.mxu1 %v3615_v36  ;;  %3301 = vmatprep.subr.bf16.mxu0 %v3616_v37  ;;  %v3624_v45 = vld [vmem:[%s4549_s23 + $0x58] sm:$0xff]   ;;  %v3628_v49 = vld [vmem:[%s4549_s23 + $0x60] sm:$0xff]   ;;  %v3632_v53 = vld [vmem:[%s4549_s23 + $0x68] sm:$0xff]  }
  0xfa   : > { %3329 = vmatprep.subr.bf16.mxu1 %v3617_v38  ;;  %v3625_v46 = vld [vmem:[%s4549_s23 + $0xd8] sm:$0xff]   ;;  %v3629_v50 = vld [vmem:[%s4549_s23 + $0xe0] sm:$0xff]   ;;  %v3633_v54 = vld [vmem:[%s4549_s23 + $0xe8] sm:$0xff]  }
  0xfb   : > { %v3626_v47 = vld [vmem:[%s4549_s23 + $0x18] sm:$0xff]   ;;  %v3630_v51 = vld [vmem:[%s4549_s23 + $0x20] sm:$0xff]   ;;  %v3634_v55 = vld [vmem:[%s4549_s23 + $0x28] sm:$0xff]  }
  0xfc   : > { %3302 = vmatpush3.bf16.msra.mxu0 %v3618_v39  ;;  %v3627_v48 = vld [vmem:[%s4549_s23 + $0x98] sm:$0xff]   ;;  %v3631_v52 = vld [vmem:[%s4549_s23 + $0xa0] sm:$0xff]   ;;  %v3635_v56 = vld [vmem:[%s4549_s23 + $0xa8] sm:$0xff]  }
  0xfd   : > { %3330 = vmatpush3.bf16.msra.mxu1 %v3619_v40  ;;  %3303 = vmatprep.subr.bf16.mxu0 %v3620_v41  ;;  %v3636_v57 = vld [vmem:[%s4549_s23 + $0x70] sm:$0xff]   ;;  %v3640_v61 = vld [vmem:[%s4549_s23 + $0x78] sm:$0xff]   ;;  %v1349_v1 = vld [vmem:[%s4547_s8] sm:$0xff] }
  0xfe   : > { %3331 = vmatprep.subr.bf16.mxu1 %v3621_v42  ;;  %v3637_v58 = vld [vmem:[%s4549_s23 + $0xf0] sm:$0xff]   ;;  %v3641_v62 = vld [vmem:[%s4549_s23 + $0xf8] sm:$0xff]   ;;  %v1357_v2 = vld [vmem:[%s4547_s8 + $0x40] sm:$0xff] }
  0xff   : > { %v3638_v59 = vld [vmem:[%s4549_s23 + $0x30] sm:$0xff]   ;;  %v3642_v63 = vld [vmem:[%s4549_s23 + $0x38] sm:$0xff]   ;;  %v1350_v3 = vld [vmem:[%s4547_s8 + $0x8] sm:$0xff]  ;;  %v3133_v4 = vcombine.low %v1349_v1, %v1357_v2  ;;  %v3134_v5 = vcombine.high %v1349_v1, %v1357_v2 }
 0x100   : > { %3304 = vmatpush3.bf16.msra.mxu0 %v3622_v43  ;;  %v3639_v60 = vld [vmem:[%s4549_s23 + $0xb0] sm:$0xff]   ;;  %v3643_v0 = vld [vmem:[%s4549_s23 + $0xb8] sm:$0xff]   ;;  %v1358_v6 = vld [vmem:[%s4547_s8 + $0x48] sm:$0xff] }
 0x101   : > { %3332 = vmatpush3.bf16.msra.mxu1 %v3623_v44  ;;  %3305 = vmatprep.subr.bf16.mxu0 %v3624_v45  ;;  %v3135_v7 = vcombine.low %v1350_v3, %v1358_v6  ;;  %v3136_v8 = vcombine.high %v1350_v3, %v1358_v6  ;;  %v3644_v9 = vld [vmem:[%s4549_s23 + $0x140] sm:$0xff]   ;;  %v3648_v13 = vld [vmem:[%s4549_s23 + $0x148] sm:$0xff]   ;;  %v3652_v17 = vld [vmem:[%s4549_s23 + $0x150] sm:$0xff]  }
 0x102   : > { %3333 = vmatprep.subr.bf16.mxu1 %v3625_v46  ;;  %2597 = vmatprep.mubr.bf16.mxu0 %v3134_v5  ;;  %v3645_v10 = vld [vmem:[%s4549_s23 + $0x1c0] sm:$0xff]   ;;  %v3649_v14 = vld [vmem:[%s4549_s23 + $0x1c8] sm:$0xff]   ;;  %v3653_v18 = vld [vmem:[%s4549_s23 + $0x1d0] sm:$0xff]  }
 0x103   : > { %2646 = vmatprep.mubr.bf16.mxu1 %v3136_v8  ;;  %v3646_v11 = vld [vmem:[%s4549_s23 + $0x100] sm:$0xff]   ;;  %v3650_v15 = vld [vmem:[%s4549_s23 + $0x108] sm:$0xff]   ;;  %v3654_v19 = vld [vmem:[%s4549_s23 + $0x110] sm:$0xff]  }
 0x104   : > { %3306 = vmatpush3.bf16.msra.mxu0 %v3626_v47  ;;  %v3647_v12 = vld [vmem:[%s4549_s23 + $0x180] sm:$0xff]   ;;  %v3651_v16 = vld [vmem:[%s4549_s23 + $0x188] sm:$0xff]   ;;  %v3655_v20 = vld [vmem:[%s4549_s23 + $0x190] sm:$0xff]  }
 0x105   : > { %3334 = vmatpush3.bf16.msra.mxu1 %v3627_v48  ;;  %3307 = vmatprep.subr.bf16.mxu0 %v3628_v49  ;;  %v3656_v21 = vld [vmem:[%s4549_s23 + $0x158] sm:$0xff]   ;;  %v3660_v25 = vld [vmem:[%s4549_s23 + $0x160] sm:$0xff]   ;;  %v3664_v29 = vld [vmem:[%s4549_s23 + $0x168] sm:$0xff]  }
 0x106   : > { %3335 = vmatprep.subr.bf16.mxu1 %v3629_v50  ;;  %v3657_v22 = vld [vmem:[%s4549_s23 + $0x1d8] sm:$0xff]   ;;  %v3661_v26 = vld [vmem:[%s4549_s23 + $0x1e0] sm:$0xff]   ;;  %v3665_v30 = vld [vmem:[%s4549_s23 + $0x1e8] sm:$0xff]  }
 0x107   : > { %v3658_v23 = vld [vmem:[%s4549_s23 + $0x118] sm:$0xff]   ;;  %v3662_v27 = vld [vmem:[%s4549_s23 + $0x120] sm:$0xff]   ;;  %v1366_v34 = vld [vmem:[%s4547_s8 + $0x88] sm:$0xff] }
 0x108   : > { %3308 = vmatpush3.bf16.msra.mxu0 %v3630_v51  ;;  %v3659_v24 = vld [vmem:[%s4549_s23 + $0x198] sm:$0xff]   ;;  %v3663_v28 = vld [vmem:[%s4549_s23 + $0x1a0] sm:$0xff]   ;;  %v1374_v35 = vld [vmem:[%s4547_s8 + $0xc8] sm:$0xff] }
 0x109   : > { %3336 = vmatpush3.bf16.msra.mxu1 %v3631_v52  ;;  %3309 = vmatprep.subr.bf16.mxu0 %v3632_v53  ;;  %v1365_v31 = vld [vmem:[%s4547_s8 + $0x80] sm:$0xff]  ;;  %v3152_v37 = vcombine.high %v1366_v34, %v1374_v35  ;;  %v3666_v38 = vld [vmem:[%s4549_s23 + $0x128] sm:$0xff]   ;;  %v3151_v39 = vcombine.low %v1366_v34, %v1374_v35  ;;  %v3668_v41 = vld [vmem:[%s4549_s23 + $0x170] sm:$0xff]  }
 0x10a   : > { %3337 = vmatprep.subr.bf16.mxu1 %v3633_v54  ;;  %v1373_v32 = vld [vmem:[%s4547_s8 + $0xc0] sm:$0xff]  ;;  %v3667_v40 = vld [vmem:[%s4549_s23 + $0x1a8] sm:$0xff]   ;;  %v3669_v42 = vld [vmem:[%s4549_s23 + $0x1f0] sm:$0xff]  }
 0x10b   : > { %v3150_v33 = vcombine.high %v1365_v31, %v1373_v32  ;;  %v3149_v36 = vcombine.low %v1365_v31, %v1373_v32  ;;  %v3670_v43 = vld [vmem:[%s4549_s23 + $0x130] sm:$0xff]   ;;  %v3672_v45 = vld [vmem:[%s4549_s23 + $0x178] sm:$0xff]   ;;  %v1361_v34 = vld [vmem:[%s4547_s8 + $0x60] sm:$0xff] }
 0x10c   : > { %3310 = vmatpush3.bf16.msra.mxu0 %v3634_v55  ;;  %v3671_v44 = vld [vmem:[%s4549_s23 + $0x1b0] sm:$0xff]   ;;  %v3673_v46 = vld [vmem:[%s4549_s23 + $0x1f8] sm:$0xff]  }
 0x10d   : > { %3338 = vmatpush3.bf16.msra.mxu1 %v3635_v56  ;;  %3311 = vmatprep.subr.bf16.mxu0 %v3636_v57  ;;  %v3674_v47 = vld [vmem:[%s4549_s23 + $0x138] sm:$0xff]   ;;  %v1351_v49 = vld [vmem:[%s4547_s8 + $0x10] sm:$0xff]  ;;  %v3676_v57 = vld [vmem:[%s4549_s23 + $0x240] sm:$0xff]  }
 0x10e   : > { %3339 = vmatprep.subr.bf16.mxu1 %v3637_v58  ;;  %v3675_v48 = vld [vmem:[%s4549_s23 + $0x1b8] sm:$0xff]   ;;  %v1359_v50 = vld [vmem:[%s4547_s8 + $0x50] sm:$0xff]  ;;  %v3677_v58 = vld [vmem:[%s4549_s23 + $0x2c0] sm:$0xff]  }
 0x10f   : > { %v1352_v51 = vld [vmem:[%s4547_s8 + $0x18] sm:$0xff]  ;;  %v3137_v53 = vcombine.low %v1351_v49, %v1359_v50  ;;  %v3138_v54 = vcombine.high %v1351_v49, %v1359_v50  ;;  %v1367_v1 = vld [vmem:[%s4547_s8 + $0x90] sm:$0xff]  ;;  %v1369_v49 = vld [vmem:[%s4547_s8 + $0xa0] sm:$0xff] }
 0x110   : > { %3312 = vmatpush3.bf16.msra.mxu0 %v3638_v59  ;;  %v1360_v52 = vld [vmem:[%s4547_s8 + $0x58] sm:$0xff]  ;;  %v3678_v59 = vld [vmem:[%s4549_s23 + $0x200] sm:$0xff]   ;;  %v1375_v2 = vld [vmem:[%s4547_s8 + $0xd0] sm:$0xff] }
 0x111   : > { %3340 = vmatpush3.bf16.msra.mxu1 %v3639_v60  ;;  %3313 = vmatprep.subr.bf16.mxu0 %v3640_v61  ;;  %v3139_v55 = vcombine.low %v1352_v51, %v1360_v52  ;;  %v3140_v56 = vcombine.high %v1352_v51, %v1360_v52  ;;  %v3679_v60 = vld [vmem:[%s4549_s23 + $0x280] sm:$0xff]   ;;  %v3680_v61 = vld [vmem:[%s4549_s23 + $0x248] sm:$0xff]   ;;  %v3154_v3 = vcombine.high %v1367_v1, %v1375_v2  ;;  %v3684_v5 = vld [vmem:[%s4549_s23 + $0x250] sm:$0xff]  }
 0x112   : > { %3341 = vmatprep.subr.bf16.mxu1 %v3641_v62  ;;  %v3681_v62 = vld [vmem:[%s4549_s23 + $0x2c8] sm:$0xff]   ;;  %v3685_v6 = vld [vmem:[%s4549_s23 + $0x2d0] sm:$0xff]   ;;  %v1376_v8 = vld [vmem:[%s4547_s8 + $0xd8] sm:$0xff] }
 0x113   : > { %v3706_v31 = vld [vmem:[%s4549_s23 + $0x238] sm:$0xff]   ;;  %v1377_v50 = vld [vmem:[%s4547_s8 + $0xe0] sm:$0xff] }
 0x114   : > { %3314 = vmatpush3.bf16.msra.mxu0 %v3642_v63  ;;  %v3682_v63 = vld [vmem:[%s4549_s23 + $0x208] sm:$0xff]   ;;  %v3707_v32 = vld [vmem:[%s4549_s23 + $0x2b8] sm:$0xff]   ;;  %v3158_v51 = vcombine.high %v1369_v49, %v1377_v50  ;;  %v3157_v52 = vcombine.low %v1369_v49, %v1377_v50 }
 0x115   : > { %3342 = vmatpush3.bf16.msra.mxu1 %v3643_v0  ;;  %3355 = vmatprep.subr.bf16.mxu0 %v3644_v9  ;;  %v3683_v0 = vld [vmem:[%s4549_s23 + $0x288] sm:$0xff]  }
 0x116   : > { %3383 = vmatprep.subr.bf16.mxu1 %v3645_v10  ;;  %v3686_v10 = vld [vmem:[%s4549_s23 + $0x210] sm:$0xff]  }
 0x117   : > { %2598 = vmatmul.mubr.bf16.vlgmr.msra.gmra.mrb[0].mxu0 %v3133_v4  ;;  %v3153_v4 = vcombine.low %v1367_v1, %v1375_v2  ;;  %v3724_v1 = vld [vmem:[%s4549_s23 + $0x360] sm:$0xff]  }
 0x118   : > { %2647 = vmatmul.mubr.bf16.vlgmr.msra.gmra.mrb[0].mxu1 %v3135_v7  ;;  %3356 = vmatpush3.bf16.msra.mxu0 %v3646_v11  ;;  %v1368_v7 = vld [vmem:[%s4547_s8 + $0x98] sm:$0xff]  ;;  %v3725_v2 = vld [vmem:[%s4549_s23 + $0x3e0] sm:$0xff]  }
 0x119   : > { %3384 = vmatpush3.bf16.msra.mxu1 %v3647_v12  ;;  %3357 = vmatprep.subr.bf16.mxu0 %v3648_v13  ;;  %v3156_v9 = vcombine.high %v1368_v7, %v1376_v8  ;;  %v3155_v11 = vcombine.low %v1368_v7, %v1376_v8  ;;  %v3687_v12 = vld [vmem:[%s4549_s23 + $0x290] sm:$0xff]   ;;  %v3688_v13 = vld [vmem:[%s4549_s23 + $0x258] sm:$0xff]   ;;  %v3730_v7 = vld [vmem:[%s4549_s23 + $0x328] sm:$0xff]  }
 0x11a   : > { %3385 = vmatprep.subr.bf16.mxu1 %v3649_v14  ;;  %2605 = vmatprep.mubr.bf16.mxu0 %v3150_v33  ;;  %v3689_v14 = vld [vmem:[%s4549_s23 + $0x2d8] sm:$0xff]   ;;  %v1353_v33 = vld [vmem:[%s4547_s8 + $0x20] sm:$0xff]  ;;  %v3731_v8 = vld [vmem:[%s4549_s23 + $0x3a8] sm:$0xff]  }
 0x11b   : > { %2654 = vmatprep.mubr.bf16.mxu1 %v3152_v37  ;;  %v3141_v35 = vcombine.low %v1353_v33, %v1361_v34  ;;  %v1354_v37 = vld [vmem:[%s4547_s8 + $0x28] sm:$0xff] }
 0x11c   : > { %3358 = vmatpush3.bf16.msra.mxu0 %v3650_v15  ;;  %v3690_v15 = vld [vmem:[%s4549_s23 + $0x218] sm:$0xff]  }
 0x11d   : > { %3386 = vmatpush3.bf16.msra.mxu1 %v3651_v16  ;;  %3359 = vmatprep.subr.bf16.mxu0 %v3652_v17  ;;  %v3691_v16 = vld [vmem:[%s4549_s23 + $0x298] sm:$0xff]   ;;  %v3692_v17 = vld [vmem:[%s4549_s23 + $0x260] sm:$0xff]  }
 0x11e   : > { %3387 = vmatprep.subr.bf16.mxu1 %v3653_v18  ;;  %v3693_v18 = vld [vmem:[%s4549_s23 + $0x2e0] sm:$0xff]  }
 0x11f   : > { %2606 = vmatmul.mubr.bf16.gmra.mrb[4].mxu0 %v3149_v36  ;;  %v3142_v36 = vcombine.high %v1353_v33, %v1361_v34 }
 0x120   : > { %3360 = vmatpush3.bf16.msra.mxu0 %v3654_v19  ;;  %2655 = vmatmul.mubr.bf16.gmra.mrb[4].mxu1 %v3151_v39  ;;  %v3694_v19 = vld [vmem:[%s4549_s23 + $0x220] sm:$0xff]  }
 0x121   : > { %3388 = vmatpush3.bf16.msra.mxu1 %v3655_v20  ;;  %3361 = vmatprep.subr.bf16.mxu0 %v3656_v21  ;;  %v3695_v20 = vld [vmem:[%s4549_s23 + $0x2a0] sm:$0xff]   ;;  %v3696_v21 = vld [vmem:[%s4549_s23 + $0x268] sm:$0xff]  }
 0x122   : > { %3389 = vmatprep.subr.bf16.mxu1 %v3657_v22  ;;  %2695 = vmatprep.mubr.bf16.mxu0 %v3138_v54  ;;  %v3697_v22 = vld [vmem:[%s4549_s23 + $0x2e8] sm:$0xff]   ;;  %v3717_v54 = vld [vmem:[%s4549_s23 + $0x3d0] sm:$0xff]  }
 0x123   : > { %2744 = vmatprep.mubr.bf16.mxu1 %v3140_v56  ;;  %v1378_v56 = vld [vmem:[%s4547_s8 + $0xe8] sm:$0xff] }
 0x124   : > { %3362 = vmatpush3.bf16.msra.mxu0 %v3658_v23  ;;  %v3698_v23 = vld [vmem:[%s4549_s23 + $0x228] sm:$0xff]  }
 0x125   : > { %3390 = vmatpush3.bf16.msra.mxu1 %v3659_v24  ;;  %3363 = vmatprep.subr.bf16.mxu0 %v3660_v25  ;;  %v3699_v24 = vld [vmem:[%s4549_s23 + $0x2a8] sm:$0xff]   ;;  %v3700_v25 = vld [vmem:[%s4549_s23 + $0x270] sm:$0xff]  }
 0x126   : > { %3391 = vmatprep.subr.bf16.mxu1 %v3661_v26  ;;  %v3701_v26 = vld [vmem:[%s4549_s23 + $0x2f0] sm:$0xff]  }
 0x128   : > { %3364 = vmatpush3.bf16.msra.mxu0 %v3662_v27  ;;  %v3702_v27 = vld [vmem:[%s4549_s23 + $0x230] sm:$0xff]  }
 0x129   : > { %3392 = vmatpush3.bf16.msra.mxu1 %v3663_v28  ;;  %3365 = vmatprep.subr.bf16.mxu0 %v3664_v29  ;;  %v3703_v28 = vld [vmem:[%s4549_s23 + $0x2b0] sm:$0xff]   ;;  %v3704_v29 = vld [vmem:[%s4549_s23 + $0x278] sm:$0xff]  }
 0x12a   : > { %3393 = vmatprep.subr.bf16.mxu1 %v3665_v30  ;;  %v3705_v30 = vld [vmem:[%s4549_s23 + $0x2f8] sm:$0xff]  }
 0x12c   : > { %3366 = vmatpush3.bf16.msra.mxu0 %v3666_v38  ;;  %v1362_v38 = vld [vmem:[%s4547_s8 + $0x68] sm:$0xff] }
 0x12d   : > { %3394 = vmatpush3.bf16.msra.mxu1 %v3667_v40  ;;  %3367 = vmatprep.subr.bf16.mxu0 %v3668_v41  ;;  %v3143_v39 = vcombine.low %v1354_v37, %v1362_v38  ;;  %v3144_v40 = vcombine.high %v1354_v37, %v1362_v38  ;;  %v3708_v41 = vld [vmem:[%s4549_s23 + $0x340] sm:$0xff]  }
 0x12e   : > { %3395 = vmatprep.subr.bf16.mxu1 %v3669_v42  ;;  %v3709_v42 = vld [vmem:[%s4549_s23 + $0x3c0] sm:$0xff]  }
 0x130   : > { %3368 = vmatpush3.bf16.msra.mxu0 %v3670_v43  ;;  %v3710_v43 = vld [vmem:[%s4549_s23 + $0x300] sm:$0xff]  }
 0x131   : > { %3396 = vmatpush3.bf16.msra.mxu1 %v3671_v44  ;;  %3369 = vmatprep.subr.bf16.mxu0 %v3672_v45  ;;  %v3711_v44 = vld [vmem:[%s4549_s23 + $0x380] sm:$0xff]   ;;  %v3712_v45 = vld [vmem:[%s4549_s23 + $0x348] sm:$0xff]  }
 0x132   : > { %3397 = vmatprep.subr.bf16.mxu1 %v3673_v46  ;;  %v3713_v46 = vld [vmem:[%s4549_s23 + $0x3c8] sm:$0xff]  }
 0x134   : > { %3370 = vmatpush3.bf16.msra.mxu0 %v3674_v47  ;;  %v3714_v47 = vld [vmem:[%s4549_s23 + $0x308] sm:$0xff]  }
 0x135   : > { %3398 = vmatpush3.bf16.msra.mxu1 %v3675_v48  ;;  %3411 = vmatprep.subr.bf16.mxu0 %v3676_v57  ;;  %v3715_v48 = vld [vmem:[%s4549_s23 + $0x388] sm:$0xff]  }
 0x136   : > { %3439 = vmatprep.subr.bf16.mxu1 %v3677_v58  ;;  %v3718_v58 = vld [vmem:[%s4549_s23 + $0x310] sm:$0xff]  }
 0x137   : > { %2696 = vmatmul.mubr.bf16.vlgmr.msra.gmra.mrb[8].mxu0 %v3137_v53  ;;  %v3716_v53 = vld [vmem:[%s4549_s23 + $0x350] sm:$0xff]  }
 0x138   : > { %2745 = vmatmul.mubr.bf16.vlgmr.msra.gmra.mrb[8].mxu1 %v3139_v55  ;;  %3412 = vmatpush3.bf16.msra.mxu0 %v3678_v59  ;;  %v1370_v55 = vld [vmem:[%s4547_s8 + $0xa8] sm:$0xff] }
 0x139   : > { %3440 = vmatpush3.bf16.msra.mxu1 %v3679_v60  ;;  %3413 = vmatprep.subr.bf16.mxu0 %v3680_v61  ;;  %v3160_v57 = vcombine.high %v1370_v55, %v1378_v56  ;;  %v3159_v59 = vcombine.low %v1370_v55, %v1378_v56  ;;  %v3719_v60 = vld [vmem:[%s4549_s23 + $0x390] sm:$0xff]   ;;  %v3720_v61 = vld [vmem:[%s4549_s23 + $0x358] sm:$0xff]  }
 0x13a   : > { %3441 = vmatprep.subr.bf16.mxu1 %v3681_v62  ;;  %2703 = vmatprep.mubr.bf16.mxu0 %v3154_v3  ;;  %v3721_v62 = vld [vmem:[%s4549_s23 + $0x3d8] sm:$0xff]   ;;  %v3726_v3 = vld [vmem:[%s4549_s23 + $0x320] sm:$0xff]  }
 0x13b   : > { %2752 = vmatprep.mubr.bf16.mxu1 %v3156_v9  ;;  %v3732_v9 = vld [vmem:[%s4549_s23 + $0x370] sm:$0xff]  }
 0x13c   : > { %3414 = vmatpush3.bf16.msra.mxu0 %v3682_v63  ;;  %v3722_v63 = vld [vmem:[%s4549_s23 + $0x318] sm:$0xff]  }
 0x13d   : > { %3442 = vmatpush3.bf16.msra.mxu1 %v3683_v0  ;;  %3415 = vmatprep.subr.bf16.mxu0 %v3684_v5  ;;  %v3723_v0 = vld [vmem:[%s4549_s23 + $0x398] sm:$0xff]   ;;  %v3728_v5 = vld [vmem:[%s4549_s23 + $0x368] sm:$0xff]  }
 0x13e   : > { %3443 = vmatprep.subr.bf16.mxu1 %v3685_v6  ;;  %v3729_v6 = vld [vmem:[%s4549_s23 + $0x3e8] sm:$0xff]  }
 0x13f   : > { %2704 = vmatmul.mubr.bf16.gmra.mrb[12].mxu0 %v3153_v4  ;;  %v3727_v4 = vld [vmem:[%s4549_s23 + $0x3a0] sm:$0xff]  }
 0x140   : > { %3416 = vmatpush3.bf16.msra.mxu0 %v3686_v10  ;;  %2753 = vmatmul.mubr.bf16.gmra.mrb[12].mxu1 %v3155_v11  ;;  %v3733_v10 = vld [vmem:[%s4549_s23 + $0x3f0] sm:$0xff]  }
 0x141   : > { %3444 = vmatpush3.bf16.msra.mxu1 %v3687_v12  ;;  %3417 = vmatprep.subr.bf16.mxu0 %v3688_v13  ;;  %v3734_v11 = vld [vmem:[%s4549_s23 + $0x330] sm:$0xff]   ;;  %v3736_v13 = vld [vmem:[%s4549_s23 + $0x378] sm:$0xff]  }
 0x142   : > { %3445 = vmatprep.subr.bf16.mxu1 %v3689_v14  ;;  %2793 = vmatprep.mubr.bf16.mxu0 %v3142_v36  ;;  %v3735_v12 = vld [vmem:[%s4549_s23 + $0x3b0] sm:$0xff]   ;;  %v3737_v14 = vld [vmem:[%s4549_s23 + $0x3f8] sm:$0xff]  }
 0x143   : > { %2842 = vmatprep.mubr.bf16.mxu1 %v3144_v40 }
 0x144   : > { %3418 = vmatpush3.bf16.msra.mxu0 %v3690_v15  ;;  %v3738_v15 = vld [vmem:[%s4549_s23 + $0x338] sm:$0xff]  }
 0x145   : > { %3446 = vmatpush3.bf16.msra.mxu1 %v3691_v16  ;;  %3419 = vmatprep.subr.bf16.mxu0 %v3692_v17  ;;  %v3739_v16 = vld [vmem:[%s4549_s23 + $0x3b8] sm:$0xff]   ;;  %v1355_v17 = vld [vmem:[%s4547_s8 + $0x30] sm:$0xff] }
 0x146   : > { %3447 = vmatprep.subr.bf16.mxu1 %v3693_v18  ;;  %v1363_v18 = vld [vmem:[%s4547_s8 + $0x70] sm:$0xff] }
 0x148   : > { %3420 = vmatpush3.bf16.msra.mxu0 %v3694_v19  ;;  %v1356_v19 = vld [vmem:[%s4547_s8 + $0x38] sm:$0xff] }
 0x149   : > { %3448 = vmatpush3.bf16.msra.mxu1 %v3695_v20  ;;  %3421 = vmatprep.subr.bf16.mxu0 %v3696_v21  ;;  %v3145_v20 = vcombine.low %v1355_v17, %v1363_v18  ;;  %v3146_v21 = vcombine.high %v1355_v17, %v1363_v18 }
 0x14a   : > { %3449 = vmatprep.subr.bf16.mxu1 %v3697_v22  ;;  %v1364_v22 = vld [vmem:[%s4547_s8 + $0x78] sm:$0xff] }
 0x14c   : > { %3422 = vmatpush3.bf16.msra.mxu0 %v3698_v23  ;;  %v1371_v23 = vld [vmem:[%s4547_s8 + $0xb0] sm:$0xff] }
 0x14d   : > { %3450 = vmatpush3.bf16.msra.mxu1 %v3699_v24  ;;  %3423 = vmatprep.subr.bf16.mxu0 %v3700_v25  ;;  %v1379_v24 = vld [vmem:[%s4547_s8 + $0xf0] sm:$0xff]  ;;  %v3147_v25 = vcombine.low %v1356_v19, %v1364_v22 }
 0x14e   : > { %3451 = vmatprep.subr.bf16.mxu1 %v3701_v26  ;;  %v3148_v26 = vcombine.high %v1356_v19, %v1364_v22 }
 0x150   : > { %3424 = vmatpush3.bf16.msra.mxu0 %v3702_v27  ;;  %v3162_v27 = vcombine.high %v1371_v23, %v1379_v24 }
 0x151   : > { %3452 = vmatpush3.bf16.msra.mxu1 %v3703_v28  ;;  %3425 = vmatprep.subr.bf16.mxu0 %v3704_v29  ;;  %v1372_v28 = vld [vmem:[%s4547_s8 + $0xb8] sm:$0xff] }
 0x152   : > { %3453 = vmatprep.subr.bf16.mxu1 %v3705_v30  ;;  %v1380_v29 = vld [vmem:[%s4547_s8 + $0xf8] sm:$0xff] }
 0x153   : > { %v3164_v30 = vcombine.high %v1372_v28, %v1380_v29 }
 0x154   : > { %3426 = vmatpush3.bf16.msra.mxu0 %v3706_v31  ;;  %v3161_v31 = vcombine.low %v1371_v23, %v1379_v24 }
 0x155   : > { %3454 = vmatpush3.bf16.msra.mxu1 %v3707_v32  ;;  %3467 = vmatprep.subr.bf16.mxu0 %v3708_v41  ;;  %v3163_v32 = vcombine.low %v1372_v28, %v1380_v29 }
 0x156   : > { %3495 = vmatprep.subr.bf16.mxu1 %v3709_v42 }
 0x157   : > { %2794 = vmatmul.mubr.bf16.vlgmr.msra.gmra.mrb[16].mxu0 %v3141_v35 }
 0x158   : > { %2843 = vmatmul.mubr.bf16.vlgmr.msra.gmra.mrb[16].mxu1 %v3143_v39  ;;  %3468 = vmatpush3.bf16.msra.mxu0 %v3710_v43 }
 0x159   : > { %3496 = vmatpush3.bf16.msra.mxu1 %v3711_v44  ;;  %3469 = vmatprep.subr.bf16.mxu0 %v3712_v45 }
 0x15a   : > { %3497 = vmatprep.subr.bf16.mxu1 %v3713_v46  ;;  %2801 = vmatprep.mubr.bf16.mxu0 %v3158_v51 }
 0x15b   : > { %2850 = vmatprep.mubr.bf16.mxu1 %v3160_v57 }
 0x15c   : > { %3470 = vmatpush3.bf16.msra.mxu0 %v3714_v47 }
 0x15d   : > { %3498 = vmatpush3.bf16.msra.mxu1 %v3715_v48  ;;  %3471 = vmatprep.subr.bf16.mxu0 %v3716_v53 }
 0x15e   : > { %3499 = vmatprep.subr.bf16.mxu1 %v3717_v54 }
 0x15f   : > { %2802 = vmatmul.mubr.bf16.gmra.mrb[20].mxu0 %v3157_v52 }
 0x160   : > { %3472 = vmatpush3.bf16.msra.mxu0 %v3718_v58  ;;  %2851 = vmatmul.mubr.bf16.gmra.mrb[20].mxu1 %v3159_v59 }
 0x161   : > { %3500 = vmatpush3.bf16.msra.mxu1 %v3719_v60  ;;  %3473 = vmatprep.subr.bf16.mxu0 %v3720_v61 }
 0x162   : > { %3501 = vmatprep.subr.bf16.mxu1 %v3721_v62  ;;  %2891 = vmatprep.mubr.bf16.mxu0 %v3146_v21 }
 0x163   : > { %2940 = vmatprep.mubr.bf16.mxu1 %v3148_v26 }
 0x164   : > { %3474 = vmatpush3.bf16.msra.mxu0 %v3722_v63 }
 0x165   : > { %3502 = vmatpush3.bf16.msra.mxu1 %v3723_v0  ;;  %3475 = vmatprep.subr.bf16.mxu0 %v3724_v1 }
 0x166   : > { %3503 = vmatprep.subr.bf16.mxu1 %v3725_v2 }
 0x168   : > { %3476 = vmatpush3.bf16.msra.mxu0 %v3726_v3 }
 0x169   : > { %3504 = vmatpush3.bf16.msra.mxu1 %v3727_v4  ;;  %3477 = vmatprep.subr.bf16.mxu0 %v3728_v5 }
 0x16a   : > { %3505 = vmatprep.subr.bf16.mxu1 %v3729_v6 }
 0x16c   : > { %3478 = vmatpush3.bf16.msra.mxu0 %v3730_v7 }
 0x16d   : > { %3506 = vmatpush3.bf16.msra.mxu1 %v3731_v8  ;;  %3479 = vmatprep.subr.bf16.mxu0 %v3732_v9 }
 0x16e   : > { %3507 = vmatprep.subr.bf16.mxu1 %v3733_v10 }
 0x170   : > { %3480 = vmatpush3.bf16.msra.mxu0 %v3734_v11 }
 0x171   : > { %3508 = vmatpush3.bf16.msra.mxu1 %v3735_v12  ;;  %3481 = vmatprep.subr.bf16.mxu0 %v3736_v13 }
 0x172   : > { %3509 = vmatprep.subr.bf16.mxu1 %v3737_v14 }
 0x174   : > { %3482 = vmatpush3.bf16.msra.mxu0 %v3738_v15 }
 0x175   : > { %3510 = vmatpush3.bf16.msra.mxu1 %v3739_v16 }
 0x177   : > { %2892 = vmatmul.mubr.bf16.vlgmr.msra.gmra.mrb[24].mxu0 %v3145_v20 }
 0x178   : > { %2941 = vmatmul.mubr.bf16.vlgmr.msra.gmra.mrb[24].mxu1 %v3147_v25  ;;  %2899 = vmatprep.mubr.bf16.mxu0 %v3162_v27 }
 0x179   : > { %2948 = vmatprep.mubr.bf16.mxu1 %v3164_v30 }
 0x17f   : > { %2900 = vmatmul.mubr.bf16.gmra.mrb[28].mxu0 %v3161_v31 }
 0x180   : > { %2949 = vmatmul.mubr.bf16.gmra.mrb[28].mxu1 %v3163_v32 }
 0x1ea   : > { %v3315_v33 = vpop.f32.mrb[0].mxu0 }
 0x1eb   : > { %v3343_v34 = vpop.f32.mrb[0].mxu1  ;;  %v3316_v35 = vpop.f32.mrb[1].mxu0 }
 0x1ec   : > { %v3317_v36 = vadd.f32 %v3316_v35, %v3315_v33  ;;  %v3344_v37 = vpop.f32.mrb[1].mxu1  ;;  %v3318_v38 = vpop.f32.mrb[2].mxu0 }
 0x1ed   : > { %v3345_v39 = vadd.f32 %v3344_v37, %v3343_v34  ;;  %v3346_v40 = vpop.f32.mrb[2].mxu1  ;;  %v3319_v41 = vpop.f32.mrb[3].mxu0 }
 0x1ee   : > { %v3320_v42 = vadd.f32 %v3319_v41, %v3318_v38  ;;  %v3347_v43 = vpop.f32.mrb[3].mxu1 }
 0x1ef   : > { %v2649_v44 = vadd.f32 %v3345_v39, %v3317_v36  ;;  %v3348_v45 = vadd.f32 %v3347_v43, %v3346_v40 }
 0x1f1   : > { %v2652_v46 = vadd.f32 %v3348_v45, %v3320_v42 }
 0x1f2   : > { %v3321_v47 = vpop.f32.mrb[4].mxu0 }
 0x1f3   : > { %v3349_v48 = vpop.f32.mrb[4].mxu1  ;;  %v3322_v49 = vpop.f32.mrb[5].mxu0 }
 0x1f4   : > { %v3323_v50 = vadd.f32 %v3322_v49, %v3321_v47  ;;  %v3350_v51 = vpop.f32.mrb[5].mxu1  ;;  %v3324_v52 = vpop.f32.mrb[6].mxu0 }
 0x1f5   : > { %v3351_v53 = vadd.f32 %v3350_v51, %v3349_v48  ;;  %v3352_v54 = vpop.f32.mrb[6].mxu1  ;;  %v3325_v55 = vpop.f32.mrb[7].mxu0 }
 0x1f6   : > { %v3326_v56 = vadd.f32 %v3325_v55, %v3324_v52  ;;  %v3353_v57 = vpop.f32.mrb[7].mxu1 }
 0x1f7   : > { %v2657_v58 = vadd.f32 %v3351_v53, %v3323_v50  ;;  %v3354_v59 = vadd.f32 %v3353_v57, %v3352_v54 }
 0x1f9   : > { %v2660_v60 = vadd.f32 %v3354_v59, %v3326_v56 }
 0x20a   : > { %v3371_v61 = vpop.f32.mrb[8].mxu0 }
 0x20b   : > { %v3399_v62 = vpop.f32.mrb[8].mxu1  ;;  %v3372_v63 = vpop.f32.mrb[9].mxu0 }
 0x20c   : > { %v3400_v0 = vpop.f32.mrb[9].mxu1  ;;  %v3373_v1 = vadd.f32 %v3372_v63, %v3371_v61  ;;  %v3374_v3 = vpop.f32.mrb[10].mxu0 }
 0x20d   : > { %v3401_v2 = vadd.f32 %v3400_v0, %v3399_v62  ;;  %v3402_v4 = vpop.f32.mrb[10].mxu1  ;;  %v3375_v5 = vpop.f32.mrb[11].mxu0 }
 0x20e   : > { %v3403_v6 = vpop.f32.mrb[11].mxu1  ;;  %v2698_v7 = vadd.f32 %v3373_v1, %v2649_v44  ;;  %v3376_v8 = vadd.f32 %v3375_v5, %v3374_v3 }
 0x20f   : > { %v3404_v9 = vadd.f32 %v3403_v6, %v3402_v4 }
 0x210   : > { %v2747_v10 = vadd.f32 %v3401_v2, %v2698_v7  ;;  %v2701_v11 = vadd.f32 %v3376_v8, %v2652_v46 }
 0x212   : > { %v2750_v12 = vadd.f32 %v3404_v9, %v2701_v11  ;;  %v3377_v13 = vpop.f32.mrb[12].mxu0  ;;  %v1345_v9 = vld [vmem:[%s4551_s24] sm:$0xff] }
 0x213   : > { %v3378_v14 = vpop.f32.mrb[13].mxu0  ;;  %v3405_v19 = vpop.f32.mrb[12].mxu1 }
 0x214   : > { %v3379_v15 = vadd.f32 %v3378_v14, %v3377_v13  ;;  %v3380_v16 = vpop.f32.mrb[14].mxu0  ;;  %v3406_v21 = vpop.f32.mrb[13].mxu1  ;;  %v1346_v13 = vld [vmem:[%s4551_s24 + $0x8] sm:$0xff] }
 0x215   : > { %v3381_v17 = vpop.f32.mrb[15].mxu0  ;;  %v3407_v23 = vadd.f32 %v3406_v21, %v3405_v19  ;;  %v3408_v24 = vpop.f32.mrb[14].mxu1 }
 0x216   : > { %v2706_v18 = vadd.f32 %v3379_v15, %v2657_v58  ;;  %v3382_v20 = vadd.f32 %v3381_v17, %v3380_v16  ;;  %v3409_v25 = vpop.f32.mrb[15].mxu1 }
 0x217   : > { %v3410_v27 = vadd.f32 %v3409_v25, %v3408_v24 }
 0x218   : > { %v2709_v22 = vadd.f32 %v3382_v20, %v2660_v60  ;;  %v2755_v26 = vadd.f32 %v3407_v23, %v2706_v18 }
 0x21a   : > { %v2758_v28 = vadd.f32 %v3410_v27, %v2709_v22 }
 0x22a   : > { %v3427_v29 = vpop.f32.mrb[16].mxu0 }
 0x22b   : > { %v3455_v30 = vpop.f32.mrb[16].mxu1  ;;  %v3428_v31 = vpop.f32.mrb[17].mxu0 }
 0x22c   : > { %v3429_v32 = vadd.f32 %v3428_v31, %v3427_v29  ;;  %v3456_v33 = vpop.f32.mrb[17].mxu1  ;;  %v3430_v34 = vpop.f32.mrb[18].mxu0  ;;  %v1347_v29 = vld [vmem:[%s4551_s24 + $0x10] sm:$0xff] }
 0x22d   : > { %v3457_v35 = vadd.f32 %v3456_v33, %v3455_v30  ;;  %v3458_v36 = vpop.f32.mrb[18].mxu1  ;;  %v3431_v37 = vpop.f32.mrb[19].mxu0  ;;  %v1348_v33 = vld [vmem:[%s4551_s24 + $0x18] sm:$0xff] }
 0x22e   : > { %v2796_v38 = vadd.f32 %v3429_v32, %v2747_v10  ;;  %v3432_v39 = vadd.f32 %v3431_v37, %v3430_v34  ;;  %v3459_v40 = vpop.f32.mrb[19].mxu1 }
 0x22f   : > { %v3460_v41 = vadd.f32 %v3459_v40, %v3458_v36 }
 0x230   : > { %v2845_v42 = vadd.f32 %v3457_v35, %v2796_v38  ;;  %v2799_v43 = vadd.f32 %v3432_v39, %v2750_v12 }
 0x232   : > { %v2848_v44 = vadd.f32 %v3460_v41, %v2799_v43  ;;  %v3433_v45 = vpop.f32.mrb[20].mxu0 }
 0x233   : > { %v3434_v46 = vpop.f32.mrb[21].mxu0  ;;  %v3461_v49 = vpop.f32.mrb[20].mxu1 }
 0x234   : > { %v3435_v47 = vadd.f32 %v3434_v46, %v3433_v45  ;;  %v3436_v48 = vpop.f32.mrb[22].mxu0  ;;  %v3462_v53 = vpop.f32.mrb[21].mxu1 }
 0x235   : > { %v3437_v50 = vpop.f32.mrb[23].mxu0  ;;  %v3463_v54 = vadd.f32 %v3462_v53, %v3461_v49  ;;  %v3464_v55 = vpop.f32.mrb[22].mxu1 }
 0x236   : > { %v2804_v51 = vadd.f32 %v3435_v47, %v2755_v26  ;;  %v3438_v52 = vadd.f32 %v3437_v50, %v3436_v48  ;;  %v3465_v57 = vpop.f32.mrb[23].mxu1 }
 0x237   : > { %v3466_v59 = vadd.f32 %v3465_v57, %v3464_v55 }
 0x238   : > { %v2807_v56 = vadd.f32 %v3438_v52, %v2758_v28  ;;  %v2853_v58 = vadd.f32 %v3463_v54, %v2804_v51 }
 0x23a   : > { %v2856_v60 = vadd.f32 %v3466_v59, %v2807_v56 }
 0x24a   : > { %v3483_v61 = vpop.f32.mrb[24].mxu0 }
 0x24b   : > { %v3511_v62 = vpop.f32.mrb[24].mxu1  ;;  %v3484_v63 = vpop.f32.mrb[25].mxu0 }
 0x24c   : > { %v3485_v0 = vadd.f32 %v3484_v63, %v3483_v61  ;;  %v3512_v1 = vpop.f32.mrb[25].mxu1  ;;  %v3486_v2 = vpop.f32.mrb[26].mxu0 }
 0x24d   : > { %v3513_v3 = vadd.f32 %v3512_v1, %v3511_v62  ;;  %v3514_v4 = vpop.f32.mrb[26].mxu1  ;;  %v3487_v5 = vpop.f32.mrb[27].mxu0 }
 0x24e   : > { %v2894_v6 = vadd.f32 %v3485_v0, %v2845_v42  ;;  %v3488_v7 = vadd.f32 %v3487_v5, %v3486_v2  ;;  %v3515_v8 = vpop.f32.mrb[27].mxu1 }
 0x24f   : > { %v3516_v10 = vadd.f32 %v3515_v8, %v3514_v4 }
 0x250   : > { %v2943_v11 = vadd.f32 %v3513_v3, %v2894_v6  ;;  %v2897_v12 = vadd.f32 %v3488_v7, %v2848_v44 }
 0x252   : > { %v2957_v14 = vadd.f32 %v2943_v11, %v1345_v9  ;;  %v2946_v15 = vadd.f32 %v3516_v10, %v2897_v12  ;;  %v3489_v16 = vpop.f32.mrb[28].mxu0 }
 0x253   : > { %v3517_v17 = vpop.f32.mrb[28].mxu1  ;;  %v3490_v18 = vpop.f32.mrb[29].mxu0 }
 0x254   : > { %2961 = vst [vmem:[%s4551_s24] sm:$0xff] %v2957_v14  ;;  %v2958_v19 = vadd.f32 %v2946_v15, %v1346_v13  ;;  %v3491_v20 = vadd.f32 %v3490_v18, %v3489_v16  ;;  %v3518_v21 = vpop.f32.mrb[29].mxu1  ;;  %v3492_v22 = vpop.f32.mrb[30].mxu0 }
 0x255   : > { %v3519_v23 = vadd.f32 %v3518_v21, %v3517_v17  ;;  %v3520_v24 = vpop.f32.mrb[30].mxu1  ;;  %v3493_v25 = vpop.f32.mrb[31].mxu0 }
 0x256   : > { %2962 = vst [vmem:[%s4551_s24 + $0x8] sm:$0xff] %v2958_v19  ;;  %v2902_v26 = vadd.f32 %v3491_v20, %v2853_v58  ;;  %v3494_v27 = vadd.f32 %v3493_v25, %v3492_v22  ;;  %v3521_v28 = vpop.f32.mrb[31].mxu1 }
 0x257   : > { %v3522_v30 = vadd.f32 %v3521_v28, %v3520_v24 }
 0x258   : > { %v2951_v31 = vadd.f32 %v3519_v23, %v2902_v26  ;;  %v2905_v32 = vadd.f32 %v3494_v27, %v2856_v60  ;;  %2971 = sbr.rel (!%p3938_p12) target bundleno = 615 (0x267), region = 100 }
 0x25a   : > { %v2959_v34 = vadd.f32 %v2951_v31, %v1347_v29  ;;  %v2954_v35 = vadd.f32 %v3522_v30, %v2905_v32 }
 0x25b   : > { %v3010_v37 = vld [vmem:[%s4551_s24] sm:$0xff] (%p3938_p12) }
 0x25c   : > { %2963 = vst [vmem:[%s4551_s24 + $0x10] sm:$0xff] %v2959_v34  ;;  %v2960_v36 = vadd.f32 %v2954_v35, %v1348_v33  ;;  %3011 = vst [vmem:[%s2976_s15] sm:$0xff] (%p3938_p12), %v3010_v37 }
 0x25d   : > { %v3012_v38 = vld [vmem:[%s4551_s24 + $0x8] sm:$0xff] (%p3938_p12) }
 0x25e   : > { %2964 = vst [vmem:[%s4551_s24 + $0x18] sm:$0xff] %v2960_v36  ;;  %3013 = vst [vmem:[%s2976_s15 + $0x20] sm:$0xff] (%p3938_p12), %v3012_v38 }
 0x263   : > { %v3014_v39 = vld [vmem:[%s4551_s24 + $0x10] sm:$0xff] }
 0x264   : > { %3015 = vst [vmem:[%s2976_s15 + $0x40] sm:$0xff] %v3014_v39 }
 0x265   : > { %v3016_v40 = vld [vmem:[%s4551_s24 + $0x18] sm:$0xff] }
 0x266   : > { %3017 = vst [vmem:[%s2976_s15 + $0x60] sm:$0xff] %v3016_v40 }
 0x267 PF: > { %s12_s19 = sadd.s32 1, %s3826_s19   ;;  %s4775_s9 = smov %s3790_s10 }
 0x268   : > { %p9_p4 = scmp.ge.s32.totalorder %s12_s19, 10   ;;  %s4776_s10 = smov %s3936_s5 }
 0x269   : > { %s4777_s11 = smov %s3798_s12  ;;  %s4778_s12 = smov %s3933_s4 }
 0x26a   : > { %s4779_s13 = smov %s3806_s14  ;;  %s4780_s14 = smov %s3919_s27 }
 0x26b   : > { %s4781_s15 = smov %s3818_s17  ;;  %s4782_s16 = smov %s3822_s18 }
 0x26c   : > { %s4783_s17 = smov %s4786_s21  ;;  %s4784_s18 = smov %s4790_s22 }
 0x26d   :  { %11 = sbr.rel (!%p9_p4) target bundleno = 6 (0x6), region = 177 }

// kernel: discriminator_forward.13
= control target key start
LH: loop header
LB: loop body
LE: loop exit
PB: predicated region body
PF: predicated region fallthrough
CT: control target
= control target key end

     0   :  { %v14_v0 = vlaneseq  ;;  %v202_v4 = vmov 1966171168   ;;  %v203_v13 = vmov 0.0   ;;  %s305_s0 = inlined_call_operand.vmem [shape: f32[32,512], index: 0, kind: input, shape index: {}]   ;;  %s306_s1 = inlined_call_operand.vmem [shape: f32[1,512], index: 1, kind: output, shape index: {0}]   ;;  %s307_s2 = inlined_call_operand.vmem [shape: f32[1,512], index: 2, kind: output, shape index: {1}]  }
   0x1   :  { %v20_v1 = vld [vmem:[%s305_s0] sm:$0xff]  ;;  %v21_v2 = vld [vmem:[%s305_s0 + $0x8] sm:$0xff]  ;;  %v22_v3 = vld [vmem:[%s305_s0 + $0x10] sm:$0xff]  ;;  %v80_v5 = vunpack.c.l.s4 %v202_v4 }
   0x2   :  { %vm228_vm0 = vcmp.lt.s32.totalorder %v14_v0, 512  ;;  %v23_v7 = vld [vmem:[%s305_s0 + $0x18] sm:$0xff]  ;;  %v24_v8 = vld [vmem:[%s305_s0 + $0x20] sm:$0xff]  ;;  %v25_v9 = vld [vmem:[%s305_s0 + $0x28] sm:$0xff]  ;;  %v83_v10 = vshrl.u32 %v14_v0, 7  ;;  %v109_v11 = vmul.f32 %v20_v1, %v20_v1  ;;  %v110_v12 = vmul.f32 %v21_v2, %v21_v2 }
   0x3   :  { %18 = vst.msk [vmem:[%s306_s1] sm:$0xf] %vm228_vm0, %v203_v13  ;;  %v26_v14 = vld [vmem:[%s305_s0 + $0x30] sm:$0xff]  ;;  %v27_v15 = vld [vmem:[%s305_s0 + $0x38] sm:$0xff]  ;;  %v37_v16 = vadd.f32 %v24_v8, %v20_v1  ;;  %v46_v17 = vadd.f32 %v25_v9, %v21_v2  ;;  %v81_v18 = vunpack.c.0.s8 %v80_v5  ;;  %19 = vst.msk [vmem:[%s307_s2] sm:$0xf] %vm228_vm0, %v203_v13  ;;  %v111_v19 = vmul.f32 %v22_v3, %v22_v3 }
   0x4   :  { %v28_v20 = vld [vmem:[%s305_s0 + $0x40] sm:$0xff]  ;;  %v29_v21 = vld [vmem:[%s305_s0 + $0x48] sm:$0xff]  ;;  %v55_v22 = vadd.f32 %v26_v14, %v22_v3  ;;  %v64_v23 = vadd.f32 %v27_v15, %v23_v7  ;;  %v112_v24 = vmul.f32 %v23_v7, %v23_v7  ;;  %v113_v25 = vmul.f32 %v24_v8, %v24_v8  ;;  %v30_v26 = vld [vmem:[%s305_s0 + $0x50] sm:$0xff] }
   0x5   :  { %v31_v27 = vld [vmem:[%s305_s0 + $0x58] sm:$0xff]  ;;  %v38_v28 = vadd.f32 %v37_v16, %v28_v20  ;;  %v47_v29 = vadd.f32 %v46_v17, %v29_v21  ;;  %v269_v30 = vsub.s32 %v81_v18, %v83_v10  ;;  %v114_v31 = vmul.f32 %v25_v9, %v25_v9  ;;  %v32_v32 = vld [vmem:[%s305_s0 + $0x60] sm:$0xff]  ;;  %v33_v33 = vld [vmem:[%s305_s0 + $0x68] sm:$0xff] }
   0x6   :  { %v56_v34 = vadd.f32 %v55_v22, %v30_v26  ;;  %v65_v35 = vadd.f32 %v64_v23, %v31_v27  ;;  %v115_v36 = vmul.f32 %v26_v14, %v26_v14  ;;  %v116_v37 = vmul.f32 %v27_v15, %v27_v15  ;;  %v34_v38 = vld [vmem:[%s305_s0 + $0x70] sm:$0xff]  ;;  %v35_v39 = vld [vmem:[%s305_s0 + $0x78] sm:$0xff] }
   0x7   :  { %v39_v40 = vadd.f32 %v38_v28, %v32_v32  ;;  %v48_v41 = vadd.f32 %v47_v29, %v33_v33  ;;  %v117_v42 = vmul.f32 %v28_v20, %v28_v20  ;;  %v118_v43 = vmul.f32 %v29_v21, %v29_v21 }
   0x8   :  { %v57_v44 = vadd.f32 %v56_v34, %v34_v38  ;;  %v66_v45 = vadd.f32 %v65_v35, %v35_v39  ;;  %v119_v46 = vmul.f32 %v30_v26, %v30_v26  ;;  %v120_v47 = vmul.f32 %v31_v27, %v31_v27 }
   0x9   :  { %v40_v48 = vrot.slane %v39_v40, 4  ;;  %v49_v49 = vrot.slane %v48_v41, 4  ;;  %v121_v50 = vmul.f32 %v32_v32, %v32_v32  ;;  %v122_v51 = vmul.f32 %v33_v33, %v33_v33 }
   0xa   :  { %v58_v52 = vrot.slane %v57_v44, 4  ;;  %v67_v53 = vrot.slane %v66_v45, 4  ;;  %v123_v54 = vmul.f32 %v34_v38, %v34_v38  ;;  %v124_v55 = vmul.f32 %v35_v39, %v35_v39 }
   0xb   :  { %v41_v56 = vadd.f32 %v40_v48, %v39_v40  ;;  %v50_v57 = vadd.f32 %v49_v49, %v48_v41  ;;  %v125_v58 = vadd.f32 %v113_v25, %v109_v11  ;;  %v134_v59 = vadd.f32 %v114_v31, %v110_v12 }
   0xc   :  { %v59_v60 = vadd.f32 %v58_v52, %v57_v44  ;;  %v68_v61 = vadd.f32 %v67_v53, %v66_v45  ;;  %v143_v62 = vadd.f32 %v115_v36, %v111_v19  ;;  %v152_v63 = vadd.f32 %v116_v37, %v112_v24 }
   0xd   :  { %v42_v0 = vrot.slane %v41_v56, 2  ;;  %v51_v1 = vrot.slane %v50_v57, 2  ;;  %v126_v2 = vadd.f32 %v125_v58, %v117_v42  ;;  %v135_v3 = vadd.f32 %v134_v59, %v118_v43 }
   0xe   :  { %v60_v4 = vrot.slane %v59_v60, 2  ;;  %v69_v5 = vrot.slane %v68_v61, 2  ;;  %v144_v7 = vadd.f32 %v143_v62, %v119_v46  ;;  %v153_v8 = vadd.f32 %v152_v63, %v120_v47  ;;  %v108_v63 = vld [vmem:[%s307_s2] sm:$0xf] }
   0xf   :  { %v43_v9 = vadd.f32 %v42_v0, %v41_v56  ;;  %v52_v10 = vadd.f32 %v51_v1, %v50_v57  ;;  %v127_v13 = vadd.f32 %v126_v2, %v121_v50  ;;  %v136_v14 = vadd.f32 %v135_v3, %v122_v51  ;;  %v36_v51 = vld [vmem:[%s306_s1] sm:$0xf] }
  0x10   :  { %v61_v15 = vadd.f32 %v60_v4, %v59_v60  ;;  %v70_v16 = vadd.f32 %v69_v5, %v68_v61  ;;  %v145_v11 = vadd.f32 %v144_v7, %v123_v54  ;;  %v154_v12 = vadd.f32 %v153_v8, %v124_v55 }
  0x11   :  { %v44_v17 = vrot.slane %v43_v9, 1  ;;  %v53_v18 = vrot.slane %v52_v10, 1  ;;  %v128_v19 = vrot.slane %v127_v13, 4  ;;  %v137_v20 = vrot.slane %v136_v14, 4 }
  0x12   :  { %v62_v21 = vrot.slane %v61_v15, 1  ;;  %v71_v22 = vrot.slane %v70_v16, 1  ;;  %v146_v23 = vrot.slane %v145_v11, 4  ;;  %v155_v24 = vrot.slane %v154_v12, 4 }
  0x13   :  { %v45_v25 = vadd.f32 %v44_v17, %v43_v9  ;;  %v54_v26 = vadd.f32 %v53_v18, %v52_v10  ;;  %v129_v27 = vadd.f32 %v128_v19, %v127_v13  ;;  %v138_v28 = vadd.f32 %v137_v20, %v136_v14 }
  0x14   :  { %v63_v29 = vadd.f32 %v62_v21, %v61_v15  ;;  %v72_v31 = vadd.f32 %v71_v22, %v70_v16  ;;  %v147_v32 = vadd.f32 %v146_v23, %v145_v11  ;;  %v156_v33 = vadd.f32 %v155_v24, %v154_v12 }
  0x15   :  { %v77_v34 = vcombine.low %v45_v25, %v54_v26  ;;  %v130_v35 = vrot.slane %v129_v27, 2  ;;  %v139_v36 = vrot.slane %v138_v28, 2 }
  0x16   :  { %v78_v37 = vcombine.low %v63_v29, %v72_v31  ;;  %v148_v38 = vrot.slane %v147_v32, 2  ;;  %v157_v39 = vrot.slane %v156_v33, 2 }
  0x17   :  { %v85_v40 = vrot.slane %v77_v34, %v269_v30  ;;  %v131_v41 = vadd.f32 %v130_v35, %v129_v27  ;;  %v140_v42 = vadd.f32 %v139_v36, %v138_v28 }
  0x18   :  { %v92_v43 = vrot.slane %v78_v37, %v269_v30  ;;  %v149_v44 = vadd.f32 %v148_v38, %v147_v32  ;;  %v158_v45 = vadd.f32 %v157_v39, %v156_v33 }
  0x19   :  { %v132_v46 = vrot.slane %v131_v41, 1  ;;  %v141_v47 = vrot.slane %v140_v42, 1 }
  0x1a   :  { %v93_v48 = vcombine.low %v85_v40, %v92_v43  ;;  %v150_v49 = vrot.slane %v149_v44, 1  ;;  %v159_v50 = vrot.slane %v158_v45, 1 }
  0x1b   :  { %v133_v52 = vadd.f32 %v132_v46, %v131_v41  ;;  %v142_v53 = vadd.f32 %v141_v47, %v140_v42 }
  0x1c   :  { %v100_v54 = vrot.slane %v93_v48, %v269_v30  ;;  %v151_v55 = vadd.f32 %v150_v49, %v149_v44  ;;  %v160_v56 = vadd.f32 %v159_v50, %v158_v45 }
  0x1d   :  { %v165_v57 = vcombine.low %v133_v52, %v142_v53 }
  0x1e   :  { %v102_v58 = vadd.f32 %v100_v54, %v36_v51  ;;  %v166_v59 = vcombine.low %v151_v55, %v160_v56 }
  0x1f   :  { %v173_v60 = vrot.slane %v165_v57, %v269_v30 }
  0x20   :  { %107 = vst.msk [vmem:[%s306_s1] sm:$0xf] %vm228_vm0, %v102_v58  ;;  %v180_v61 = vrot.slane %v166_v59, %v269_v30 }
  0x22   :  { %v181_v62 = vcombine.low %v173_v60, %v180_v61 }
  0x24   :  { %v188_v0 = vrot.slane %v181_v62, %v269_v30 }
  0x26   :  { %v190_v1 = vadd.f32 %v188_v0, %v108_v63 }
  0x28   :  { %191 = vst.msk [vmem:[%s307_s2] sm:$0xf] %vm228_vm0, %v190_v1 }

// kernel: discriminator_forward.14
= control target key start
LH: loop header
LB: loop body
LE: loop exit
PB: predicated region body
PF: predicated region fallthrough
CT: control target
= control target key end

     0   :  { %v32_v0 = vlaneseq  ;;  %s328_s1 = inlined_call_operand.vmem [shape: f32[1,512], index: 1, kind: input, shape index: {}]   ;;  %s329_s2 = inlined_call_operand.vmem [shape: f32[1,512], index: 2, kind: input, shape index: {}]   ;;  %s330_s0 = inlined_call_operand.vmem [shape: f32[32,512], index: 0, kind: input, shape index: {}]   ;;  %s331_s3 = inlined_call_operand.vmem [shape: f32[32,512], index: 3, kind: output, shape index: {}]  }
   0x1   :  { %v30_v2 = vld [vmem:[%s328_s1] sm:$0xf]  ;;  %v15_v6 = vld [vmem:[%s330_s0 + $0x8] sm:$0xff]  ;;  %v16_v10 = vld [vmem:[%s330_s0 + $0x10] sm:$0xff] }
   0x2   :  { %v33_v1 = vshrl.u32 %v32_v0, 7  ;;  %v68_v3 = vld [vmem:[%s329_s2] sm:$0xf]  ;;  %v19_v12 = vld [vmem:[%s330_s0 + $0x28] sm:$0xff]  ;;  %v17_v17 = vld [vmem:[%s330_s0 + $0x18] sm:$0xff] }
   0x3   :  { %v14_v4 = vld [vmem:[%s330_s0] sm:$0xff]  ;;  %v20_v18 = vld [vmem:[%s330_s0 + $0x30] sm:$0xff]  ;;  %v21_v19 = vld [vmem:[%s330_s0 + $0x38] sm:$0xff] }
   0x4   :  { %v34_v5 = vsub.s32 0, %v33_v1  ;;  %v38_v7 = vsub.s32 1, %v33_v1  ;;  %v42_v8 = vsub.s32 2, %v33_v1  ;;  %v46_v9 = vsub.s32 3, %v33_v1  ;;  %v18_v11 = vld [vmem:[%s330_s0 + $0x20] sm:$0xff]  ;;  %v23_v37 = vld [vmem:[%s330_s0 + $0x48] sm:$0xff] }
   0x5   :  { %v22_v32 = vld [vmem:[%s330_s0 + $0x40] sm:$0xff]  ;;  %v24_v42 = vld [vmem:[%s330_s0 + $0x50] sm:$0xff]  ;;  %v25_v55 = vld [vmem:[%s330_s0 + $0x58] sm:$0xff] }
   0x6   :  { %v199_v13 = vrot.slane %v30_v2, %v34_v5  ;;  %v201_v14 = vrot.slane %v68_v3, %v34_v5  ;;  %v203_v15 = vrot.slane %v30_v2, %v38_v7  ;;  %v205_v16 = vrot.slane %v68_v3, %v38_v7  ;;  %v26_v56 = vld [vmem:[%s330_s0 + $0x60] sm:$0xff]  ;;  %v27_v57 = vld [vmem:[%s330_s0 + $0x68] sm:$0xff]  ;;  %v28_v62 = vld [vmem:[%s330_s0 + $0x70] sm:$0xff] }
   0x7   :  { %v216_v20 = vrot.slane %v30_v2, %v42_v8  ;;  %v218_v21 = vrot.slane %v68_v3, %v42_v8  ;;  %v220_v22 = vrot.slane %v30_v2, %v46_v9  ;;  %v222_v23 = vrot.slane %v68_v3, %v46_v9  ;;  %v29_v3 = vld [vmem:[%s330_s0 + $0x78] sm:$0xff] }
   0x8   :  { %v52_v24 = vmul.f32 %v199_v13, %v14_v4  ;;  %v53_v25 = vmul.f32 %v203_v15, %v15_v6  ;;  %v56_v26 = vmul.f32 %v199_v13, %v18_v11  ;;  %v57_v27 = vmul.f32 %v203_v15, %v19_v12 }
   0x9   :  { %v54_v28 = vmul.f32 %v216_v20, %v16_v10  ;;  %v55_v29 = vmul.f32 %v220_v22, %v17_v17  ;;  %v58_v30 = vmul.f32 %v216_v20, %v20_v18  ;;  %v59_v31 = vmul.f32 %v220_v22, %v21_v19 }
   0xa   :  { %v90_v33 = vadd.f32 %v201_v14, %v52_v24  ;;  %v91_v34 = vadd.f32 %v205_v16, %v53_v25  ;;  %v94_v35 = vadd.f32 %v201_v14, %v56_v26  ;;  %v95_v36 = vadd.f32 %v205_v16, %v57_v27 }
   0xb   :  { %v92_v38 = vadd.f32 %v218_v21, %v54_v28  ;;  %v93_v39 = vadd.f32 %v222_v23, %v55_v29  ;;  %v96_v40 = vadd.f32 %v218_v21, %v58_v30  ;;  %v97_v41 = vadd.f32 %v222_v23, %v59_v31 }
   0xc   :  { %v106_v43 = vmul.f32 0.2, %v90_v33  ;;  %v107_v44 = vmul.f32 0.2, %v91_v34  ;;  %v110_v45 = vmul.f32 0.2, %v94_v35  ;;  %v60_v46 = vmul.f32 %v199_v13, %v22_v32 }
   0xd   :  { %v108_v47 = vmul.f32 0.2, %v92_v38  ;;  %v109_v48 = vmul.f32 0.2, %v93_v39  ;;  %v111_v49 = vmul.f32 0.2, %v95_v36  ;;  %v61_v50 = vmul.f32 %v203_v15, %v23_v37 }
   0xe   :  { %v122_v51 = vmax.f32 %v90_v33, %v106_v43  ;;  %v123_v52 = vmax.f32 %v91_v34, %v107_v44  ;;  %v126_v53 = vmax.f32 %v94_v35, %v110_v45  ;;  %v112_v54 = vmul.f32 0.2, %v96_v40 }
   0xf   :  { %v124_v58 = vmax.f32 %v92_v38, %v108_v47  ;;  %v125_v59 = vmax.f32 %v93_v39, %v109_v48  ;;  %v127_v60 = vmax.f32 %v95_v36, %v111_v49  ;;  %v113_v61 = vmul.f32 0.2, %v97_v41 }
  0x10   :  { %138 = vst [vmem:[%s331_s3] sm:$0xff] %v122_v51  ;;  %139 = vst [vmem:[%s331_s3 + $0x8] sm:$0xff] %v123_v52  ;;  %v128_v63 = vmax.f32 %v96_v40, %v112_v54  ;;  %v98_v0 = vadd.f32 %v201_v14, %v60_v46  ;;  %v99_v1 = vadd.f32 %v205_v16, %v61_v50 }
  0x11   :  { %142 = vst [vmem:[%s331_s3 + $0x20] sm:$0xff] %v126_v53  ;;  %v62_v2 = vmul.f32 %v216_v20, %v24_v42  ;;  %140 = vst [vmem:[%s331_s3 + $0x10] sm:$0xff] %v124_v58  ;;  %v129_v4 = vmax.f32 %v97_v41, %v113_v61  ;;  %v63_v5 = vmul.f32 %v220_v22, %v25_v55 }
  0x12   :  { %141 = vst [vmem:[%s331_s3 + $0x18] sm:$0xff] %v125_v59  ;;  %143 = vst [vmem:[%s331_s3 + $0x28] sm:$0xff] %v127_v60  ;;  %v64_v6 = vmul.f32 %v199_v13, %v26_v56  ;;  %v65_v7 = vmul.f32 %v203_v15, %v27_v57  ;;  %v114_v8 = vmul.f32 0.2, %v98_v0  ;;  %v115_v9 = vmul.f32 0.2, %v99_v1 }
  0x13   :  { %144 = vst [vmem:[%s331_s3 + $0x30] sm:$0xff] %v128_v63  ;;  %v100_v10 = vadd.f32 %v218_v21, %v62_v2  ;;  %v66_v11 = vmul.f32 %v216_v20, %v28_v62  ;;  %145 = vst [vmem:[%s331_s3 + $0x38] sm:$0xff] %v129_v4  ;;  %v101_v12 = vadd.f32 %v222_v23, %v63_v5 }
  0x14   :  { %v102_v13 = vadd.f32 %v201_v14, %v64_v6  ;;  %v103_v15 = vadd.f32 %v205_v16, %v65_v7  ;;  %v67_v17 = vmul.f32 %v220_v22, %v29_v3  ;;  %v130_v18 = vmax.f32 %v98_v0, %v114_v8 }
  0x15   :  { %v131_v19 = vmax.f32 %v99_v1, %v115_v9  ;;  %v116_v24 = vmul.f32 0.2, %v100_v10  ;;  %v104_v25 = vadd.f32 %v218_v21, %v66_v11  ;;  %v117_v26 = vmul.f32 0.2, %v101_v12 }
  0x16   :  { %v118_v27 = vmul.f32 0.2, %v102_v13  ;;  %v119_v20 = vmul.f32 0.2, %v103_v15  ;;  %v105_v28 = vadd.f32 %v222_v23, %v67_v17  ;;  %146 = vst [vmem:[%s331_s3 + $0x40] sm:$0xff] %v130_v18 }
  0x17   :  { %147 = vst [vmem:[%s331_s3 + $0x48] sm:$0xff] %v131_v19  ;;  %v132_v14 = vmax.f32 %v100_v10, %v116_v24  ;;  %v120_v16 = vmul.f32 0.2, %v104_v25  ;;  %v133_v22 = vmax.f32 %v101_v12, %v117_v26 }
  0x18   :  { %v134_v29 = vmax.f32 %v102_v13, %v118_v27  ;;  %v135_v30 = vmax.f32 %v103_v15, %v119_v20  ;;  %v121_v31 = vmul.f32 0.2, %v105_v28 }
  0x19   :  { %148 = vst [vmem:[%s331_s3 + $0x50] sm:$0xff] %v132_v14  ;;  %v136_v21 = vmax.f32 %v104_v25, %v120_v16  ;;  %149 = vst [vmem:[%s331_s3 + $0x58] sm:$0xff] %v133_v22 }
  0x1a   :  { %150 = vst [vmem:[%s331_s3 + $0x60] sm:$0xff] %v134_v29  ;;  %151 = vst [vmem:[%s331_s3 + $0x68] sm:$0xff] %v135_v30  ;;  %v137_v23 = vmax.f32 %v105_v28, %v121_v31 }
  0x1b   :  { %152 = vst [vmem:[%s331_s3 + $0x70] sm:$0xff] %v136_v21 }
  0x1c   :  { %153 = vst [vmem:[%s331_s3 + $0x78] sm:$0xff] %v137_v23 }

// kernel: discriminator_forward.15
= control target key start
LH: loop header
LB: loop body
LE: loop exit
PB: predicated region body
PF: predicated region fallthrough
CT: control target
= control target key end

     0   :  { %s2305_s9 = smov 0   ;;  %s2307_s10 = smov 0   ;;  %s2517_s0 = inlined_call_operand.vmem [shape: bf16[2,8192], index: 0, kind: input, shape index: {}]   ;;  %s2518_s1 = inlined_call_operand.vmem [shape: bf16[8192,128], index: 1, kind: input, shape index: {}]   ;;  %s2519_s2 = inlined_call_operand.vmem [shape: f32[2,128], index: 2, kind: output, shape index: {}]  }
   0x1   :  { %s2309_s11 = smov 0  }
   0x2 LB: > { %s24_s12 = sadd.s32 1, %s2282_s10  ;;  %p1791_p0 = scmp.ge.s32.totalorder %s2286_s11, 1  ;;  %s2286_s11 = sphi %s2309_s11, %s12_s11   ;;  %s2282_s10 = sphi %s2307_s10, %s2521_s10   ;;  %s2278_s9 = sphi %s2305_s9, %s2520_s9  }
   0x3   : > { %p25_p1 = scmp.ge.s32.totalorder %s24_s12, 4  ;;  %p155_p2 = scmp.lt.s32.totalorder %s2286_s11, 5 }
   0x5   : > { %s2523_s12 = smov (%p25_p1, %s24_s12), 0  ;;  %p156_p3 = pnand %p1791_p0, %p155_p2 }
   0x6   : > { %s1792_s13 = sshll.u32 (!%p156_p3), %s2278_s9, 4  ;;  %s1793_s14 = sshll.u32 (!%p156_p3), %s2278_s9, 8 }
   0x7   : > { %159 = sbr.rel (%p156_p3) target bundleno = 411 (0x19b), region = 28  ;;  %p193_p4 = scmp.lt.s32.totalorder (!%p156_p3), %s1792_s13, 63 }
   0x8   : > { %p200_p5 = scmp.lt.s32.totalorder (!%p156_p3), %s1793_s14, 1023  ;;  %p1795_p6 = scmp.ne.s32.totalorder (!%p156_p3), %s2278_s9, 0 }
   0xe   : > { %s2525_s13 = smov (!%p193_p4, %s1792_s13), 63  ;;  %s2527_s14 = smov (!%p200_p5, %s1793_s14), 1023 }
   0xf   : > { %s2330_s17 = scalar_lea.vmem %s2517_s0, %s2525_s13  ;;  %s1794_s18 = sshll.u32 %s2527_s14, 2  ;;  %v2288_v0 = vmov (!%p1795_p6), 0.0  }
  0x10   : > { %s2335_s21 = scalar_lea.vmem %s2518_s1, %s1794_s18  ;;  %219 = sbr.rel (%p1795_p6) target bundleno = 23 (0x17), region = 32  ;;  %220 = vst [vmem:[%s2519_s2] sm:$0x3] (!%p1795_p6), %v2288_v0 }
  0x17 PF: > { %v2130_v1 = vld [vmem:[%s2335_s21 + $0x40] sm:$0xff]   ;;  %v2134_v5 = vld [vmem:[%s2335_s21 + $0x48] sm:$0xff]   ;;  %v2138_v9 = vld [vmem:[%s2335_s21 + $0x50] sm:$0xff]   ;;  %v486_v29 = vlaneseq  ;;  %v2289_v37 = vmov 1966171168   ;;  %p1924_p7 = scmp.ne.s32.totalorder %s2278_s9, 3 }
  0x18   : > { %v2131_v2 = vld [vmem:[%s2335_s21 + $0xc0] sm:$0xff]   ;;  %1928 = vmatprep.subr.bf16.mxu0 %v2130_v1  ;;  %v2135_v6 = vld [vmem:[%s2335_s21 + $0xc8] sm:$0xff]   ;;  %v2139_v10 = vld [vmem:[%s2335_s21 + $0xd0] sm:$0xff]   ;;  %v484_v38 = vunpack.c.l.s4 %v2289_v37 }
  0x19   : > { %v2132_v3 = vld [vmem:[%s2335_s21] sm:$0xff]   ;;  %1950 = vmatprep.subr.bf16.mxu1 %v2131_v2  ;;  %v2136_v7 = vld [vmem:[%s2335_s21 + $0x8] sm:$0xff]   ;;  %v2140_v11 = vld [vmem:[%s2335_s21 + $0x10] sm:$0xff]   ;;  %v487_v34 = vshrl.u32 %v486_v29, 7 }
  0x1a   : > { %v2133_v4 = vld [vmem:[%s2335_s21 + $0x80] sm:$0xff]   ;;  %1929 = vmatpush3.bf16.msra.mxu0 %v2132_v3  ;;  %v2137_v8 = vld [vmem:[%s2335_s21 + $0x88] sm:$0xff]   ;;  %v2141_v12 = vld [vmem:[%s2335_s21 + $0x90] sm:$0xff]   ;;  %v485_v41 = vunpack.c.0.s8 %v484_v38 }
  0x1b   : > { %1951 = vmatpush3.bf16.msra.mxu1 %v2133_v4  ;;  %1930 = vmatprep.subr.bf16.mxu0 %v2134_v5  ;;  %v2142_v13 = vld [vmem:[%s2335_s21 + $0x58] sm:$0xff]   ;;  %v2146_v17 = vld [vmem:[%s2335_s21 + $0x60] sm:$0xff]   ;;  %v2150_v21 = vld [vmem:[%s2335_s21 + $0x68] sm:$0xff]  }
  0x1c   : > { %1952 = vmatprep.subr.bf16.mxu1 %v2135_v6  ;;  %v2143_v14 = vld [vmem:[%s2335_s21 + $0xd8] sm:$0xff]   ;;  %v2147_v18 = vld [vmem:[%s2335_s21 + $0xe0] sm:$0xff]   ;;  %v2151_v22 = vld [vmem:[%s2335_s21 + $0xe8] sm:$0xff]   ;;  %v2376_v42 = vsub.s32 %v485_v41, %v487_v34 }
  0x1d   : > { %v2144_v15 = vld [vmem:[%s2335_s21 + $0x18] sm:$0xff]   ;;  %v2148_v19 = vld [vmem:[%s2335_s21 + $0x20] sm:$0xff]   ;;  %v2152_v23 = vld [vmem:[%s2335_s21 + $0x28] sm:$0xff]  }
  0x1e   : > { %1931 = vmatpush3.bf16.msra.mxu0 %v2136_v7  ;;  %v2145_v16 = vld [vmem:[%s2335_s21 + $0x98] sm:$0xff]   ;;  %v2149_v20 = vld [vmem:[%s2335_s21 + $0xa0] sm:$0xff]   ;;  %v2153_v24 = vld [vmem:[%s2335_s21 + $0xa8] sm:$0xff]  }
  0x1f   : > { %1953 = vmatpush3.bf16.msra.mxu1 %v2137_v8  ;;  %1932 = vmatprep.subr.bf16.mxu0 %v2138_v9  ;;  %v2154_v25 = vld [vmem:[%s2335_s21 + $0x70] sm:$0xff]   ;;  %v2158_v30 = vld [vmem:[%s2335_s21 + $0x78] sm:$0xff]   ;;  %v222_v35 = vld [vmem:[%s2330_s17] sm:$0xff] }
  0x20   : > { %1954 = vmatprep.subr.bf16.mxu1 %v2139_v10  ;;  %v2155_v26 = vld [vmem:[%s2335_s21 + $0xf0] sm:$0xff]   ;;  %v2159_v31 = vld [vmem:[%s2335_s21 + $0xf8] sm:$0xff]   ;;  %v2163_v36 = vld [vmem:[%s2335_s21 + $0x140] sm:$0xff]   ;;  %v482_v40 = vcombine.high %v222_v35, %v222_v35  ;;  %v489_v43 = vrot.slane %v222_v35, %v2376_v42 }
  0x21   : > { %v2156_v27 = vld [vmem:[%s2335_s21 + $0x30] sm:$0xff]   ;;  %v2160_v32 = vld [vmem:[%s2335_s21 + $0x38] sm:$0xff]   ;;  %v2164_v39 = vld [vmem:[%s2335_s21 + $0x1c0] sm:$0xff]  }
  0x22   : > { %1933 = vmatpush3.bf16.msra.mxu0 %v2140_v11  ;;  %v2157_v28 = vld [vmem:[%s2335_s21 + $0xb0] sm:$0xff]   ;;  %v2161_v33 = vld [vmem:[%s2335_s21 + $0xb8] sm:$0xff]   ;;  %v2380_v44 = vrot.slane %v482_v40, %v2376_v42  ;;  %v497_v45 = vcombine.high %v489_v43, %v489_v43  ;;  %v505_v46 = vrot.slane %v489_v43, %v2376_v42  ;;  %v2165_v49 = vld [vmem:[%s2335_s21 + $0x100] sm:$0xff]  }
  0x23   : > { %1955 = vmatpush3.bf16.msra.mxu1 %v2141_v12  ;;  %1934 = vmatprep.subr.bf16.mxu0 %v2142_v13  ;;  %v2167_v52 = vld [vmem:[%s2335_s21 + $0x148] sm:$0xff]   ;;  %v2166_v54 = vld [vmem:[%s2335_s21 + $0x180] sm:$0xff]   ;;  %v2171_v58 = vld [vmem:[%s2335_s21 + $0x150] sm:$0xff]  }
  0x24   : > { %1956 = vmatprep.subr.bf16.mxu1 %v2143_v14  ;;  %v498_v47 = vcombine.high %v2380_v44, %v2380_v44  ;;  %v519_v48 = vrot.slane %v497_v45, %v2376_v42  ;;  %v527_v51 = vcombine.high %v505_v46, %v505_v46  ;;  %v2168_v55 = vld [vmem:[%s2335_s21 + $0x1c8] sm:$0xff]   ;;  %v2172_v60 = vld [vmem:[%s2335_s21 + $0x1d0] sm:$0xff]   ;;  %v2175_v62 = vld [vmem:[%s2335_s21 + $0x158] sm:$0xff]  }
  0x25   : > { %v2169_v57 = vld [vmem:[%s2335_s21 + $0x108] sm:$0xff]   ;;  %v2173_v61 = vld [vmem:[%s2335_s21 + $0x110] sm:$0xff]   ;;  %v2176_v0 = vld [vmem:[%s2335_s21 + $0x1d8] sm:$0xff]  }
  0x26   : > { %1935 = vmatpush3.bf16.msra.mxu0 %v2144_v15  ;;  %v526_v50 = vrot.slane %v498_v47, %v2376_v42  ;;  %1396 = vmatprep.mubr.bf16.mxu0 %v519_v48  ;;  %v529_v53 = vcombine.high %v519_v48, %v519_v48  ;;  %v2170_v59 = vld [vmem:[%s2335_s21 + $0x188] sm:$0xff]   ;;  %v2174_v63 = vld [vmem:[%s2335_s21 + $0x190] sm:$0xff]   ;;  %v2177_v1 = vld [vmem:[%s2335_s21 + $0x118] sm:$0xff]  }
  0x27   : > { %1957 = vmatpush3.bf16.msra.mxu1 %v2145_v16  ;;  %1936 = vmatprep.subr.bf16.mxu0 %v2146_v17  ;;  %v2179_v2 = vld [vmem:[%s2335_s21 + $0x160] sm:$0xff]   ;;  %v2178_v3 = vld [vmem:[%s2335_s21 + $0x198] sm:$0xff]   ;;  %v2183_v6 = vld [vmem:[%s2335_s21 + $0x168] sm:$0xff]  }
  0x28   : > { %1958 = vmatprep.subr.bf16.mxu1 %v2147_v18  ;;  %v530_v56 = vcombine.high %v526_v50, %v526_v50  ;;  %1436 = vmatprep.mubr.bf16.mxu1 %v529_v53  ;;  %v2180_v4 = vld [vmem:[%s2335_s21 + $0x1e0] sm:$0xff]   ;;  %v2184_v8 = vld [vmem:[%s2335_s21 + $0x1e8] sm:$0xff]   ;;  %v2187_v10 = vld [vmem:[%s2335_s21 + $0x170] sm:$0xff]   ;;  %v512_v18 = vrot.slane %v2380_v44, %v2376_v42 }
  0x29   : > { %v2181_v5 = vld [vmem:[%s2335_s21 + $0x120] sm:$0xff]   ;;  %v2185_v9 = vld [vmem:[%s2335_s21 + $0x128] sm:$0xff]   ;;  %v2188_v12 = vld [vmem:[%s2335_s21 + $0x1f0] sm:$0xff]  }
  0x2a   : > { %1937 = vmatpush3.bf16.msra.mxu0 %v2148_v19  ;;  %v2182_v7 = vld [vmem:[%s2335_s21 + $0x1a0] sm:$0xff]   ;;  %v2186_v11 = vld [vmem:[%s2335_s21 + $0x1a8] sm:$0xff]   ;;  %v2189_v13 = vld [vmem:[%s2335_s21 + $0x130] sm:$0xff]  }
  0x2b   : > { %1959 = vmatpush3.bf16.msra.mxu1 %v2149_v20  ;;  %1938 = vmatprep.subr.bf16.mxu0 %v2150_v21  ;;  %v2191_v14 = vld [vmem:[%s2335_s21 + $0x178] sm:$0xff]   ;;  %v2190_v15 = vld [vmem:[%s2335_s21 + $0x1b0] sm:$0xff]   ;;  %v2195_v19 = vld [vmem:[%s2335_s21 + $0x240] sm:$0xff]  }
  0x2c   : > { %1960 = vmatprep.subr.bf16.mxu1 %v2151_v22  ;;  %v2192_v16 = vld [vmem:[%s2335_s21 + $0x1f8] sm:$0xff]   ;;  %v2196_v21 = vld [vmem:[%s2335_s21 + $0x2c0] sm:$0xff]   ;;  %v2202_v29 = vld [vmem:[%s2335_s21 + $0x288] sm:$0xff]  }
  0x2d   : > { %v2193_v17 = vld [vmem:[%s2335_s21 + $0x138] sm:$0xff]   ;;  %v2197_v22 = vld [vmem:[%s2335_s21 + $0x200] sm:$0xff]   ;;  %v2215_v40 = vld [vmem:[%s2335_s21 + $0x268] sm:$0xff]  }
  0x2e   : > { %1939 = vmatpush3.bf16.msra.mxu0 %v2152_v23  ;;  %v2194_v20 = vld [vmem:[%s2335_s21 + $0x1b8] sm:$0xff]   ;;  %v528_v23 = vcombine.high %v512_v18, %v512_v18  ;;  %v2212_v38 = vld [vmem:[%s2335_s21 + $0x2e0] sm:$0xff]   ;;  %v2216_v43 = vld [vmem:[%s2335_s21 + $0x2e8] sm:$0xff]  }
  0x2f   : > { %1961 = vmatpush3.bf16.msra.mxu1 %v2153_v24  ;;  %1940 = vmatprep.subr.bf16.mxu0 %v2154_v25  ;;  %v2199_v24 = vld [vmem:[%s2335_s21 + $0x248] sm:$0xff]   ;;  %v2198_v25 = vld [vmem:[%s2335_s21 + $0x280] sm:$0xff]   ;;  %v2208_v34 = vld [vmem:[%s2335_s21 + $0x2d8] sm:$0xff]  }
  0x30   : > { %1962 = vmatprep.subr.bf16.mxu1 %v2155_v26  ;;  %v2200_v26 = vld [vmem:[%s2335_s21 + $0x2c8] sm:$0xff]   ;;  %v2209_v35 = vld [vmem:[%s2335_s21 + $0x218] sm:$0xff]   ;;  %v2214_v41 = vld [vmem:[%s2335_s21 + $0x2a0] sm:$0xff]  }
  0x31   : > { %v2210_v37 = vld [vmem:[%s2335_s21 + $0x298] sm:$0xff]   ;;  %v2217_v44 = vld [vmem:[%s2335_s21 + $0x228] sm:$0xff]   ;;  %v2219_v45 = vld [vmem:[%s2335_s21 + $0x270] sm:$0xff]  }
  0x32   : > { %1941 = vmatpush3.bf16.msra.mxu0 %v2156_v27  ;;  %v2201_v27 = vld [vmem:[%s2335_s21 + $0x208] sm:$0xff]  }
  0x33   : > { %1963 = vmatpush3.bf16.msra.mxu1 %v2157_v28  ;;  %1942 = vmatprep.subr.bf16.mxu0 %v2158_v30  ;;  %v2203_v28 = vld [vmem:[%s2335_s21 + $0x250] sm:$0xff]   ;;  %v2218_v47 = vld [vmem:[%s2335_s21 + $0x2a8] sm:$0xff]  }
  0x34   : > { %1964 = vmatprep.subr.bf16.mxu1 %v2159_v31  ;;  %v2204_v30 = vld [vmem:[%s2335_s21 + $0x2d0] sm:$0xff]  }
  0x35   : > { %v2205_v31 = vld [vmem:[%s2335_s21 + $0x210] sm:$0xff]  }
  0x36   : > { %1943 = vmatpush3.bf16.msra.mxu0 %v2160_v32  ;;  %v2207_v32 = vld [vmem:[%s2335_s21 + $0x258] sm:$0xff]  }
  0x37   : > { %1965 = vmatpush3.bf16.msra.mxu1 %v2161_v33  ;;  %1972 = vmatprep.subr.bf16.mxu0 %v2163_v36  ;;  %v2206_v33 = vld [vmem:[%s2335_s21 + $0x290] sm:$0xff]   ;;  %v2211_v36 = vld [vmem:[%s2335_s21 + $0x260] sm:$0xff]  }
  0x38   : > { %1994 = vmatprep.subr.bf16.mxu1 %v2164_v39  ;;  %v2213_v39 = vld [vmem:[%s2335_s21 + $0x220] sm:$0xff]  }
  0x39   : > { %1397 = vmatmul.mubr.bf16.vlgmr.msra.gmra.mrb[0].mxu0 %v505_v46  ;;  %v223_v46 = vld [vmem:[%s2330_s17 + $0x8] sm:$0xff] }
  0x3a   : > { %1973 = vmatpush3.bf16.msra.mxu0 %v2165_v49  ;;  %1437 = vmatmul.mubr.bf16.vlgmr.msra.gmra.mrb[0].mxu1 %v527_v51  ;;  %v538_v48 = vrot.slane %v223_v46, %v2376_v42  ;;  %v531_v49 = vcombine.high %v223_v46, %v223_v46  ;;  %v2221_v51 = vld [vmem:[%s2335_s21 + $0x230] sm:$0xff]  }
  0x3b   : > { %1974 = vmatprep.subr.bf16.mxu0 %v2167_v52  ;;  %1995 = vmatpush3.bf16.msra.mxu1 %v2166_v54  ;;  %v2223_v54 = vld [vmem:[%s2335_s21 + $0x278] sm:$0xff]  }
  0x3c   : > { %1476 = vmatprep.mubr.bf16.mxu0 %v526_v50  ;;  %1996 = vmatprep.subr.bf16.mxu1 %v2168_v55  ;;  %v2220_v50 = vld [vmem:[%s2335_s21 + $0x2f0] sm:$0xff]   ;;  %v546_v52 = vcombine.high %v538_v48, %v538_v48  ;;  %v2449_v53 = vrot.slane %v531_v49, %v2376_v42 }
  0x3d   : > { %1516 = vmatprep.mubr.bf16.mxu1 %v530_v56  ;;  %v2222_v55 = vld [vmem:[%s2335_s21 + $0x2b0] sm:$0xff]  }
  0x3e   : > { %1975 = vmatpush3.bf16.msra.mxu0 %v2169_v57  ;;  %v568_v56 = vrot.slane %v546_v52, %v2376_v42  ;;  %v547_v57 = vcombine.high %v2449_v53, %v2449_v53 }
  0x3f   : > { %1976 = vmatprep.subr.bf16.mxu0 %v2171_v58  ;;  %1997 = vmatpush3.bf16.msra.mxu1 %v2170_v59  ;;  %v2224_v58 = vld [vmem:[%s2335_s21 + $0x2f8] sm:$0xff]  }
  0x40   : > { %1998 = vmatprep.subr.bf16.mxu1 %v2172_v60  ;;  %v2225_v59 = vld [vmem:[%s2335_s21 + $0x238] sm:$0xff]   ;;  %v578_v60 = vcombine.high %v568_v56, %v568_v56 }
  0x42   : > { %1977 = vmatpush3.bf16.msra.mxu0 %v2173_v61  ;;  %v554_v61 = vrot.slane %v538_v48, %v2376_v42 }
  0x43   : > { %1978 = vmatprep.subr.bf16.mxu0 %v2175_v62  ;;  %1999 = vmatpush3.bf16.msra.mxu1 %v2174_v63  ;;  %v2227_v62 = vld [vmem:[%s2335_s21 + $0x340] sm:$0xff]   ;;  %v2226_v63 = vld [vmem:[%s2335_s21 + $0x2b8] sm:$0xff]  }
  0x44   : > { %2000 = vmatprep.subr.bf16.mxu1 %v2176_v0  ;;  %v575_v0 = vrot.slane %v547_v57, %v2376_v42 }
  0x46   : > { %1979 = vmatpush3.bf16.msra.mxu0 %v2177_v1  ;;  %v2228_v1 = vld [vmem:[%s2335_s21 + $0x3c0] sm:$0xff]  }
  0x47   : > { %1980 = vmatprep.subr.bf16.mxu0 %v2179_v2  ;;  %2001 = vmatpush3.bf16.msra.mxu1 %v2178_v3  ;;  %v2229_v2 = vld [vmem:[%s2335_s21 + $0x300] sm:$0xff]   ;;  %v576_v3 = vcombine.high %v554_v61, %v554_v61 }
  0x48   : > { %2002 = vmatprep.subr.bf16.mxu1 %v2180_v4  ;;  %v2231_v4 = vld [vmem:[%s2335_s21 + $0x348] sm:$0xff]  }
  0x4a   : > { %1981 = vmatpush3.bf16.msra.mxu0 %v2181_v5  ;;  %v2230_v5 = vld [vmem:[%s2335_s21 + $0x380] sm:$0xff]  }
  0x4b   : > { %1982 = vmatprep.subr.bf16.mxu0 %v2183_v6  ;;  %2003 = vmatpush3.bf16.msra.mxu1 %v2182_v7  ;;  %v579_v6 = vcombine.high %v575_v0, %v575_v0  ;;  %v2232_v7 = vld [vmem:[%s2335_s21 + $0x3c8] sm:$0xff]  }
  0x4c   : > { %2004 = vmatprep.subr.bf16.mxu1 %v2184_v8  ;;  %v2233_v8 = vld [vmem:[%s2335_s21 + $0x308] sm:$0xff]  }
  0x4e   : > { %1983 = vmatpush3.bf16.msra.mxu0 %v2185_v9  ;;  %v2235_v9 = vld [vmem:[%s2335_s21 + $0x350] sm:$0xff]  }
  0x4f   : > { %1984 = vmatprep.subr.bf16.mxu0 %v2187_v10  ;;  %2005 = vmatpush3.bf16.msra.mxu1 %v2186_v11  ;;  %v2234_v10 = vld [vmem:[%s2335_s21 + $0x388] sm:$0xff]   ;;  %v2236_v11 = vld [vmem:[%s2335_s21 + $0x3d0] sm:$0xff]  }
  0x50   : > { %2006 = vmatprep.subr.bf16.mxu1 %v2188_v12  ;;  %v2237_v12 = vld [vmem:[%s2335_s21 + $0x310] sm:$0xff]  }
  0x52   : > { %1985 = vmatpush3.bf16.msra.mxu0 %v2189_v13  ;;  %v2239_v13 = vld [vmem:[%s2335_s21 + $0x358] sm:$0xff]  }
  0x53   : > { %1986 = vmatprep.subr.bf16.mxu0 %v2191_v14  ;;  %2007 = vmatpush3.bf16.msra.mxu1 %v2190_v15  ;;  %v2238_v14 = vld [vmem:[%s2335_s21 + $0x390] sm:$0xff]   ;;  %v2240_v15 = vld [vmem:[%s2335_s21 + $0x3d8] sm:$0xff]  }
  0x54   : > { %2008 = vmatprep.subr.bf16.mxu1 %v2192_v16  ;;  %v2241_v16 = vld [vmem:[%s2335_s21 + $0x318] sm:$0xff]  }
  0x56   : > { %1987 = vmatpush3.bf16.msra.mxu0 %v2193_v17  ;;  %v2243_v17 = vld [vmem:[%s2335_s21 + $0x360] sm:$0xff]  }
  0x57   : > { %2016 = vmatprep.subr.bf16.mxu0 %v2195_v19  ;;  %2009 = vmatpush3.bf16.msra.mxu1 %v2194_v20  ;;  %v2244_v19 = vld [vmem:[%s2335_s21 + $0x3e0] sm:$0xff]  }
  0x58   : > { %2038 = vmatprep.subr.bf16.mxu1 %v2196_v21  ;;  %v2245_v20 = vld [vmem:[%s2335_s21 + $0x320] sm:$0xff]   ;;  %v2247_v21 = vld [vmem:[%s2335_s21 + $0x368] sm:$0xff]  }
  0x59   : > { %1477 = vmatmul.mubr.bf16.vlgmr.msra.gmra.mrb[4].mxu0 %v512_v18  ;;  %v2242_v18 = vld [vmem:[%s2335_s21 + $0x398] sm:$0xff]  }
  0x5a   : > { %2017 = vmatpush3.bf16.msra.mxu0 %v2197_v22  ;;  %1517 = vmatmul.mubr.bf16.vlgmr.msra.gmra.mrb[4].mxu1 %v528_v23  ;;  %v2246_v22 = vld [vmem:[%s2335_s21 + $0x3a0] sm:$0xff]   ;;  %v2248_v23 = vld [vmem:[%s2335_s21 + $0x3e8] sm:$0xff]  }
  0x5b   : > { %2018 = vmatprep.subr.bf16.mxu0 %v2199_v24  ;;  %2039 = vmatpush3.bf16.msra.mxu1 %v2198_v25  ;;  %v2249_v24 = vld [vmem:[%s2335_s21 + $0x328] sm:$0xff]   ;;  %v2251_v25 = vld [vmem:[%s2335_s21 + $0x370] sm:$0xff]  }
  0x5c   : > { %2040 = vmatprep.subr.bf16.mxu1 %v2200_v26  ;;  %1556 = vmatprep.mubr.bf16.mxu0 %v568_v56  ;;  %v2250_v26 = vld [vmem:[%s2335_s21 + $0x3a8] sm:$0xff]  }
  0x5d   : > { %1596 = vmatprep.mubr.bf16.mxu1 %v578_v60 }
  0x5e   : > { %2019 = vmatpush3.bf16.msra.mxu0 %v2201_v27  ;;  %v2252_v27 = vld [vmem:[%s2335_s21 + $0x3f0] sm:$0xff]  }
  0x5f   : > { %2020 = vmatprep.subr.bf16.mxu0 %v2203_v28  ;;  %2041 = vmatpush3.bf16.msra.mxu1 %v2202_v29  ;;  %v2253_v28 = vld [vmem:[%s2335_s21 + $0x330] sm:$0xff]   ;;  %v2255_v29 = vld [vmem:[%s2335_s21 + $0x378] sm:$0xff]  }
  0x60   : > { %2042 = vmatprep.subr.bf16.mxu1 %v2204_v30  ;;  %v2254_v30 = vld [vmem:[%s2335_s21 + $0x3b0] sm:$0xff]  }
  0x62   : > { %2021 = vmatpush3.bf16.msra.mxu0 %v2205_v31  ;;  %v2256_v31 = vld [vmem:[%s2335_s21 + $0x3f8] sm:$0xff]  }
  0x63   : > { %2022 = vmatprep.subr.bf16.mxu0 %v2207_v32  ;;  %2043 = vmatpush3.bf16.msra.mxu1 %v2206_v33  ;;  %v2257_v32 = vld [vmem:[%s2335_s21 + $0x338] sm:$0xff]   ;;  %v561_v33 = vrot.slane %v2449_v53, %v2376_v42 }
  0x64   : > { %2044 = vmatprep.subr.bf16.mxu1 %v2208_v34  ;;  %v2258_v34 = vld [vmem:[%s2335_s21 + $0x3b8] sm:$0xff]  }
  0x66   : > { %2023 = vmatpush3.bf16.msra.mxu0 %v2209_v35  ;;  %v577_v35 = vcombine.high %v561_v33, %v561_v33 }
  0x67   : > { %2024 = vmatprep.subr.bf16.mxu0 %v2211_v36  ;;  %2045 = vmatpush3.bf16.msra.mxu1 %v2210_v37 }
  0x68   : > { %2046 = vmatprep.subr.bf16.mxu1 %v2212_v38 }
  0x6a   : > { %2025 = vmatpush3.bf16.msra.mxu0 %v2213_v39 }
  0x6b   : > { %2026 = vmatprep.subr.bf16.mxu0 %v2215_v40  ;;  %2047 = vmatpush3.bf16.msra.mxu1 %v2214_v41 }
  0x6c   : > { %2048 = vmatprep.subr.bf16.mxu1 %v2216_v43 }
  0x6e   : > { %2027 = vmatpush3.bf16.msra.mxu0 %v2217_v44 }
  0x6f   : > { %2028 = vmatprep.subr.bf16.mxu0 %v2219_v45  ;;  %2049 = vmatpush3.bf16.msra.mxu1 %v2218_v47 }
  0x70   : > { %2050 = vmatprep.subr.bf16.mxu1 %v2220_v50 }
  0x72   : > { %2029 = vmatpush3.bf16.msra.mxu0 %v2221_v51 }
  0x73   : > { %2030 = vmatprep.subr.bf16.mxu0 %v2223_v54  ;;  %2051 = vmatpush3.bf16.msra.mxu1 %v2222_v55 }
  0x74   : > { %2052 = vmatprep.subr.bf16.mxu1 %v2224_v58 }
  0x76   : > { %2031 = vmatpush3.bf16.msra.mxu0 %v2225_v59 }
  0x77   : > { %2060 = vmatprep.subr.bf16.mxu0 %v2227_v62  ;;  %2053 = vmatpush3.bf16.msra.mxu1 %v2226_v63 }
  0x78   : > { %2082 = vmatprep.subr.bf16.mxu1 %v2228_v1 }
  0x79   : > { %1557 = vmatmul.mubr.bf16.vlgmr.msra.gmra.mrb[8].mxu0 %v554_v61 }
  0x7a   : > { %2061 = vmatpush3.bf16.msra.mxu0 %v2229_v2  ;;  %1636 = vmatprep.mubr.bf16.mxu0 %v575_v0 }
  0x7b   : > { %1597 = vmatmul.mubr.bf16.vlgmr.msra.gmra.mrb[8].mxu1 %v576_v3  ;;  %2062 = vmatprep.subr.bf16.mxu0 %v2231_v4 }
  0x7c   : > { %2083 = vmatpush3.bf16.msra.mxu1 %v2230_v5  ;;  %1676 = vmatprep.mubr.bf16.mxu1 %v579_v6 }
  0x7d   : > { %2084 = vmatprep.subr.bf16.mxu1 %v2232_v7 }
  0x7e   : > { %2063 = vmatpush3.bf16.msra.mxu0 %v2233_v8 }
  0x7f   : > { %2064 = vmatprep.subr.bf16.mxu0 %v2235_v9 }
  0x80   : > { %2085 = vmatpush3.bf16.msra.mxu1 %v2234_v10 }
  0x81   : > { %2086 = vmatprep.subr.bf16.mxu1 %v2236_v11 }
  0x82   : > { %2065 = vmatpush3.bf16.msra.mxu0 %v2237_v12 }
  0x83   : > { %2066 = vmatprep.subr.bf16.mxu0 %v2239_v13 }
  0x84   : > { %2087 = vmatpush3.bf16.msra.mxu1 %v2238_v14 }
  0x85   : > { %2088 = vmatprep.subr.bf16.mxu1 %v2240_v15 }
  0x86   : > { %2067 = vmatpush3.bf16.msra.mxu0 %v2241_v16 }
  0x87   : > { %2068 = vmatprep.subr.bf16.mxu0 %v2243_v17  ;;  %v221_v17 = vld [vmem:[%s2519_s2] sm:$0x3] }
  0x88   : > { %2089 = vmatpush3.bf16.msra.mxu1 %v2242_v18 }
  0x89   : > { %2090 = vmatprep.subr.bf16.mxu1 %v2244_v19 }
  0x8a   : > { %2069 = vmatpush3.bf16.msra.mxu0 %v2245_v20 }
  0x8b   : > { %2070 = vmatprep.subr.bf16.mxu0 %v2247_v21 }
  0x8c   : > { %2091 = vmatpush3.bf16.msra.mxu1 %v2246_v22 }
  0x8d   : > { %2092 = vmatprep.subr.bf16.mxu1 %v2248_v23 }
  0x8e   : > { %2071 = vmatpush3.bf16.msra.mxu0 %v2249_v24 }
  0x8f   : > { %2072 = vmatprep.subr.bf16.mxu0 %v2251_v25 }
  0x90   : > { %2093 = vmatpush3.bf16.msra.mxu1 %v2250_v26 }
  0x91   : > { %2094 = vmatprep.subr.bf16.mxu1 %v2252_v27 }
  0x92   : > { %2073 = vmatpush3.bf16.msra.mxu0 %v2253_v28 }
  0x93   : > { %2074 = vmatprep.subr.bf16.mxu0 %v2255_v29 }
  0x94   : > { %2095 = vmatpush3.bf16.msra.mxu1 %v2254_v30 }
  0x95   : > { %2096 = vmatprep.subr.bf16.mxu1 %v2256_v31 }
  0x96   : > { %2075 = vmatpush3.bf16.msra.mxu0 %v2257_v32 }
  0x98   : > { %2097 = vmatpush3.bf16.msra.mxu1 %v2258_v34 }
  0x99   : > { %1637 = vmatmul.mubr.bf16.vlgmr.msra.gmra.mrb[12].mxu0 %v561_v33 }
  0x9b   : > { %1677 = vmatmul.mubr.bf16.vlgmr.msra.gmra.mrb[12].mxu1 %v577_v35 }
 0x10c   : > { %v1944_v36 = vpop.f32.mrb[0].mxu0 }
 0x10d   : > { %v1945_v37 = vpop.f32.mrb[1].mxu0  ;;  %v1966_v38 = vpop.f32.mrb[0].mxu1 }
 0x10e   : > { %v1946_v39 = vadd.f32 %v1945_v37, %v1944_v36  ;;  %v1947_v40 = vpop.f32.mrb[2].mxu0  ;;  %v1967_v41 = vpop.f32.mrb[1].mxu1 }
 0x10f   : > { %v1948_v43 = vpop.f32.mrb[3].mxu0  ;;  %v1968_v44 = vadd.f32 %v1967_v41, %v1966_v38  ;;  %v1969_v45 = vpop.f32.mrb[2].mxu1 }
 0x110   : > { %v1970_v46 = vpop.f32.mrb[3].mxu1 }
 0x111   : > { %v1439_v47 = vadd.f32 %v1968_v44, %v1946_v39 }
 0x12c   : > { %v1988_v42 = vpop.f32.mrb[4].mxu0 }
 0x12d   : > { %v1989_v48 = vpop.f32.mrb[5].mxu0  ;;  %v2010_v49 = vpop.f32.mrb[4].mxu1 }
 0x12e   : > { %v1990_v50 = vadd.f32 %v1989_v48, %v1988_v42  ;;  %v1991_v51 = vpop.f32.mrb[6].mxu0  ;;  %v2011_v52 = vpop.f32.mrb[5].mxu1 }
 0x12f   : > { %v1992_v53 = vpop.f32.mrb[7].mxu0  ;;  %v2012_v55 = vadd.f32 %v2011_v52, %v2010_v49  ;;  %v2013_v56 = vpop.f32.mrb[6].mxu1 }
 0x130   : > { %v1479_v54 = vadd.f32 %v1990_v50, %v1439_v47  ;;  %v2014_v57 = vpop.f32.mrb[7].mxu1 }
 0x132   : > { %v1519_v58 = vadd.f32 %v2012_v55, %v1479_v54 }
 0x14c   : > { %v2032_v59 = vpop.f32.mrb[8].mxu0 }
 0x14d   : > { %v2033_v60 = vpop.f32.mrb[9].mxu0 }
 0x14e   : > { %v2054_v61 = vpop.f32.mrb[8].mxu1  ;;  %v2034_v62 = vadd.f32 %v2033_v60, %v2032_v59  ;;  %v2035_v63 = vpop.f32.mrb[10].mxu0 }
 0x14f   : > { %v2055_v0 = vpop.f32.mrb[9].mxu1  ;;  %v2036_v1 = vpop.f32.mrb[11].mxu0 }
 0x150   : > { %v1559_v2 = vadd.f32 %v2034_v62, %v1519_v58  ;;  %v2056_v3 = vadd.f32 %v2055_v0, %v2054_v61  ;;  %v2057_v4 = vpop.f32.mrb[10].mxu1 }
 0x151   : > { %v2058_v5 = vpop.f32.mrb[11].mxu1 }
 0x152   : > { %v1599_v6 = vadd.f32 %v2056_v3, %v1559_v2 }
 0x16c   : > { %v2076_v7 = vpop.f32.mrb[12].mxu0 }
 0x16d   : > { %v2077_v8 = vpop.f32.mrb[13].mxu0 }
 0x16e   : > { %v2098_v9 = vpop.f32.mrb[12].mxu1  ;;  %v2078_v10 = vadd.f32 %v2077_v8, %v2076_v7  ;;  %v2079_v11 = vpop.f32.mrb[14].mxu0 }
 0x16f   : > { %v2099_v12 = vpop.f32.mrb[13].mxu1  ;;  %v2080_v13 = vpop.f32.mrb[15].mxu0 }
 0x170   : > { %v1639_v14 = vadd.f32 %v2078_v10, %v1599_v6  ;;  %v2100_v15 = vadd.f32 %v2099_v12, %v2098_v9  ;;  %v2101_v16 = vpop.f32.mrb[14].mxu1  ;;  %1689 = sbr.rel (%p1924_p7) target bundleno = 411 (0x19b), region = 36 }
 0x171   : > { %v2102_v18 = vpop.f32.mrb[15].mxu1 }
 0x172   : > { %v1679_v19 = vadd.f32 %v2100_v15, %v1639_v14 }
 0x174   : > { %v1684_v20 = vadd.f32 %v1679_v19, %v221_v17 }
 0x176   : > { %1685 = vst [vmem:[%s2519_s2] sm:$0x3] %v1684_v20 }
 0x17d   : > { %v1690_v21 = vld [vmem:[%s2519_s2] sm:$0x3] }
 0x17e   : > { %v1691_v22 = vsub.f32 0.0, %v1690_v21 }
 0x180   : > { %v1692_v23 = vmul.f32 1.442695, %v1691_v22 }
 0x182   : > { %2260 = vpow2.f32 %v1692_v23 }
 0x18c   : > { %v2261_v24 = vpop.eup %2260 }
 0x18d   : > { %v1694_v25 = vadd.f32 1.0, %v2261_v24 }
 0x18f   : > { %2262 = vrcp.f32 %v1694_v25 }
 0x199   : > { %v2263_v26 = vpop.eup %2262 }
 0x19a   : > { %1697 = vst [vmem:[%s2519_s2] sm:$0x3] %v2263_v26 }
 0x19b PF: > { %s12_s11 = sadd.s32 1, %s2286_s11   ;;  %s2520_s9 = smov %s2282_s10 }
 0x19c   : > { %p9_p8 = scmp.ge.s32.totalorder %s12_s11, 6   ;;  %s2521_s10 = smov %s2523_s12 }
 0x19e   :  { %11 = sbr.rel (!%p9_p8) target bundleno = 2 (0x2), region = 69 }

</bundles_post_ra>
